<compile_context>
chip_gen: v6e
topology: v6e:2x2x1
jax: 0.10.0
libtpu: 0.0.40
codegen_flags: <defaults>
</compile_context>

<pallas_src>
import functools

import numpy as np
import jax
import jax.numpy as jnp
from jax.experimental import pallas as pl
from jax.experimental.pallas import tpu as pltpu


def _round_up(v, m):
    return (v + m - 1) // m * m


# ---------------------------------------------------------------------------
# Pallas kernel: fused input projection + bidirectional GRU recurrence, chunked
# ---------------------------------------------------------------------------
def _bigru_chunk_kernel(len_ref, xf_ref, xb_ref,
                        wih_f_ref, wih_b_ref, bih_f_ref, bih_b_ref,
                        whh_f_ref, whh_b_ref, bhn_f_ref, bhn_b_ref,
                        outf_ref, outb_ref,
                        hf_scr, hb_scr, gxf_scr, gxb_scr,
                        *, TC, Hp, NC):
    c = pl.program_id(1)                       # time-chunk index (sequential axis)

    @pl.when(c == 0)
    def _():                                   # new batch tile -> reset carried state
        hf_scr[...] = jnp.zeros_like(hf_scr)
        hb_scr[...] = jnp.zeros_like(hb_scr)

    BT = hf_scr.shape[0]
    D = xf_ref.shape[-1]
    G = 3 * Hp

    # Loop-invariant loads / broadcasts, hoisted out of the timestep loop.
    lengths = len_ref[...]                                     # (BT, 1) int32
    whh_f = whh_f_ref[...]                                     # (Hp, 3Hp) bf16
    whh_b = whh_b_ref[...]
    bhn_f = jnp.broadcast_to(bhn_f_ref[...], (BT, Hp))         # n-gate hidden bias
    bhn_b = jnp.broadcast_to(bhn_b_ref[...], (BT, Hp))

    # Chunk-level input projections: one MXU matmul per direction per chunk
    # (bf16 operands, f32 accumulation).  b_ih and the r/z parts of b_hh are folded
    # in here once.  Result staged to bf16 VMEM scratch (bounded vreg pressure).
    gxf_scr[...] = ((jnp.dot(xf_ref[...].reshape(TC * BT, D), wih_f_ref[...],
                             preferred_element_type=jnp.float32)
                     + bih_f_ref[...]).reshape(TC, BT, G).astype(gxf_scr.dtype))
    gxb_scr[...] = ((jnp.dot(xb_ref[...].reshape(TC * BT, D), wih_b_ref[...],
                             preferred_element_type=jnp.float32)
                     + bih_b_ref[...]).reshape(TC, BT, G).astype(gxb_scr.dtype))

    h_f = hf_scr[...]                                          # (BT, Hp) f32 state
    h_b = hb_scr[...]

    cb = NC - 1 - c                                            # backward chunk index
    t0_f = c * TC
    t0_b = cb * TC

    # Statically unrolled inner loop over the chunk (short fixed trip count).
    for i in range(TC):
        j = TC - 1 - i                                         # backward local index

        gx_f = gxf_scr[i]                                      # (BT, 3Hp) bf16
        gx_b = gxb_scr[j]

        # Two independent per-direction recurrent matmuls (no zero-padded passes).
        gh_f = jnp.dot(h_f.astype(jnp.bfloat16), whh_f,
                       preferred_element_type=jnp.float32)     # (BT, 3Hp) f32
        gh_b = jnp.dot(h_b.astype(jnp.bfloat16), whh_b,
                       preferred_element_type=jnp.float32)

        # ---- forward cell (PyTorch gate order: r, z, n) ----
        r = jax.nn.sigmoid(gx_f[:, :Hp] + gh_f[:, :Hp])
        z = jax.nn.sigmoid(gx_f[:, Hp:2 * Hp] + gh_f[:, Hp:2 * Hp])
        n = jnp.tanh(gx_f[:, 2 * Hp:] + r * (gh_f[:, 2 * Hp:] + bhn_f))
        h_new = (1.0 - z) * n + z * h_f
        valid = lengths > (t0_f + i)                           # (BT, 1)
        h_f = jnp.where(valid, h_new, h_f)
        outf_ref[i] = jnp.where(valid, h_new, 0.0).astype(outf_ref.dtype)

        # ---- backward cell (processed in descending time order) ----
        r = jax.nn.sigmoid(gx_b[:, :Hp] + gh_b[:, :Hp])
        z = jax.nn.sigmoid(gx_b[:, Hp:2 * Hp] + gh_b[:, Hp:2 * Hp])
        n = jnp.tanh(gx_b[:, 2 * Hp:] + r * (gh_b[:, 2 * Hp:] + bhn_b))
        h_new = (1.0 - z) * n + z * h_b
        valid = lengths > (t0_b + j)
        h_b = jnp.where(valid, h_new, h_b)
        outb_ref[j] = jnp.where(valid, h_new, 0.0).astype(outb_ref.dtype)

    hf_scr[...] = h_f
    hb_scr[...] = h_b


# ---------------------------------------------------------------------------
# Weight/bias preparation (pad each gate block H -> Hp, transpose, cast)
# ---------------------------------------------------------------------------
def _prep_wih(w, H, Hp):
    # (3H, D) -> (D, 3Hp) with per-gate zero padding, bf16
    D = w.shape[1]
    w = w.T.reshape(D, 3, H)
    w = jnp.pad(w, ((0, 0), (0, 0), (0, Hp - H)))
    return w.reshape(D, 3 * Hp).astype(jnp.bfloat16)


def _prep_whh(w, H, Hp):
    # (3H, H) -> (Hp, 3Hp), zero-padded rows and per-gate columns, bf16
    w = w.T.reshape(H, 3, H)
    w = jnp.pad(w, ((0, Hp - H), (0, 0), (0, Hp - H)))
    return w.reshape(Hp, 3 * Hp).astype(jnp.bfloat16)


def _prep_bih(b_ih, b_hh, H, Hp):
    # Fold the r/z parts of b_hh into the chunk-level bias.  The n-gate hidden bias
    # b_hn is NOT folded: PyTorch computes n = tanh(gx_n + r*(gh_n + b_hn)).
    bi = b_ih.reshape(3, H).astype(jnp.float32)
    bh = b_hh.reshape(3, H).astype(jnp.float32)
    fused = bi + bh * jnp.array([1.0, 1.0, 0.0], jnp.float32)[:, None]
    fused = jnp.pad(fused, ((0, 0), (0, Hp - H)))
    return fused.reshape(1, 3 * Hp)


def _prep_bhn(b_hh, H, Hp):
    # n-gate hidden bias only: (3H,) -> (1, Hp)
    bhn = b_hh.reshape(3, H)[2].astype(jnp.float32)
    bhn = jnp.pad(bhn, (0, Hp - H))
    return bhn.reshape(1, Hp)


# ---------------------------------------------------------------------------
# Wrapper (JAX glue): equivalent of RNN.forward(x, x_len), d_in=D, d_out=H, bi=True
# ---------------------------------------------------------------------------
def rnn_forward(x, x_len, params, n_to_1=False, time_chunk=16, batch_tile=None):
    B, T, D = x.shape
    H = params['weight_hh_l0'].shape[1]

    Hp = _round_up(H, 128)                     # lane-aligned gates & lane-dense stores
    TC = time_chunk
    Tp = _round_up(T, TC)
    NC = Tp // TC
    if batch_tile is None:
        batch_tile = min(128, _round_up(B, 16))   # fill MXU rows; 16-sublane aligned
    BT = batch_tile
    Bp = _round_up(B, BT)
    NB = Bp // BT
    G = 3 * Hp

    # --- prepare operands (transpose/pad done in bf16 -> half the HBM traffic) ---
    x_tm = jnp.transpose(x, (1, 0, 2)).astype(jnp.bfloat16)           # (T, B, D)
    x_tm = jnp.pad(x_tm, ((0, Tp - T), (0, Bp - B), (0, 0)))

    lens = jnp.pad(x_len.astype(jnp.int32), (0, Bp - B)).reshape(Bp, 1)

    wih_f = _prep_wih(params['weight_ih_l0'], H, Hp)
    wih_b = _prep_wih(params['weight_ih_l0_reverse'], H, Hp)
    bih_f = _prep_bih(params['bias_ih_l0'], params['bias_hh_l0'], H, Hp)
    bih_b = _prep_bih(params['bias_ih_l0_reverse'], params['bias_hh_l0_reverse'], H, Hp)
    whh_f = _prep_whh(params['weight_hh_l0'], H, Hp)
    whh_b = _prep_whh(params['weight_hh_l0_reverse'], H, Hp)
    bhn_f = _prep_bhn(params['bias_hh_l0'], H, Hp)
    bhn_b = _prep_bhn(params['bias_hh_l0_reverse'], H, Hp)

    # --- VMEM budget derived from actual tile sizes (2x headroom, clamped) ---
    est = (2 * 2 * TC * BT * D * 2            # x chunks fwd/bwd, bf16, double-buffered
           + 2 * 2 * TC * BT * Hp * 2         # out chunks fwd/bwd, bf16, double-buffered
           + 2 * 2 * D * G * 2                # W_ih fwd/bwd, bf16 (2 buffers each)
           + 2 * 2 * Hp * G * 2               # W_hh fwd/bwd, bf16
           + 2 * 2 * (G + Hp) * 4             # biases
           + 2 * BT * 4                       # lengths
           + 2 * BT * Hp * 4                  # hidden-state scratch (f32)
           + 2 * TC * BT * G * 2)             # gx scratch (bf16)
    vmem_limit = int(min(100 * 1024 * 1024, max(32 * 1024 * 1024, 2 * est)))

    kernel = functools.partial(_bigru_chunk_kernel, TC=TC, Hp=Hp, NC=NC)

    outf, outb = pl.pallas_call(
        kernel,
        grid=(NB, NC),
        in_specs=[
            pl.BlockSpec((BT, 1), lambda b, c: (b, 0)),                     # lengths
            pl.BlockSpec((TC, BT, D), lambda b, c: (c, b, 0)),              # x fwd chunk
            pl.BlockSpec((TC, BT, D), lambda b, c: (NC - 1 - c, b, 0)),     # x bwd chunk
            pl.BlockSpec((D, G), lambda b, c: (0, 0)),                      # W_ih^T fwd
            pl.BlockSpec((D, G), lambda b, c: (0, 0)),                      # W_ih^T bwd
            pl.BlockSpec((1, G), lambda b, c: (0, 0)),                      # b_i+rz fwd
            pl.BlockSpec((1, G), lambda b, c: (0, 0)),                      # b_i+rz bwd
            pl.BlockSpec((Hp, G), lambda b, c: (0, 0)),                     # W_hh^T fwd
            pl.BlockSpec((Hp, G), lambda b, c: (0, 0)),                     # W_hh^T bwd
            pl.BlockSpec((1, Hp), lambda b, c: (0, 0)),                     # b_hn fwd
            pl.BlockSpec((1, Hp), lambda b, c: (0, 0)),                     # b_hn bwd
        ],
        out_specs=[
            pl.BlockSpec((TC, BT, Hp), lambda b, c: (c, b, 0)),             # fwd outputs
            pl.BlockSpec((TC, BT, Hp), lambda b, c: (NC - 1 - c, b, 0)),    # bwd outputs
        ],
        out_shape=[
            jax.ShapeDtypeStruct((Tp, Bp, Hp), jnp.bfloat16),
            jax.ShapeDtypeStruct((Tp, Bp, Hp), jnp.bfloat16),
        ],
        scratch_shapes=[
            pltpu.VMEM((BT, Hp), jnp.float32),          # carried fwd hidden state
            pltpu.VMEM((BT, Hp), jnp.float32),          # carried bwd hidden state
            pltpu.VMEM((TC, BT, G), jnp.bfloat16),      # staged fwd input gates
            pltpu.VMEM((TC, BT, G), jnp.bfloat16),      # staged bwd input gates
        ],
        compiler_params=pltpu.CompilerParams(
            dimension_semantics=("parallel", "arbitrary"),
            vmem_limit_bytes=vmem_limit,
        ),
    )(lens, x_tm, x_tm, wih_f, wih_b, bih_f, bih_b, whh_f, whh_b, bhn_f, bhn_b)

    out = jnp.concatenate([outf[:T, :B, :H], outb[:T, :B, :H]], axis=-1)    # bf16 (T,B,2H)
    out = jnp.transpose(out, (1, 0, 2)).astype(jnp.float32)                 # (B, T, 2H)

    if n_to_1:
        # last_item_from_packed == output at the last valid timestep (guard len==0)
        idx = jnp.clip(x_len.astype(jnp.int32) - 1, 0, T - 1)
        return out[jnp.arange(B), idx]
    return out


# ---------------------------------------------------------------------------
# Pure-numpy reference (PyTorch packed bi-GRU semantics) for verification
# ---------------------------------------------------------------------------
def _sigmoid(v):
    return 1.0 / (1.0 + np.exp(-v))


def gru_ref(x, x_len, params):
    x = np.asarray(x, np.float64)
    B, T, D = x.shape
    H = np.asarray(params['weight_hh_l0']).shape[1]

    def run_dir(wih, whh, bih, bhh, reverse):
        wih, whh = np.asarray(wih, np.float64), np.asarray(whh, np.float64)
        bih, bhh = np.asarray(bih, np.float64), np.asarray(bhh, np.float64)
        out = np.zeros((B, T, H), np.float64)
        for b in range(B):
            L = int(x_len[b])
            h = np.zeros((H,), np.float64)
            trange = range(L - 1, -1, -1) if reverse else range(L)
            for t in trange:
                gx = wih @ x[b, t] + bih
                gh = whh @ h + bhh
                r = _sigmoid(gx[:H] + gh[:H])
                z = _sigmoid(gx[H:2 * H] + gh[H:2 * H])
                n = np.tanh(gx[2 * H:] + r * gh[2 * H:])
                h = (1.0 - z) * n + z * h
                out[b, t] = h
        return out

    of = run_dir(params['weight_ih_l0'], params['weight_hh_l0'],
                 params['bias_ih_l0'], params['bias_hh_l0'], reverse=False)
    ob = run_dir(params['weight_ih_l0_reverse'], params['weight_hh_l0_reverse'],
                 params['bias_ih_l0_reverse'], params['bias_hh_l0_reverse'], reverse=True)
    return np.concatenate([of, ob], axis=-1).astype(np.float32)


# ---------------------------------------------------------------------------
if __name__ == "__main__":
    B, T, D, H = 2, 8, 16, 32          # batch, seq, d_in, d_out (hidden)

    key = jax.random.PRNGKey(0)
    keys = jax.random.split(key, 10)
    bound = 1.0 / np.sqrt(H)

    def u(k, shape):
        return jax.random.uniform(k, shape, jnp.float32, -bound, bound)

    params = {
        'weight_ih_l0':         u(keys[0], (3 * H, D)),
        'weight_hh_l0':         u(keys[1], (3 * H, H)),
        'bias_ih_l0':           u(keys[2], (3 * H,)),
        'bias_hh_l0':           u(keys[3], (3 * H,)),
        'weight_ih_l0_reverse': u(keys[4], (3 * H, D)),
        'weight_hh_l0_reverse': u(keys[5], (3 * H, H)),
        'bias_ih_l0_reverse':   u(keys[6], (3 * H,)),
        'bias_hh_l0_reverse':   u(keys[7], (3 * H,)),
    }

    x = jax.random.normal(keys[8], (B, T, D), jnp.float32)
    x_len = jnp.array([8, 5], dtype=jnp.int32)     # variable sequence lengths

    out = rnn_forward(x, x_len, params, n_to_1=False)     # (B, T, 2H)
    out = jax.block_until_ready(out)

    ref = gru_ref(np.asarray(x), np.asarray(x_len), jax.tree.map(np.asarray, params))
    # bf16 MXU operands / bf16 output store (f32 accumulation, f32 recurrent state)
    # -> bf16-level tolerance.
    np.testing.assert_allclose(np.asarray(out), ref, rtol=5e-2, atol=5e-2)

    # n_to_1 path: output at the last valid timestep per sequence.
    out_n1 = jax.block_until_ready(rnn_forward(x, x_len, params, n_to_1=True))
    ref_n1 = ref[np.arange(B), np.asarray(x_len) - 1]
    np.testing.assert_allclose(np.asarray(out_n1), ref_n1, rtol=5e-2, atol=5e-2)

    print("KERNEL_OK")
</pallas_src>

<mosaic_0001>
module attributes {stable_mosaic.version = 11 : i64} {
  func.func @_bigru_chunk_kernel(%arg0: i32, %arg1: i32, %arg2: memref<16x1xi32, #tpu.memory_space<vmem>>, %arg3: memref<16x16x16xbf16, #tpu.memory_space<vmem>>, %arg4: memref<16x16x16xbf16, #tpu.memory_space<vmem>>, %arg5: memref<16x384xbf16, #tpu.memory_space<vmem>>, %arg6: memref<16x384xbf16, #tpu.memory_space<vmem>>, %arg7: memref<1x384xf32, #tpu.memory_space<vmem>>, %arg8: memref<1x384xf32, #tpu.memory_space<vmem>>, %arg9: memref<128x384xbf16, #tpu.memory_space<vmem>>, %arg10: memref<128x384xbf16, #tpu.memory_space<vmem>>, %arg11: memref<1x128xf32, #tpu.memory_space<vmem>>, %arg12: memref<1x128xf32, #tpu.memory_space<vmem>>, %arg13: memref<16x16x128xbf16, #tpu.memory_space<vmem>>, %arg14: memref<16x16x128xbf16, #tpu.memory_space<vmem>>, %arg15: memref<16x128xf32, #tpu.memory_space<vmem>>, %arg16: memref<16x128xf32, #tpu.memory_space<vmem>>, %arg17: memref<16x16x384xbf16, #tpu.memory_space<vmem>>, %arg18: memref<16x16x384xbf16, #tpu.memory_space<vmem>>) attributes {dimension_semantics = [#tpu.dimension_semantics<parallel>, #tpu.dimension_semantics<arbitrary>], iteration_bounds = array<i64: 1, 1>, scalar_prefetch = 0 : i64, scratch_operands = 4 : i64, tpu.core_type = #tpu.core_type<tc>, window_params = [{transform_indices = @transform_0, window_bounds = array<i64: 16, 1>}, {transform_indices = @transform_1, window_bounds = array<i64: 16, 16, 16>}, {transform_indices = @transform_2, window_bounds = array<i64: 16, 16, 16>}, {pipeline_mode = #tpu.pipeline_mode<synchronous>, transform_indices = @transform_3, window_bounds = array<i64: 16, 384>}, {pipeline_mode = #tpu.pipeline_mode<synchronous>, transform_indices = @transform_4, window_bounds = array<i64: 16, 384>}, {pipeline_mode = #tpu.pipeline_mode<synchronous>, transform_indices = @transform_5, window_bounds = array<i64: 1, 384>}, {pipeline_mode = #tpu.pipeline_mode<synchronous>, transform_indices = @transform_6, window_bounds = array<i64: 1, 384>}, {pipeline_mode = #tpu.pipeline_mode<synchronous>, transform_indices = @transform_7, window_bounds = array<i64: 128, 384>}, {pipeline_mode = #tpu.pipeline_mode<synchronous>, transform_indices = @transform_8, window_bounds = array<i64: 128, 384>}, {pipeline_mode = #tpu.pipeline_mode<synchronous>, transform_indices = @transform_9, window_bounds = array<i64: 1, 128>}, {pipeline_mode = #tpu.pipeline_mode<synchronous>, transform_indices = @transform_10, window_bounds = array<i64: 1, 128>}, {transform_indices = @transform_11, window_bounds = array<i64: 16, 16, 128>}, {transform_indices = @transform_12, window_bounds = array<i64: 16, 16, 128>}]} {
    %c0_i32 = arith.constant 0 : i32
    %0 = arith.cmpi eq, %arg1, %c0_i32 : i32
    %1 = arith.extui %0 : i1 to i32
    %c0_i32_0 = arith.constant 0 : i32
    %2 = arith.cmpi ne, %1, %c0_i32_0 : i32
    scf.if %2 {
      %cst_395 = arith.constant 0.000000e+00 : f32
      %1575 = vector.broadcast %cst_395 : f32 to vector<16x128xf32>
      %c0_396 = arith.constant 0 : index
      %c0_397 = arith.constant 0 : index
      %1576 = vector.load %arg15[%c0_396, %c0_397] : memref<16x128xf32, #tpu.memory_space<vmem>>, vector<16x128xf32>
      tpu.vector_store %arg15[%c0_396, %c0_397], %1575 {strides = array<i32>} : memref<16x128xf32, #tpu.memory_space<vmem>>, vector<16x128xf32>,
      %cst_398 = arith.constant 0.000000e+00 : f32
      %1577 = vector.broadcast %cst_398 : f32 to vector<16x128xf32>
      %c0_399 = arith.constant 0 : index
      %c0_400 = arith.constant 0 : index
      %1578 = vector.load %arg16[%c0_399, %c0_400] : memref<16x128xf32, #tpu.memory_space<vmem>>, vector<16x128xf32>
      tpu.vector_store %arg16[%c0_399, %c0_400], %1577 {strides = array<i32>} : memref<16x128xf32, #tpu.memory_space<vmem>>, vector<16x128xf32>,
    } else {
    }
    %c0 = arith.constant 0 : index
    %c0_1 = arith.constant 0 : index
    %3 = vector.load %arg2[%c0, %c0_1] : memref<16x1xi32, #tpu.memory_space<vmem>>, vector<16x1xi32>
    %c0_2 = arith.constant 0 : index
    %c0_3 = arith.constant 0 : index
    %4 = vector.load %arg9[%c0_2, %c0_3] : memref<128x384xbf16, #tpu.memory_space<vmem>>, vector<128x384xbf16>
    %c0_4 = arith.constant 0 : index
    %c0_5 = arith.constant 0 : index
    %5 = vector.load %arg10[%c0_4, %c0_5] : memref<128x384xbf16, #tpu.memory_space<vmem>>, vector<128x384xbf16>
    %c0_6 = arith.constant 0 : index
    %c0_7 = arith.constant 0 : index
    %6 = vector.load %arg11[%c0_6, %c0_7] : memref<1x128xf32, #tpu.memory_space<vmem>>, vector<1x128xf32>
    %7 = vector.shape_cast %6 : vector<1x128xf32> to vector<1x128xf32>
    %8 = vector.broadcast %7 : vector<1x128xf32> to vector<16x128xf32>
    %c0_8 = arith.constant 0 : index
    %c0_9 = arith.constant 0 : index
    %9 = vector.load %arg12[%c0_8, %c0_9] : memref<1x128xf32, #tpu.memory_space<vmem>>, vector<1x128xf32>
    %10 = vector.shape_cast %9 : vector<1x128xf32> to vector<1x128xf32>
    %11 = vector.broadcast %10 : vector<1x128xf32> to vector<16x128xf32>
    %c0_10 = arith.constant 0 : index
    %c0_11 = arith.constant 0 : index
    %c0_12 = arith.constant 0 : index
    %12 = vector.load %arg3[%c0_10, %c0_11, %c0_12] : memref<16x16x16xbf16, #tpu.memory_space<vmem>>, vector<16x16x16xbf16>
    %13 = vector.shape_cast %12 : vector<16x16x16xbf16> to vector<256x16xbf16>
    %c0_13 = arith.constant 0 : index
    %c0_14 = arith.constant 0 : index
    %14 = vector.load %arg5[%c0_13, %c0_14] : memref<16x384xbf16, #tpu.memory_space<vmem>>, vector<16x384xbf16>
    %cst = arith.constant dense<0.000000e+00> : vector<256x384xf32>
    %15 = tpu.matmul %13, %14, %cst {dimension_numbers = #tpu.dot_dimension_numbers<[1], [0], [0], [1], [0, 0, 1, 1], [], []>} : vector<256x16xbf16>, vector<16x384xbf16>, vector<256x384xf32> -> vector<256x384xf32>
    %c0_15 = arith.constant 0 : index
    %c0_16 = arith.constant 0 : index
    %16 = vector.load %arg7[%c0_15, %c0_16] : memref<1x384xf32, #tpu.memory_space<vmem>>, vector<1x384xf32>
    %17 = vector.broadcast %16 : vector<1x384xf32> to vector<256x384xf32>
    %18 = arith.addf %15, %17 : vector<256x384xf32>
    %19 = vector.shape_cast %18 : vector<256x384xf32> to vector<16x16x384xf32>
    %20 = arith.truncf %19 : vector<16x16x384xf32> to vector<16x16x384xbf16>
    %c0_17 = arith.constant 0 : index
    %c0_18 = arith.constant 0 : index
    %c0_19 = arith.constant 0 : index
    %21 = vector.load %arg17[%c0_17, %c0_18, %c0_19] : memref<16x16x384xbf16, #tpu.memory_space<vmem>>, vector<16x16x384xbf16>
    tpu.vector_store %arg17[%c0_17, %c0_18, %c0_19], %20 {strides = array<i32>} : memref<16x16x384xbf16, #tpu.memory_space<vmem>>, vector<16x16x384xbf16>,
    %c0_20 = arith.constant 0 : index
    %c0_21 = arith.constant 0 : index
    %c0_22 = arith.constant 0 : index
    %22 = vector.load %arg4[%c0_20, %c0_21, %c0_22] : memref<16x16x16xbf16, #tpu.memory_space<vmem>>, vector<16x16x16xbf16>
    %23 = vector.shape_cast %22 : vector<16x16x16xbf16> to vector<256x16xbf16>
    %c0_23 = arith.constant 0 : index
    %c0_24 = arith.constant 0 : index
    %24 = vector.load %arg6[%c0_23, %c0_24] : memref<16x384xbf16, #tpu.memory_space<vmem>>, vector<16x384xbf16>
    %cst_25 = arith.constant dense<0.000000e+00> : vector<256x384xf32>
    %25 = tpu.matmul %23, %24, %cst_25 {dimension_numbers = #tpu.dot_dimension_numbers<[1], [0], [0], [1], [0, 0, 1, 1], [], []>} : vector<256x16xbf16>, vector<16x384xbf16>, vector<256x384xf32> -> vector<256x384xf32>
    %c0_26 = arith.constant 0 : index
    %c0_27 = arith.constant 0 : index
    %26 = vector.load %arg8[%c0_26, %c0_27] : memref<1x384xf32, #tpu.memory_space<vmem>>, vector<1x384xf32>
    %27 = vector.broadcast %26 : vector<1x384xf32> to vector<256x384xf32>
    %28 = arith.addf %25, %27 : vector<256x384xf32>
    %29 = vector.shape_cast %28 : vector<256x384xf32> to vector<16x16x384xf32>
    %30 = arith.truncf %29 : vector<16x16x384xf32> to vector<16x16x384xbf16>
    %c0_28 = arith.constant 0 : index
    %c0_29 = arith.constant 0 : index
    %c0_30 = arith.constant 0 : index
    %31 = vector.load %arg18[%c0_28, %c0_29, %c0_30] : memref<16x16x384xbf16, #tpu.memory_space<vmem>>, vector<16x16x384xbf16>
    tpu.vector_store %arg18[%c0_28, %c0_29, %c0_30], %30 {strides = array<i32>} : memref<16x16x384xbf16, #tpu.memory_space<vmem>>, vector<16x16x384xbf16>,
    %c0_31 = arith.constant 0 : index
    %c0_32 = arith.constant 0 : index
    %32 = vector.load %arg15[%c0_31, %c0_32] : memref<16x128xf32, #tpu.memory_space<vmem>>, vector<16x128xf32>
    %c0_33 = arith.constant 0 : index
    %c0_34 = arith.constant 0 : index
    %33 = vector.load %arg16[%c0_33, %c0_34] : memref<16x128xf32, #tpu.memory_space<vmem>>, vector<16x128xf32>
    %c0_i32_35 = arith.constant 0 : i32
    %34 = arith.subi %c0_i32_35, %arg1 : i32
    %c16_i32 = arith.constant 16 : i32
    %35 = arith.muli %arg1, %c16_i32 : i32
    %c16_i32_36 = arith.constant 16 : i32
    %36 = arith.muli %34, %c16_i32_36 : i32
    %c0_37 = arith.constant 0 : index
    %c0_38 = arith.constant 0 : index
    %c0_39 = arith.constant 0 : index
    %37 = vector.load %arg17[%c0_37, %c0_38, %c0_39] : memref<16x16x384xbf16, #tpu.memory_space<vmem>>, vector<1x16x384xbf16>
    %38 = vector.shape_cast %37 : vector<1x16x384xbf16> to vector<16x384xbf16>
    %c15 = arith.constant 15 : index
    %c0_40 = arith.constant 0 : index
    %c0_41 = arith.constant 0 : index
    %39 = vector.load %arg18[%c15, %c0_40, %c0_41] : memref<16x16x384xbf16, #tpu.memory_space<vmem>>, vector<1x16x384xbf16>
    %40 = vector.shape_cast %39 : vector<1x16x384xbf16> to vector<16x384xbf16>
    %41 = arith.truncf %32 : vector<16x128xf32> to vector<16x128xbf16>
    %cst_42 = arith.constant dense<0.000000e+00> : vector<16x384xf32>
    %42 = tpu.matmul %41, %4, %cst_42 {dimension_numbers = #tpu.dot_dimension_numbers<[1], [0], [0], [1], [0, 0, 1, 1], [], []>} : vector<16x128xbf16>, vector<128x384xbf16>, vector<16x384xf32> -> vector<16x384xf32>
    %43 = arith.truncf %33 : vector<16x128xf32> to vector<16x128xbf16>
    %cst_43 = arith.constant dense<0.000000e+00> : vector<16x384xf32>
    %44 = tpu.matmul %43, %5, %cst_43 {dimension_numbers = #tpu.dot_dimension_numbers<[1], [0], [0], [1], [0, 0, 1, 1], [], []>} : vector<16x128xbf16>, vector<128x384xbf16>, vector<16x384xf32> -> vector<16x384xf32>
    %45 = vector.extract_strided_slice %38 {offsets = [0, 0], sizes = [16, 128], strides = [1, 1]} : vector<16x384xbf16> to vector<16x128xbf16>
    %46 = vector.extract_strided_slice %42 {offsets = [0, 0], sizes = [16, 128], strides = [1, 1]} : vector<16x384xf32> to vector<16x128xf32>
    %47 = arith.extf %45 : vector<16x128xbf16> to vector<16x128xf32>
    %48 = arith.addf %47, %46 : vector<16x128xf32>
    %49 = arith.negf %48 : vector<16x128xf32>
    %50 = math.exp %49 : vector<16x128xf32>
    %cst_44 = arith.constant 1.000000e+00 : f32
    %51 = vector.broadcast %cst_44 : f32 to vector<16x128xf32>
    %52 = arith.addf %51, %50 : vector<16x128xf32>
    %53 = arith.divf %51, %52 : vector<16x128xf32>
    %54 = vector.extract_strided_slice %38 {offsets = [0, 128], sizes = [16, 128], strides = [1, 1]} : vector<16x384xbf16> to vector<16x128xbf16>
    %55 = vector.extract_strided_slice %42 {offsets = [0, 128], sizes = [16, 128], strides = [1, 1]} : vector<16x384xf32> to vector<16x128xf32>
    %56 = arith.extf %54 : vector<16x128xbf16> to vector<16x128xf32>
    %57 = arith.addf %56, %55 : vector<16x128xf32>
    %58 = arith.negf %57 : vector<16x128xf32>
    %59 = math.exp %58 : vector<16x128xf32>
    %cst_45 = arith.constant 1.000000e+00 : f32
    %60 = vector.broadcast %cst_45 : f32 to vector<16x128xf32>
    %61 = arith.addf %60, %59 : vector<16x128xf32>
    %62 = arith.divf %60, %61 : vector<16x128xf32>
    %63 = vector.extract_strided_slice %38 {offsets = [0, 256], sizes = [16, 128], strides = [1, 1]} : vector<16x384xbf16> to vector<16x128xbf16>
    %64 = vector.extract_strided_slice %42 {offsets = [0, 256], sizes = [16, 128], strides = [1, 1]} : vector<16x384xf32> to vector<16x128xf32>
    %65 = arith.addf %64, %8 : vector<16x128xf32>
    %66 = arith.mulf %53, %65 : vector<16x128xf32>
    %67 = arith.extf %63 : vector<16x128xbf16> to vector<16x128xf32>
    %68 = arith.addf %67, %66 : vector<16x128xf32>
    %69 = math.tanh %68 : vector<16x128xf32>
    %cst_46 = arith.constant 1.000000e+00 : f32
    %70 = vector.broadcast %cst_46 : f32 to vector<16x128xf32>
    %71 = arith.subf %70, %62 : vector<16x128xf32>
    %72 = arith.mulf %71, %69 : vector<16x128xf32>
    %73 = arith.mulf %62, %32 : vector<16x128xf32>
    %74 = arith.addf %72, %73 : vector<16x128xf32>
    %c0_i32_47 = arith.constant 0 : i32
    %75 = arith.addi %35, %c0_i32_47 : i32
    %76 = vector.broadcast %75 : i32 to vector<16x1xi32>
    %77 = arith.cmpi sgt, %3, %76 : vector<16x1xi32>
    %78 = vector.shape_cast %77 : vector<16x1xi1> to vector<16x1xi1>
    %79 = vector.broadcast %78 : vector<16x1xi1> to vector<16x128xi1>
    %80 = arith.select %79, %74, %32 : vector<16x128xi1>, vector<16x128xf32>
    %cst_48 = arith.constant 0.000000e+00 : f32
    %81 = vector.shape_cast %77 : vector<16x1xi1> to vector<16x1xi1>
    %82 = vector.broadcast %81 : vector<16x1xi1> to vector<16x128xi1>
    %83 = vector.broadcast %cst_48 : f32 to vector<16x128xf32>
    %84 = arith.select %82, %74, %83 : vector<16x128xi1>, vector<16x128xf32>
    %85 = arith.truncf %84 : vector<16x128xf32> to vector<16x128xbf16>
    %c0_49 = arith.constant 0 : index
    %c0_50 = arith.constant 0 : index
    %c0_51 = arith.constant 0 : index
    %86 = vector.load %arg13[%c0_49, %c0_50, %c0_51] : memref<16x16x128xbf16, #tpu.memory_space<vmem>>, vector<1x16x128xbf16>
    %87 = vector.shape_cast %86 : vector<1x16x128xbf16> to vector<16x128xbf16>
    %88 = vector.shape_cast %85 : vector<16x128xbf16> to vector<1x16x128xbf16>
    tpu.vector_store %arg13[%c0_49, %c0_50, %c0_51], %88 {strides = array<i32>} : memref<16x16x128xbf16, #tpu.memory_space<vmem>>, vector<1x16x128xbf16>,
    %89 = vector.extract_strided_slice %40 {offsets = [0, 0], sizes = [16, 128], strides = [1, 1]} : vector<16x384xbf16> to vector<16x128xbf16>
    %90 = vector.extract_strided_slice %44 {offsets = [0, 0], sizes = [16, 128], strides = [1, 1]} : vector<16x384xf32> to vector<16x128xf32>
    %91 = arith.extf %89 : vector<16x128xbf16> to vector<16x128xf32>
    %92 = arith.addf %91, %90 : vector<16x128xf32>
    %93 = arith.negf %92 : vector<16x128xf32>
    %94 = math.exp %93 : vector<16x128xf32>
    %cst_52 = arith.constant 1.000000e+00 : f32
    %95 = vector.broadcast %cst_52 : f32 to vector<16x128xf32>
    %96 = arith.addf %95, %94 : vector<16x128xf32>
    %97 = arith.divf %95, %96 : vector<16x128xf32>
    %98 = vector.extract_strided_slice %40 {offsets = [0, 128], sizes = [16, 128], strides = [1, 1]} : vector<16x384xbf16> to vector<16x128xbf16>
    %99 = vector.extract_strided_slice %44 {offsets = [0, 128], sizes = [16, 128], strides = [1, 1]} : vector<16x384xf32> to vector<16x128xf32>
    %100 = arith.extf %98 : vector<16x128xbf16> to vector<16x128xf32>
    %101 = arith.addf %100, %99 : vector<16x128xf32>
    %102 = arith.negf %101 : vector<16x128xf32>
    %103 = math.exp %102 : vector<16x128xf32>
    %cst_53 = arith.constant 1.000000e+00 : f32
    %104 = vector.broadcast %cst_53 : f32 to vector<16x128xf32>
    %105 = arith.addf %104, %103 : vector<16x128xf32>
    %106 = arith.divf %104, %105 : vector<16x128xf32>
    %107 = vector.extract_strided_slice %40 {offsets = [0, 256], sizes = [16, 128], strides = [1, 1]} : vector<16x384xbf16> to vector<16x128xbf16>
    %108 = vector.extract_strided_slice %44 {offsets = [0, 256], sizes = [16, 128], strides = [1, 1]} : vector<16x384xf32> to vector<16x128xf32>
    %109 = arith.addf %108, %11 : vector<16x128xf32>
    %110 = arith.mulf %97, %109 : vector<16x128xf32>
    %111 = arith.extf %107 : vector<16x128xbf16> to vector<16x128xf32>
    %112 = arith.addf %111, %110 : vector<16x128xf32>
    %113 = math.tanh %112 : vector<16x128xf32>
    %cst_54 = arith.constant 1.000000e+00 : f32
    %114 = vector.broadcast %cst_54 : f32 to vector<16x128xf32>
    %115 = arith.subf %114, %106 : vector<16x128xf32>
    %116 = arith.mulf %115, %113 : vector<16x128xf32>
    %117 = arith.mulf %106, %33 : vector<16x128xf32>
    %118 = arith.addf %116, %117 : vector<16x128xf32>
    %c15_i32 = arith.constant 15 : i32
    %119 = arith.addi %36, %c15_i32 : i32
    %120 = vector.broadcast %119 : i32 to vector<16x1xi32>
    %121 = arith.cmpi sgt, %3, %120 : vector<16x1xi32>
    %122 = vector.shape_cast %121 : vector<16x1xi1> to vector<16x1xi1>
    %123 = vector.broadcast %122 : vector<16x1xi1> to vector<16x128xi1>
    %124 = arith.select %123, %118, %33 : vector<16x128xi1>, vector<16x128xf32>
    %cst_55 = arith.constant 0.000000e+00 : f32
    %125 = vector.shape_cast %121 : vector<16x1xi1> to vector<16x1xi1>
    %126 = vector.broadcast %125 : vector<16x1xi1> to vector<16x128xi1>
    %127 = vector.broadcast %cst_55 : f32 to vector<16x128xf32>
    %128 = arith.select %126, %118, %127 : vector<16x128xi1>, vector<16x128xf32>
    %129 = arith.truncf %128 : vector<16x128xf32> to vector<16x128xbf16>
    %c15_56 = arith.constant 15 : index
    %c0_57 = arith.constant 0 : index
    %c0_58 = arith.constant 0 : index
    %130 = vector.load %arg14[%c15_56, %c0_57, %c0_58] : memref<16x16x128xbf16, #tpu.memory_space<vmem>>, vector<1x16x128xbf16>
    %131 = vector.shape_cast %130 : vector<1x16x128xbf16> to vector<16x128xbf16>
    %132 = vector.shape_cast %129 : vector<16x128xbf16> to vector<1x16x128xbf16>
    tpu.vector_store %arg14[%c15_56, %c0_57, %c0_58], %132 {strides = array<i32>} : memref<16x16x128xbf16, #tpu.memory_space<vmem>>, vector<1x16x128xbf16>,
    %c1 = arith.constant 1 : index
    %c0_59 = arith.constant 0 : index
    %c0_60 = arith.constant 0 : index
    %133 = vector.load %arg17[%c1, %c0_59, %c0_60] : memref<16x16x384xbf16, #tpu.memory_space<vmem>>, vector<1x16x384xbf16>
    %134 = vector.shape_cast %133 : vector<1x16x384xbf16> to vector<16x384xbf16>
    %c14 = arith.constant 14 : index
    %c0_61 = arith.constant 0 : index
    %c0_62 = arith.constant 0 : index
    %135 = vector.load %arg18[%c14, %c0_61, %c0_62] : memref<16x16x384xbf16, #tpu.memory_space<vmem>>, vector<1x16x384xbf16>
    %136 = vector.shape_cast %135 : vector<1x16x384xbf16> to vector<16x384xbf16>
    %137 = arith.truncf %80 : vector<16x128xf32> to vector<16x128xbf16>
    %cst_63 = arith.constant dense<0.000000e+00> : vector<16x384xf32>
    %138 = tpu.matmul %137, %4, %cst_63 {dimension_numbers = #tpu.dot_dimension_numbers<[1], [0], [0], [1], [0, 0, 1, 1], [], []>} : vector<16x128xbf16>, vector<128x384xbf16>, vector<16x384xf32> -> vector<16x384xf32>
    %139 = arith.truncf %124 : vector<16x128xf32> to vector<16x128xbf16>
    %cst_64 = arith.constant dense<0.000000e+00> : vector<16x384xf32>
    %140 = tpu.matmul %139, %5, %cst_64 {dimension_numbers = #tpu.dot_dimension_numbers<[1], [0], [0], [1], [0, 0, 1, 1], [], []>} : vector<16x128xbf16>, vector<128x384xbf16>, vector<16x384xf32> -> vector<16x384xf32>
    %141 = vector.extract_strided_slice %134 {offsets = [0, 0], sizes = [16, 128], strides = [1, 1]} : vector<16x384xbf16> to vector<16x128xbf16>
    %142 = vector.extract_strided_slice %138 {offsets = [0, 0], sizes = [16, 128], strides = [1, 1]} : vector<16x384xf32> to vector<16x128xf32>
    %143 = arith.extf %141 : vector<16x128xbf16> to vector<16x128xf32>
    %144 = arith.addf %143, %142 : vector<16x128xf32>
    %145 = arith.negf %144 : vector<16x128xf32>
    %146 = math.exp %145 : vector<16x128xf32>
    %cst_65 = arith.constant 1.000000e+00 : f32
    %147 = vector.broadcast %cst_65 : f32 to vector<16x128xf32>
    %148 = arith.addf %147, %146 : vector<16x128xf32>
    %149 = arith.divf %147, %148 : vector<16x128xf32>
    %150 = vector.extract_strided_slice %134 {offsets = [0, 128], sizes = [16, 128], strides = [1, 1]} : vector<16x384xbf16> to vector<16x128xbf16>
    %151 = vector.extract_strided_slice %138 {offsets = [0, 128], sizes = [16, 128], strides = [1, 1]} : vector<16x384xf32> to vector<16x128xf32>
    %152 = arith.extf %150 : vector<16x128xbf16> to vector<16x128xf32>
    %153 = arith.addf %152, %151 : vector<16x128xf32>
    %154 = arith.negf %153 : vector<16x128xf32>
    %155 = math.exp %154 : vector<16x128xf32>
    %cst_66 = arith.constant 1.000000e+00 : f32
    %156 = vector.broadcast %cst_66 : f32 to vector<16x128xf32>
    %157 = arith.addf %156, %155 : vector<16x128xf32>
    %158 = arith.divf %156, %157 : vector<16x128xf32>
    %159 = vector.extract_strided_slice %134 {offsets = [0, 256], sizes = [16, 128], strides = [1, 1]} : vector<16x384xbf16> to vector<16x128xbf16>
    %160 = vector.extract_strided_slice %138 {offsets = [0, 256], sizes = [16, 128], strides = [1, 1]} : vector<16x384xf32> to vector<16x128xf32>
    %161 = arith.addf %160, %8 : vector<16x128xf32>
    %162 = arith.mulf %149, %161 : vector<16x128xf32>
    %163 = arith.extf %159 : vector<16x128xbf16> to vector<16x128xf32>
    %164 = arith.addf %163, %162 : vector<16x128xf32>
    %165 = math.tanh %164 : vector<16x128xf32>
    %cst_67 = arith.constant 1.000000e+00 : f32
    %166 = vector.broadcast %cst_67 : f32 to vector<16x128xf32>
    %167 = arith.subf %166, %158 : vector<16x128xf32>
    %168 = arith.mulf %167, %165 : vector<16x128xf32>
    %169 = arith.mulf %158, %80 : vector<16x128xf32>
    %170 = arith.addf %168, %169 : vector<16x128xf32>
    %c1_i32 = arith.constant 1 : i32
    %171 = arith.addi %35, %c1_i32 : i32
    %172 = vector.broadcast %171 : i32 to vector<16x1xi32>
    %173 = arith.cmpi sgt, %3, %172 : vector<16x1xi32>
    %174 = vector.shape_cast %173 : vector<16x1xi1> to vector<16x1xi1>
    %175 = vector.broadcast %174 : vector<16x1xi1> to vector<16x128xi1>
    %176 = arith.select %175, %170, %80 : vector<16x128xi1>, vector<16x128xf32>
    %cst_68 = arith.constant 0.000000e+00 : f32
    %177 = vector.shape_cast %173 : vector<16x1xi1> to vector<16x1xi1>
    %178 = vector.broadcast %177 : vector<16x1xi1> to vector<16x128xi1>
    %179 = vector.broadcast %cst_68 : f32 to vector<16x128xf32>
    %180 = arith.select %178, %170, %179 : vector<16x128xi1>, vector<16x128xf32>
    %181 = arith.truncf %180 : vector<16x128xf32> to vector<16x128xbf16>
    %c1_69 = arith.constant 1 : index
    %c0_70 = arith.constant 0 : index
    %c0_71 = arith.constant 0 : index
    %182 = vector.load %arg13[%c1_69, %c0_70, %c0_71] : memref<16x16x128xbf16, #tpu.memory_space<vmem>>, vector<1x16x128xbf16>
    %183 = vector.shape_cast %182 : vector<1x16x128xbf16> to vector<16x128xbf16>
    %184 = vector.shape_cast %181 : vector<16x128xbf16> to vector<1x16x128xbf16>
    tpu.vector_store %arg13[%c1_69, %c0_70, %c0_71], %184 {strides = array<i32>} : memref<16x16x128xbf16, #tpu.memory_space<vmem>>, vector<1x16x128xbf16>,
    %185 = vector.extract_strided_slice %136 {offsets = [0, 0], sizes = [16, 128], strides = [1, 1]} : vector<16x384xbf16> to vector<16x128xbf16>
    %186 = vector.extract_strided_slice %140 {offsets = [0, 0], sizes = [16, 128], strides = [1, 1]} : vector<16x384xf32> to vector<16x128xf32>
    %187 = arith.extf %185 : vector<16x128xbf16> to vector<16x128xf32>
    %188 = arith.addf %187, %186 : vector<16x128xf32>
    %189 = arith.negf %188 : vector<16x128xf32>
    %190 = math.exp %189 : vector<16x128xf32>
    %cst_72 = arith.constant 1.000000e+00 : f32
    %191 = vector.broadcast %cst_72 : f32 to vector<16x128xf32>
    %192 = arith.addf %191, %190 : vector<16x128xf32>
    %193 = arith.divf %191, %192 : vector<16x128xf32>
    %194 = vector.extract_strided_slice %136 {offsets = [0, 128], sizes = [16, 128], strides = [1, 1]} : vector<16x384xbf16> to vector<16x128xbf16>
    %195 = vector.extract_strided_slice %140 {offsets = [0, 128], sizes = [16, 128], strides = [1, 1]} : vector<16x384xf32> to vector<16x128xf32>
    %196 = arith.extf %194 : vector<16x128xbf16> to vector<16x128xf32>
    %197 = arith.addf %196, %195 : vector<16x128xf32>
    %198 = arith.negf %197 : vector<16x128xf32>
    %199 = math.exp %198 : vector<16x128xf32>
    %cst_73 = arith.constant 1.000000e+00 : f32
    %200 = vector.broadcast %cst_73 : f32 to vector<16x128xf32>
    %201 = arith.addf %200, %199 : vector<16x128xf32>
    %202 = arith.divf %200, %201 : vector<16x128xf32>
    %203 = vector.extract_strided_slice %136 {offsets = [0, 256], sizes = [16, 128], strides = [1, 1]} : vector<16x384xbf16> to vector<16x128xbf16>
    %204 = vector.extract_strided_slice %140 {offsets = [0, 256], sizes = [16, 128], strides = [1, 1]} : vector<16x384xf32> to vector<16x128xf32>
    %205 = arith.addf %204, %11 : vector<16x128xf32>
    %206 = arith.mulf %193, %205 : vector<16x128xf32>
    %207 = arith.extf %203 : vector<16x128xbf16> to vector<16x128xf32>
    %208 = arith.addf %207, %206 : vector<16x128xf32>
    %209 = math.tanh %208 : vector<16x128xf32>
    %cst_74 = arith.constant 1.000000e+00 : f32
    %210 = vector.broadcast %cst_74 : f32 to vector<16x128xf32>
    %211 = arith.subf %210, %202 : vector<16x128xf32>
    %212 = arith.mulf %211, %209 : vector<16x128xf32>
    %213 = arith.mulf %202, %124 : vector<16x128xf32>
    %214 = arith.addf %212, %213 : vector<16x128xf32>
    %c14_i32 = arith.constant 14 : i32
    %215 = arith.addi %36, %c14_i32 : i32
    %216 = vector.broadcast %215 : i32 to vector<16x1xi32>
    %217 = arith.cmpi sgt, %3, %216 : vector<16x1xi32>
    %218 = vector.shape_cast %217 : vector<16x1xi1> to vector<16x1xi1>
    %219 = vector.broadcast %218 : vector<16x1xi1> to vector<16x128xi1>
    %220 = arith.select %219, %214, %124 : vector<16x128xi1>, vector<16x128xf32>
    %cst_75 = arith.constant 0.000000e+00 : f32
    %221 = vector.shape_cast %217 : vector<16x1xi1> to vector<16x1xi1>
    %222 = vector.broadcast %221 : vector<16x1xi1> to vector<16x128xi1>
    %223 = vector.broadcast %cst_75 : f32 to vector<16x128xf32>
    %224 = arith.select %222, %214, %223 : vector<16x128xi1>, vector<16x128xf32>
    %225 = arith.truncf %224 : vector<16x128xf32> to vector<16x128xbf16>
    %c14_76 = arith.constant 14 : index
    %c0_77 = arith.constant 0 : index
    %c0_78 = arith.constant 0 : index
    %226 = vector.load %arg14[%c14_76, %c0_77, %c0_78] : memref<16x16x128xbf16, #tpu.memory_space<vmem>>, vector<1x16x128xbf16>
    %227 = vector.shape_cast %226 : vector<1x16x128xbf16> to vector<16x128xbf16>
    %228 = vector.shape_cast %225 : vector<16x128xbf16> to vector<1x16x128xbf16>
    tpu.vector_store %arg14[%c14_76, %c0_77, %c0_78], %228 {strides = array<i32>} : memref<16x16x128xbf16, #tpu.memory_space<vmem>>, vector<1x16x128xbf16>,
    %c2 = arith.constant 2 : index
    %c0_79 = arith.constant 0 : index
    %c0_80 = arith.constant 0 : index
    %229 = vector.load %arg17[%c2, %c0_79, %c0_80] : memref<16x16x384xbf16, #tpu.memory_space<vmem>>, vector<1x16x384xbf16>
    %230 = vector.shape_cast %229 : vector<1x16x384xbf16> to vector<16x384xbf16>
    %c13 = arith.constant 13 : index
    %c0_81 = arith.constant 0 : index
    %c0_82 = arith.constant 0 : index
    %231 = vector.load %arg18[%c13, %c0_81, %c0_82] : memref<16x16x384xbf16, #tpu.memory_space<vmem>>, vector<1x16x384xbf16>
    %232 = vector.shape_cast %231 : vector<1x16x384xbf16> to vector<16x384xbf16>
    %233 = arith.truncf %176 : vector<16x128xf32> to vector<16x128xbf16>
    %cst_83 = arith.constant dense<0.000000e+00> : vector<16x384xf32>
    %234 = tpu.matmul %233, %4, %cst_83 {dimension_numbers = #tpu.dot_dimension_numbers<[1], [0], [0], [1], [0, 0, 1, 1], [], []>} : vector<16x128xbf16>, vector<128x384xbf16>, vector<16x384xf32> -> vector<16x384xf32>
    %235 = arith.truncf %220 : vector<16x128xf32> to vector<16x128xbf16>
    %cst_84 = arith.constant dense<0.000000e+00> : vector<16x384xf32>
    %236 = tpu.matmul %235, %5, %cst_84 {dimension_numbers = #tpu.dot_dimension_numbers<[1], [0], [0], [1], [0, 0, 1, 1], [], []>} : vector<16x128xbf16>, vector<128x384xbf16>, vector<16x384xf32> -> vector<16x384xf32>
    %237 = vector.extract_strided_slice %230 {offsets = [0, 0], sizes = [16, 128], strides = [1, 1]} : vector<16x384xbf16> to vector<16x128xbf16>
    %238 = vector.extract_strided_slice %234 {offsets = [0, 0], sizes = [16, 128], strides = [1, 1]} : vector<16x384xf32> to vector<16x128xf32>
    %239 = arith.extf %237 : vector<16x128xbf16> to vector<16x128xf32>
    %240 = arith.addf %239, %238 : vector<16x128xf32>
    %241 = arith.negf %240 : vector<16x128xf32>
    %242 = math.exp %241 : vector<16x128xf32>
    %cst_85 = arith.constant 1.000000e+00 : f32
    %243 = vector.broadcast %cst_85 : f32 to vector<16x128xf32>
    %244 = arith.addf %243, %242 : vector<16x128xf32>
    %245 = arith.divf %243, %244 : vector<16x128xf32>
    %246 = vector.extract_strided_slice %230 {offsets = [0, 128], sizes = [16, 128], strides = [1, 1]} : vector<16x384xbf16> to vector<16x128xbf16>
    %247 = vector.extract_strided_slice %234 {offsets = [0, 128], sizes = [16, 128], strides = [1, 1]} : vector<16x384xf32> to vector<16x128xf32>
    %248 = arith.extf %246 : vector<16x128xbf16> to vector<16x128xf32>
    %249 = arith.addf %248, %247 : vector<16x128xf32>
    %250 = arith.negf %249 : vector<16x128xf32>
    %251 = math.exp %250 : vector<16x128xf32>
    %cst_86 = arith.constant 1.000000e+00 : f32
    %252 = vector.broadcast %cst_86 : f32 to vector<16x128xf32>
    %253 = arith.addf %252, %251 : vector<16x128xf32>
    %254 = arith.divf %252, %253 : vector<16x128xf32>
    %255 = vector.extract_strided_slice %230 {offsets = [0, 256], sizes = [16, 128], strides = [1, 1]} : vector<16x384xbf16> to vector<16x128xbf16>
    %256 = vector.extract_strided_slice %234 {offsets = [0, 256], sizes = [16, 128], strides = [1, 1]} : vector<16x384xf32> to vector<16x128xf32>
    %257 = arith.addf %256, %8 : vector<16x128xf32>
    %258 = arith.mulf %245, %257 : vector<16x128xf32>
    %259 = arith.extf %255 : vector<16x128xbf16> to vector<16x128xf32>
    %260 = arith.addf %259, %258 : vector<16x128xf32>
    %261 = math.tanh %260 : vector<16x128xf32>
    %cst_87 = arith.constant 1.000000e+00 : f32
    %262 = vector.broadcast %cst_87 : f32 to vector<16x128xf32>
    %263 = arith.subf %262, %254 : vector<16x128xf32>
    %264 = arith.mulf %263, %261 : vector<16x128xf32>
    %265 = arith.mulf %254, %176 : vector<16x128xf32>
    %266 = arith.addf %264, %265 : vector<16x128xf32>
    %c2_i32 = arith.constant 2 : i32
    %267 = arith.addi %35, %c2_i32 : i32
    %268 = vector.broadcast %267 : i32 to vector<16x1xi32>
    %269 = arith.cmpi sgt, %3, %268 : vector<16x1xi32>
    %270 = vector.shape_cast %269 : vector<16x1xi1> to vector<16x1xi1>
    %271 = vector.broadcast %270 : vector<16x1xi1> to vector<16x128xi1>
    %272 = arith.select %271, %266, %176 : vector<16x128xi1>, vector<16x128xf32>
    %cst_88 = arith.constant 0.000000e+00 : f32
    %273 = vector.shape_cast %269 : vector<16x1xi1> to vector<16x1xi1>
    %274 = vector.broadcast %273 : vector<16x1xi1> to vector<16x128xi1>
    %275 = vector.broadcast %cst_88 : f32 to vector<16x128xf32>
    %276 = arith.select %274, %266, %275 : vector<16x128xi1>, vector<16x128xf32>
    %277 = arith.truncf %276 : vector<16x128xf32> to vector<16x128xbf16>
    %c2_89 = arith.constant 2 : index
    %c0_90 = arith.constant 0 : index
    %c0_91 = arith.constant 0 : index
    %278 = vector.load %arg13[%c2_89, %c0_90, %c0_91] : memref<16x16x128xbf16, #tpu.memory_space<vmem>>, vector<1x16x128xbf16>
    %279 = vector.shape_cast %278 : vector<1x16x128xbf16> to vector<16x128xbf16>
    %280 = vector.shape_cast %277 : vector<16x128xbf16> to vector<1x16x128xbf16>
    tpu.vector_store %arg13[%c2_89, %c0_90, %c0_91], %280 {strides = array<i32>} : memref<16x16x128xbf16, #tpu.memory_space<vmem>>, vector<1x16x128xbf16>,
    %281 = vector.extract_strided_slice %232 {offsets = [0, 0], sizes = [16, 128], strides = [1, 1]} : vector<16x384xbf16> to vector<16x128xbf16>
    %282 = vector.extract_strided_slice %236 {offsets = [0, 0], sizes = [16, 128], strides = [1, 1]} : vector<16x384xf32> to vector<16x128xf32>
    %283 = arith.extf %281 : vector<16x128xbf16> to vector<16x128xf32>
    %284 = arith.addf %283, %282 : vector<16x128xf32>
    %285 = arith.negf %284 : vector<16x128xf32>
    %286 = math.exp %285 : vector<16x128xf32>
    %cst_92 = arith.constant 1.000000e+00 : f32
    %287 = vector.broadcast %cst_92 : f32 to vector<16x128xf32>
    %288 = arith.addf %287, %286 : vector<16x128xf32>
    %289 = arith.divf %287, %288 : vector<16x128xf32>
    %290 = vector.extract_strided_slice %232 {offsets = [0, 128], sizes = [16, 128], strides = [1, 1]} : vector<16x384xbf16> to vector<16x128xbf16>
    %291 = vector.extract_strided_slice %236 {offsets = [0, 128], sizes = [16, 128], strides = [1, 1]} : vector<16x384xf32> to vector<16x128xf32>
    %292 = arith.extf %290 : vector<16x128xbf16> to vector<16x128xf32>
    %293 = arith.addf %292, %291 : vector<16x128xf32>
    %294 = arith.negf %293 : vector<16x128xf32>
    %295 = math.exp %294 : vector<16x128xf32>
    %cst_93 = arith.constant 1.000000e+00 : f32
    %296 = vector.broadcast %cst_93 : f32 to vector<16x128xf32>
    %297 = arith.addf %296, %295 : vector<16x128xf32>
    %298 = arith.divf %296, %297 : vector<16x128xf32>
    %299 = vector.extract_strided_slice %232 {offsets = [0, 256], sizes = [16, 128], strides = [1, 1]} : vector<16x384xbf16> to vector<16x128xbf16>
    %300 = vector.extract_strided_slice %236 {offsets = [0, 256], sizes = [16, 128], strides = [1, 1]} : vector<16x384xf32> to vector<16x128xf32>
    %301 = arith.addf %300, %11 : vector<16x128xf32>
    %302 = arith.mulf %289, %301 : vector<16x128xf32>
    %303 = arith.extf %299 : vector<16x128xbf16> to vector<16x128xf32>
    %304 = arith.addf %303, %302 : vector<16x128xf32>
    %305 = math.tanh %304 : vector<16x128xf32>
    %cst_94 = arith.constant 1.000000e+00 : f32
    %306 = vector.broadcast %cst_94 : f32 to vector<16x128xf32>
    %307 = arith.subf %306, %298 : vector<16x128xf32>
    %308 = arith.mulf %307, %305 : vector<16x128xf32>
    %309 = arith.mulf %298, %220 : vector<16x128xf32>
    %310 = arith.addf %308, %309 : vector<16x128xf32>
    %c13_i32 = arith.constant 13 : i32
    %311 = arith.addi %36, %c13_i32 : i32
    %312 = vector.broadcast %311 : i32 to vector<16x1xi32>
    %313 = arith.cmpi sgt, %3, %312 : vector<16x1xi32>
    %314 = vector.shape_cast %313 : vector<16x1xi1> to vector<16x1xi1>
    %315 = vector.broadcast %314 : vector<16x1xi1> to vector<16x128xi1>
    %316 = arith.select %315, %310, %220 : vector<16x128xi1>, vector<16x128xf32>
    %cst_95 = arith.constant 0.000000e+00 : f32
    %317 = vector.shape_cast %313 : vector<16x1xi1> to vector<16x1xi1>
    %318 = vector.broadcast %317 : vector<16x1xi1> to vector<16x128xi1>
    %319 = vector.broadcast %cst_95 : f32 to vector<16x128xf32>
    %320 = arith.select %318, %310, %319 : vector<16x128xi1>, vector<16x128xf32>
    %321 = arith.truncf %320 : vector<16x128xf32> to vector<16x128xbf16>
    %c13_96 = arith.constant 13 : index
    %c0_97 = arith.constant 0 : index
    %c0_98 = arith.constant 0 : index
    %322 = vector.load %arg14[%c13_96, %c0_97, %c0_98] : memref<16x16x128xbf16, #tpu.memory_space<vmem>>, vector<1x16x128xbf16>
    %323 = vector.shape_cast %322 : vector<1x16x128xbf16> to vector<16x128xbf16>
    %324 = vector.shape_cast %321 : vector<16x128xbf16> to vector<1x16x128xbf16>
    tpu.vector_store %arg14[%c13_96, %c0_97, %c0_98], %324 {strides = array<i32>} : memref<16x16x128xbf16, #tpu.memory_space<vmem>>, vector<1x16x128xbf16>,
    %c3 = arith.constant 3 : index
    %c0_99 = arith.constant 0 : index
    %c0_100 = arith.constant 0 : index
    %325 = vector.load %arg17[%c3, %c0_99, %c0_100] : memref<16x16x384xbf16, #tpu.memory_space<vmem>>, vector<1x16x384xbf16>
    %326 = vector.shape_cast %325 : vector<1x16x384xbf16> to vector<16x384xbf16>
    %c12 = arith.constant 12 : index
    %c0_101 = arith.constant 0 : index
    %c0_102 = arith.constant 0 : index
    %327 = vector.load %arg18[%c12, %c0_101, %c0_102] : memref<16x16x384xbf16, #tpu.memory_space<vmem>>, vector<1x16x384xbf16>
    %328 = vector.shape_cast %327 : vector<1x16x384xbf16> to vector<16x384xbf16>
    %329 = arith.truncf %272 : vector<16x128xf32> to vector<16x128xbf16>
    %cst_103 = arith.constant dense<0.000000e+00> : vector<16x384xf32>
    %330 = tpu.matmul %329, %4, %cst_103 {dimension_numbers = #tpu.dot_dimension_numbers<[1], [0], [0], [1], [0, 0, 1, 1], [], []>} : vector<16x128xbf16>, vector<128x384xbf16>, vector<16x384xf32> -> vector<16x384xf32>
    %331 = arith.truncf %316 : vector<16x128xf32> to vector<16x128xbf16>
    %cst_104 = arith.constant dense<0.000000e+00> : vector<16x384xf32>
    %332 = tpu.matmul %331, %5, %cst_104 {dimension_numbers = #tpu.dot_dimension_numbers<[1], [0], [0], [1], [0, 0, 1, 1], [], []>} : vector<16x128xbf16>, vector<128x384xbf16>, vector<16x384xf32> -> vector<16x384xf32>
    %333 = vector.extract_strided_slice %326 {offsets = [0, 0], sizes = [16, 128], strides = [1, 1]} : vector<16x384xbf16> to vector<16x128xbf16>
    %334 = vector.extract_strided_slice %330 {offsets = [0, 0], sizes = [16, 128], strides = [1, 1]} : vector<16x384xf32> to vector<16x128xf32>
    %335 = arith.extf %333 : vector<16x128xbf16> to vector<16x128xf32>
    %336 = arith.addf %335, %334 : vector<16x128xf32>
    %337 = arith.negf %336 : vector<16x128xf32>
    %338 = math.exp %337 : vector<16x128xf32>
    %cst_105 = arith.constant 1.000000e+00 : f32
    %339 = vector.broadcast %cst_105 : f32 to vector<16x128xf32>
    %340 = arith.addf %339, %338 : vector<16x128xf32>
    %341 = arith.divf %339, %340 : vector<16x128xf32>
    %342 = vector.extract_strided_slice %326 {offsets = [0, 128], sizes = [16, 128], strides = [1, 1]} : vector<16x384xbf16> to vector<16x128xbf16>
    %343 = vector.extract_strided_slice %330 {offsets = [0, 128], sizes = [16, 128], strides = [1, 1]} : vector<16x384xf32> to vector<16x128xf32>
    %344 = arith.extf %342 : vector<16x128xbf16> to vector<16x128xf32>
    %345 = arith.addf %344, %343 : vector<16x128xf32>
    %346 = arith.negf %345 : vector<16x128xf32>
    %347 = math.exp %346 : vector<16x128xf32>
    %cst_106 = arith.constant 1.000000e+00 : f32
    %348 = vector.broadcast %cst_106 : f32 to vector<16x128xf32>
    %349 = arith.addf %348, %347 : vector<16x128xf32>
    %350 = arith.divf %348, %349 : vector<16x128xf32>
    %351 = vector.extract_strided_slice %326 {offsets = [0, 256], sizes = [16, 128], strides = [1, 1]} : vector<16x384xbf16> to vector<16x128xbf16>
    %352 = vector.extract_strided_slice %330 {offsets = [0, 256], sizes = [16, 128], strides = [1, 1]} : vector<16x384xf32> to vector<16x128xf32>
    %353 = arith.addf %352, %8 : vector<16x128xf32>
    %354 = arith.mulf %341, %353 : vector<16x128xf32>
    %355 = arith.extf %351 : vector<16x128xbf16> to vector<16x128xf32>
    %356 = arith.addf %355, %354 : vector<16x128xf32>
    %357 = math.tanh %356 : vector<16x128xf32>
    %cst_107 = arith.constant 1.000000e+00 : f32
    %358 = vector.broadcast %cst_107 : f32 to vector<16x128xf32>
    %359 = arith.subf %358, %350 : vector<16x128xf32>
    %360 = arith.mulf %359, %357 : vector<16x128xf32>
    %361 = arith.mulf %350, %272 : vector<16x128xf32>
    %362 = arith.addf %360, %361 : vector<16x128xf32>
    %c3_i32 = arith.constant 3 : i32
    %363 = arith.addi %35, %c3_i32 : i32
    %364 = vector.broadcast %363 : i32 to vector<16x1xi32>
    %365 = arith.cmpi sgt, %3, %364 : vector<16x1xi32>
    %366 = vector.shape_cast %365 : vector<16x1xi1> to vector<16x1xi1>
    %367 = vector.broadcast %366 : vector<16x1xi1> to vector<16x128xi1>
    %368 = arith.select %367, %362, %272 : vector<16x128xi1>, vector<16x128xf32>
    %cst_108 = arith.constant 0.000000e+00 : f32
    %369 = vector.shape_cast %365 : vector<16x1xi1> to vector<16x1xi1>
    %370 = vector.broadcast %369 : vector<16x1xi1> to vector<16x128xi1>
    %371 = vector.broadcast %cst_108 : f32 to vector<16x128xf32>
    %372 = arith.select %370, %362, %371 : vector<16x128xi1>, vector<16x128xf32>
    %373 = arith.truncf %372 : vector<16x128xf32> to vector<16x128xbf16>
    %c3_109 = arith.constant 3 : index
    %c0_110 = arith.constant 0 : index
    %c0_111 = arith.constant 0 : index
    %374 = vector.load %arg13[%c3_109, %c0_110, %c0_111] : memref<16x16x128xbf16, #tpu.memory_space<vmem>>, vector<1x16x128xbf16>
    %375 = vector.shape_cast %374 : vector<1x16x128xbf16> to vector<16x128xbf16>
    %376 = vector.shape_cast %373 : vector<16x128xbf16> to vector<1x16x128xbf16>
    tpu.vector_store %arg13[%c3_109, %c0_110, %c0_111], %376 {strides = array<i32>} : memref<16x16x128xbf16, #tpu.memory_space<vmem>>, vector<1x16x128xbf16>,
    %377 = vector.extract_strided_slice %328 {offsets = [0, 0], sizes = [16, 128], strides = [1, 1]} : vector<16x384xbf16> to vector<16x128xbf16>
    %378 = vector.extract_strided_slice %332 {offsets = [0, 0], sizes = [16, 128], strides = [1, 1]} : vector<16x384xf32> to vector<16x128xf32>
    %379 = arith.extf %377 : vector<16x128xbf16> to vector<16x128xf32>
    %380 = arith.addf %379, %378 : vector<16x128xf32>
    %381 = arith.negf %380 : vector<16x128xf32>
    %382 = math.exp %381 : vector<16x128xf32>
    %cst_112 = arith.constant 1.000000e+00 : f32
    %383 = vector.broadcast %cst_112 : f32 to vector<16x128xf32>
    %384 = arith.addf %383, %382 : vector<16x128xf32>
    %385 = arith.divf %383, %384 : vector<16x128xf32>
    %386 = vector.extract_strided_slice %328 {offsets = [0, 128], sizes = [16, 128], strides = [1, 1]} : vector<16x384xbf16> to vector<16x128xbf16>
    %387 = vector.extract_strided_slice %332 {offsets = [0, 128], sizes = [16, 128], strides = [1, 1]} : vector<16x384xf32> to vector<16x128xf32>
    %388 = arith.extf %386 : vector<16x128xbf16> to vector<16x128xf32>
    %389 = arith.addf %388, %387 : vector<16x128xf32>
    %390 = arith.negf %389 : vector<16x128xf32>
    %391 = math.exp %390 : vector<16x128xf32>
    %cst_113 = arith.constant 1.000000e+00 : f32
    %392 = vector.broadcast %cst_113 : f32 to vector<16x128xf32>
    %393 = arith.addf %392, %391 : vector<16x128xf32>
    %394 = arith.divf %392, %393 : vector<16x128xf32>
    %395 = vector.extract_strided_slice %328 {offsets = [0, 256], sizes = [16, 128], strides = [1, 1]} : vector<16x384xbf16> to vector<16x128xbf16>
    %396 = vector.extract_strided_slice %332 {offsets = [0, 256], sizes = [16, 128], strides = [1, 1]} : vector<16x384xf32> to vector<16x128xf32>
    %397 = arith.addf %396, %11 : vector<16x128xf32>
    %398 = arith.mulf %385, %397 : vector<16x128xf32>
    %399 = arith.extf %395 : vector<16x128xbf16> to vector<16x128xf32>
    %400 = arith.addf %399, %398 : vector<16x128xf32>
    %401 = math.tanh %400 : vector<16x128xf32>
    %cst_114 = arith.constant 1.000000e+00 : f32
    %402 = vector.broadcast %cst_114 : f32 to vector<16x128xf32>
    %403 = arith.subf %402, %394 : vector<16x128xf32>
    %404 = arith.mulf %403, %401 : vector<16x128xf32>
    %405 = arith.mulf %394, %316 : vector<16x128xf32>
    %406 = arith.addf %404, %405 : vector<16x128xf32>
    %c12_i32 = arith.constant 12 : i32
    %407 = arith.addi %36, %c12_i32 : i32
    %408 = vector.broadcast %407 : i32 to vector<16x1xi32>
    %409 = arith.cmpi sgt, %3, %408 : vector<16x1xi32>
    %410 = vector.shape_cast %409 : vector<16x1xi1> to vector<16x1xi1>
    %411 = vector.broadcast %410 : vector<16x1xi1> to vector<16x128xi1>
    %412 = arith.select %411, %406, %316 : vector<16x128xi1>, vector<16x128xf32>
    %cst_115 = arith.constant 0.000000e+00 : f32
    %413 = vector.shape_cast %409 : vector<16x1xi1> to vector<16x1xi1>
    %414 = vector.broadcast %413 : vector<16x1xi1> to vector<16x128xi1>
    %415 = vector.broadcast %cst_115 : f32 to vector<16x128xf32>
    %416 = arith.select %414, %406, %415 : vector<16x128xi1>, vector<16x128xf32>
    %417 = arith.truncf %416 : vector<16x128xf32> to vector<16x128xbf16>
    %c12_116 = arith.constant 12 : index
    %c0_117 = arith.constant 0 : index
    %c0_118 = arith.constant 0 : index
    %418 = vector.load %arg14[%c12_116, %c0_117, %c0_118] : memref<16x16x128xbf16, #tpu.memory_space<vmem>>, vector<1x16x128xbf16>
    %419 = vector.shape_cast %418 : vector<1x16x128xbf16> to vector<16x128xbf16>
    %420 = vector.shape_cast %417 : vector<16x128xbf16> to vector<1x16x128xbf16>
    tpu.vector_store %arg14[%c12_116, %c0_117, %c0_118], %420 {strides = array<i32>} : memref<16x16x128xbf16, #tpu.memory_space<vmem>>, vector<1x16x128xbf16>,
    %c4 = arith.constant 4 : index
    %c0_119 = arith.constant 0 : index
    %c0_120 = arith.constant 0 : index
    %421 = vector.load %arg17[%c4, %c0_119, %c0_120] : memref<16x16x384xbf16, #tpu.memory_space<vmem>>, vector<1x16x384xbf16>
    %422 = vector.shape_cast %421 : vector<1x16x384xbf16> to vector<16x384xbf16>
    %c11 = arith.constant 11 : index
    %c0_121 = arith.constant 0 : index
    %c0_122 = arith.constant 0 : index
    %423 = vector.load %arg18[%c11, %c0_121, %c0_122] : memref<16x16x384xbf16, #tpu.memory_space<vmem>>, vector<1x16x384xbf16>
    %424 = vector.shape_cast %423 : vector<1x16x384xbf16> to vector<16x384xbf16>
    %425 = arith.truncf %368 : vector<16x128xf32> to vector<16x128xbf16>
    %cst_123 = arith.constant dense<0.000000e+00> : vector<16x384xf32>
    %426 = tpu.matmul %425, %4, %cst_123 {dimension_numbers = #tpu.dot_dimension_numbers<[1], [0], [0], [1], [0, 0, 1, 1], [], []>} : vector<16x128xbf16>, vector<128x384xbf16>, vector<16x384xf32> -> vector<16x384xf32>
    %427 = arith.truncf %412 : vector<16x128xf32> to vector<16x128xbf16>
    %cst_124 = arith.constant dense<0.000000e+00> : vector<16x384xf32>
    %428 = tpu.matmul %427, %5, %cst_124 {dimension_numbers = #tpu.dot_dimension_numbers<[1], [0], [0], [1], [0, 0, 1, 1], [], []>} : vector<16x128xbf16>, vector<128x384xbf16>, vector<16x384xf32> -> vector<16x384xf32>
    %429 = vector.extract_strided_slice %422 {offsets = [0, 0], sizes = [16, 128], strides = [1, 1]} : vector<16x384xbf16> to vector<16x128xbf16>
    %430 = vector.extract_strided_slice %426 {offsets = [0, 0], sizes = [16, 128], strides = [1, 1]} : vector<16x384xf32> to vector<16x128xf32>
    %431 = arith.extf %429 : vector<16x128xbf16> to vector<16x128xf32>
    %432 = arith.addf %431, %430 : vector<16x128xf32>
    %433 = arith.negf %432 : vector<16x128xf32>
    %434 = math.exp %433 : vector<16x128xf32>
    %cst_125 = arith.constant 1.000000e+00 : f32
    %435 = vector.broadcast %cst_125 : f32 to vector<16x128xf32>
    %436 = arith.addf %435, %434 : vector<16x128xf32>
    %437 = arith.divf %435, %436 : vector<16x128xf32>
    %438 = vector.extract_strided_slice %422 {offsets = [0, 128], sizes = [16, 128], strides = [1, 1]} : vector<16x384xbf16> to vector<16x128xbf16>
    %439 = vector.extract_strided_slice %426 {offsets = [0, 128], sizes = [16, 128], strides = [1, 1]} : vector<16x384xf32> to vector<16x128xf32>
    %440 = arith.extf %438 : vector<16x128xbf16> to vector<16x128xf32>
    %441 = arith.addf %440, %439 : vector<16x128xf32>
    %442 = arith.negf %441 : vector<16x128xf32>
    %443 = math.exp %442 : vector<16x128xf32>
    %cst_126 = arith.constant 1.000000e+00 : f32
    %444 = vector.broadcast %cst_126 : f32 to vector<16x128xf32>
    %445 = arith.addf %444, %443 : vector<16x128xf32>
    %446 = arith.divf %444, %445 : vector<16x128xf32>
    %447 = vector.extract_strided_slice %422 {offsets = [0, 256], sizes = [16, 128], strides = [1, 1]} : vector<16x384xbf16> to vector<16x128xbf16>
    %448 = vector.extract_strided_slice %426 {offsets = [0, 256], sizes = [16, 128], strides = [1, 1]} : vector<16x384xf32> to vector<16x128xf32>
    %449 = arith.addf %448, %8 : vector<16x128xf32>
    %450 = arith.mulf %437, %449 : vector<16x128xf32>
    %451 = arith.extf %447 : vector<16x128xbf16> to vector<16x128xf32>
    %452 = arith.addf %451, %450 : vector<16x128xf32>
    %453 = math.tanh %452 : vector<16x128xf32>
    %cst_127 = arith.constant 1.000000e+00 : f32
    %454 = vector.broadcast %cst_127 : f32 to vector<16x128xf32>
    %455 = arith.subf %454, %446 : vector<16x128xf32>
    %456 = arith.mulf %455, %453 : vector<16x128xf32>
    %457 = arith.mulf %446, %368 : vector<16x128xf32>
    %458 = arith.addf %456, %457 : vector<16x128xf32>
    %c4_i32 = arith.constant 4 : i32
    %459 = arith.addi %35, %c4_i32 : i32
    %460 = vector.broadcast %459 : i32 to vector<16x1xi32>
    %461 = arith.cmpi sgt, %3, %460 : vector<16x1xi32>
    %462 = vector.shape_cast %461 : vector<16x1xi1> to vector<16x1xi1>
    %463 = vector.broadcast %462 : vector<16x1xi1> to vector<16x128xi1>
    %464 = arith.select %463, %458, %368 : vector<16x128xi1>, vector<16x128xf32>
    %cst_128 = arith.constant 0.000000e+00 : f32
    %465 = vector.shape_cast %461 : vector<16x1xi1> to vector<16x1xi1>
    %466 = vector.broadcast %465 : vector<16x1xi1> to vector<16x128xi1>
    %467 = vector.broadcast %cst_128 : f32 to vector<16x128xf32>
    %468 = arith.select %466, %458, %467 : vector<16x128xi1>, vector<16x128xf32>
    %469 = arith.truncf %468 : vector<16x128xf32> to vector<16x128xbf16>
    %c4_129 = arith.constant 4 : index
    %c0_130 = arith.constant 0 : index
    %c0_131 = arith.constant 0 : index
    %470 = vector.load %arg13[%c4_129, %c0_130, %c0_131] : memref<16x16x128xbf16, #tpu.memory_space<vmem>>, vector<1x16x128xbf16>
    %471 = vector.shape_cast %470 : vector<1x16x128xbf16> to vector<16x128xbf16>
    %472 = vector.shape_cast %469 : vector<16x128xbf16> to vector<1x16x128xbf16>
    tpu.vector_store %arg13[%c4_129, %c0_130, %c0_131], %472 {strides = array<i32>} : memref<16x16x128xbf16, #tpu.memory_space<vmem>>, vector<1x16x128xbf16>,
    %473 = vector.extract_strided_slice %424 {offsets = [0, 0], sizes = [16, 128], strides = [1, 1]} : vector<16x384xbf16> to vector<16x128xbf16>
    %474 = vector.extract_strided_slice %428 {offsets = [0, 0], sizes = [16, 128], strides = [1, 1]} : vector<16x384xf32> to vector<16x128xf32>
    %475 = arith.extf %473 : vector<16x128xbf16> to vector<16x128xf32>
    %476 = arith.addf %475, %474 : vector<16x128xf32>
    %477 = arith.negf %476 : vector<16x128xf32>
    %478 = math.exp %477 : vector<16x128xf32>
    %cst_132 = arith.constant 1.000000e+00 : f32
    %479 = vector.broadcast %cst_132 : f32 to vector<16x128xf32>
    %480 = arith.addf %479, %478 : vector<16x128xf32>
    %481 = arith.divf %479, %480 : vector<16x128xf32>
    %482 = vector.extract_strided_slice %424 {offsets = [0, 128], sizes = [16, 128], strides = [1, 1]} : vector<16x384xbf16> to vector<16x128xbf16>
    %483 = vector.extract_strided_slice %428 {offsets = [0, 128], sizes = [16, 128], strides = [1, 1]} : vector<16x384xf32> to vector<16x128xf32>
    %484 = arith.extf %482 : vector<16x128xbf16> to vector<16x128xf32>
    %485 = arith.addf %484, %483 : vector<16x128xf32>
    %486 = arith.negf %485 : vector<16x128xf32>
    %487 = math.exp %486 : vector<16x128xf32>
    %cst_133 = arith.constant 1.000000e+00 : f32
    %488 = vector.broadcast %cst_133 : f32 to vector<16x128xf32>
    %489 = arith.addf %488, %487 : vector<16x128xf32>
    %490 = arith.divf %488, %489 : vector<16x128xf32>
    %491 = vector.extract_strided_slice %424 {offsets = [0, 256], sizes = [16, 128], strides = [1, 1]} : vector<16x384xbf16> to vector<16x128xbf16>
    %492 = vector.extract_strided_slice %428 {offsets = [0, 256], sizes = [16, 128], strides = [1, 1]} : vector<16x384xf32> to vector<16x128xf32>
    %493 = arith.addf %492, %11 : vector<16x128xf32>
    %494 = arith.mulf %481, %493 : vector<16x128xf32>
    %495 = arith.extf %491 : vector<16x128xbf16> to vector<16x128xf32>
    %496 = arith.addf %495, %494 : vector<16x128xf32>
    %497 = math.tanh %496 : vector<16x128xf32>
    %cst_134 = arith.constant 1.000000e+00 : f32
    %498 = vector.broadcast %cst_134 : f32 to vector<16x128xf32>
    %499 = arith.subf %498, %490 : vector<16x128xf32>
    %500 = arith.mulf %499, %497 : vector<16x128xf32>
    %501 = arith.mulf %490, %412 : vector<16x128xf32>
    %502 = arith.addf %500, %501 : vector<16x128xf32>
    %c11_i32 = arith.constant 11 : i32
    %503 = arith.addi %36, %c11_i32 : i32
    %504 = vector.broadcast %503 : i32 to vector<16x1xi32>
    %505 = arith.cmpi sgt, %3, %504 : vector<16x1xi32>
    %506 = vector.shape_cast %505 : vector<16x1xi1> to vector<16x1xi1>
    %507 = vector.broadcast %506 : vector<16x1xi1> to vector<16x128xi1>
    %508 = arith.select %507, %502, %412 : vector<16x128xi1>, vector<16x128xf32>
    %cst_135 = arith.constant 0.000000e+00 : f32
    %509 = vector.shape_cast %505 : vector<16x1xi1> to vector<16x1xi1>
    %510 = vector.broadcast %509 : vector<16x1xi1> to vector<16x128xi1>
    %511 = vector.broadcast %cst_135 : f32 to vector<16x128xf32>
    %512 = arith.select %510, %502, %511 : vector<16x128xi1>, vector<16x128xf32>
    %513 = arith.truncf %512 : vector<16x128xf32> to vector<16x128xbf16>
    %c11_136 = arith.constant 11 : index
    %c0_137 = arith.constant 0 : index
    %c0_138 = arith.constant 0 : index
    %514 = vector.load %arg14[%c11_136, %c0_137, %c0_138] : memref<16x16x128xbf16, #tpu.memory_space<vmem>>, vector<1x16x128xbf16>
    %515 = vector.shape_cast %514 : vector<1x16x128xbf16> to vector<16x128xbf16>
    %516 = vector.shape_cast %513 : vector<16x128xbf16> to vector<1x16x128xbf16>
    tpu.vector_store %arg14[%c11_136, %c0_137, %c0_138], %516 {strides = array<i32>} : memref<16x16x128xbf16, #tpu.memory_space<vmem>>, vector<1x16x128xbf16>,
    %c5 = arith.constant 5 : index
    %c0_139 = arith.constant 0 : index
    %c0_140 = arith.constant 0 : index
    %517 = vector.load %arg17[%c5, %c0_139, %c0_140] : memref<16x16x384xbf16, #tpu.memory_space<vmem>>, vector<1x16x384xbf16>
    %518 = vector.shape_cast %517 : vector<1x16x384xbf16> to vector<16x384xbf16>
    %c10 = arith.constant 10 : index
    %c0_141 = arith.constant 0 : index
    %c0_142 = arith.constant 0 : index
    %519 = vector.load %arg18[%c10, %c0_141, %c0_142] : memref<16x16x384xbf16, #tpu.memory_space<vmem>>, vector<1x16x384xbf16>
    %520 = vector.shape_cast %519 : vector<1x16x384xbf16> to vector<16x384xbf16>
    %521 = arith.truncf %464 : vector<16x128xf32> to vector<16x128xbf16>
    %cst_143 = arith.constant dense<0.000000e+00> : vector<16x384xf32>
    %522 = tpu.matmul %521, %4, %cst_143 {dimension_numbers = #tpu.dot_dimension_numbers<[1], [0], [0], [1], [0, 0, 1, 1], [], []>} : vector<16x128xbf16>, vector<128x384xbf16>, vector<16x384xf32> -> vector<16x384xf32>
    %523 = arith.truncf %508 : vector<16x128xf32> to vector<16x128xbf16>
    %cst_144 = arith.constant dense<0.000000e+00> : vector<16x384xf32>
    %524 = tpu.matmul %523, %5, %cst_144 {dimension_numbers = #tpu.dot_dimension_numbers<[1], [0], [0], [1], [0, 0, 1, 1], [], []>} : vector<16x128xbf16>, vector<128x384xbf16>, vector<16x384xf32> -> vector<16x384xf32>
    %525 = vector.extract_strided_slice %518 {offsets = [0, 0], sizes = [16, 128], strides = [1, 1]} : vector<16x384xbf16> to vector<16x128xbf16>
    %526 = vector.extract_strided_slice %522 {offsets = [0, 0], sizes = [16, 128], strides = [1, 1]} : vector<16x384xf32> to vector<16x128xf32>
    %527 = arith.extf %525 : vector<16x128xbf16> to vector<16x128xf32>
    %528 = arith.addf %527, %526 : vector<16x128xf32>
    %529 = arith.negf %528 : vector<16x128xf32>
    %530 = math.exp %529 : vector<16x128xf32>
    %cst_145 = arith.constant 1.000000e+00 : f32
    %531 = vector.broadcast %cst_145 : f32 to vector<16x128xf32>
    %532 = arith.addf %531, %530 : vector<16x128xf32>
    %533 = arith.divf %531, %532 : vector<16x128xf32>
    %534 = vector.extract_strided_slice %518 {offsets = [0, 128], sizes = [16, 128], strides = [1, 1]} : vector<16x384xbf16> to vector<16x128xbf16>
    %535 = vector.extract_strided_slice %522 {offsets = [0, 128], sizes = [16, 128], strides = [1, 1]} : vector<16x384xf32> to vector<16x128xf32>
    %536 = arith.extf %534 : vector<16x128xbf16> to vector<16x128xf32>
    %537 = arith.addf %536, %535 : vector<16x128xf32>
    %538 = arith.negf %537 : vector<16x128xf32>
    %539 = math.exp %538 : vector<16x128xf32>
    %cst_146 = arith.constant 1.000000e+00 : f32
    %540 = vector.broadcast %cst_146 : f32 to vector<16x128xf32>
    %541 = arith.addf %540, %539 : vector<16x128xf32>
    %542 = arith.divf %540, %541 : vector<16x128xf32>
    %543 = vector.extract_strided_slice %518 {offsets = [0, 256], sizes = [16, 128], strides = [1, 1]} : vector<16x384xbf16> to vector<16x128xbf16>
    %544 = vector.extract_strided_slice %522 {offsets = [0, 256], sizes = [16, 128], strides = [1, 1]} : vector<16x384xf32> to vector<16x128xf32>
    %545 = arith.addf %544, %8 : vector<16x128xf32>
    %546 = arith.mulf %533, %545 : vector<16x128xf32>
    %547 = arith.extf %543 : vector<16x128xbf16> to vector<16x128xf32>
    %548 = arith.addf %547, %546 : vector<16x128xf32>
    %549 = math.tanh %548 : vector<16x128xf32>
    %cst_147 = arith.constant 1.000000e+00 : f32
    %550 = vector.broadcast %cst_147 : f32 to vector<16x128xf32>
    %551 = arith.subf %550, %542 : vector<16x128xf32>
    %552 = arith.mulf %551, %549 : vector<16x128xf32>
    %553 = arith.mulf %542, %464 : vector<16x128xf32>
    %554 = arith.addf %552, %553 : vector<16x128xf32>
    %c5_i32 = arith.constant 5 : i32
    %555 = arith.addi %35, %c5_i32 : i32
    %556 = vector.broadcast %555 : i32 to vector<16x1xi32>
    %557 = arith.cmpi sgt, %3, %556 : vector<16x1xi32>
    %558 = vector.shape_cast %557 : vector<16x1xi1> to vector<16x1xi1>
    %559 = vector.broadcast %558 : vector<16x1xi1> to vector<16x128xi1>
    %560 = arith.select %559, %554, %464 : vector<16x128xi1>, vector<16x128xf32>
    %cst_148 = arith.constant 0.000000e+00 : f32
    %561 = vector.shape_cast %557 : vector<16x1xi1> to vector<16x1xi1>
    %562 = vector.broadcast %561 : vector<16x1xi1> to vector<16x128xi1>
    %563 = vector.broadcast %cst_148 : f32 to vector<16x128xf32>
    %564 = arith.select %562, %554, %563 : vector<16x128xi1>, vector<16x128xf32>
    %565 = arith.truncf %564 : vector<16x128xf32> to vector<16x128xbf16>
    %c5_149 = arith.constant 5 : index
    %c0_150 = arith.constant 0 : index
    %c0_151 = arith.constant 0 : index
    %566 = vector.load %arg13[%c5_149, %c0_150, %c0_151] : memref<16x16x128xbf16, #tpu.memory_space<vmem>>, vector<1x16x128xbf16>
    %567 = vector.shape_cast %566 : vector<1x16x128xbf16> to vector<16x128xbf16>
    %568 = vector.shape_cast %565 : vector<16x128xbf16> to vector<1x16x128xbf16>
    tpu.vector_store %arg13[%c5_149, %c0_150, %c0_151], %568 {strides = array<i32>} : memref<16x16x128xbf16, #tpu.memory_space<vmem>>, vector<1x16x128xbf16>,
    %569 = vector.extract_strided_slice %520 {offsets = [0, 0], sizes = [16, 128], strides = [1, 1]} : vector<16x384xbf16> to vector<16x128xbf16>
    %570 = vector.extract_strided_slice %524 {offsets = [0, 0], sizes = [16, 128], strides = [1, 1]} : vector<16x384xf32> to vector<16x128xf32>
    %571 = arith.extf %569 : vector<16x128xbf16> to vector<16x128xf32>
    %572 = arith.addf %571, %570 : vector<16x128xf32>
    %573 = arith.negf %572 : vector<16x128xf32>
    %574 = math.exp %573 : vector<16x128xf32>
    %cst_152 = arith.constant 1.000000e+00 : f32
    %575 = vector.broadcast %cst_152 : f32 to vector<16x128xf32>
    %576 = arith.addf %575, %574 : vector<16x128xf32>
    %577 = arith.divf %575, %576 : vector<16x128xf32>
    %578 = vector.extract_strided_slice %520 {offsets = [0, 128], sizes = [16, 128], strides = [1, 1]} : vector<16x384xbf16> to vector<16x128xbf16>
    %579 = vector.extract_strided_slice %524 {offsets = [0, 128], sizes = [16, 128], strides = [1, 1]} : vector<16x384xf32> to vector<16x128xf32>
    %580 = arith.extf %578 : vector<16x128xbf16> to vector<16x128xf32>
    %581 = arith.addf %580, %579 : vector<16x128xf32>
    %582 = arith.negf %581 : vector<16x128xf32>
    %583 = math.exp %582 : vector<16x128xf32>
    %cst_153 = arith.constant 1.000000e+00 : f32
    %584 = vector.broadcast %cst_153 : f32 to vector<16x128xf32>
    %585 = arith.addf %584, %583 : vector<16x128xf32>
    %586 = arith.divf %584, %585 : vector<16x128xf32>
    %587 = vector.extract_strided_slice %520 {offsets = [0, 256], sizes = [16, 128], strides = [1, 1]} : vector<16x384xbf16> to vector<16x128xbf16>
    %588 = vector.extract_strided_slice %524 {offsets = [0, 256], sizes = [16, 128], strides = [1, 1]} : vector<16x384xf32> to vector<16x128xf32>
    %589 = arith.addf %588, %11 : vector<16x128xf32>
    %590 = arith.mulf %577, %589 : vector<16x128xf32>
    %591 = arith.extf %587 : vector<16x128xbf16> to vector<16x128xf32>
    %592 = arith.addf %591, %590 : vector<16x128xf32>
    %593 = math.tanh %592 : vector<16x128xf32>
    %cst_154 = arith.constant 1.000000e+00 : f32
    %594 = vector.broadcast %cst_154 : f32 to vector<16x128xf32>
    %595 = arith.subf %594, %586 : vector<16x128xf32>
    %596 = arith.mulf %595, %593 : vector<16x128xf32>
    %597 = arith.mulf %586, %508 : vector<16x128xf32>
    %598 = arith.addf %596, %597 : vector<16x128xf32>
    %c10_i32 = arith.constant 10 : i32
    %599 = arith.addi %36, %c10_i32 : i32
    %600 = vector.broadcast %599 : i32 to vector<16x1xi32>
    %601 = arith.cmpi sgt, %3, %600 : vector<16x1xi32>
    %602 = vector.shape_cast %601 : vector<16x1xi1> to vector<16x1xi1>
    %603 = vector.broadcast %602 : vector<16x1xi1> to vector<16x128xi1>
    %604 = arith.select %603, %598, %508 : vector<16x128xi1>, vector<16x128xf32>
    %cst_155 = arith.constant 0.000000e+00 : f32
    %605 = vector.shape_cast %601 : vector<16x1xi1> to vector<16x1xi1>
    %606 = vector.broadcast %605 : vector<16x1xi1> to vector<16x128xi1>
    %607 = vector.broadcast %cst_155 : f32 to vector<16x128xf32>
    %608 = arith.select %606, %598, %607 : vector<16x128xi1>, vector<16x128xf32>
    %609 = arith.truncf %608 : vector<16x128xf32> to vector<16x128xbf16>
    %c10_156 = arith.constant 10 : index
    %c0_157 = arith.constant 0 : index
    %c0_158 = arith.constant 0 : index
    %610 = vector.load %arg14[%c10_156, %c0_157, %c0_158] : memref<16x16x128xbf16, #tpu.memory_space<vmem>>, vector<1x16x128xbf16>
    %611 = vector.shape_cast %610 : vector<1x16x128xbf16> to vector<16x128xbf16>
    %612 = vector.shape_cast %609 : vector<16x128xbf16> to vector<1x16x128xbf16>
    tpu.vector_store %arg14[%c10_156, %c0_157, %c0_158], %612 {strides = array<i32>} : memref<16x16x128xbf16, #tpu.memory_space<vmem>>, vector<1x16x128xbf16>,
    %c6 = arith.constant 6 : index
    %c0_159 = arith.constant 0 : index
    %c0_160 = arith.constant 0 : index
    %613 = vector.load %arg17[%c6, %c0_159, %c0_160] : memref<16x16x384xbf16, #tpu.memory_space<vmem>>, vector<1x16x384xbf16>
    %614 = vector.shape_cast %613 : vector<1x16x384xbf16> to vector<16x384xbf16>
    %c9 = arith.constant 9 : index
    %c0_161 = arith.constant 0 : index
    %c0_162 = arith.constant 0 : index
    %615 = vector.load %arg18[%c9, %c0_161, %c0_162] : memref<16x16x384xbf16, #tpu.memory_space<vmem>>, vector<1x16x384xbf16>
    %616 = vector.shape_cast %615 : vector<1x16x384xbf16> to vector<16x384xbf16>
    %617 = arith.truncf %560 : vector<16x128xf32> to vector<16x128xbf16>
    %cst_163 = arith.constant dense<0.000000e+00> : vector<16x384xf32>
    %618 = tpu.matmul %617, %4, %cst_163 {dimension_numbers = #tpu.dot_dimension_numbers<[1], [0], [0], [1], [0, 0, 1, 1], [], []>} : vector<16x128xbf16>, vector<128x384xbf16>, vector<16x384xf32> -> vector<16x384xf32>
    %619 = arith.truncf %604 : vector<16x128xf32> to vector<16x128xbf16>
    %cst_164 = arith.constant dense<0.000000e+00> : vector<16x384xf32>
    %620 = tpu.matmul %619, %5, %cst_164 {dimension_numbers = #tpu.dot_dimension_numbers<[1], [0], [0], [1], [0, 0, 1, 1], [], []>} : vector<16x128xbf16>, vector<128x384xbf16>, vector<16x384xf32> -> vector<16x384xf32>
    %621 = vector.extract_strided_slice %614 {offsets = [0, 0], sizes = [16, 128], strides = [1, 1]} : vector<16x384xbf16> to vector<16x128xbf16>
    %622 = vector.extract_strided_slice %618 {offsets = [0, 0], sizes = [16, 128], strides = [1, 1]} : vector<16x384xf32> to vector<16x128xf32>
    %623 = arith.extf %621 : vector<16x128xbf16> to vector<16x128xf32>
    %624 = arith.addf %623, %622 : vector<16x128xf32>
    %625 = arith.negf %624 : vector<16x128xf32>
    %626 = math.exp %625 : vector<16x128xf32>
    %cst_165 = arith.constant 1.000000e+00 : f32
    %627 = vector.broadcast %cst_165 : f32 to vector<16x128xf32>
    %628 = arith.addf %627, %626 : vector<16x128xf32>
    %629 = arith.divf %627, %628 : vector<16x128xf32>
    %630 = vector.extract_strided_slice %614 {offsets = [0, 128], sizes = [16, 128], strides = [1, 1]} : vector<16x384xbf16> to vector<16x128xbf16>
    %631 = vector.extract_strided_slice %618 {offsets = [0, 128], sizes = [16, 128], strides = [1, 1]} : vector<16x384xf32> to vector<16x128xf32>
    %632 = arith.extf %630 : vector<16x128xbf16> to vector<16x128xf32>
    %633 = arith.addf %632, %631 : vector<16x128xf32>
    %634 = arith.negf %633 : vector<16x128xf32>
    %635 = math.exp %634 : vector<16x128xf32>
    %cst_166 = arith.constant 1.000000e+00 : f32
    %636 = vector.broadcast %cst_166 : f32 to vector<16x128xf32>
    %637 = arith.addf %636, %635 : vector<16x128xf32>
    %638 = arith.divf %636, %637 : vector<16x128xf32>
    %639 = vector.extract_strided_slice %614 {offsets = [0, 256], sizes = [16, 128], strides = [1, 1]} : vector<16x384xbf16> to vector<16x128xbf16>
    %640 = vector.extract_strided_slice %618 {offsets = [0, 256], sizes = [16, 128], strides = [1, 1]} : vector<16x384xf32> to vector<16x128xf32>
    %641 = arith.addf %640, %8 : vector<16x128xf32>
    %642 = arith.mulf %629, %641 : vector<16x128xf32>
    %643 = arith.extf %639 : vector<16x128xbf16> to vector<16x128xf32>
    %644 = arith.addf %643, %642 : vector<16x128xf32>
    %645 = math.tanh %644 : vector<16x128xf32>
    %cst_167 = arith.constant 1.000000e+00 : f32
    %646 = vector.broadcast %cst_167 : f32 to vector<16x128xf32>
    %647 = arith.subf %646, %638 : vector<16x128xf32>
    %648 = arith.mulf %647, %645 : vector<16x128xf32>
    %649 = arith.mulf %638, %560 : vector<16x128xf32>
    %650 = arith.addf %648, %649 : vector<16x128xf32>
    %c6_i32 = arith.constant 6 : i32
    %651 = arith.addi %35, %c6_i32 : i32
    %652 = vector.broadcast %651 : i32 to vector<16x1xi32>
    %653 = arith.cmpi sgt, %3, %652 : vector<16x1xi32>
    %654 = vector.shape_cast %653 : vector<16x1xi1> to vector<16x1xi1>
    %655 = vector.broadcast %654 : vector<16x1xi1> to vector<16x128xi1>
    %656 = arith.select %655, %650, %560 : vector<16x128xi1>, vector<16x128xf32>
    %cst_168 = arith.constant 0.000000e+00 : f32
    %657 = vector.shape_cast %653 : vector<16x1xi1> to vector<16x1xi1>
    %658 = vector.broadcast %657 : vector<16x1xi1> to vector<16x128xi1>
    %659 = vector.broadcast %cst_168 : f32 to vector<16x128xf32>
    %660 = arith.select %658, %650, %659 : vector<16x128xi1>, vector<16x128xf32>
    %661 = arith.truncf %660 : vector<16x128xf32> to vector<16x128xbf16>
    %c6_169 = arith.constant 6 : index
    %c0_170 = arith.constant 0 : index
    %c0_171 = arith.constant 0 : index
    %662 = vector.load %arg13[%c6_169, %c0_170, %c0_171] : memref<16x16x128xbf16, #tpu.memory_space<vmem>>, vector<1x16x128xbf16>
    %663 = vector.shape_cast %662 : vector<1x16x128xbf16> to vector<16x128xbf16>
    %664 = vector.shape_cast %661 : vector<16x128xbf16> to vector<1x16x128xbf16>
    tpu.vector_store %arg13[%c6_169, %c0_170, %c0_171], %664 {strides = array<i32>} : memref<16x16x128xbf16, #tpu.memory_space<vmem>>, vector<1x16x128xbf16>,
    %665 = vector.extract_strided_slice %616 {offsets = [0, 0], sizes = [16, 128], strides = [1, 1]} : vector<16x384xbf16> to vector<16x128xbf16>
    %666 = vector.extract_strided_slice %620 {offsets = [0, 0], sizes = [16, 128], strides = [1, 1]} : vector<16x384xf32> to vector<16x128xf32>
    %667 = arith.extf %665 : vector<16x128xbf16> to vector<16x128xf32>
    %668 = arith.addf %667, %666 : vector<16x128xf32>
    %669 = arith.negf %668 : vector<16x128xf32>
    %670 = math.exp %669 : vector<16x128xf32>
    %cst_172 = arith.constant 1.000000e+00 : f32
    %671 = vector.broadcast %cst_172 : f32 to vector<16x128xf32>
    %672 = arith.addf %671, %670 : vector<16x128xf32>
    %673 = arith.divf %671, %672 : vector<16x128xf32>
    %674 = vector.extract_strided_slice %616 {offsets = [0, 128], sizes = [16, 128], strides = [1, 1]} : vector<16x384xbf16> to vector<16x128xbf16>
    %675 = vector.extract_strided_slice %620 {offsets = [0, 128], sizes = [16, 128], strides = [1, 1]} : vector<16x384xf32> to vector<16x128xf32>
    %676 = arith.extf %674 : vector<16x128xbf16> to vector<16x128xf32>
    %677 = arith.addf %676, %675 : vector<16x128xf32>
    %678 = arith.negf %677 : vector<16x128xf32>
    %679 = math.exp %678 : vector<16x128xf32>
    %cst_173 = arith.constant 1.000000e+00 : f32
    %680 = vector.broadcast %cst_173 : f32 to vector<16x128xf32>
    %681 = arith.addf %680, %679 : vector<16x128xf32>
    %682 = arith.divf %680, %681 : vector<16x128xf32>
    %683 = vector.extract_strided_slice %616 {offsets = [0, 256], sizes = [16, 128], strides = [1, 1]} : vector<16x384xbf16> to vector<16x128xbf16>
    %684 = vector.extract_strided_slice %620 {offsets = [0, 256], sizes = [16, 128], strides = [1, 1]} : vector<16x384xf32> to vector<16x128xf32>
    %685 = arith.addf %684, %11 : vector<16x128xf32>
    %686 = arith.mulf %673, %685 : vector<16x128xf32>
    %687 = arith.extf %683 : vector<16x128xbf16> to vector<16x128xf32>
    %688 = arith.addf %687, %686 : vector<16x128xf32>
    %689 = math.tanh %688 : vector<16x128xf32>
    %cst_174 = arith.constant 1.000000e+00 : f32
    %690 = vector.broadcast %cst_174 : f32 to vector<16x128xf32>
    %691 = arith.subf %690, %682 : vector<16x128xf32>
    %692 = arith.mulf %691, %689 : vector<16x128xf32>
    %693 = arith.mulf %682, %604 : vector<16x128xf32>
    %694 = arith.addf %692, %693 : vector<16x128xf32>
    %c9_i32 = arith.constant 9 : i32
    %695 = arith.addi %36, %c9_i32 : i32
    %696 = vector.broadcast %695 : i32 to vector<16x1xi32>
    %697 = arith.cmpi sgt, %3, %696 : vector<16x1xi32>
    %698 = vector.shape_cast %697 : vector<16x1xi1> to vector<16x1xi1>
    %699 = vector.broadcast %698 : vector<16x1xi1> to vector<16x128xi1>
    %700 = arith.select %699, %694, %604 : vector<16x128xi1>, vector<16x128xf32>
    %cst_175 = arith.constant 0.000000e+00 : f32
    %701 = vector.shape_cast %697 : vector<16x1xi1> to vector<16x1xi1>
    %702 = vector.broadcast %701 : vector<16x1xi1> to vector<16x128xi1>
    %703 = vector.broadcast %cst_175 : f32 to vector<16x128xf32>
    %704 = arith.select %702, %694, %703 : vector<16x128xi1>, vector<16x128xf32>
    %705 = arith.truncf %704 : vector<16x128xf32> to vector<16x128xbf16>
    %c9_176 = arith.constant 9 : index
    %c0_177 = arith.constant 0 : index
    %c0_178 = arith.constant 0 : index
    %706 = vector.load %arg14[%c9_176, %c0_177, %c0_178] : memref<16x16x128xbf16, #tpu.memory_space<vmem>>, vector<1x16x128xbf16>
    %707 = vector.shape_cast %706 : vector<1x16x128xbf16> to vector<16x128xbf16>
    %708 = vector.shape_cast %705 : vector<16x128xbf16> to vector<1x16x128xbf16>
    tpu.vector_store %arg14[%c9_176, %c0_177, %c0_178], %708 {strides = array<i32>} : memref<16x16x128xbf16, #tpu.memory_space<vmem>>, vector<1x16x128xbf16>,
    %c7 = arith.constant 7 : index
    %c0_179 = arith.constant 0 : index
    %c0_180 = arith.constant 0 : index
    %709 = vector.load %arg17[%c7, %c0_179, %c0_180] : memref<16x16x384xbf16, #tpu.memory_space<vmem>>, vector<1x16x384xbf16>
    %710 = vector.shape_cast %709 : vector<1x16x384xbf16> to vector<16x384xbf16>
    %c8 = arith.constant 8 : index
    %c0_181 = arith.constant 0 : index
    %c0_182 = arith.constant 0 : index
    %711 = vector.load %arg18[%c8, %c0_181, %c0_182] : memref<16x16x384xbf16, #tpu.memory_space<vmem>>, vector<1x16x384xbf16>
    %712 = vector.shape_cast %711 : vector<1x16x384xbf16> to vector<16x384xbf16>
    %713 = arith.truncf %656 : vector<16x128xf32> to vector<16x128xbf16>
    %cst_183 = arith.constant dense<0.000000e+00> : vector<16x384xf32>
    %714 = tpu.matmul %713, %4, %cst_183 {dimension_numbers = #tpu.dot_dimension_numbers<[1], [0], [0], [1], [0, 0, 1, 1], [], []>} : vector<16x128xbf16>, vector<128x384xbf16>, vector<16x384xf32> -> vector<16x384xf32>
    %715 = arith.truncf %700 : vector<16x128xf32> to vector<16x128xbf16>
    %cst_184 = arith.constant dense<0.000000e+00> : vector<16x384xf32>
    %716 = tpu.matmul %715, %5, %cst_184 {dimension_numbers = #tpu.dot_dimension_numbers<[1], [0], [0], [1], [0, 0, 1, 1], [], []>} : vector<16x128xbf16>, vector<128x384xbf16>, vector<16x384xf32> -> vector<16x384xf32>
    %717 = vector.extract_strided_slice %710 {offsets = [0, 0], sizes = [16, 128], strides = [1, 1]} : vector<16x384xbf16> to vector<16x128xbf16>
    %718 = vector.extract_strided_slice %714 {offsets = [0, 0], sizes = [16, 128], strides = [1, 1]} : vector<16x384xf32> to vector<16x128xf32>
    %719 = arith.extf %717 : vector<16x128xbf16> to vector<16x128xf32>
    %720 = arith.addf %719, %718 : vector<16x128xf32>
    %721 = arith.negf %720 : vector<16x128xf32>
    %722 = math.exp %721 : vector<16x128xf32>
    %cst_185 = arith.constant 1.000000e+00 : f32
    %723 = vector.broadcast %cst_185 : f32 to vector<16x128xf32>
    %724 = arith.addf %723, %722 : vector<16x128xf32>
    %725 = arith.divf %723, %724 : vector<16x128xf32>
    %726 = vector.extract_strided_slice %710 {offsets = [0, 128], sizes = [16, 128], strides = [1, 1]} : vector<16x384xbf16> to vector<16x128xbf16>
    %727 = vector.extract_strided_slice %714 {offsets = [0, 128], sizes = [16, 128], strides = [1, 1]} : vector<16x384xf32> to vector<16x128xf32>
    %728 = arith.extf %726 : vector<16x128xbf16> to vector<16x128xf32>
    %729 = arith.addf %728, %727 : vector<16x128xf32>
    %730 = arith.negf %729 : vector<16x128xf32>
    %731 = math.exp %730 : vector<16x128xf32>
    %cst_186 = arith.constant 1.000000e+00 : f32
    %732 = vector.broadcast %cst_186 : f32 to vector<16x128xf32>
    %733 = arith.addf %732, %731 : vector<16x128xf32>
    %734 = arith.divf %732, %733 : vector<16x128xf32>
    %735 = vector.extract_strided_slice %710 {offsets = [0, 256], sizes = [16, 128], strides = [1, 1]} : vector<16x384xbf16> to vector<16x128xbf16>
    %736 = vector.extract_strided_slice %714 {offsets = [0, 256], sizes = [16, 128], strides = [1, 1]} : vector<16x384xf32> to vector<16x128xf32>
    %737 = arith.addf %736, %8 : vector<16x128xf32>
    %738 = arith.mulf %725, %737 : vector<16x128xf32>
    %739 = arith.extf %735 : vector<16x128xbf16> to vector<16x128xf32>
    %740 = arith.addf %739, %738 : vector<16x128xf32>
    %741 = math.tanh %740 : vector<16x128xf32>
    %cst_187 = arith.constant 1.000000e+00 : f32
    %742 = vector.broadcast %cst_187 : f32 to vector<16x128xf32>
    %743 = arith.subf %742, %734 : vector<16x128xf32>
    %744 = arith.mulf %743, %741 : vector<16x128xf32>
    %745 = arith.mulf %734, %656 : vector<16x128xf32>
    %746 = arith.addf %744, %745 : vector<16x128xf32>
    %c7_i32 = arith.constant 7 : i32
    %747 = arith.addi %35, %c7_i32 : i32
    %748 = vector.broadcast %747 : i32 to vector<16x1xi32>
    %749 = arith.cmpi sgt, %3, %748 : vector<16x1xi32>
    %750 = vector.shape_cast %749 : vector<16x1xi1> to vector<16x1xi1>
    %751 = vector.broadcast %750 : vector<16x1xi1> to vector<16x128xi1>
    %752 = arith.select %751, %746, %656 : vector<16x128xi1>, vector<16x128xf32>
    %cst_188 = arith.constant 0.000000e+00 : f32
    %753 = vector.shape_cast %749 : vector<16x1xi1> to vector<16x1xi1>
    %754 = vector.broadcast %753 : vector<16x1xi1> to vector<16x128xi1>
    %755 = vector.broadcast %cst_188 : f32 to vector<16x128xf32>
    %756 = arith.select %754, %746, %755 : vector<16x128xi1>, vector<16x128xf32>
    %757 = arith.truncf %756 : vector<16x128xf32> to vector<16x128xbf16>
    %c7_189 = arith.constant 7 : index
    %c0_190 = arith.constant 0 : index
    %c0_191 = arith.constant 0 : index
    %758 = vector.load %arg13[%c7_189, %c0_190, %c0_191] : memref<16x16x128xbf16, #tpu.memory_space<vmem>>, vector<1x16x128xbf16>
    %759 = vector.shape_cast %758 : vector<1x16x128xbf16> to vector<16x128xbf16>
    %760 = vector.shape_cast %757 : vector<16x128xbf16> to vector<1x16x128xbf16>
    tpu.vector_store %arg13[%c7_189, %c0_190, %c0_191], %760 {strides = array<i32>} : memref<16x16x128xbf16, #tpu.memory_space<vmem>>, vector<1x16x128xbf16>,
    %761 = vector.extract_strided_slice %712 {offsets = [0, 0], sizes = [16, 128], strides = [1, 1]} : vector<16x384xbf16> to vector<16x128xbf16>
    %762 = vector.extract_strided_slice %716 {offsets = [0, 0], sizes = [16, 128], strides = [1, 1]} : vector<16x384xf32> to vector<16x128xf32>
    %763 = arith.extf %761 : vector<16x128xbf16> to vector<16x128xf32>
    %764 = arith.addf %763, %762 : vector<16x128xf32>
    %765 = arith.negf %764 : vector<16x128xf32>
    %766 = math.exp %765 : vector<16x128xf32>
    %cst_192 = arith.constant 1.000000e+00 : f32
    %767 = vector.broadcast %cst_192 : f32 to vector<16x128xf32>
    %768 = arith.addf %767, %766 : vector<16x128xf32>
    %769 = arith.divf %767, %768 : vector<16x128xf32>
    %770 = vector.extract_strided_slice %712 {offsets = [0, 128], sizes = [16, 128], strides = [1, 1]} : vector<16x384xbf16> to vector<16x128xbf16>
    %771 = vector.extract_strided_slice %716 {offsets = [0, 128], sizes = [16, 128], strides = [1, 1]} : vector<16x384xf32> to vector<16x128xf32>
    %772 = arith.extf %770 : vector<16x128xbf16> to vector<16x128xf32>
    %773 = arith.addf %772, %771 : vector<16x128xf32>
    %774 = arith.negf %773 : vector<16x128xf32>
    %775 = math.exp %774 : vector<16x128xf32>
    %cst_193 = arith.constant 1.000000e+00 : f32
    %776 = vector.broadcast %cst_193 : f32 to vector<16x128xf32>
    %777 = arith.addf %776, %775 : vector<16x128xf32>
    %778 = arith.divf %776, %777 : vector<16x128xf32>
    %779 = vector.extract_strided_slice %712 {offsets = [0, 256], sizes = [16, 128], strides = [1, 1]} : vector<16x384xbf16> to vector<16x128xbf16>
    %780 = vector.extract_strided_slice %716 {offsets = [0, 256], sizes = [16, 128], strides = [1, 1]} : vector<16x384xf32> to vector<16x128xf32>
    %781 = arith.addf %780, %11 : vector<16x128xf32>
    %782 = arith.mulf %769, %781 : vector<16x128xf32>
    %783 = arith.extf %779 : vector<16x128xbf16> to vector<16x128xf32>
    %784 = arith.addf %783, %782 : vector<16x128xf32>
    %785 = math.tanh %784 : vector<16x128xf32>
    %cst_194 = arith.constant 1.000000e+00 : f32
    %786 = vector.broadcast %cst_194 : f32 to vector<16x128xf32>
    %787 = arith.subf %786, %778 : vector<16x128xf32>
    %788 = arith.mulf %787, %785 : vector<16x128xf32>
    %789 = arith.mulf %778, %700 : vector<16x128xf32>
    %790 = arith.addf %788, %789 : vector<16x128xf32>
    %c8_i32 = arith.constant 8 : i32
    %791 = arith.addi %36, %c8_i32 : i32
    %792 = vector.broadcast %791 : i32 to vector<16x1xi32>
    %793 = arith.cmpi sgt, %3, %792 : vector<16x1xi32>
    %794 = vector.shape_cast %793 : vector<16x1xi1> to vector<16x1xi1>
    %795 = vector.broadcast %794 : vector<16x1xi1> to vector<16x128xi1>
    %796 = arith.select %795, %790, %700 : vector<16x128xi1>, vector<16x128xf32>
    %cst_195 = arith.constant 0.000000e+00 : f32
    %797 = vector.shape_cast %793 : vector<16x1xi1> to vector<16x1xi1>
    %798 = vector.broadcast %797 : vector<16x1xi1> to vector<16x128xi1>
    %799 = vector.broadcast %cst_195 : f32 to vector<16x128xf32>
    %800 = arith.select %798, %790, %799 : vector<16x128xi1>, vector<16x128xf32>
    %801 = arith.truncf %800 : vector<16x128xf32> to vector<16x128xbf16>
    %c8_196 = arith.constant 8 : index
    %c0_197 = arith.constant 0 : index
    %c0_198 = arith.constant 0 : index
    %802 = vector.load %arg14[%c8_196, %c0_197, %c0_198] : memref<16x16x128xbf16, #tpu.memory_space<vmem>>, vector<1x16x128xbf16>
    %803 = vector.shape_cast %802 : vector<1x16x128xbf16> to vector<16x128xbf16>
    %804 = vector.shape_cast %801 : vector<16x128xbf16> to vector<1x16x128xbf16>
    tpu.vector_store %arg14[%c8_196, %c0_197, %c0_198], %804 {strides = array<i32>} : memref<16x16x128xbf16, #tpu.memory_space<vmem>>, vector<1x16x128xbf16>,
    %c8_199 = arith.constant 8 : index
    %c0_200 = arith.constant 0 : index
    %c0_201 = arith.constant 0 : index
    %805 = vector.load %arg17[%c8_199, %c0_200, %c0_201] : memref<16x16x384xbf16, #tpu.memory_space<vmem>>, vector<1x16x384xbf16>
    %806 = vector.shape_cast %805 : vector<1x16x384xbf16> to vector<16x384xbf16>
    %c7_202 = arith.constant 7 : index
    %c0_203 = arith.constant 0 : index
    %c0_204 = arith.constant 0 : index
    %807 = vector.load %arg18[%c7_202, %c0_203, %c0_204] : memref<16x16x384xbf16, #tpu.memory_space<vmem>>, vector<1x16x384xbf16>
    %808 = vector.shape_cast %807 : vector<1x16x384xbf16> to vector<16x384xbf16>
    %809 = arith.truncf %752 : vector<16x128xf32> to vector<16x128xbf16>
    %cst_205 = arith.constant dense<0.000000e+00> : vector<16x384xf32>
    %810 = tpu.matmul %809, %4, %cst_205 {dimension_numbers = #tpu.dot_dimension_numbers<[1], [0], [0], [1], [0, 0, 1, 1], [], []>} : vector<16x128xbf16>, vector<128x384xbf16>, vector<16x384xf32> -> vector<16x384xf32>
    %811 = arith.truncf %796 : vector<16x128xf32> to vector<16x128xbf16>
    %cst_206 = arith.constant dense<0.000000e+00> : vector<16x384xf32>
    %812 = tpu.matmul %811, %5, %cst_206 {dimension_numbers = #tpu.dot_dimension_numbers<[1], [0], [0], [1], [0, 0, 1, 1], [], []>} : vector<16x128xbf16>, vector<128x384xbf16>, vector<16x384xf32> -> vector<16x384xf32>
    %813 = vector.extract_strided_slice %806 {offsets = [0, 0], sizes = [16, 128], strides = [1, 1]} : vector<16x384xbf16> to vector<16x128xbf16>
    %814 = vector.extract_strided_slice %810 {offsets = [0, 0], sizes = [16, 128], strides = [1, 1]} : vector<16x384xf32> to vector<16x128xf32>
    %815 = arith.extf %813 : vector<16x128xbf16> to vector<16x128xf32>
    %816 = arith.addf %815, %814 : vector<16x128xf32>
    %817 = arith.negf %816 : vector<16x128xf32>
    %818 = math.exp %817 : vector<16x128xf32>
    %cst_207 = arith.constant 1.000000e+00 : f32
    %819 = vector.broadcast %cst_207 : f32 to vector<16x128xf32>
    %820 = arith.addf %819, %818 : vector<16x128xf32>
    %821 = arith.divf %819, %820 : vector<16x128xf32>
    %822 = vector.extract_strided_slice %806 {offsets = [0, 128], sizes = [16, 128], strides = [1, 1]} : vector<16x384xbf16> to vector<16x128xbf16>
    %823 = vector.extract_strided_slice %810 {offsets = [0, 128], sizes = [16, 128], strides = [1, 1]} : vector<16x384xf32> to vector<16x128xf32>
    %824 = arith.extf %822 : vector<16x128xbf16> to vector<16x128xf32>
    %825 = arith.addf %824, %823 : vector<16x128xf32>
    %826 = arith.negf %825 : vector<16x128xf32>
    %827 = math.exp %826 : vector<16x128xf32>
    %cst_208 = arith.constant 1.000000e+00 : f32
    %828 = vector.broadcast %cst_208 : f32 to vector<16x128xf32>
    %829 = arith.addf %828, %827 : vector<16x128xf32>
    %830 = arith.divf %828, %829 : vector<16x128xf32>
    %831 = vector.extract_strided_slice %806 {offsets = [0, 256], sizes = [16, 128], strides = [1, 1]} : vector<16x384xbf16> to vector<16x128xbf16>
    %832 = vector.extract_strided_slice %810 {offsets = [0, 256], sizes = [16, 128], strides = [1, 1]} : vector<16x384xf32> to vector<16x128xf32>
    %833 = arith.addf %832, %8 : vector<16x128xf32>
    %834 = arith.mulf %821, %833 : vector<16x128xf32>
    %835 = arith.extf %831 : vector<16x128xbf16> to vector<16x128xf32>
    %836 = arith.addf %835, %834 : vector<16x128xf32>
    %837 = math.tanh %836 : vector<16x128xf32>
    %cst_209 = arith.constant 1.000000e+00 : f32
    %838 = vector.broadcast %cst_209 : f32 to vector<16x128xf32>
    %839 = arith.subf %838, %830 : vector<16x128xf32>
    %840 = arith.mulf %839, %837 : vector<16x128xf32>
    %841 = arith.mulf %830, %752 : vector<16x128xf32>
    %842 = arith.addf %840, %841 : vector<16x128xf32>
    %c8_i32_210 = arith.constant 8 : i32
    %843 = arith.addi %35, %c8_i32_210 : i32
    %844 = vector.broadcast %843 : i32 to vector<16x1xi32>
    %845 = arith.cmpi sgt, %3, %844 : vector<16x1xi32>
    %846 = vector.shape_cast %845 : vector<16x1xi1> to vector<16x1xi1>
    %847 = vector.broadcast %846 : vector<16x1xi1> to vector<16x128xi1>
    %848 = arith.select %847, %842, %752 : vector<16x128xi1>, vector<16x128xf32>
    %cst_211 = arith.constant 0.000000e+00 : f32
    %849 = vector.shape_cast %845 : vector<16x1xi1> to vector<16x1xi1>
    %850 = vector.broadcast %849 : vector<16x1xi1> to vector<16x128xi1>
    %851 = vector.broadcast %cst_211 : f32 to vector<16x128xf32>
    %852 = arith.select %850, %842, %851 : vector<16x128xi1>, vector<16x128xf32>
    %853 = arith.truncf %852 : vector<16x128xf32> to vector<16x128xbf16>
    %c8_212 = arith.constant 8 : index
    %c0_213 = arith.constant 0 : index
    %c0_214 = arith.constant 0 : index
    %854 = vector.load %arg13[%c8_212, %c0_213, %c0_214] : memref<16x16x128xbf16, #tpu.memory_space<vmem>>, vector<1x16x128xbf16>
    %855 = vector.shape_cast %854 : vector<1x16x128xbf16> to vector<16x128xbf16>
    %856 = vector.shape_cast %853 : vector<16x128xbf16> to vector<1x16x128xbf16>
    tpu.vector_store %arg13[%c8_212, %c0_213, %c0_214], %856 {strides = array<i32>} : memref<16x16x128xbf16, #tpu.memory_space<vmem>>, vector<1x16x128xbf16>,
    %857 = vector.extract_strided_slice %808 {offsets = [0, 0], sizes = [16, 128], strides = [1, 1]} : vector<16x384xbf16> to vector<16x128xbf16>
    %858 = vector.extract_strided_slice %812 {offsets = [0, 0], sizes = [16, 128], strides = [1, 1]} : vector<16x384xf32> to vector<16x128xf32>
    %859 = arith.extf %857 : vector<16x128xbf16> to vector<16x128xf32>
    %860 = arith.addf %859, %858 : vector<16x128xf32>
    %861 = arith.negf %860 : vector<16x128xf32>
    %862 = math.exp %861 : vector<16x128xf32>
    %cst_215 = arith.constant 1.000000e+00 : f32
    %863 = vector.broadcast %cst_215 : f32 to vector<16x128xf32>
    %864 = arith.addf %863, %862 : vector<16x128xf32>
    %865 = arith.divf %863, %864 : vector<16x128xf32>
    %866 = vector.extract_strided_slice %808 {offsets = [0, 128], sizes = [16, 128], strides = [1, 1]} : vector<16x384xbf16> to vector<16x128xbf16>
    %867 = vector.extract_strided_slice %812 {offsets = [0, 128], sizes = [16, 128], strides = [1, 1]} : vector<16x384xf32> to vector<16x128xf32>
    %868 = arith.extf %866 : vector<16x128xbf16> to vector<16x128xf32>
    %869 = arith.addf %868, %867 : vector<16x128xf32>
    %870 = arith.negf %869 : vector<16x128xf32>
    %871 = math.exp %870 : vector<16x128xf32>
    %cst_216 = arith.constant 1.000000e+00 : f32
    %872 = vector.broadcast %cst_216 : f32 to vector<16x128xf32>
    %873 = arith.addf %872, %871 : vector<16x128xf32>
    %874 = arith.divf %872, %873 : vector<16x128xf32>
    %875 = vector.extract_strided_slice %808 {offsets = [0, 256], sizes = [16, 128], strides = [1, 1]} : vector<16x384xbf16> to vector<16x128xbf16>
    %876 = vector.extract_strided_slice %812 {offsets = [0, 256], sizes = [16, 128], strides = [1, 1]} : vector<16x384xf32> to vector<16x128xf32>
    %877 = arith.addf %876, %11 : vector<16x128xf32>
    %878 = arith.mulf %865, %877 : vector<16x128xf32>
    %879 = arith.extf %875 : vector<16x128xbf16> to vector<16x128xf32>
    %880 = arith.addf %879, %878 : vector<16x128xf32>
    %881 = math.tanh %880 : vector<16x128xf32>
    %cst_217 = arith.constant 1.000000e+00 : f32
    %882 = vector.broadcast %cst_217 : f32 to vector<16x128xf32>
    %883 = arith.subf %882, %874 : vector<16x128xf32>
    %884 = arith.mulf %883, %881 : vector<16x128xf32>
    %885 = arith.mulf %874, %796 : vector<16x128xf32>
    %886 = arith.addf %884, %885 : vector<16x128xf32>
    %c7_i32_218 = arith.constant 7 : i32
    %887 = arith.addi %36, %c7_i32_218 : i32
    %888 = vector.broadcast %887 : i32 to vector<16x1xi32>
    %889 = arith.cmpi sgt, %3, %888 : vector<16x1xi32>
    %890 = vector.shape_cast %889 : vector<16x1xi1> to vector<16x1xi1>
    %891 = vector.broadcast %890 : vector<16x1xi1> to vector<16x128xi1>
    %892 = arith.select %891, %886, %796 : vector<16x128xi1>, vector<16x128xf32>
    %cst_219 = arith.constant 0.000000e+00 : f32
    %893 = vector.shape_cast %889 : vector<16x1xi1> to vector<16x1xi1>
    %894 = vector.broadcast %893 : vector<16x1xi1> to vector<16x128xi1>
    %895 = vector.broadcast %cst_219 : f32 to vector<16x128xf32>
    %896 = arith.select %894, %886, %895 : vector<16x128xi1>, vector<16x128xf32>
    %897 = arith.truncf %896 : vector<16x128xf32> to vector<16x128xbf16>
    %c7_220 = arith.constant 7 : index
    %c0_221 = arith.constant 0 : index
    %c0_222 = arith.constant 0 : index
    %898 = vector.load %arg14[%c7_220, %c0_221, %c0_222] : memref<16x16x128xbf16, #tpu.memory_space<vmem>>, vector<1x16x128xbf16>
    %899 = vector.shape_cast %898 : vector<1x16x128xbf16> to vector<16x128xbf16>
    %900 = vector.shape_cast %897 : vector<16x128xbf16> to vector<1x16x128xbf16>
    tpu.vector_store %arg14[%c7_220, %c0_221, %c0_222], %900 {strides = array<i32>} : memref<16x16x128xbf16, #tpu.memory_space<vmem>>, vector<1x16x128xbf16>,
    %c9_223 = arith.constant 9 : index
    %c0_224 = arith.constant 0 : index
    %c0_225 = arith.constant 0 : index
    %901 = vector.load %arg17[%c9_223, %c0_224, %c0_225] : memref<16x16x384xbf16, #tpu.memory_space<vmem>>, vector<1x16x384xbf16>
    %902 = vector.shape_cast %901 : vector<1x16x384xbf16> to vector<16x384xbf16>
    %c6_226 = arith.constant 6 : index
    %c0_227 = arith.constant 0 : index
    %c0_228 = arith.constant 0 : index
    %903 = vector.load %arg18[%c6_226, %c0_227, %c0_228] : memref<16x16x384xbf16, #tpu.memory_space<vmem>>, vector<1x16x384xbf16>
    %904 = vector.shape_cast %903 : vector<1x16x384xbf16> to vector<16x384xbf16>
    %905 = arith.truncf %848 : vector<16x128xf32> to vector<16x128xbf16>
    %cst_229 = arith.constant dense<0.000000e+00> : vector<16x384xf32>
    %906 = tpu.matmul %905, %4, %cst_229 {dimension_numbers = #tpu.dot_dimension_numbers<[1], [0], [0], [1], [0, 0, 1, 1], [], []>} : vector<16x128xbf16>, vector<128x384xbf16>, vector<16x384xf32> -> vector<16x384xf32>
    %907 = arith.truncf %892 : vector<16x128xf32> to vector<16x128xbf16>
    %cst_230 = arith.constant dense<0.000000e+00> : vector<16x384xf32>
    %908 = tpu.matmul %907, %5, %cst_230 {dimension_numbers = #tpu.dot_dimension_numbers<[1], [0], [0], [1], [0, 0, 1, 1], [], []>} : vector<16x128xbf16>, vector<128x384xbf16>, vector<16x384xf32> -> vector<16x384xf32>
    %909 = vector.extract_strided_slice %902 {offsets = [0, 0], sizes = [16, 128], strides = [1, 1]} : vector<16x384xbf16> to vector<16x128xbf16>
    %910 = vector.extract_strided_slice %906 {offsets = [0, 0], sizes = [16, 128], strides = [1, 1]} : vector<16x384xf32> to vector<16x128xf32>
    %911 = arith.extf %909 : vector<16x128xbf16> to vector<16x128xf32>
    %912 = arith.addf %911, %910 : vector<16x128xf32>
    %913 = arith.negf %912 : vector<16x128xf32>
    %914 = math.exp %913 : vector<16x128xf32>
    %cst_231 = arith.constant 1.000000e+00 : f32
    %915 = vector.broadcast %cst_231 : f32 to vector<16x128xf32>
    %916 = arith.addf %915, %914 : vector<16x128xf32>
    %917 = arith.divf %915, %916 : vector<16x128xf32>
    %918 = vector.extract_strided_slice %902 {offsets = [0, 128], sizes = [16, 128], strides = [1, 1]} : vector<16x384xbf16> to vector<16x128xbf16>
    %919 = vector.extract_strided_slice %906 {offsets = [0, 128], sizes = [16, 128], strides = [1, 1]} : vector<16x384xf32> to vector<16x128xf32>
    %920 = arith.extf %918 : vector<16x128xbf16> to vector<16x128xf32>
    %921 = arith.addf %920, %919 : vector<16x128xf32>
    %922 = arith.negf %921 : vector<16x128xf32>
    %923 = math.exp %922 : vector<16x128xf32>
    %cst_232 = arith.constant 1.000000e+00 : f32
    %924 = vector.broadcast %cst_232 : f32 to vector<16x128xf32>
    %925 = arith.addf %924, %923 : vector<16x128xf32>
    %926 = arith.divf %924, %925 : vector<16x128xf32>
    %927 = vector.extract_strided_slice %902 {offsets = [0, 256], sizes = [16, 128], strides = [1, 1]} : vector<16x384xbf16> to vector<16x128xbf16>
    %928 = vector.extract_strided_slice %906 {offsets = [0, 256], sizes = [16, 128], strides = [1, 1]} : vector<16x384xf32> to vector<16x128xf32>
    %929 = arith.addf %928, %8 : vector<16x128xf32>
    %930 = arith.mulf %917, %929 : vector<16x128xf32>
    %931 = arith.extf %927 : vector<16x128xbf16> to vector<16x128xf32>
    %932 = arith.addf %931, %930 : vector<16x128xf32>
    %933 = math.tanh %932 : vector<16x128xf32>
    %cst_233 = arith.constant 1.000000e+00 : f32
    %934 = vector.broadcast %cst_233 : f32 to vector<16x128xf32>
    %935 = arith.subf %934, %926 : vector<16x128xf32>
    %936 = arith.mulf %935, %933 : vector<16x128xf32>
    %937 = arith.mulf %926, %848 : vector<16x128xf32>
    %938 = arith.addf %936, %937 : vector<16x128xf32>
    %c9_i32_234 = arith.constant 9 : i32
    %939 = arith.addi %35, %c9_i32_234 : i32
    %940 = vector.broadcast %939 : i32 to vector<16x1xi32>
    %941 = arith.cmpi sgt, %3, %940 : vector<16x1xi32>
    %942 = vector.shape_cast %941 : vector<16x1xi1> to vector<16x1xi1>
    %943 = vector.broadcast %942 : vector<16x1xi1> to vector<16x128xi1>
    %944 = arith.select %943, %938, %848 : vector<16x128xi1>, vector<16x128xf32>
    %cst_235 = arith.constant 0.000000e+00 : f32
    %945 = vector.shape_cast %941 : vector<16x1xi1> to vector<16x1xi1>
    %946 = vector.broadcast %945 : vector<16x1xi1> to vector<16x128xi1>
    %947 = vector.broadcast %cst_235 : f32 to vector<16x128xf32>
    %948 = arith.select %946, %938, %947 : vector<16x128xi1>, vector<16x128xf32>
    %949 = arith.truncf %948 : vector<16x128xf32> to vector<16x128xbf16>
    %c9_236 = arith.constant 9 : index
    %c0_237 = arith.constant 0 : index
    %c0_238 = arith.constant 0 : index
    %950 = vector.load %arg13[%c9_236, %c0_237, %c0_238] : memref<16x16x128xbf16, #tpu.memory_space<vmem>>, vector<1x16x128xbf16>
    %951 = vector.shape_cast %950 : vector<1x16x128xbf16> to vector<16x128xbf16>
    %952 = vector.shape_cast %949 : vector<16x128xbf16> to vector<1x16x128xbf16>
    tpu.vector_store %arg13[%c9_236, %c0_237, %c0_238], %952 {strides = array<i32>} : memref<16x16x128xbf16, #tpu.memory_space<vmem>>, vector<1x16x128xbf16>,
    %953 = vector.extract_strided_slice %904 {offsets = [0, 0], sizes = [16, 128], strides = [1, 1]} : vector<16x384xbf16> to vector<16x128xbf16>
    %954 = vector.extract_strided_slice %908 {offsets = [0, 0], sizes = [16, 128], strides = [1, 1]} : vector<16x384xf32> to vector<16x128xf32>
    %955 = arith.extf %953 : vector<16x128xbf16> to vector<16x128xf32>
    %956 = arith.addf %955, %954 : vector<16x128xf32>
    %957 = arith.negf %956 : vector<16x128xf32>
    %958 = math.exp %957 : vector<16x128xf32>
    %cst_239 = arith.constant 1.000000e+00 : f32
    %959 = vector.broadcast %cst_239 : f32 to vector<16x128xf32>
    %960 = arith.addf %959, %958 : vector<16x128xf32>
    %961 = arith.divf %959, %960 : vector<16x128xf32>
    %962 = vector.extract_strided_slice %904 {offsets = [0, 128], sizes = [16, 128], strides = [1, 1]} : vector<16x384xbf16> to vector<16x128xbf16>
    %963 = vector.extract_strided_slice %908 {offsets = [0, 128], sizes = [16, 128], strides = [1, 1]} : vector<16x384xf32> to vector<16x128xf32>
    %964 = arith.extf %962 : vector<16x128xbf16> to vector<16x128xf32>
    %965 = arith.addf %964, %963 : vector<16x128xf32>
    %966 = arith.negf %965 : vector<16x128xf32>
    %967 = math.exp %966 : vector<16x128xf32>
    %cst_240 = arith.constant 1.000000e+00 : f32
    %968 = vector.broadcast %cst_240 : f32 to vector<16x128xf32>
    %969 = arith.addf %968, %967 : vector<16x128xf32>
    %970 = arith.divf %968, %969 : vector<16x128xf32>
    %971 = vector.extract_strided_slice %904 {offsets = [0, 256], sizes = [16, 128], strides = [1, 1]} : vector<16x384xbf16> to vector<16x128xbf16>
    %972 = vector.extract_strided_slice %908 {offsets = [0, 256], sizes = [16, 128], strides = [1, 1]} : vector<16x384xf32> to vector<16x128xf32>
    %973 = arith.addf %972, %11 : vector<16x128xf32>
    %974 = arith.mulf %961, %973 : vector<16x128xf32>
    %975 = arith.extf %971 : vector<16x128xbf16> to vector<16x128xf32>
    %976 = arith.addf %975, %974 : vector<16x128xf32>
    %977 = math.tanh %976 : vector<16x128xf32>
    %cst_241 = arith.constant 1.000000e+00 : f32
    %978 = vector.broadcast %cst_241 : f32 to vector<16x128xf32>
    %979 = arith.subf %978, %970 : vector<16x128xf32>
    %980 = arith.mulf %979, %977 : vector<16x128xf32>
    %981 = arith.mulf %970, %892 : vector<16x128xf32>
    %982 = arith.addf %980, %981 : vector<16x128xf32>
    %c6_i32_242 = arith.constant 6 : i32
    %983 = arith.addi %36, %c6_i32_242 : i32
    %984 = vector.broadcast %983 : i32 to vector<16x1xi32>
    %985 = arith.cmpi sgt, %3, %984 : vector<16x1xi32>
    %986 = vector.shape_cast %985 : vector<16x1xi1> to vector<16x1xi1>
    %987 = vector.broadcast %986 : vector<16x1xi1> to vector<16x128xi1>
    %988 = arith.select %987, %982, %892 : vector<16x128xi1>, vector<16x128xf32>
    %cst_243 = arith.constant 0.000000e+00 : f32
    %989 = vector.shape_cast %985 : vector<16x1xi1> to vector<16x1xi1>
    %990 = vector.broadcast %989 : vector<16x1xi1> to vector<16x128xi1>
    %991 = vector.broadcast %cst_243 : f32 to vector<16x128xf32>
    %992 = arith.select %990, %982, %991 : vector<16x128xi1>, vector<16x128xf32>
    %993 = arith.truncf %992 : vector<16x128xf32> to vector<16x128xbf16>
    %c6_244 = arith.constant 6 : index
    %c0_245 = arith.constant 0 : index
    %c0_246 = arith.constant 0 : index
    %994 = vector.load %arg14[%c6_244, %c0_245, %c0_246] : memref<16x16x128xbf16, #tpu.memory_space<vmem>>, vector<1x16x128xbf16>
    %995 = vector.shape_cast %994 : vector<1x16x128xbf16> to vector<16x128xbf16>
    %996 = vector.shape_cast %993 : vector<16x128xbf16> to vector<1x16x128xbf16>
    tpu.vector_store %arg14[%c6_244, %c0_245, %c0_246], %996 {strides = array<i32>} : memref<16x16x128xbf16, #tpu.memory_space<vmem>>, vector<1x16x128xbf16>,
    %c10_247 = arith.constant 10 : index
    %c0_248 = arith.constant 0 : index
    %c0_249 = arith.constant 0 : index
    %997 = vector.load %arg17[%c10_247, %c0_248, %c0_249] : memref<16x16x384xbf16, #tpu.memory_space<vmem>>, vector<1x16x384xbf16>
    %998 = vector.shape_cast %997 : vector<1x16x384xbf16> to vector<16x384xbf16>
    %c5_250 = arith.constant 5 : index
    %c0_251 = arith.constant 0 : index
    %c0_252 = arith.constant 0 : index
    %999 = vector.load %arg18[%c5_250, %c0_251, %c0_252] : memref<16x16x384xbf16, #tpu.memory_space<vmem>>, vector<1x16x384xbf16>
    %1000 = vector.shape_cast %999 : vector<1x16x384xbf16> to vector<16x384xbf16>
    %1001 = arith.truncf %944 : vector<16x128xf32> to vector<16x128xbf16>
    %cst_253 = arith.constant dense<0.000000e+00> : vector<16x384xf32>
    %1002 = tpu.matmul %1001, %4, %cst_253 {dimension_numbers = #tpu.dot_dimension_numbers<[1], [0], [0], [1], [0, 0, 1, 1], [], []>} : vector<16x128xbf16>, vector<128x384xbf16>, vector<16x384xf32> -> vector<16x384xf32>
    %1003 = arith.truncf %988 : vector<16x128xf32> to vector<16x128xbf16>
    %cst_254 = arith.constant dense<0.000000e+00> : vector<16x384xf32>
    %1004 = tpu.matmul %1003, %5, %cst_254 {dimension_numbers = #tpu.dot_dimension_numbers<[1], [0], [0], [1], [0, 0, 1, 1], [], []>} : vector<16x128xbf16>, vector<128x384xbf16>, vector<16x384xf32> -> vector<16x384xf32>
    %1005 = vector.extract_strided_slice %998 {offsets = [0, 0], sizes = [16, 128], strides = [1, 1]} : vector<16x384xbf16> to vector<16x128xbf16>
    %1006 = vector.extract_strided_slice %1002 {offsets = [0, 0], sizes = [16, 128], strides = [1, 1]} : vector<16x384xf32> to vector<16x128xf32>
    %1007 = arith.extf %1005 : vector<16x128xbf16> to vector<16x128xf32>
    %1008 = arith.addf %1007, %1006 : vector<16x128xf32>
    %1009 = arith.negf %1008 : vector<16x128xf32>
    %1010 = math.exp %1009 : vector<16x128xf32>
    %cst_255 = arith.constant 1.000000e+00 : f32
    %1011 = vector.broadcast %cst_255 : f32 to vector<16x128xf32>
    %1012 = arith.addf %1011, %1010 : vector<16x128xf32>
    %1013 = arith.divf %1011, %1012 : vector<16x128xf32>
    %1014 = vector.extract_strided_slice %998 {offsets = [0, 128], sizes = [16, 128], strides = [1, 1]} : vector<16x384xbf16> to vector<16x128xbf16>
    %1015 = vector.extract_strided_slice %1002 {offsets = [0, 128], sizes = [16, 128], strides = [1, 1]} : vector<16x384xf32> to vector<16x128xf32>
    %1016 = arith.extf %1014 : vector<16x128xbf16> to vector<16x128xf32>
    %1017 = arith.addf %1016, %1015 : vector<16x128xf32>
    %1018 = arith.negf %1017 : vector<16x128xf32>
    %1019 = math.exp %1018 : vector<16x128xf32>
    %cst_256 = arith.constant 1.000000e+00 : f32
    %1020 = vector.broadcast %cst_256 : f32 to vector<16x128xf32>
    %1021 = arith.addf %1020, %1019 : vector<16x128xf32>
    %1022 = arith.divf %1020, %1021 : vector<16x128xf32>
    %1023 = vector.extract_strided_slice %998 {offsets = [0, 256], sizes = [16, 128], strides = [1, 1]} : vector<16x384xbf16> to vector<16x128xbf16>
    %1024 = vector.extract_strided_slice %1002 {offsets = [0, 256], sizes = [16, 128], strides = [1, 1]} : vector<16x384xf32> to vector<16x128xf32>
    %1025 = arith.addf %1024, %8 : vector<16x128xf32>
    %1026 = arith.mulf %1013, %1025 : vector<16x128xf32>
    %1027 = arith.extf %1023 : vector<16x128xbf16> to vector<16x128xf32>
    %1028 = arith.addf %1027, %1026 : vector<16x128xf32>
    %1029 = math.tanh %1028 : vector<16x128xf32>
    %cst_257 = arith.constant 1.000000e+00 : f32
    %1030 = vector.broadcast %cst_257 : f32 to vector<16x128xf32>
    %1031 = arith.subf %1030, %1022 : vector<16x128xf32>
    %1032 = arith.mulf %1031, %1029 : vector<16x128xf32>
    %1033 = arith.mulf %1022, %944 : vector<16x128xf32>
    %1034 = arith.addf %1032, %1033 : vector<16x128xf32>
    %c10_i32_258 = arith.constant 10 : i32
    %1035 = arith.addi %35, %c10_i32_258 : i32
    %1036 = vector.broadcast %1035 : i32 to vector<16x1xi32>
    %1037 = arith.cmpi sgt, %3, %1036 : vector<16x1xi32>
    %1038 = vector.shape_cast %1037 : vector<16x1xi1> to vector<16x1xi1>
    %1039 = vector.broadcast %1038 : vector<16x1xi1> to vector<16x128xi1>
    %1040 = arith.select %1039, %1034, %944 : vector<16x128xi1>, vector<16x128xf32>
    %cst_259 = arith.constant 0.000000e+00 : f32
    %1041 = vector.shape_cast %1037 : vector<16x1xi1> to vector<16x1xi1>
    %1042 = vector.broadcast %1041 : vector<16x1xi1> to vector<16x128xi1>
    %1043 = vector.broadcast %cst_259 : f32 to vector<16x128xf32>
    %1044 = arith.select %1042, %1034, %1043 : vector<16x128xi1>, vector<16x128xf32>
    %1045 = arith.truncf %1044 : vector<16x128xf32> to vector<16x128xbf16>
    %c10_260 = arith.constant 10 : index
    %c0_261 = arith.constant 0 : index
    %c0_262 = arith.constant 0 : index
    %1046 = vector.load %arg13[%c10_260, %c0_261, %c0_262] : memref<16x16x128xbf16, #tpu.memory_space<vmem>>, vector<1x16x128xbf16>
    %1047 = vector.shape_cast %1046 : vector<1x16x128xbf16> to vector<16x128xbf16>
    %1048 = vector.shape_cast %1045 : vector<16x128xbf16> to vector<1x16x128xbf16>
    tpu.vector_store %arg13[%c10_260, %c0_261, %c0_262], %1048 {strides = array<i32>} : memref<16x16x128xbf16, #tpu.memory_space<vmem>>, vector<1x16x128xbf16>,
    %1049 = vector.extract_strided_slice %1000 {offsets = [0, 0], sizes = [16, 128], strides = [1, 1]} : vector<16x384xbf16> to vector<16x128xbf16>
    %1050 = vector.extract_strided_slice %1004 {offsets = [0, 0], sizes = [16, 128], strides = [1, 1]} : vector<16x384xf32> to vector<16x128xf32>
    %1051 = arith.extf %1049 : vector<16x128xbf16> to vector<16x128xf32>
    %1052 = arith.addf %1051, %1050 : vector<16x128xf32>
    %1053 = arith.negf %1052 : vector<16x128xf32>
    %1054 = math.exp %1053 : vector<16x128xf32>
    %cst_263 = arith.constant 1.000000e+00 : f32
    %1055 = vector.broadcast %cst_263 : f32 to vector<16x128xf32>
    %1056 = arith.addf %1055, %1054 : vector<16x128xf32>
    %1057 = arith.divf %1055, %1056 : vector<16x128xf32>
    %1058 = vector.extract_strided_slice %1000 {offsets = [0, 128], sizes = [16, 128], strides = [1, 1]} : vector<16x384xbf16> to vector<16x128xbf16>
    %1059 = vector.extract_strided_slice %1004 {offsets = [0, 128], sizes = [16, 128], strides = [1, 1]} : vector<16x384xf32> to vector<16x128xf32>
    %1060 = arith.extf %1058 : vector<16x128xbf16> to vector<16x128xf32>
    %1061 = arith.addf %1060, %1059 : vector<16x128xf32>
    %1062 = arith.negf %1061 : vector<16x128xf32>
    %1063 = math.exp %1062 : vector<16x128xf32>
    %cst_264 = arith.constant 1.000000e+00 : f32
    %1064 = vector.broadcast %cst_264 : f32 to vector<16x128xf32>
    %1065 = arith.addf %1064, %1063 : vector<16x128xf32>
    %1066 = arith.divf %1064, %1065 : vector<16x128xf32>
    %1067 = vector.extract_strided_slice %1000 {offsets = [0, 256], sizes = [16, 128], strides = [1, 1]} : vector<16x384xbf16> to vector<16x128xbf16>
    %1068 = vector.extract_strided_slice %1004 {offsets = [0, 256], sizes = [16, 128], strides = [1, 1]} : vector<16x384xf32> to vector<16x128xf32>
    %1069 = arith.addf %1068, %11 : vector<16x128xf32>
    %1070 = arith.mulf %1057, %1069 : vector<16x128xf32>
    %1071 = arith.extf %1067 : vector<16x128xbf16> to vector<16x128xf32>
    %1072 = arith.addf %1071, %1070 : vector<16x128xf32>
    %1073 = math.tanh %1072 : vector<16x128xf32>
    %cst_265 = arith.constant 1.000000e+00 : f32
    %1074 = vector.broadcast %cst_265 : f32 to vector<16x128xf32>
    %1075 = arith.subf %1074, %1066 : vector<16x128xf32>
    %1076 = arith.mulf %1075, %1073 : vector<16x128xf32>
    %1077 = arith.mulf %1066, %988 : vector<16x128xf32>
    %1078 = arith.addf %1076, %1077 : vector<16x128xf32>
    %c5_i32_266 = arith.constant 5 : i32
    %1079 = arith.addi %36, %c5_i32_266 : i32
    %1080 = vector.broadcast %1079 : i32 to vector<16x1xi32>
    %1081 = arith.cmpi sgt, %3, %1080 : vector<16x1xi32>
    %1082 = vector.shape_cast %1081 : vector<16x1xi1> to vector<16x1xi1>
    %1083 = vector.broadcast %1082 : vector<16x1xi1> to vector<16x128xi1>
    %1084 = arith.select %1083, %1078, %988 : vector<16x128xi1>, vector<16x128xf32>
    %cst_267 = arith.constant 0.000000e+00 : f32
    %1085 = vector.shape_cast %1081 : vector<16x1xi1> to vector<16x1xi1>
    %1086 = vector.broadcast %1085 : vector<16x1xi1> to vector<16x128xi1>
    %1087 = vector.broadcast %cst_267 : f32 to vector<16x128xf32>
    %1088 = arith.select %1086, %1078, %1087 : vector<16x128xi1>, vector<16x128xf32>
    %1089 = arith.truncf %1088 : vector<16x128xf32> to vector<16x128xbf16>
    %c5_268 = arith.constant 5 : index
    %c0_269 = arith.constant 0 : index
    %c0_270 = arith.constant 0 : index
    %1090 = vector.load %arg14[%c5_268, %c0_269, %c0_270] : memref<16x16x128xbf16, #tpu.memory_space<vmem>>, vector<1x16x128xbf16>
    %1091 = vector.shape_cast %1090 : vector<1x16x128xbf16> to vector<16x128xbf16>
    %1092 = vector.shape_cast %1089 : vector<16x128xbf16> to vector<1x16x128xbf16>
    tpu.vector_store %arg14[%c5_268, %c0_269, %c0_270], %1092 {strides = array<i32>} : memref<16x16x128xbf16, #tpu.memory_space<vmem>>, vector<1x16x128xbf16>,
    %c11_271 = arith.constant 11 : index
    %c0_272 = arith.constant 0 : index
    %c0_273 = arith.constant 0 : index
    %1093 = vector.load %arg17[%c11_271, %c0_272, %c0_273] : memref<16x16x384xbf16, #tpu.memory_space<vmem>>, vector<1x16x384xbf16>
    %1094 = vector.shape_cast %1093 : vector<1x16x384xbf16> to vector<16x384xbf16>
    %c4_274 = arith.constant 4 : index
    %c0_275 = arith.constant 0 : index
    %c0_276 = arith.constant 0 : index
    %1095 = vector.load %arg18[%c4_274, %c0_275, %c0_276] : memref<16x16x384xbf16, #tpu.memory_space<vmem>>, vector<1x16x384xbf16>
    %1096 = vector.shape_cast %1095 : vector<1x16x384xbf16> to vector<16x384xbf16>
    %1097 = arith.truncf %1040 : vector<16x128xf32> to vector<16x128xbf16>
    %cst_277 = arith.constant dense<0.000000e+00> : vector<16x384xf32>
    %1098 = tpu.matmul %1097, %4, %cst_277 {dimension_numbers = #tpu.dot_dimension_numbers<[1], [0], [0], [1], [0, 0, 1, 1], [], []>} : vector<16x128xbf16>, vector<128x384xbf16>, vector<16x384xf32> -> vector<16x384xf32>
    %1099 = arith.truncf %1084 : vector<16x128xf32> to vector<16x128xbf16>
    %cst_278 = arith.constant dense<0.000000e+00> : vector<16x384xf32>
    %1100 = tpu.matmul %1099, %5, %cst_278 {dimension_numbers = #tpu.dot_dimension_numbers<[1], [0], [0], [1], [0, 0, 1, 1], [], []>} : vector<16x128xbf16>, vector<128x384xbf16>, vector<16x384xf32> -> vector<16x384xf32>
    %1101 = vector.extract_strided_slice %1094 {offsets = [0, 0], sizes = [16, 128], strides = [1, 1]} : vector<16x384xbf16> to vector<16x128xbf16>
    %1102 = vector.extract_strided_slice %1098 {offsets = [0, 0], sizes = [16, 128], strides = [1, 1]} : vector<16x384xf32> to vector<16x128xf32>
    %1103 = arith.extf %1101 : vector<16x128xbf16> to vector<16x128xf32>
    %1104 = arith.addf %1103, %1102 : vector<16x128xf32>
    %1105 = arith.negf %1104 : vector<16x128xf32>
    %1106 = math.exp %1105 : vector<16x128xf32>
    %cst_279 = arith.constant 1.000000e+00 : f32
    %1107 = vector.broadcast %cst_279 : f32 to vector<16x128xf32>
    %1108 = arith.addf %1107, %1106 : vector<16x128xf32>
    %1109 = arith.divf %1107, %1108 : vector<16x128xf32>
    %1110 = vector.extract_strided_slice %1094 {offsets = [0, 128], sizes = [16, 128], strides = [1, 1]} : vector<16x384xbf16> to vector<16x128xbf16>
    %1111 = vector.extract_strided_slice %1098 {offsets = [0, 128], sizes = [16, 128], strides = [1, 1]} : vector<16x384xf32> to vector<16x128xf32>
    %1112 = arith.extf %1110 : vector<16x128xbf16> to vector<16x128xf32>
    %1113 = arith.addf %1112, %1111 : vector<16x128xf32>
    %1114 = arith.negf %1113 : vector<16x128xf32>
    %1115 = math.exp %1114 : vector<16x128xf32>
    %cst_280 = arith.constant 1.000000e+00 : f32
    %1116 = vector.broadcast %cst_280 : f32 to vector<16x128xf32>
    %1117 = arith.addf %1116, %1115 : vector<16x128xf32>
    %1118 = arith.divf %1116, %1117 : vector<16x128xf32>
    %1119 = vector.extract_strided_slice %1094 {offsets = [0, 256], sizes = [16, 128], strides = [1, 1]} : vector<16x384xbf16> to vector<16x128xbf16>
    %1120 = vector.extract_strided_slice %1098 {offsets = [0, 256], sizes = [16, 128], strides = [1, 1]} : vector<16x384xf32> to vector<16x128xf32>
    %1121 = arith.addf %1120, %8 : vector<16x128xf32>
    %1122 = arith.mulf %1109, %1121 : vector<16x128xf32>
    %1123 = arith.extf %1119 : vector<16x128xbf16> to vector<16x128xf32>
    %1124 = arith.addf %1123, %1122 : vector<16x128xf32>
    %1125 = math.tanh %1124 : vector<16x128xf32>
    %cst_281 = arith.constant 1.000000e+00 : f32
    %1126 = vector.broadcast %cst_281 : f32 to vector<16x128xf32>
    %1127 = arith.subf %1126, %1118 : vector<16x128xf32>
    %1128 = arith.mulf %1127, %1125 : vector<16x128xf32>
    %1129 = arith.mulf %1118, %1040 : vector<16x128xf32>
    %1130 = arith.addf %1128, %1129 : vector<16x128xf32>
    %c11_i32_282 = arith.constant 11 : i32
    %1131 = arith.addi %35, %c11_i32_282 : i32
    %1132 = vector.broadcast %1131 : i32 to vector<16x1xi32>
    %1133 = arith.cmpi sgt, %3, %1132 : vector<16x1xi32>
    %1134 = vector.shape_cast %1133 : vector<16x1xi1> to vector<16x1xi1>
    %1135 = vector.broadcast %1134 : vector<16x1xi1> to vector<16x128xi1>
    %1136 = arith.select %1135, %1130, %1040 : vector<16x128xi1>, vector<16x128xf32>
    %cst_283 = arith.constant 0.000000e+00 : f32
    %1137 = vector.shape_cast %1133 : vector<16x1xi1> to vector<16x1xi1>
    %1138 = vector.broadcast %1137 : vector<16x1xi1> to vector<16x128xi1>
    %1139 = vector.broadcast %cst_283 : f32 to vector<16x128xf32>
    %1140 = arith.select %1138, %1130, %1139 : vector<16x128xi1>, vector<16x128xf32>
    %1141 = arith.truncf %1140 : vector<16x128xf32> to vector<16x128xbf16>
    %c11_284 = arith.constant 11 : index
    %c0_285 = arith.constant 0 : index
    %c0_286 = arith.constant 0 : index
    %1142 = vector.load %arg13[%c11_284, %c0_285, %c0_286] : memref<16x16x128xbf16, #tpu.memory_space<vmem>>, vector<1x16x128xbf16>
    %1143 = vector.shape_cast %1142 : vector<1x16x128xbf16> to vector<16x128xbf16>
    %1144 = vector.shape_cast %1141 : vector<16x128xbf16> to vector<1x16x128xbf16>
    tpu.vector_store %arg13[%c11_284, %c0_285, %c0_286], %1144 {strides = array<i32>} : memref<16x16x128xbf16, #tpu.memory_space<vmem>>, vector<1x16x128xbf16>,
    %1145 = vector.extract_strided_slice %1096 {offsets = [0, 0], sizes = [16, 128], strides = [1, 1]} : vector<16x384xbf16> to vector<16x128xbf16>
    %1146 = vector.extract_strided_slice %1100 {offsets = [0, 0], sizes = [16, 128], strides = [1, 1]} : vector<16x384xf32> to vector<16x128xf32>
    %1147 = arith.extf %1145 : vector<16x128xbf16> to vector<16x128xf32>
    %1148 = arith.addf %1147, %1146 : vector<16x128xf32>
    %1149 = arith.negf %1148 : vector<16x128xf32>
    %1150 = math.exp %1149 : vector<16x128xf32>
    %cst_287 = arith.constant 1.000000e+00 : f32
    %1151 = vector.broadcast %cst_287 : f32 to vector<16x128xf32>
    %1152 = arith.addf %1151, %1150 : vector<16x128xf32>
    %1153 = arith.divf %1151, %1152 : vector<16x128xf32>
    %1154 = vector.extract_strided_slice %1096 {offsets = [0, 128], sizes = [16, 128], strides = [1, 1]} : vector<16x384xbf16> to vector<16x128xbf16>
    %1155 = vector.extract_strided_slice %1100 {offsets = [0, 128], sizes = [16, 128], strides = [1, 1]} : vector<16x384xf32> to vector<16x128xf32>
    %1156 = arith.extf %1154 : vector<16x128xbf16> to vector<16x128xf32>
    %1157 = arith.addf %1156, %1155 : vector<16x128xf32>
    %1158 = arith.negf %1157 : vector<16x128xf32>
    %1159 = math.exp %1158 : vector<16x128xf32>
    %cst_288 = arith.constant 1.000000e+00 : f32
    %1160 = vector.broadcast %cst_288 : f32 to vector<16x128xf32>
    %1161 = arith.addf %1160, %1159 : vector<16x128xf32>
    %1162 = arith.divf %1160, %1161 : vector<16x128xf32>
    %1163 = vector.extract_strided_slice %1096 {offsets = [0, 256], sizes = [16, 128], strides = [1, 1]} : vector<16x384xbf16> to vector<16x128xbf16>
    %1164 = vector.extract_strided_slice %1100 {offsets = [0, 256], sizes = [16, 128], strides = [1, 1]} : vector<16x384xf32> to vector<16x128xf32>
    %1165 = arith.addf %1164, %11 : vector<16x128xf32>
    %1166 = arith.mulf %1153, %1165 : vector<16x128xf32>
    %1167 = arith.extf %1163 : vector<16x128xbf16> to vector<16x128xf32>
    %1168 = arith.addf %1167, %1166 : vector<16x128xf32>
    %1169 = math.tanh %1168 : vector<16x128xf32>
    %cst_289 = arith.constant 1.000000e+00 : f32
    %1170 = vector.broadcast %cst_289 : f32 to vector<16x128xf32>
    %1171 = arith.subf %1170, %1162 : vector<16x128xf32>
    %1172 = arith.mulf %1171, %1169 : vector<16x128xf32>
    %1173 = arith.mulf %1162, %1084 : vector<16x128xf32>
    %1174 = arith.addf %1172, %1173 : vector<16x128xf32>
    %c4_i32_290 = arith.constant 4 : i32
    %1175 = arith.addi %36, %c4_i32_290 : i32
    %1176 = vector.broadcast %1175 : i32 to vector<16x1xi32>
    %1177 = arith.cmpi sgt, %3, %1176 : vector<16x1xi32>
    %1178 = vector.shape_cast %1177 : vector<16x1xi1> to vector<16x1xi1>
    %1179 = vector.broadcast %1178 : vector<16x1xi1> to vector<16x128xi1>
    %1180 = arith.select %1179, %1174, %1084 : vector<16x128xi1>, vector<16x128xf32>
    %cst_291 = arith.constant 0.000000e+00 : f32
    %1181 = vector.shape_cast %1177 : vector<16x1xi1> to vector<16x1xi1>
    %1182 = vector.broadcast %1181 : vector<16x1xi1> to vector<16x128xi1>
    %1183 = vector.broadcast %cst_291 : f32 to vector<16x128xf32>
    %1184 = arith.select %1182, %1174, %1183 : vector<16x128xi1>, vector<16x128xf32>
    %1185 = arith.truncf %1184 : vector<16x128xf32> to vector<16x128xbf16>
    %c4_292 = arith.constant 4 : index
    %c0_293 = arith.constant 0 : index
    %c0_294 = arith.constant 0 : index
    %1186 = vector.load %arg14[%c4_292, %c0_293, %c0_294] : memref<16x16x128xbf16, #tpu.memory_space<vmem>>, vector<1x16x128xbf16>
    %1187 = vector.shape_cast %1186 : vector<1x16x128xbf16> to vector<16x128xbf16>
    %1188 = vector.shape_cast %1185 : vector<16x128xbf16> to vector<1x16x128xbf16>
    tpu.vector_store %arg14[%c4_292, %c0_293, %c0_294], %1188 {strides = array<i32>} : memref<16x16x128xbf16, #tpu.memory_space<vmem>>, vector<1x16x128xbf16>,
    %c12_295 = arith.constant 12 : index
    %c0_296 = arith.constant 0 : index
    %c0_297 = arith.constant 0 : index
    %1189 = vector.load %arg17[%c12_295, %c0_296, %c0_297] : memref<16x16x384xbf16, #tpu.memory_space<vmem>>, vector<1x16x384xbf16>
    %1190 = vector.shape_cast %1189 : vector<1x16x384xbf16> to vector<16x384xbf16>
    %c3_298 = arith.constant 3 : index
    %c0_299 = arith.constant 0 : index
    %c0_300 = arith.constant 0 : index
    %1191 = vector.load %arg18[%c3_298, %c0_299, %c0_300] : memref<16x16x384xbf16, #tpu.memory_space<vmem>>, vector<1x16x384xbf16>
    %1192 = vector.shape_cast %1191 : vector<1x16x384xbf16> to vector<16x384xbf16>
    %1193 = arith.truncf %1136 : vector<16x128xf32> to vector<16x128xbf16>
    %cst_301 = arith.constant dense<0.000000e+00> : vector<16x384xf32>
    %1194 = tpu.matmul %1193, %4, %cst_301 {dimension_numbers = #tpu.dot_dimension_numbers<[1], [0], [0], [1], [0, 0, 1, 1], [], []>} : vector<16x128xbf16>, vector<128x384xbf16>, vector<16x384xf32> -> vector<16x384xf32>
    %1195 = arith.truncf %1180 : vector<16x128xf32> to vector<16x128xbf16>
    %cst_302 = arith.constant dense<0.000000e+00> : vector<16x384xf32>
    %1196 = tpu.matmul %1195, %5, %cst_302 {dimension_numbers = #tpu.dot_dimension_numbers<[1], [0], [0], [1], [0, 0, 1, 1], [], []>} : vector<16x128xbf16>, vector<128x384xbf16>, vector<16x384xf32> -> vector<16x384xf32>
    %1197 = vector.extract_strided_slice %1190 {offsets = [0, 0], sizes = [16, 128], strides = [1, 1]} : vector<16x384xbf16> to vector<16x128xbf16>
    %1198 = vector.extract_strided_slice %1194 {offsets = [0, 0], sizes = [16, 128], strides = [1, 1]} : vector<16x384xf32> to vector<16x128xf32>
    %1199 = arith.extf %1197 : vector<16x128xbf16> to vector<16x128xf32>
    %1200 = arith.addf %1199, %1198 : vector<16x128xf32>
    %1201 = arith.negf %1200 : vector<16x128xf32>
    %1202 = math.exp %1201 : vector<16x128xf32>
    %cst_303 = arith.constant 1.000000e+00 : f32
    %1203 = vector.broadcast %cst_303 : f32 to vector<16x128xf32>
    %1204 = arith.addf %1203, %1202 : vector<16x128xf32>
    %1205 = arith.divf %1203, %1204 : vector<16x128xf32>
    %1206 = vector.extract_strided_slice %1190 {offsets = [0, 128], sizes = [16, 128], strides = [1, 1]} : vector<16x384xbf16> to vector<16x128xbf16>
    %1207 = vector.extract_strided_slice %1194 {offsets = [0, 128], sizes = [16, 128], strides = [1, 1]} : vector<16x384xf32> to vector<16x128xf32>
    %1208 = arith.extf %1206 : vector<16x128xbf16> to vector<16x128xf32>
    %1209 = arith.addf %1208, %1207 : vector<16x128xf32>
    %1210 = arith.negf %1209 : vector<16x128xf32>
    %1211 = math.exp %1210 : vector<16x128xf32>
    %cst_304 = arith.constant 1.000000e+00 : f32
    %1212 = vector.broadcast %cst_304 : f32 to vector<16x128xf32>
    %1213 = arith.addf %1212, %1211 : vector<16x128xf32>
    %1214 = arith.divf %1212, %1213 : vector<16x128xf32>
    %1215 = vector.extract_strided_slice %1190 {offsets = [0, 256], sizes = [16, 128], strides = [1, 1]} : vector<16x384xbf16> to vector<16x128xbf16>
    %1216 = vector.extract_strided_slice %1194 {offsets = [0, 256], sizes = [16, 128], strides = [1, 1]} : vector<16x384xf32> to vector<16x128xf32>
    %1217 = arith.addf %1216, %8 : vector<16x128xf32>
    %1218 = arith.mulf %1205, %1217 : vector<16x128xf32>
    %1219 = arith.extf %1215 : vector<16x128xbf16> to vector<16x128xf32>
    %1220 = arith.addf %1219, %1218 : vector<16x128xf32>
    %1221 = math.tanh %1220 : vector<16x128xf32>
    %cst_305 = arith.constant 1.000000e+00 : f32
    %1222 = vector.broadcast %cst_305 : f32 to vector<16x128xf32>
    %1223 = arith.subf %1222, %1214 : vector<16x128xf32>
    %1224 = arith.mulf %1223, %1221 : vector<16x128xf32>
    %1225 = arith.mulf %1214, %1136 : vector<16x128xf32>
    %1226 = arith.addf %1224, %1225 : vector<16x128xf32>
    %c12_i32_306 = arith.constant 12 : i32
    %1227 = arith.addi %35, %c12_i32_306 : i32
    %1228 = vector.broadcast %1227 : i32 to vector<16x1xi32>
    %1229 = arith.cmpi sgt, %3, %1228 : vector<16x1xi32>
    %1230 = vector.shape_cast %1229 : vector<16x1xi1> to vector<16x1xi1>
    %1231 = vector.broadcast %1230 : vector<16x1xi1> to vector<16x128xi1>
    %1232 = arith.select %1231, %1226, %1136 : vector<16x128xi1>, vector<16x128xf32>
    %cst_307 = arith.constant 0.000000e+00 : f32
    %1233 = vector.shape_cast %1229 : vector<16x1xi1> to vector<16x1xi1>
    %1234 = vector.broadcast %1233 : vector<16x1xi1> to vector<16x128xi1>
    %1235 = vector.broadcast %cst_307 : f32 to vector<16x128xf32>
    %1236 = arith.select %1234, %1226, %1235 : vector<16x128xi1>, vector<16x128xf32>
    %1237 = arith.truncf %1236 : vector<16x128xf32> to vector<16x128xbf16>
    %c12_308 = arith.constant 12 : index
    %c0_309 = arith.constant 0 : index
    %c0_310 = arith.constant 0 : index
    %1238 = vector.load %arg13[%c12_308, %c0_309, %c0_310] : memref<16x16x128xbf16, #tpu.memory_space<vmem>>, vector<1x16x128xbf16>
    %1239 = vector.shape_cast %1238 : vector<1x16x128xbf16> to vector<16x128xbf16>
    %1240 = vector.shape_cast %1237 : vector<16x128xbf16> to vector<1x16x128xbf16>
    tpu.vector_store %arg13[%c12_308, %c0_309, %c0_310], %1240 {strides = array<i32>} : memref<16x16x128xbf16, #tpu.memory_space<vmem>>, vector<1x16x128xbf16>,
    %1241 = vector.extract_strided_slice %1192 {offsets = [0, 0], sizes = [16, 128], strides = [1, 1]} : vector<16x384xbf16> to vector<16x128xbf16>
    %1242 = vector.extract_strided_slice %1196 {offsets = [0, 0], sizes = [16, 128], strides = [1, 1]} : vector<16x384xf32> to vector<16x128xf32>
    %1243 = arith.extf %1241 : vector<16x128xbf16> to vector<16x128xf32>
    %1244 = arith.addf %1243, %1242 : vector<16x128xf32>
    %1245 = arith.negf %1244 : vector<16x128xf32>
    %1246 = math.exp %1245 : vector<16x128xf32>
    %cst_311 = arith.constant 1.000000e+00 : f32
    %1247 = vector.broadcast %cst_311 : f32 to vector<16x128xf32>
    %1248 = arith.addf %1247, %1246 : vector<16x128xf32>
    %1249 = arith.divf %1247, %1248 : vector<16x128xf32>
    %1250 = vector.extract_strided_slice %1192 {offsets = [0, 128], sizes = [16, 128], strides = [1, 1]} : vector<16x384xbf16> to vector<16x128xbf16>
    %1251 = vector.extract_strided_slice %1196 {offsets = [0, 128], sizes = [16, 128], strides = [1, 1]} : vector<16x384xf32> to vector<16x128xf32>
    %1252 = arith.extf %1250 : vector<16x128xbf16> to vector<16x128xf32>
    %1253 = arith.addf %1252, %1251 : vector<16x128xf32>
    %1254 = arith.negf %1253 : vector<16x128xf32>
    %1255 = math.exp %1254 : vector<16x128xf32>
    %cst_312 = arith.constant 1.000000e+00 : f32
    %1256 = vector.broadcast %cst_312 : f32 to vector<16x128xf32>
    %1257 = arith.addf %1256, %1255 : vector<16x128xf32>
    %1258 = arith.divf %1256, %1257 : vector<16x128xf32>
    %1259 = vector.extract_strided_slice %1192 {offsets = [0, 256], sizes = [16, 128], strides = [1, 1]} : vector<16x384xbf16> to vector<16x128xbf16>
    %1260 = vector.extract_strided_slice %1196 {offsets = [0, 256], sizes = [16, 128], strides = [1, 1]} : vector<16x384xf32> to vector<16x128xf32>
    %1261 = arith.addf %1260, %11 : vector<16x128xf32>
    %1262 = arith.mulf %1249, %1261 : vector<16x128xf32>
    %1263 = arith.extf %1259 : vector<16x128xbf16> to vector<16x128xf32>
    %1264 = arith.addf %1263, %1262 : vector<16x128xf32>
    %1265 = math.tanh %1264 : vector<16x128xf32>
    %cst_313 = arith.constant 1.000000e+00 : f32
    %1266 = vector.broadcast %cst_313 : f32 to vector<16x128xf32>
    %1267 = arith.subf %1266, %1258 : vector<16x128xf32>
    %1268 = arith.mulf %1267, %1265 : vector<16x128xf32>
    %1269 = arith.mulf %1258, %1180 : vector<16x128xf32>
    %1270 = arith.addf %1268, %1269 : vector<16x128xf32>
    %c3_i32_314 = arith.constant 3 : i32
    %1271 = arith.addi %36, %c3_i32_314 : i32
    %1272 = vector.broadcast %1271 : i32 to vector<16x1xi32>
    %1273 = arith.cmpi sgt, %3, %1272 : vector<16x1xi32>
    %1274 = vector.shape_cast %1273 : vector<16x1xi1> to vector<16x1xi1>
    %1275 = vector.broadcast %1274 : vector<16x1xi1> to vector<16x128xi1>
    %1276 = arith.select %1275, %1270, %1180 : vector<16x128xi1>, vector<16x128xf32>
    %cst_315 = arith.constant 0.000000e+00 : f32
    %1277 = vector.shape_cast %1273 : vector<16x1xi1> to vector<16x1xi1>
    %1278 = vector.broadcast %1277 : vector<16x1xi1> to vector<16x128xi1>
    %1279 = vector.broadcast %cst_315 : f32 to vector<16x128xf32>
    %1280 = arith.select %1278, %1270, %1279 : vector<16x128xi1>, vector<16x128xf32>
    %1281 = arith.truncf %1280 : vector<16x128xf32> to vector<16x128xbf16>
    %c3_316 = arith.constant 3 : index
    %c0_317 = arith.constant 0 : index
    %c0_318 = arith.constant 0 : index
    %1282 = vector.load %arg14[%c3_316, %c0_317, %c0_318] : memref<16x16x128xbf16, #tpu.memory_space<vmem>>, vector<1x16x128xbf16>
    %1283 = vector.shape_cast %1282 : vector<1x16x128xbf16> to vector<16x128xbf16>
    %1284 = vector.shape_cast %1281 : vector<16x128xbf16> to vector<1x16x128xbf16>
    tpu.vector_store %arg14[%c3_316, %c0_317, %c0_318], %1284 {strides = array<i32>} : memref<16x16x128xbf16, #tpu.memory_space<vmem>>, vector<1x16x128xbf16>,
    %c13_319 = arith.constant 13 : index
    %c0_320 = arith.constant 0 : index
    %c0_321 = arith.constant 0 : index
    %1285 = vector.load %arg17[%c13_319, %c0_320, %c0_321] : memref<16x16x384xbf16, #tpu.memory_space<vmem>>, vector<1x16x384xbf16>
    %1286 = vector.shape_cast %1285 : vector<1x16x384xbf16> to vector<16x384xbf16>
    %c2_322 = arith.constant 2 : index
    %c0_323 = arith.constant 0 : index
    %c0_324 = arith.constant 0 : index
    %1287 = vector.load %arg18[%c2_322, %c0_323, %c0_324] : memref<16x16x384xbf16, #tpu.memory_space<vmem>>, vector<1x16x384xbf16>
    %1288 = vector.shape_cast %1287 : vector<1x16x384xbf16> to vector<16x384xbf16>
    %1289 = arith.truncf %1232 : vector<16x128xf32> to vector<16x128xbf16>
    %cst_325 = arith.constant dense<0.000000e+00> : vector<16x384xf32>
    %1290 = tpu.matmul %1289, %4, %cst_325 {dimension_numbers = #tpu.dot_dimension_numbers<[1], [0], [0], [1], [0, 0, 1, 1], [], []>} : vector<16x128xbf16>, vector<128x384xbf16>, vector<16x384xf32> -> vector<16x384xf32>
    %1291 = arith.truncf %1276 : vector<16x128xf32> to vector<16x128xbf16>
    %cst_326 = arith.constant dense<0.000000e+00> : vector<16x384xf32>
    %1292 = tpu.matmul %1291, %5, %cst_326 {dimension_numbers = #tpu.dot_dimension_numbers<[1], [0], [0], [1], [0, 0, 1, 1], [], []>} : vector<16x128xbf16>, vector<128x384xbf16>, vector<16x384xf32> -> vector<16x384xf32>
    %1293 = vector.extract_strided_slice %1286 {offsets = [0, 0], sizes = [16, 128], strides = [1, 1]} : vector<16x384xbf16> to vector<16x128xbf16>
    %1294 = vector.extract_strided_slice %1290 {offsets = [0, 0], sizes = [16, 128], strides = [1, 1]} : vector<16x384xf32> to vector<16x128xf32>
    %1295 = arith.extf %1293 : vector<16x128xbf16> to vector<16x128xf32>
    %1296 = arith.addf %1295, %1294 : vector<16x128xf32>
    %1297 = arith.negf %1296 : vector<16x128xf32>
    %1298 = math.exp %1297 : vector<16x128xf32>
    %cst_327 = arith.constant 1.000000e+00 : f32
    %1299 = vector.broadcast %cst_327 : f32 to vector<16x128xf32>
    %1300 = arith.addf %1299, %1298 : vector<16x128xf32>
    %1301 = arith.divf %1299, %1300 : vector<16x128xf32>
    %1302 = vector.extract_strided_slice %1286 {offsets = [0, 128], sizes = [16, 128], strides = [1, 1]} : vector<16x384xbf16> to vector<16x128xbf16>
    %1303 = vector.extract_strided_slice %1290 {offsets = [0, 128], sizes = [16, 128], strides = [1, 1]} : vector<16x384xf32> to vector<16x128xf32>
    %1304 = arith.extf %1302 : vector<16x128xbf16> to vector<16x128xf32>
    %1305 = arith.addf %1304, %1303 : vector<16x128xf32>
    %1306 = arith.negf %1305 : vector<16x128xf32>
    %1307 = math.exp %1306 : vector<16x128xf32>
    %cst_328 = arith.constant 1.000000e+00 : f32
    %1308 = vector.broadcast %cst_328 : f32 to vector<16x128xf32>
    %1309 = arith.addf %1308, %1307 : vector<16x128xf32>
    %1310 = arith.divf %1308, %1309 : vector<16x128xf32>
    %1311 = vector.extract_strided_slice %1286 {offsets = [0, 256], sizes = [16, 128], strides = [1, 1]} : vector<16x384xbf16> to vector<16x128xbf16>
    %1312 = vector.extract_strided_slice %1290 {offsets = [0, 256], sizes = [16, 128], strides = [1, 1]} : vector<16x384xf32> to vector<16x128xf32>
    %1313 = arith.addf %1312, %8 : vector<16x128xf32>
    %1314 = arith.mulf %1301, %1313 : vector<16x128xf32>
    %1315 = arith.extf %1311 : vector<16x128xbf16> to vector<16x128xf32>
    %1316 = arith.addf %1315, %1314 : vector<16x128xf32>
    %1317 = math.tanh %1316 : vector<16x128xf32>
    %cst_329 = arith.constant 1.000000e+00 : f32
    %1318 = vector.broadcast %cst_329 : f32 to vector<16x128xf32>
    %1319 = arith.subf %1318, %1310 : vector<16x128xf32>
    %1320 = arith.mulf %1319, %1317 : vector<16x128xf32>
    %1321 = arith.mulf %1310, %1232 : vector<16x128xf32>
    %1322 = arith.addf %1320, %1321 : vector<16x128xf32>
    %c13_i32_330 = arith.constant 13 : i32
    %1323 = arith.addi %35, %c13_i32_330 : i32
    %1324 = vector.broadcast %1323 : i32 to vector<16x1xi32>
    %1325 = arith.cmpi sgt, %3, %1324 : vector<16x1xi32>
    %1326 = vector.shape_cast %1325 : vector<16x1xi1> to vector<16x1xi1>
    %1327 = vector.broadcast %1326 : vector<16x1xi1> to vector<16x128xi1>
    %1328 = arith.select %1327, %1322, %1232 : vector<16x128xi1>, vector<16x128xf32>
    %cst_331 = arith.constant 0.000000e+00 : f32
    %1329 = vector.shape_cast %1325 : vector<16x1xi1> to vector<16x1xi1>
    %1330 = vector.broadcast %1329 : vector<16x1xi1> to vector<16x128xi1>
    %1331 = vector.broadcast %cst_331 : f32 to vector<16x128xf32>
    %1332 = arith.select %1330, %1322, %1331 : vector<16x128xi1>, vector<16x128xf32>
    %1333 = arith.truncf %1332 : vector<16x128xf32> to vector<16x128xbf16>
    %c13_332 = arith.constant 13 : index
    %c0_333 = arith.constant 0 : index
    %c0_334 = arith.constant 0 : index
    %1334 = vector.load %arg13[%c13_332, %c0_333, %c0_334] : memref<16x16x128xbf16, #tpu.memory_space<vmem>>, vector<1x16x128xbf16>
    %1335 = vector.shape_cast %1334 : vector<1x16x128xbf16> to vector<16x128xbf16>
    %1336 = vector.shape_cast %1333 : vector<16x128xbf16> to vector<1x16x128xbf16>
    tpu.vector_store %arg13[%c13_332, %c0_333, %c0_334], %1336 {strides = array<i32>} : memref<16x16x128xbf16, #tpu.memory_space<vmem>>, vector<1x16x128xbf16>,
    %1337 = vector.extract_strided_slice %1288 {offsets = [0, 0], sizes = [16, 128], strides = [1, 1]} : vector<16x384xbf16> to vector<16x128xbf16>
    %1338 = vector.extract_strided_slice %1292 {offsets = [0, 0], sizes = [16, 128], strides = [1, 1]} : vector<16x384xf32> to vector<16x128xf32>
    %1339 = arith.extf %1337 : vector<16x128xbf16> to vector<16x128xf32>
    %1340 = arith.addf %1339, %1338 : vector<16x128xf32>
    %1341 = arith.negf %1340 : vector<16x128xf32>
    %1342 = math.exp %1341 : vector<16x128xf32>
    %cst_335 = arith.constant 1.000000e+00 : f32
    %1343 = vector.broadcast %cst_335 : f32 to vector<16x128xf32>
    %1344 = arith.addf %1343, %1342 : vector<16x128xf32>
    %1345 = arith.divf %1343, %1344 : vector<16x128xf32>
    %1346 = vector.extract_strided_slice %1288 {offsets = [0, 128], sizes = [16, 128], strides = [1, 1]} : vector<16x384xbf16> to vector<16x128xbf16>
    %1347 = vector.extract_strided_slice %1292 {offsets = [0, 128], sizes = [16, 128], strides = [1, 1]} : vector<16x384xf32> to vector<16x128xf32>
    %1348 = arith.extf %1346 : vector<16x128xbf16> to vector<16x128xf32>
    %1349 = arith.addf %1348, %1347 : vector<16x128xf32>
    %1350 = arith.negf %1349 : vector<16x128xf32>
    %1351 = math.exp %1350 : vector<16x128xf32>
    %cst_336 = arith.constant 1.000000e+00 : f32
    %1352 = vector.broadcast %cst_336 : f32 to vector<16x128xf32>
    %1353 = arith.addf %1352, %1351 : vector<16x128xf32>
    %1354 = arith.divf %1352, %1353 : vector<16x128xf32>
    %1355 = vector.extract_strided_slice %1288 {offsets = [0, 256], sizes = [16, 128], strides = [1, 1]} : vector<16x384xbf16> to vector<16x128xbf16>
    %1356 = vector.extract_strided_slice %1292 {offsets = [0, 256], sizes = [16, 128], strides = [1, 1]} : vector<16x384xf32> to vector<16x128xf32>
    %1357 = arith.addf %1356, %11 : vector<16x128xf32>
    %1358 = arith.mulf %1345, %1357 : vector<16x128xf32>
    %1359 = arith.extf %1355 : vector<16x128xbf16> to vector<16x128xf32>
    %1360 = arith.addf %1359, %1358 : vector<16x128xf32>
    %1361 = math.tanh %1360 : vector<16x128xf32>
    %cst_337 = arith.constant 1.000000e+00 : f32
    %1362 = vector.broadcast %cst_337 : f32 to vector<16x128xf32>
    %1363 = arith.subf %1362, %1354 : vector<16x128xf32>
    %1364 = arith.mulf %1363, %1361 : vector<16x128xf32>
    %1365 = arith.mulf %1354, %1276 : vector<16x128xf32>
    %1366 = arith.addf %1364, %1365 : vector<16x128xf32>
    %c2_i32_338 = arith.constant 2 : i32
    %1367 = arith.addi %36, %c2_i32_338 : i32
    %1368 = vector.broadcast %1367 : i32 to vector<16x1xi32>
    %1369 = arith.cmpi sgt, %3, %1368 : vector<16x1xi32>
    %1370 = vector.shape_cast %1369 : vector<16x1xi1> to vector<16x1xi1>
    %1371 = vector.broadcast %1370 : vector<16x1xi1> to vector<16x128xi1>
    %1372 = arith.select %1371, %1366, %1276 : vector<16x128xi1>, vector<16x128xf32>
    %cst_339 = arith.constant 0.000000e+00 : f32
    %1373 = vector.shape_cast %1369 : vector<16x1xi1> to vector<16x1xi1>
    %1374 = vector.broadcast %1373 : vector<16x1xi1> to vector<16x128xi1>
    %1375 = vector.broadcast %cst_339 : f32 to vector<16x128xf32>
    %1376 = arith.select %1374, %1366, %1375 : vector<16x128xi1>, vector<16x128xf32>
    %1377 = arith.truncf %1376 : vector<16x128xf32> to vector<16x128xbf16>
    %c2_340 = arith.constant 2 : index
    %c0_341 = arith.constant 0 : index
    %c0_342 = arith.constant 0 : index
    %1378 = vector.load %arg14[%c2_340, %c0_341, %c0_342] : memref<16x16x128xbf16, #tpu.memory_space<vmem>>, vector<1x16x128xbf16>
    %1379 = vector.shape_cast %1378 : vector<1x16x128xbf16> to vector<16x128xbf16>
    %1380 = vector.shape_cast %1377 : vector<16x128xbf16> to vector<1x16x128xbf16>
    tpu.vector_store %arg14[%c2_340, %c0_341, %c0_342], %1380 {strides = array<i32>} : memref<16x16x128xbf16, #tpu.memory_space<vmem>>, vector<1x16x128xbf16>,
    %c14_343 = arith.constant 14 : index
    %c0_344 = arith.constant 0 : index
    %c0_345 = arith.constant 0 : index
    %1381 = vector.load %arg17[%c14_343, %c0_344, %c0_345] : memref<16x16x384xbf16, #tpu.memory_space<vmem>>, vector<1x16x384xbf16>
    %1382 = vector.shape_cast %1381 : vector<1x16x384xbf16> to vector<16x384xbf16>
    %c1_346 = arith.constant 1 : index
    %c0_347 = arith.constant 0 : index
    %c0_348 = arith.constant 0 : index
    %1383 = vector.load %arg18[%c1_346, %c0_347, %c0_348] : memref<16x16x384xbf16, #tpu.memory_space<vmem>>, vector<1x16x384xbf16>
    %1384 = vector.shape_cast %1383 : vector<1x16x384xbf16> to vector<16x384xbf16>
    %1385 = arith.truncf %1328 : vector<16x128xf32> to vector<16x128xbf16>
    %cst_349 = arith.constant dense<0.000000e+00> : vector<16x384xf32>
    %1386 = tpu.matmul %1385, %4, %cst_349 {dimension_numbers = #tpu.dot_dimension_numbers<[1], [0], [0], [1], [0, 0, 1, 1], [], []>} : vector<16x128xbf16>, vector<128x384xbf16>, vector<16x384xf32> -> vector<16x384xf32>
    %1387 = arith.truncf %1372 : vector<16x128xf32> to vector<16x128xbf16>
    %cst_350 = arith.constant dense<0.000000e+00> : vector<16x384xf32>
    %1388 = tpu.matmul %1387, %5, %cst_350 {dimension_numbers = #tpu.dot_dimension_numbers<[1], [0], [0], [1], [0, 0, 1, 1], [], []>} : vector<16x128xbf16>, vector<128x384xbf16>, vector<16x384xf32> -> vector<16x384xf32>
    %1389 = vector.extract_strided_slice %1382 {offsets = [0, 0], sizes = [16, 128], strides = [1, 1]} : vector<16x384xbf16> to vector<16x128xbf16>
    %1390 = vector.extract_strided_slice %1386 {offsets = [0, 0], sizes = [16, 128], strides = [1, 1]} : vector<16x384xf32> to vector<16x128xf32>
    %1391 = arith.extf %1389 : vector<16x128xbf16> to vector<16x128xf32>
    %1392 = arith.addf %1391, %1390 : vector<16x128xf32>
    %1393 = arith.negf %1392 : vector<16x128xf32>
    %1394 = math.exp %1393 : vector<16x128xf32>
    %cst_351 = arith.constant 1.000000e+00 : f32
    %1395 = vector.broadcast %cst_351 : f32 to vector<16x128xf32>
    %1396 = arith.addf %1395, %1394 : vector<16x128xf32>
    %1397 = arith.divf %1395, %1396 : vector<16x128xf32>
    %1398 = vector.extract_strided_slice %1382 {offsets = [0, 128], sizes = [16, 128], strides = [1, 1]} : vector<16x384xbf16> to vector<16x128xbf16>
    %1399 = vector.extract_strided_slice %1386 {offsets = [0, 128], sizes = [16, 128], strides = [1, 1]} : vector<16x384xf32> to vector<16x128xf32>
    %1400 = arith.extf %1398 : vector<16x128xbf16> to vector<16x128xf32>
    %1401 = arith.addf %1400, %1399 : vector<16x128xf32>
    %1402 = arith.negf %1401 : vector<16x128xf32>
    %1403 = math.exp %1402 : vector<16x128xf32>
    %cst_352 = arith.constant 1.000000e+00 : f32
    %1404 = vector.broadcast %cst_352 : f32 to vector<16x128xf32>
    %1405 = arith.addf %1404, %1403 : vector<16x128xf32>
    %1406 = arith.divf %1404, %1405 : vector<16x128xf32>
    %1407 = vector.extract_strided_slice %1382 {offsets = [0, 256], sizes = [16, 128], strides = [1, 1]} : vector<16x384xbf16> to vector<16x128xbf16>
    %1408 = vector.extract_strided_slice %1386 {offsets = [0, 256], sizes = [16, 128], strides = [1, 1]} : vector<16x384xf32> to vector<16x128xf32>
    %1409 = arith.addf %1408, %8 : vector<16x128xf32>
    %1410 = arith.mulf %1397, %1409 : vector<16x128xf32>
    %1411 = arith.extf %1407 : vector<16x128xbf16> to vector<16x128xf32>
    %1412 = arith.addf %1411, %1410 : vector<16x128xf32>
    %1413 = math.tanh %1412 : vector<16x128xf32>
    %cst_353 = arith.constant 1.000000e+00 : f32
    %1414 = vector.broadcast %cst_353 : f32 to vector<16x128xf32>
    %1415 = arith.subf %1414, %1406 : vector<16x128xf32>
    %1416 = arith.mulf %1415, %1413 : vector<16x128xf32>
    %1417 = arith.mulf %1406, %1328 : vector<16x128xf32>
    %1418 = arith.addf %1416, %1417 : vector<16x128xf32>
    %c14_i32_354 = arith.constant 14 : i32
    %1419 = arith.addi %35, %c14_i32_354 : i32
    %1420 = vector.broadcast %1419 : i32 to vector<16x1xi32>
    %1421 = arith.cmpi sgt, %3, %1420 : vector<16x1xi32>
    %1422 = vector.shape_cast %1421 : vector<16x1xi1> to vector<16x1xi1>
    %1423 = vector.broadcast %1422 : vector<16x1xi1> to vector<16x128xi1>
    %1424 = arith.select %1423, %1418, %1328 : vector<16x128xi1>, vector<16x128xf32>
    %cst_355 = arith.constant 0.000000e+00 : f32
    %1425 = vector.shape_cast %1421 : vector<16x1xi1> to vector<16x1xi1>
    %1426 = vector.broadcast %1425 : vector<16x1xi1> to vector<16x128xi1>
    %1427 = vector.broadcast %cst_355 : f32 to vector<16x128xf32>
    %1428 = arith.select %1426, %1418, %1427 : vector<16x128xi1>, vector<16x128xf32>
    %1429 = arith.truncf %1428 : vector<16x128xf32> to vector<16x128xbf16>
    %c14_356 = arith.constant 14 : index
    %c0_357 = arith.constant 0 : index
    %c0_358 = arith.constant 0 : index
    %1430 = vector.load %arg13[%c14_356, %c0_357, %c0_358] : memref<16x16x128xbf16, #tpu.memory_space<vmem>>, vector<1x16x128xbf16>
    %1431 = vector.shape_cast %1430 : vector<1x16x128xbf16> to vector<16x128xbf16>
    %1432 = vector.shape_cast %1429 : vector<16x128xbf16> to vector<1x16x128xbf16>
    tpu.vector_store %arg13[%c14_356, %c0_357, %c0_358], %1432 {strides = array<i32>} : memref<16x16x128xbf16, #tpu.memory_space<vmem>>, vector<1x16x128xbf16>,
    %1433 = vector.extract_strided_slice %1384 {offsets = [0, 0], sizes = [16, 128], strides = [1, 1]} : vector<16x384xbf16> to vector<16x128xbf16>
    %1434 = vector.extract_strided_slice %1388 {offsets = [0, 0], sizes = [16, 128], strides = [1, 1]} : vector<16x384xf32> to vector<16x128xf32>
    %1435 = arith.extf %1433 : vector<16x128xbf16> to vector<16x128xf32>
    %1436 = arith.addf %1435, %1434 : vector<16x128xf32>
    %1437 = arith.negf %1436 : vector<16x128xf32>
    %1438 = math.exp %1437 : vector<16x128xf32>
    %cst_359 = arith.constant 1.000000e+00 : f32
    %1439 = vector.broadcast %cst_359 : f32 to vector<16x128xf32>
    %1440 = arith.addf %1439, %1438 : vector<16x128xf32>
    %1441 = arith.divf %1439, %1440 : vector<16x128xf32>
    %1442 = vector.extract_strided_slice %1384 {offsets = [0, 128], sizes = [16, 128], strides = [1, 1]} : vector<16x384xbf16> to vector<16x128xbf16>
    %1443 = vector.extract_strided_slice %1388 {offsets = [0, 128], sizes = [16, 128], strides = [1, 1]} : vector<16x384xf32> to vector<16x128xf32>
    %1444 = arith.extf %1442 : vector<16x128xbf16> to vector<16x128xf32>
    %1445 = arith.addf %1444, %1443 : vector<16x128xf32>
    %1446 = arith.negf %1445 : vector<16x128xf32>
    %1447 = math.exp %1446 : vector<16x128xf32>
    %cst_360 = arith.constant 1.000000e+00 : f32
    %1448 = vector.broadcast %cst_360 : f32 to vector<16x128xf32>
    %1449 = arith.addf %1448, %1447 : vector<16x128xf32>
    %1450 = arith.divf %1448, %1449 : vector<16x128xf32>
    %1451 = vector.extract_strided_slice %1384 {offsets = [0, 256], sizes = [16, 128], strides = [1, 1]} : vector<16x384xbf16> to vector<16x128xbf16>
    %1452 = vector.extract_strided_slice %1388 {offsets = [0, 256], sizes = [16, 128], strides = [1, 1]} : vector<16x384xf32> to vector<16x128xf32>
    %1453 = arith.addf %1452, %11 : vector<16x128xf32>
    %1454 = arith.mulf %1441, %1453 : vector<16x128xf32>
    %1455 = arith.extf %1451 : vector<16x128xbf16> to vector<16x128xf32>
    %1456 = arith.addf %1455, %1454 : vector<16x128xf32>
    %1457 = math.tanh %1456 : vector<16x128xf32>
    %cst_361 = arith.constant 1.000000e+00 : f32
    %1458 = vector.broadcast %cst_361 : f32 to vector<16x128xf32>
    %1459 = arith.subf %1458, %1450 : vector<16x128xf32>
    %1460 = arith.mulf %1459, %1457 : vector<16x128xf32>
    %1461 = arith.mulf %1450, %1372 : vector<16x128xf32>
    %1462 = arith.addf %1460, %1461 : vector<16x128xf32>
    %c1_i32_362 = arith.constant 1 : i32
    %1463 = arith.addi %36, %c1_i32_362 : i32
    %1464 = vector.broadcast %1463 : i32 to vector<16x1xi32>
    %1465 = arith.cmpi sgt, %3, %1464 : vector<16x1xi32>
    %1466 = vector.shape_cast %1465 : vector<16x1xi1> to vector<16x1xi1>
    %1467 = vector.broadcast %1466 : vector<16x1xi1> to vector<16x128xi1>
    %1468 = arith.select %1467, %1462, %1372 : vector<16x128xi1>, vector<16x128xf32>
    %cst_363 = arith.constant 0.000000e+00 : f32
    %1469 = vector.shape_cast %1465 : vector<16x1xi1> to vector<16x1xi1>
    %1470 = vector.broadcast %1469 : vector<16x1xi1> to vector<16x128xi1>
    %1471 = vector.broadcast %cst_363 : f32 to vector<16x128xf32>
    %1472 = arith.select %1470, %1462, %1471 : vector<16x128xi1>, vector<16x128xf32>
    %1473 = arith.truncf %1472 : vector<16x128xf32> to vector<16x128xbf16>
    %c1_364 = arith.constant 1 : index
    %c0_365 = arith.constant 0 : index
    %c0_366 = arith.constant 0 : index
    %1474 = vector.load %arg14[%c1_364, %c0_365, %c0_366] : memref<16x16x128xbf16, #tpu.memory_space<vmem>>, vector<1x16x128xbf16>
    %1475 = vector.shape_cast %1474 : vector<1x16x128xbf16> to vector<16x128xbf16>
    %1476 = vector.shape_cast %1473 : vector<16x128xbf16> to vector<1x16x128xbf16>
    tpu.vector_store %arg14[%c1_364, %c0_365, %c0_366], %1476 {strides = array<i32>} : memref<16x16x128xbf16, #tpu.memory_space<vmem>>, vector<1x16x128xbf16>,
    %c15_367 = arith.constant 15 : index
    %c0_368 = arith.constant 0 : index
    %c0_369 = arith.constant 0 : index
    %1477 = vector.load %arg17[%c15_367, %c0_368, %c0_369] : memref<16x16x384xbf16, #tpu.memory_space<vmem>>, vector<1x16x384xbf16>
    %1478 = vector.shape_cast %1477 : vector<1x16x384xbf16> to vector<16x384xbf16>
    %c0_370 = arith.constant 0 : index
    %c0_371 = arith.constant 0 : index
    %c0_372 = arith.constant 0 : index
    %1479 = vector.load %arg18[%c0_370, %c0_371, %c0_372] : memref<16x16x384xbf16, #tpu.memory_space<vmem>>, vector<1x16x384xbf16>
    %1480 = vector.shape_cast %1479 : vector<1x16x384xbf16> to vector<16x384xbf16>
    %1481 = arith.truncf %1424 : vector<16x128xf32> to vector<16x128xbf16>
    %cst_373 = arith.constant dense<0.000000e+00> : vector<16x384xf32>
    %1482 = tpu.matmul %1481, %4, %cst_373 {dimension_numbers = #tpu.dot_dimension_numbers<[1], [0], [0], [1], [0, 0, 1, 1], [], []>} : vector<16x128xbf16>, vector<128x384xbf16>, vector<16x384xf32> -> vector<16x384xf32>
    %1483 = arith.truncf %1468 : vector<16x128xf32> to vector<16x128xbf16>
    %cst_374 = arith.constant dense<0.000000e+00> : vector<16x384xf32>
    %1484 = tpu.matmul %1483, %5, %cst_374 {dimension_numbers = #tpu.dot_dimension_numbers<[1], [0], [0], [1], [0, 0, 1, 1], [], []>} : vector<16x128xbf16>, vector<128x384xbf16>, vector<16x384xf32> -> vector<16x384xf32>
    %1485 = vector.extract_strided_slice %1478 {offsets = [0, 0], sizes = [16, 128], strides = [1, 1]} : vector<16x384xbf16> to vector<16x128xbf16>
    %1486 = vector.extract_strided_slice %1482 {offsets = [0, 0], sizes = [16, 128], strides = [1, 1]} : vector<16x384xf32> to vector<16x128xf32>
    %1487 = arith.extf %1485 : vector<16x128xbf16> to vector<16x128xf32>
    %1488 = arith.addf %1487, %1486 : vector<16x128xf32>
    %1489 = arith.negf %1488 : vector<16x128xf32>
    %1490 = math.exp %1489 : vector<16x128xf32>
    %cst_375 = arith.constant 1.000000e+00 : f32
    %1491 = vector.broadcast %cst_375 : f32 to vector<16x128xf32>
    %1492 = arith.addf %1491, %1490 : vector<16x128xf32>
    %1493 = arith.divf %1491, %1492 : vector<16x128xf32>
    %1494 = vector.extract_strided_slice %1478 {offsets = [0, 128], sizes = [16, 128], strides = [1, 1]} : vector<16x384xbf16> to vector<16x128xbf16>
    %1495 = vector.extract_strided_slice %1482 {offsets = [0, 128], sizes = [16, 128], strides = [1, 1]} : vector<16x384xf32> to vector<16x128xf32>
    %1496 = arith.extf %1494 : vector<16x128xbf16> to vector<16x128xf32>
    %1497 = arith.addf %1496, %1495 : vector<16x128xf32>
    %1498 = arith.negf %1497 : vector<16x128xf32>
    %1499 = math.exp %1498 : vector<16x128xf32>
    %cst_376 = arith.constant 1.000000e+00 : f32
    %1500 = vector.broadcast %cst_376 : f32 to vector<16x128xf32>
    %1501 = arith.addf %1500, %1499 : vector<16x128xf32>
    %1502 = arith.divf %1500, %1501 : vector<16x128xf32>
    %1503 = vector.extract_strided_slice %1478 {offsets = [0, 256], sizes = [16, 128], strides = [1, 1]} : vector<16x384xbf16> to vector<16x128xbf16>
    %1504 = vector.extract_strided_slice %1482 {offsets = [0, 256], sizes = [16, 128], strides = [1, 1]} : vector<16x384xf32> to vector<16x128xf32>
    %1505 = arith.addf %1504, %8 : vector<16x128xf32>
    %1506 = arith.mulf %1493, %1505 : vector<16x128xf32>
    %1507 = arith.extf %1503 : vector<16x128xbf16> to vector<16x128xf32>
    %1508 = arith.addf %1507, %1506 : vector<16x128xf32>
    %1509 = math.tanh %1508 : vector<16x128xf32>
    %cst_377 = arith.constant 1.000000e+00 : f32
    %1510 = vector.broadcast %cst_377 : f32 to vector<16x128xf32>
    %1511 = arith.subf %1510, %1502 : vector<16x128xf32>
    %1512 = arith.mulf %1511, %1509 : vector<16x128xf32>
    %1513 = arith.mulf %1502, %1424 : vector<16x128xf32>
    %1514 = arith.addf %1512, %1513 : vector<16x128xf32>
    %c15_i32_378 = arith.constant 15 : i32
    %1515 = arith.addi %35, %c15_i32_378 : i32
    %1516 = vector.broadcast %1515 : i32 to vector<16x1xi32>
    %1517 = arith.cmpi sgt, %3, %1516 : vector<16x1xi32>
    %1518 = vector.shape_cast %1517 : vector<16x1xi1> to vector<16x1xi1>
    %1519 = vector.broadcast %1518 : vector<16x1xi1> to vector<16x128xi1>
    %1520 = arith.select %1519, %1514, %1424 : vector<16x128xi1>, vector<16x128xf32>
    %cst_379 = arith.constant 0.000000e+00 : f32
    %1521 = vector.shape_cast %1517 : vector<16x1xi1> to vector<16x1xi1>
    %1522 = vector.broadcast %1521 : vector<16x1xi1> to vector<16x128xi1>
    %1523 = vector.broadcast %cst_379 : f32 to vector<16x128xf32>
    %1524 = arith.select %1522, %1514, %1523 : vector<16x128xi1>, vector<16x128xf32>
    %1525 = arith.truncf %1524 : vector<16x128xf32> to vector<16x128xbf16>
    %c15_380 = arith.constant 15 : index
    %c0_381 = arith.constant 0 : index
    %c0_382 = arith.constant 0 : index
    %1526 = vector.load %arg13[%c15_380, %c0_381, %c0_382] : memref<16x16x128xbf16, #tpu.memory_space<vmem>>, vector<1x16x128xbf16>
    %1527 = vector.shape_cast %1526 : vector<1x16x128xbf16> to vector<16x128xbf16>
    %1528 = vector.shape_cast %1525 : vector<16x128xbf16> to vector<1x16x128xbf16>
    tpu.vector_store %arg13[%c15_380, %c0_381, %c0_382], %1528 {strides = array<i32>} : memref<16x16x128xbf16, #tpu.memory_space<vmem>>, vector<1x16x128xbf16>,
    %1529 = vector.extract_strided_slice %1480 {offsets = [0, 0], sizes = [16, 128], strides = [1, 1]} : vector<16x384xbf16> to vector<16x128xbf16>
    %1530 = vector.extract_strided_slice %1484 {offsets = [0, 0], sizes = [16, 128], strides = [1, 1]} : vector<16x384xf32> to vector<16x128xf32>
    %1531 = arith.extf %1529 : vector<16x128xbf16> to vector<16x128xf32>
    %1532 = arith.addf %1531, %1530 : vector<16x128xf32>
    %1533 = arith.negf %1532 : vector<16x128xf32>
    %1534 = math.exp %1533 : vector<16x128xf32>
    %cst_383 = arith.constant 1.000000e+00 : f32
    %1535 = vector.broadcast %cst_383 : f32 to vector<16x128xf32>
    %1536 = arith.addf %1535, %1534 : vector<16x128xf32>
    %1537 = arith.divf %1535, %1536 : vector<16x128xf32>
    %1538 = vector.extract_strided_slice %1480 {offsets = [0, 128], sizes = [16, 128], strides = [1, 1]} : vector<16x384xbf16> to vector<16x128xbf16>
    %1539 = vector.extract_strided_slice %1484 {offsets = [0, 128], sizes = [16, 128], strides = [1, 1]} : vector<16x384xf32> to vector<16x128xf32>
    %1540 = arith.extf %1538 : vector<16x128xbf16> to vector<16x128xf32>
    %1541 = arith.addf %1540, %1539 : vector<16x128xf32>
    %1542 = arith.negf %1541 : vector<16x128xf32>
    %1543 = math.exp %1542 : vector<16x128xf32>
    %cst_384 = arith.constant 1.000000e+00 : f32
    %1544 = vector.broadcast %cst_384 : f32 to vector<16x128xf32>
    %1545 = arith.addf %1544, %1543 : vector<16x128xf32>
    %1546 = arith.divf %1544, %1545 : vector<16x128xf32>
    %1547 = vector.extract_strided_slice %1480 {offsets = [0, 256], sizes = [16, 128], strides = [1, 1]} : vector<16x384xbf16> to vector<16x128xbf16>
    %1548 = vector.extract_strided_slice %1484 {offsets = [0, 256], sizes = [16, 128], strides = [1, 1]} : vector<16x384xf32> to vector<16x128xf32>
    %1549 = arith.addf %1548, %11 : vector<16x128xf32>
    %1550 = arith.mulf %1537, %1549 : vector<16x128xf32>
    %1551 = arith.extf %1547 : vector<16x128xbf16> to vector<16x128xf32>
    %1552 = arith.addf %1551, %1550 : vector<16x128xf32>
    %1553 = math.tanh %1552 : vector<16x128xf32>
    %cst_385 = arith.constant 1.000000e+00 : f32
    %1554 = vector.broadcast %cst_385 : f32 to vector<16x128xf32>
    %1555 = arith.subf %1554, %1546 : vector<16x128xf32>
    %1556 = arith.mulf %1555, %1553 : vector<16x128xf32>
    %1557 = arith.mulf %1546, %1468 : vector<16x128xf32>
    %1558 = arith.addf %1556, %1557 : vector<16x128xf32>
    %c0_i32_386 = arith.constant 0 : i32
    %1559 = arith.addi %36, %c0_i32_386 : i32
    %1560 = vector.broadcast %1559 : i32 to vector<16x1xi32>
    %1561 = arith.cmpi sgt, %3, %1560 : vector<16x1xi32>
    %1562 = vector.shape_cast %1561 : vector<16x1xi1> to vector<16x1xi1>
    %1563 = vector.broadcast %1562 : vector<16x1xi1> to vector<16x128xi1>
    %1564 = arith.select %1563, %1558, %1468 : vector<16x128xi1>, vector<16x128xf32>
    %cst_387 = arith.constant 0.000000e+00 : f32
    %1565 = vector.shape_cast %1561 : vector<16x1xi1> to vector<16x1xi1>
    %1566 = vector.broadcast %1565 : vector<16x1xi1> to vector<16x128xi1>
    %1567 = vector.broadcast %cst_387 : f32 to vector<16x128xf32>
    %1568 = arith.select %1566, %1558, %1567 : vector<16x128xi1>, vector<16x128xf32>
    %1569 = arith.truncf %1568 : vector<16x128xf32> to vector<16x128xbf16>
    %c0_388 = arith.constant 0 : index
    %c0_389 = arith.constant 0 : index
    %c0_390 = arith.constant 0 : index
    %1570 = vector.load %arg14[%c0_388, %c0_389, %c0_390] : memref<16x16x128xbf16, #tpu.memory_space<vmem>>, vector<1x16x128xbf16>
    %1571 = vector.shape_cast %1570 : vector<1x16x128xbf16> to vector<16x128xbf16>
    %1572 = vector.shape_cast %1569 : vector<16x128xbf16> to vector<1x16x128xbf16>
    tpu.vector_store %arg14[%c0_388, %c0_389, %c0_390], %1572 {strides = array<i32>} : memref<16x16x128xbf16, #tpu.memory_space<vmem>>, vector<1x16x128xbf16>,
    %c0_391 = arith.constant 0 : index
    %c0_392 = arith.constant 0 : index
    %1573 = vector.load %arg15[%c0_391, %c0_392] : memref<16x128xf32, #tpu.memory_space<vmem>>, vector<16x128xf32>
    tpu.vector_store %arg15[%c0_391, %c0_392], %1520 {strides = array<i32>} : memref<16x128xf32, #tpu.memory_space<vmem>>, vector<16x128xf32>,
    %c0_393 = arith.constant 0 : index
    %c0_394 = arith.constant 0 : index
    %1574 = vector.load %arg16[%c0_393, %c0_394] : memref<16x128xf32, #tpu.memory_space<vmem>>, vector<16x128xf32>
    tpu.vector_store %arg16[%c0_393, %c0_394], %1564 {strides = array<i32>} : memref<16x128xf32, #tpu.memory_space<vmem>>, vector<16x128xf32>,
    return
  }
  func.func @transform_0(%arg0: i32, %arg1: i32) -> (i32, i32) {
    %c0_i32 = arith.constant 0 : i32
    %c0_i32_0 = arith.constant 0 : i32
    return %arg0, %c0_i32 : i32, i32
  }
  func.func @transform_1(%arg0: i32, %arg1: i32) -> (i32, i32, i32) {
    %c0_i32 = arith.constant 0 : i32
    %c0_i32_0 = arith.constant 0 : i32
    return %arg1, %arg0, %c0_i32 : i32, i32, i32
  }
  func.func @transform_2(%arg0: i32, %arg1: i32) -> (i32, i32, i32) {
    %c0_i32 = arith.constant 0 : i32
    %0 = arith.subi %c0_i32, %arg1 : i32
    %c0_i32_0 = arith.constant 0 : i32
    %c0_i32_1 = arith.constant 0 : i32
    return %0, %arg0, %c0_i32_0 : i32, i32, i32
  }
  func.func @transform_3(%arg0: i32, %arg1: i32) -> (i32, i32) {
    %c0_i32 = arith.constant 0 : i32
    %c0_i32_0 = arith.constant 0 : i32
    %c0_i32_1 = arith.constant 0 : i32
    return %c0_i32, %c0_i32_0 : i32, i32
  }
  func.func @transform_4(%arg0: i32, %arg1: i32) -> (i32, i32) {
    %c0_i32 = arith.constant 0 : i32
    %c0_i32_0 = arith.constant 0 : i32
    %c0_i32_1 = arith.constant 0 : i32
    return %c0_i32, %c0_i32_0 : i32, i32
  }
  func.func @transform_5(%arg0: i32, %arg1: i32) -> (i32, i32) {
    %c0_i32 = arith.constant 0 : i32
    %c0_i32_0 = arith.constant 0 : i32
    %c0_i32_1 = arith.constant 0 : i32
    return %c0_i32, %c0_i32_0 : i32, i32
  }
  func.func @transform_6(%arg0: i32, %arg1: i32) -> (i32, i32) {
    %c0_i32 = arith.constant 0 : i32
    %c0_i32_0 = arith.constant 0 : i32
    %c0_i32_1 = arith.constant 0 : i32
    return %c0_i32, %c0_i32_0 : i32, i32
  }
  func.func @transform_7(%arg0: i32, %arg1: i32) -> (i32, i32) {
    %c0_i32 = arith.constant 0 : i32
    %c0_i32_0 = arith.constant 0 : i32
    %c0_i32_1 = arith.constant 0 : i32
    return %c0_i32, %c0_i32_0 : i32, i32
  }
  func.func @transform_8(%arg0: i32, %arg1: i32) -> (i32, i32) {
    %c0_i32 = arith.constant 0 : i32
    %c0_i32_0 = arith.constant 0 : i32
    %c0_i32_1 = arith.constant 0 : i32
    return %c0_i32, %c0_i32_0 : i32, i32
  }
  func.func @transform_9(%arg0: i32, %arg1: i32) -> (i32, i32) {
    %c0_i32 = arith.constant 0 : i32
    %c0_i32_0 = arith.constant 0 : i32
    %c0_i32_1 = arith.constant 0 : i32
    return %c0_i32, %c0_i32_0 : i32, i32
  }
  func.func @transform_10(%arg0: i32, %arg1: i32) -> (i32, i32) {
    %c0_i32 = arith.constant 0 : i32
    %c0_i32_0 = arith.constant 0 : i32
    %c0_i32_1 = arith.constant 0 : i32
    return %c0_i32, %c0_i32_0 : i32, i32
  }
  func.func @transform_11(%arg0: i32, %arg1: i32) -> (i32, i32, i32) {
    %c0_i32 = arith.constant 0 : i32
    %c0_i32_0 = arith.constant 0 : i32
    return %arg1, %arg0, %c0_i32 : i32, i32, i32
  }
  func.func @transform_12(%arg0: i32, %arg1: i32) -> (i32, i32, i32) {
    %c0_i32 = arith.constant 0 : i32
    %0 = arith.subi %c0_i32, %arg1 : i32
    %c0_i32_0 = arith.constant 0 : i32
    %c0_i32_1 = arith.constant 0 : i32
    return %0, %arg0, %c0_i32_0 : i32, i32, i32
  }
}

</mosaic_0001>

<bundles_post_ra>
// kernel: tpu_custom_call.1
= control target key start
LH: loop header
LB: loop body
LE: loop exit
PB: predicated region body
PF: predicated region fallthrough
CT: control target
= control target key end

     0   :  { %18 = vsyncpa [#allocation7], 0  ;;  %s13858_s0 = inlined_call_operand.vmem [shape: s32[16,1], index: 0, kind: input, shape index: {}]   ;;  %s13859_s1 = inlined_call_operand.hbm [shape: bf16[16,16,16], index: 1, kind: input, shape index: {}]   ;;  %s13860_s2 = inlined_call_operand.hbm [shape: bf16[16,16,16], index: 2, kind: input, shape index: {}]   ;;  %s13861_s3 = inlined_call_operand.hbm [shape: bf16[16,384], index: 3, kind: input, shape index: {}]   ;;  %s13862_s4 = inlined_call_operand.vmem [shape: bf16[16,384], index: 4, kind: input, shape index: {}]   ;;  %s13863_s5 = inlined_call_operand.hbm [shape: f32[1,384], index: 5, kind: input, shape index: {}]   ;;  %s13864_s6 = inlined_call_operand.vmem [shape: f32[1,384], index: 6, kind: input, shape index: {}]   ;;  %s13865_s7 = inlined_call_operand.hbm [shape: bf16[128,384], index: 7, kind: input, shape index: {}]   ;;  %s13866_s8 = inlined_call_operand.hbm [shape: bf16[128,384], index: 8, kind: input, shape index: {}]   ;;  %s13867_s9 = inlined_call_operand.vmem [shape: f32[1,128], index: 9, kind: input, shape index: {}]   ;;  %s13868_s10 = inlined_call_operand.vmem [shape: f32[1,128], index: 10, kind: input, shape index: {}]   ;;  %s13869_s11 = inlined_call_operand.hbm [shape: bf16[16,16,128], index: 11, kind: output, shape index: {0}]   ;;  %s13870_s12 = inlined_call_operand.hbm [shape: bf16[16,16,128], index: 12, kind: output, shape index: {1}]  }
   0x1   :  { %19 = vsyncpa [#allocation10], 0 }
   0x2   :  { %20 = vsyncpa [#allocation13], 0 }
   0x3   :  { %21 = vsyncpa [#allocation16], 0 }
   0x4   :  { %22 = vsyncpa [#allocation8], 0 }
   0x5   :  { %23 = vsyncpa [#allocation19], 0  ;;  %s11050_s21 = smov [#allocation9]   ;;  %s11051_s23 = smov [#allocation12]  }
   0x6   :  { %s48_s22 = sshll.u32 %s11050_s21, 4  ;;  %s75_s24 = sshll.u32 %s11051_s23, 4  ;;  %s49_s22 = int_to_ptr.vmem [resolvable:$true] %s48_s22  ;;  %s76_s24 = int_to_ptr.vmem [resolvable:$true] %s75_s24 }
   0x7   :  { %s10886_s25 = scalar_lea.vmem %s49_s22, 2048  ;;  %p10891_p1 = scmp.lt.s32.totalorder %s49_s22, %s49_s22 }
   0x8   :  { %p10887_p0 = scmp.ne.s32.totalorder %s49_s22, %s10886_s25  ;;  %p10892_p2 = scmp.lt.s32.totalorder %s10886_s25, %s10886_s25 }
   0xa   :  { %p10893_p3 = por %p10892_p2, %p10891_p1 }
   0xc   :  { %p10894_p4 = pnand %p10893_p3, %p10887_p0 }
   0xe   :  { %10897 = shalt.err (!%p10894_p4)
}
   0xf   :  { %s11052_s26 = smov 64   ;;  %s11053_s27 = smov 4  }
  0x10   :  { %54 = dma.hbm_to_vmem [thread:$0]  %s13860_s2, 2048, %s49_s22, [#allocation10], %s11052_s26, %s11052_s26, %s11053_s27  }
  0x11   :  { %s10906_s30 = scalar_lea.vmem %s76_s24, 48  ;;  %s10910_s13 = scalar_lea.vmem %s76_s24, 64 }
  0x12   :  { %p10907_p5 = scmp.ne.s32.totalorder %s76_s24, %s10906_s30  ;;  %p10911_p6 = scmp.lt.s32.totalorder %s76_s24, %s76_s24 }
  0x13   :  { %p10912_p7 = scmp.lt.s32.totalorder %s10910_s13, %s10906_s30 }
  0x15   :  { %p10913_p8 = por %p10912_p7, %p10911_p6 }
  0x17   :  { %p10914_p9 = pnand %p10913_p8, %p10907_p5 }
  0x19   :  { %10917 = shalt.err (!%p10914_p9)
}
  0x1a   :  { %78 = dma.hbm_to_vmem [thread:$0]  %s13863_s5, 48, %s76_s24, [#allocation13]  }
  0x1b   :  { %s11054_s16 = smov [#allocation6]   ;;  %s11055_s18 = smov [#allocation11]  }
  0x1c   :  { %s31_s17 = sshll.u32 %s11054_s16, 4  ;;  %s60_s19 = sshll.u32 %s11055_s18, 4  ;;  %s32_s17 = int_to_ptr.vmem [resolvable:$true] %s31_s17  ;;  %s61_s19 = int_to_ptr.vmem [resolvable:$true] %s60_s19 }
  0x1d   :  { %s10926_s20 = scalar_lea.vmem %s32_s17, 2048  ;;  %p10931_p11 = scmp.lt.s32.totalorder %s32_s17, %s32_s17 }
  0x1e   :  { %p10927_p10 = scmp.ne.s32.totalorder %s32_s17, %s10926_s20  ;;  %p10932_p12 = scmp.lt.s32.totalorder %s10926_s20, %s10926_s20 }
  0x20   :  { %p10933_p13 = por %p10932_p12, %p10931_p11 }
  0x22   :  { %p10934_p0 = pnand %p10933_p13, %p10927_p10 }
  0x24   :  { %10937 = shalt.err (!%p10934_p0)
}
  0x25   :  { %37 = dma.hbm_to_vmem [thread:$0]  %s13859_s1, 2048, %s32_s17, [#allocation7], %s11052_s26, %s11052_s26, %s11053_s27  }
  0x26   :  { %s10946_s5 = scalar_lea.vmem %s61_s19, 384  ;;  %p10951_p2 = scmp.lt.s32.totalorder %s61_s19, %s61_s19 }
  0x27   :  { %p10947_p1 = scmp.ne.s32.totalorder %s61_s19, %s10946_s5  ;;  %p10952_p3 = scmp.lt.s32.totalorder %s10946_s5, %s10946_s5 }
  0x29   :  { %p10953_p4 = por %p10952_p3, %p10951_p2 }
  0x2b   :  { %p10954_p5 = pnand %p10953_p4, %p10947_p1 }
  0x2d   :  { %10957 = shalt.err (!%p10954_p5)
}
  0x2e   :  { %s11056_s22 = smov 192   ;;  %s11057_s23 = smov 12  }
  0x2f   :  { %66 = dma.hbm_to_vmem [thread:$0]  %s13861_s3, 384, %s61_s19, [#allocation10], %s11056_s22, %s11056_s22, %s11057_s23  }
  0x30   :  { %s11058_s28 = smov [#allocation14]   ;;  %s11059_s30 = smov [#allocation15]  }
  0x31   :  { %s86_s29 = sshll.u32 %s11058_s28, 4  ;;  %s98_s13 = sshll.u32 %s11059_s30, 4  ;;  %s87_s29 = int_to_ptr.vmem [resolvable:$true] %s86_s29  ;;  %s99_s13 = int_to_ptr.vmem [resolvable:$true] %s98_s13 }
  0x32   :  { %s10966_s1 = scalar_lea.vmem %s87_s29, 3072  ;;  %p10971_p7 = scmp.lt.s32.totalorder %s87_s29, %s87_s29 }
  0x33   :  { %p10967_p6 = scmp.ne.s32.totalorder %s87_s29, %s10966_s1  ;;  %p10972_p8 = scmp.lt.s32.totalorder %s10966_s1, %s10966_s1 }
  0x35   :  { %p10973_p9 = por %p10972_p8, %p10971_p7 }
  0x37   :  { %p10974_p10 = pnand %p10973_p9, %p10967_p6 }
  0x39   :  { %10977 = shalt.err (!%p10974_p10)
}
  0x3a   :  { %92 = dma.hbm_to_vmem [thread:$0]  %s13865_s7, 3072, %s87_s29, [#allocation13], %s11056_s22, %s11056_s22, %s11057_s23  }
  0x3b   :  { %s10986_s16 = scalar_lea.vmem %s99_s13, 3072  ;;  %p10991_p12 = scmp.lt.s32.totalorder %s99_s13, %s99_s13 }
  0x3c   :  { %p10987_p11 = scmp.ne.s32.totalorder %s99_s13, %s10986_s16  ;;  %p10992_p13 = scmp.lt.s32.totalorder %s10986_s16, %s10986_s16 }
  0x3e   :  { %p10993_p0 = por %p10992_p13, %p10991_p12 }
  0x40   :  { %p10994_p1 = pnand %p10993_p0, %p10987_p11 }
  0x42   :  { %10997 = shalt.err (!%p10994_p1)
}
  0x43   :  { %104 = dma.hbm_to_vmem [thread:$0]  %s13866_s8, 3072, %s99_s13, [#allocation16], %s11056_s22, %s11056_s22, %s11057_s23  }
  0x44   :  { %11038 = dma.done.wait [#allocation7], 2048  }
  0x45   :  { %11039 = vsyncadd [#allocation7], 4294965248 }
  0x46   :  { %11040 = dma.done.wait [#allocation10], 2432  }
  0x47   :  { %11041 = vsyncadd [#allocation10], 4294964864 }
  0x48   :  { %11042 = dma.done.wait [#allocation13], 3120  }
  0x49   :  { %11043 = vsyncadd [#allocation13], 4294964176 }
  0x4a   :  { %11044 = dma.done.wait [#allocation16], 3072  }
  0x4b   :  { %11045 = vsyncadd [#allocation16], 4294964224  ;;  %v13871_v0 = vmov 0   ;;  %v9881_v1 = vld [vmem:[#allocation11 + $0x4] ss:$12 sps:$4 sm:$0xff]   ;;  %vm369_vm0 = vcmask 130048  }
  0x4c   :  { %450 = vmatprep.mubr.bf16.mxu0 %v13871_v0  ;;  %9879 = vset.pattern.permute.xlu0 %v13871_v0  ;;  %v9883_v2 = vld [vmem:[#allocation11] ss:$12 sps:$4 sm:$0xff]   ;;  %v9885_v4 = vld [vmem:[%s13862_s4 + $0x8] ss:$12 sps:$4 sm:$0xff]   ;;  %v9887_v5 = vld [vmem:[#allocation11 + $0x8] ss:$12 sps:$4 sm:$0xff]  }
  0x4d   :  { %9880 = vset.pattern.permute.xlu1 %v13871_v0  ;;  %432 = vmatprep.subr.bf16.mxu0 %v9881_v1  ;;  %v9884_v3 = vld [vmem:[#allocation6] sm:$0xff]   ;;  %v9891_v6 = vld [vmem:[%s13862_s4 + $0x4] ss:$12 sps:$4 sm:$0xff]   ;;  %v9889_v7 = vld [vmem:[%s13862_s4] ss:$12 sps:$4 sm:$0xff]   ;;  %v13895_v10 = vmov 0.0  }
  0x4e   :  { %433 = vmatpush1.bf16.msra.mxu0 %v9883_v2  ;;  %9157 = vmatprep.mubr.msk.bf16.mxu1 %vm369_vm0, %v9884_v3  ;;  %v9886_v8 = vld [vmem:[#allocation6 + $0x8] sm:$0xff]   ;;  %v9888_v9 = vld [vmem:[#allocation6 + $0x10] sm:$0xff]   ;;  %v9892_v11 = vld [vmem:[#allocation6 + $0x18] sm:$0xff]  }
  0x4f   :  { %9189 = vmatprep.subr.bf16.mxu0 %v9885_v4  ;;  %9155 = vmatprep.subr.bf16.mxu1 %v9887_v5  ;;  %v9893_v12 = vld [vmem:[#allocation6 + $0x20] sm:$0xff]   ;;  %v9894_v13 = vld [vmem:[#allocation6 + $0x28] sm:$0xff]   ;;  %v9895_v14 = vld [vmem:[#allocation6 + $0x30] sm:$0xff]  }
  0x50   :  { %9156 = vmatpush3.bf16.msra.mxu1 %v9887_v5  ;;  %v9913_v15 = vld [vmem:[#allocation14 + $0xac] ss:$12 sps:$4 sm:$0xff]   ;;  %v9896_v16 = vld [vmem:[#allocation6 + $0x38] sm:$0xff]   ;;  %v9897_v17 = vld [vmem:[#allocation6 + $0x40] sm:$0xff]  }
  0x51   :  { %8018 = vmatmul.mubr.msk.bf16.vlgmr.msra.gmra.mxu0 %vm369_vm0, %v9884_v3  ;;  %1367 = vmatprep.subr.bf16.mxu1 %v9891_v6  ;;  %v9898_v18 = vld [vmem:[#allocation6 + $0x48] sm:$0xff]   ;;  %v9899_v19 = vld [vmem:[#allocation6 + $0x50] sm:$0xff]   ;;  %v11190_v20 = vld [vmem:[#allocation6 + $0x58] sm:$0xff]  }
  0x52   :  { %9190 = vmatpush3.bf16.msra.mxu0 %v9885_v4  ;;  %460 = vmatprep.mubr.bf16.mxu0 %v13871_v0  ;;  %v11193_v21 = vld [vmem:[#allocation6 + $0x60] sm:$0xff]   ;;  %v11201_v22 = vld [vmem:[#allocation6 + $0x68] sm:$0xff]   ;;  %v11203_v23 = vld [vmem:[#allocation6 + $0x70] sm:$0xff]  }
  0x53   :  { %9158 = vmatmul.mubr.msk.bf16.vlgmr.msra.gmra.mxu1 %vm369_vm0, %v9886_v8  ;;  %2236 = vmatprep.subr.bf16.mxu0 %v9913_v15  ;;  %v11211_v24 = vld [vmem:[#allocation6 + $0x78] sm:$0xff]   ;;  %v11219_v25 = vld [vmem:[%s13858_s0] sm:$0xff]  ;;  %v11227_v27 = vld [vmem:[#allocation9] sm:$0xff]  }
  0x54   :  { %1368 = vmatpush1.bf16.msra.mxu1 %v9889_v7  ;;  %9161 = vmatprep.mubr.msk.bf16.mxu1 %vm369_vm0, %v9888_v9  ;;  %vm2590_vm1 = vcmp.gt.s32.totalorder %v11219_v25, 0  ;;  %v11230_v28 = vld [vmem:[#allocation14 + $0xb0] ss:$12 sps:$4 sm:$0xff]   ;;  %v11235_v29 = vld [vmem:[%s13858_s0 + $0x8] sm:$0xff]  ;;  %vm2939_vm3 = vcmp.gt.s32.totalorder %v11219_v25, 1  ;;  %vm3024_vm4 = vcmp.gt.s32.totalorder %v11219_v25, 14 }
  0x55   :  { %9223 = vmatprep.subr.bf16.mxu1 %v13895_v10  ;;  %v11225_v26 = vsel %vm2590_vm1, 1, %v13871_v0  ;;  %vm2591_vm2 = vcmp.gt.s32.totalorder %v11235_v29, 0  ;;  %v11246_v31 = vld [vmem:[#allocation14 + $0x98] ss:$12 sps:$4 sm:$0xff]   ;;  %v11253_v32 = vsel %vm2939_vm3, 1, %v13871_v0  ;;  %v11255_v33 = vld [vmem:[#allocation9 + $0x8] sm:$0xff]  }
  0x56   :  { %2595 = vperm.xlu0 %9879, %v11225_v26   ;;  %v11239_v30 = vsel %vm2591_vm2, 1, %v13871_v0  ;;  %v11259_v34 = vld [vmem:[#allocation14 + $0x80] ss:$12 sps:$4 sm:$0xff]   ;;  %v11264_v35 = vsel %vm3024_vm4, 1, %v13871_v0  ;;  %v11271_v36 = vld [vmem:[#allocation14 + $0x68] ss:$12 sps:$4 sm:$0xff]  }
  0x57   :  { %vm3289_vm5 = vcmp.gt.s32.totalorder %v11219_v25, 2  ;;  %v11280_v38 = vld [vmem:[#allocation9 + $0x10] sm:$0xff]   ;;  %v11284_v39 = vld [vmem:[#allocation14 + $0x50] ss:$12 sps:$4 sm:$0xff]   ;;  %vm3374_vm6 = vcmp.gt.s32.totalorder %v11219_v25, 13  ;;  %vm3639_vm7 = vcmp.gt.s32.totalorder %v11219_v25, 3 }
  0x58   :  { %v11278_v37 = vsel %vm3289_vm5, 1, %v13871_v0  ;;  %v11289_v40 = vsel %vm3374_vm6, 1, %v13871_v0  ;;  %v11296_v41 = vld [vmem:[#allocation14 + $0x38] ss:$12 sps:$4 sm:$0xff]   ;;  %v11304_v42 = vsel %vm3639_vm7, 1, %v13871_v0  ;;  %v11306_v43 = vld [vmem:[#allocation9 + $0x18] sm:$0xff]  }
  0x59   :  { %8019 = vmatmul.mubr.msk.bf16.gmra.mxu0 %vm369_vm0, %v9886_v8  ;;  %v9954_v44 = vld [vmem:[#allocation14 + $0x20] ss:$12 sps:$4 sm:$0xff]   ;;  %vm3724_vm8 = vcmp.gt.s32.totalorder %v11219_v25, 12  ;;  %v9967_v46 = vld [vmem:[#allocation14 + $0x8] ss:$12 sps:$4 sm:$0xff]   ;;  %vm2674_vm9 = vcmp.gt.s32.totalorder %v11219_v25, 15 }
  0x5a   :  { %470 = vmatprep.mubr.bf16.mxu0 %v13871_v0  ;;  %2598 = vperm.xlu0 %9879, %v11239_v30   ;;  %v11313_v45 = vsel %vm3724_vm8, 1, %v13871_v0  ;;  %v11324_v47 = vsel %vm2674_vm9, 1, %v13871_v0  ;;  %vm3989_vm10 = vcmp.gt.s32.totalorder %v11219_v25, 4  ;;  %v11332_v49 = vld [vmem:[#allocation9 + $0x20] sm:$0xff]   ;;  %vm2675_vm11 = vcmp.gt.s32.totalorder %v11235_v29, 15  ;;  %v11361_v54 = vld [vmem:[#allocation9 + $0x28] sm:$0xff]  }
  0x5b   :  { %9162 = vmatmul.mubr.msk.bf16.gmra.mxu1 %vm369_vm0, %v9892_v11  ;;  %2679 = vperm.xlu1 %9880, %v11324_v47   ;;  %v11330_v48 = vsel %vm3989_vm10, 1, %v13871_v0  ;;  %v11338_v50 = vsel %vm2675_vm11, 1, %v13871_v0  ;;  %vm4074_vm12 = vcmp.gt.s32.totalorder %v11219_v25, 11  ;;  %vm2940_vm13 = vcmp.gt.s32.totalorder %v11235_v29, 1  ;;  %v11389_v59 = vld [vmem:[#allocation9 + $0x30] sm:$0xff]   ;;  %v11413_v1 = vld [vmem:[#allocation9 + $0x38] sm:$0xff]  }
  0x5c   :  { %9165 = vmatprep.mubr.msk.bf16.mxu1 %vm369_vm0, %v9893_v12  ;;  %v11343_v51 = vsel %vm4074_vm12, 1, %v13871_v0  ;;  %v11353_v52 = vsel %vm2940_vm13, 1, %v13871_v0  ;;  %vm4339_vm14 = vcmp.gt.s32.totalorder %v11219_v25, 5  ;;  %vm3025_vm15 = vcmp.gt.s32.totalorder %v11235_v29, 14  ;;  %v11420_v3 = vld [vmem:[#allocation14 + $0xa8] ss:$12 sps:$4 sm:$0xff]  }
  0x5d   :  { %v11359_v53 = vsel %vm4339_vm14, 1, %v13871_v0  ;;  %v11366_v55 = vsel %vm3025_vm15, 1, %v13871_v0  ;;  %vm4424_vm1 = vcmp.gt.s32.totalorder %v11219_v25, 10  ;;  %vm3290_vm2 = vcmp.gt.s32.totalorder %v11235_v29, 2  ;;  %v11424_v5 = vld [vmem:[#allocation14 + $0x94] ss:$12 sps:$4 sm:$0xff]  }
  0x5e   :  { %2944 = vperm.xlu0 %9879, %v11253_v32   ;;  %v11371_v56 = vsel %vm4424_vm1, 1, %v13871_v0  ;;  %v11381_v57 = vsel %vm3290_vm2, 1, %v13871_v0  ;;  %vm4689_vm3 = vcmp.gt.s32.totalorder %v11219_v25, 6  ;;  %vm3375_vm4 = vcmp.gt.s32.totalorder %v11235_v29, 13  ;;  %v11438_v7 = vld [vmem:[#allocation14 + $0x90] ss:$12 sps:$4 sm:$0xff]  }
  0x5f   :  { %2682 = vperm.xlu1 %9880, %v11338_v50   ;;  %v11387_v58 = vsel %vm4689_vm3, 1, %v13871_v0  ;;  %v11394_v60 = vsel %vm3375_vm4, 1, %v13871_v0  ;;  %vm4774_vm5 = vcmp.gt.s32.totalorder %v11219_v25, 9  ;;  %vm3640_vm6 = vcmp.gt.s32.totalorder %v11235_v29, 3  ;;  %v11441_v8 = vld [vmem:[#allocation14 + $0x7c] ss:$12 sps:$4 sm:$0xff]  }
  0x60   :  { %v4776_v61 = vsel %vm4774_vm5, 1, %v13871_v0  ;;  %v11406_v62 = vsel %vm3640_vm6, 1, %v13871_v0  ;;  %vm5039_vm7 = vcmp.gt.s32.totalorder %v11219_v25, 7  ;;  %vm3725_vm8 = vcmp.gt.s32.totalorder %v11235_v29, 12  ;;  %v11466_v15 = vld [vmem:[#allocation14 + $0x60] ss:$12 sps:$4 sm:$0xff]  }
  0x61   :  { %8020 = vmatmul.mubr.msk.bf16.gmra.mxu0 %vm369_vm0, %v9888_v9  ;;  %v5041_v63 = vsel %vm5039_vm7, 1, %v13871_v0  ;;  %v11417_v2 = vsel %vm3725_vm8, 1, %v13871_v0  ;;  %vm5124_vm9 = vcmp.gt.s32.totalorder %v11219_v25, 8  ;;  %vm3990_vm10 = vcmp.gt.s32.totalorder %v11235_v29, 4  ;;  %v9926_v9 = vld [vmem:[#allocation9 + $0x40] sm:$0xff]  }
  0x62   :  { %480 = vmatprep.mubr.bf16.mxu0 %v13871_v0  ;;  %3029 = vperm.xlu0 %9879, %v11264_v35   ;;  %v5126_v4 = vsel %vm5124_vm9, 1, %v13871_v0  ;;  %v11433_v6 = vsel %vm3990_vm10, 1, %v13871_v0  ;;  %vm4075_vm11 = vcmp.gt.s32.totalorder %v11235_v29, 11  ;;  %vm4340_vm12 = vcmp.gt.s32.totalorder %v11235_v29, 5 }
  0x63   :  { %9166 = vmatmul.mubr.msk.bf16.gmra.mxu1 %vm369_vm0, %v9894_v13  ;;  %2947 = vperm.xlu1 %9880, %v11353_v52   ;;  %vm4425_vm13 = vcmp.gt.s32.totalorder %v11235_v29, 10  ;;  %vm4690_vm14 = vcmp.gt.s32.totalorder %v11235_v29, 6  ;;  %vm4775_vm15 = vcmp.gt.s32.totalorder %v11235_v29, 9  ;;  %vm5040_vm1 = vcmp.gt.s32.totalorder %v11235_v29, 7 }
  0x64   :  { %9169 = vmatprep.mubr.msk.bf16.mxu1 %vm369_vm0, %v9895_v14  ;;  %v4777_v25 = vsel %vm4775_vm15, 1, %v13871_v0  ;;  %vm5125_vm2 = vcmp.gt.s32.totalorder %v11235_v29, 8  ;;  %v9940_v29 = vld [vmem:[#allocation9 + $0x60] sm:$0xff]   ;;  %vm11062_vm3 = vmmov 0  }
  0x66   :  { %3294 = vperm.xlu0 %9879, %v11278_v37  }
  0x67   :  { %3032 = vperm.xlu1 %9880, %v11366_v55  }
  0x69   :  { %8021 = vmatmul.mubr.msk.bf16.gmra.mxu0 %vm369_vm0, %v9892_v11  ;;  %v11446_v11 = vsel %vm4075_vm11, 1, %v13871_v0 }
  0x6a   :  { %490 = vmatprep.mubr.bf16.mxu0 %v13871_v0  ;;  %3379 = vperm.xlu0 %9879, %v11289_v40  }
  0x6b   :  { %9170 = vmatmul.mubr.msk.bf16.gmra.mxu1 %vm369_vm0, %v9896_v16  ;;  %3297 = vperm.xlu1 %9880, %v11381_v57  }
  0x6c   :  { %9173 = vmatprep.mubr.msk.bf16.mxu1 %vm369_vm0, %v9897_v17 }
  0x6e   :  { %3644 = vperm.xlu0 %9879, %v11304_v42  }
  0x6f   :  { %3382 = vperm.xlu1 %9880, %v11394_v60  }
  0x71   :  { %8022 = vmatmul.mubr.msk.bf16.gmra.mxu0 %vm369_vm0, %v9893_v12  ;;  %v11449_v12 = vld [vmem:[#allocation14 + $0x78] ss:$12 sps:$4 sm:$0xff]  }
  0x72   :  { %500 = vmatprep.mubr.bf16.mxu0 %v13871_v0  ;;  %3729 = vperm.xlu0 %9879, %v11313_v45  }
  0x73   :  { %9174 = vmatmul.mubr.msk.bf16.gmra.mxu1 %vm369_vm0, %v9898_v18  ;;  %3647 = vperm.xlu1 %9880, %v11406_v62  }
  0x74   :  { %9177 = vmatprep.mubr.msk.bf16.mxu1 %vm369_vm0, %v9899_v19 }
  0x76   :  { %3994 = vperm.xlu0 %9879, %v11330_v48  }
  0x77   :  { %3732 = vperm.xlu1 %9880, %v11417_v2  }
  0x79   :  { %8023 = vmatmul.mubr.msk.bf16.gmra.mxu0 %vm369_vm0, %v9894_v13  ;;  %v11453_v13 = vld [vmem:[#allocation14 + $0x64] ss:$12 sps:$4 sm:$0xff]  }
  0x7a   :  { %510 = vmatprep.mubr.bf16.mxu0 %v13871_v0  ;;  %4079 = vperm.xlu0 %9879, %v11343_v51  }
  0x7b   :  { %9178 = vmatmul.mubr.msk.bf16.gmra.mxu1 %vm369_vm0, %v11190_v20  ;;  %3997 = vperm.xlu1 %9880, %v11433_v6  }
  0x7c   :  { %9181 = vmatprep.mubr.msk.bf16.mxu1 %vm369_vm0, %v11193_v21 }
  0x7e   :  { %4344 = vperm.xlu0 %9879, %v11359_v53  }
  0x7f   :  { %4082 = vperm.xlu1 %9880, %v11446_v11  }
  0x81   :  { %8024 = vmatmul.mubr.msk.bf16.gmra.mxu0 %vm369_vm0, %v9895_v14  ;;  %v11461_v14 = vsel %vm4340_vm12, 1, %v13871_v0 }
  0x82   :  { %520 = vmatprep.mubr.bf16.mxu0 %v13871_v0  ;;  %4429 = vperm.xlu0 %9879, %v11371_v56  }
  0x83   :  { %9182 = vmatmul.mubr.msk.bf16.gmra.mxu1 %vm369_vm0, %v11201_v22  ;;  %4347 = vperm.xlu1 %9880, %v11461_v14  }
  0x84   :  { %9185 = vmatprep.mubr.msk.bf16.mxu1 %vm369_vm0, %v11203_v23 }
  0x86   :  { %4694 = vperm.xlu0 %9879, %v11387_v58  }
  0x89   :  { %8025 = vmatmul.mubr.msk.bf16.gmra.mxu0 %vm369_vm0, %v9896_v16  ;;  %v9930_v16 = vld [vmem:[#allocation9 + $0x48] sm:$0xff]  }
  0x8a   :  { %530 = vmatprep.mubr.bf16.mxu0 %v13871_v0  ;;  %4779 = vperm.xlu0 %9879, %v4776_v61  }
  0x8b   :  { %9186 = vmatmul.mubr.msk.bf16.gmra.mxu1 %vm369_vm0, %v11211_v24 }
  0x8c   :  { %1385 = vmatprep.mubr.bf16.mxu1 %v13871_v0 }
  0x8e   :  { %5044 = vperm.xlu0 %9879, %v5041_v63  }
  0x91   :  { %8026 = vmatmul.mubr.msk.bf16.gmra.mxu0 %vm369_vm0, %v9897_v17  ;;  %v11469_v17 = vld [vmem:[#allocation14 + $0x4c] ss:$12 sps:$4 sm:$0xff]  }
  0x92   :  { %540 = vmatprep.mubr.bf16.mxu0 %v13871_v0  ;;  %5129 = vperm.xlu0 %9879, %v5126_v4  }
  0x93   :  { %8133 = vmatmul.mubr.msk.bf16.vlgmr.msra.gmra.mxu1 %vm369_vm0, %v11227_v27 }
  0x94   :  { %1395 = vmatprep.mubr.bf16.mxu1 %v13871_v0  ;;  %9224 = vmatpush3.bf16.msra.mxu1 %v11230_v28 }
  0x95   :  { %9225 = vmatprep.subr.bf16.mxu1 %v13895_v10 }
  0x96   :  { %5394 = vperm.xlu0 %9879, %v5126_v4   ;;  %v9958_v4 = vld [vmem:[#allocation15 + $0x7c] ss:$12 sps:$4 sm:$0xff]  }
  0x98   :  { %9226 = vmatpush3.bf16.msra.mxu1 %v11246_v31 }
  0x99   :  { %8027 = vmatmul.mubr.msk.bf16.gmra.mxu0 %vm369_vm0, %v9898_v18  ;;  %9227 = vmatprep.subr.bf16.mxu1 %v13895_v10  ;;  %v11474_v18 = vsel %vm4425_vm13, 1, %v13871_v0 }
  0x9a   :  { %550 = vmatprep.mubr.bf16.mxu0 %v13871_v0  ;;  %5479 = vperm.xlu0 %9879, %v5041_v63   ;;  %v9957_v63 = vld [vmem:[#allocation15 + $0x90] ss:$12 sps:$4 sm:$0xff]  }
  0x9b   :  { %8134 = vmatmul.mubr.msk.bf16.gmra.mxu1 %vm369_vm0, %v11255_v33  ;;  %4432 = vperm.xlu1 %9880, %v11474_v18  }
  0x9c   :  { %1405 = vmatprep.mubr.bf16.mxu1 %v13871_v0  ;;  %9228 = vmatpush3.bf16.msra.mxu1 %v11259_v34 }
  0x9d   :  { %9229 = vmatprep.subr.bf16.mxu1 %v13895_v10 }
  0x9e   :  { %5744 = vperm.xlu0 %9879, %v4776_v61   ;;  %v11063_v61 = vmov 0.0|0.0  }
  0xa0   :  { %9230 = vmatpush3.bf16.msra.mxu1 %v11271_v36 }
  0xa1   :  { %8028 = vmatmul.mubr.msk.bf16.gmra.mxu0 %vm369_vm0, %v9899_v19  ;;  %9231 = vmatprep.subr.bf16.mxu1 %v13895_v10  ;;  %v11477_v19 = vld [vmem:[#allocation14 + $0x48] ss:$12 sps:$4 sm:$0xff]  }
  0xa2   :  { %560 = vmatprep.mubr.bf16.mxu0 %v13871_v0  ;;  %5829 = vperm.xlu0 %9879, %v11387_v58  }
  0xa3   :  { %8135 = vmatmul.mubr.msk.bf16.gmra.mxu1 %vm369_vm0, %v11280_v38 }
  0xa4   :  { %1415 = vmatprep.mubr.bf16.mxu1 %v13871_v0  ;;  %9232 = vmatpush3.bf16.msra.mxu1 %v11284_v39 }
  0xa5   :  { %9233 = vmatprep.subr.bf16.mxu1 %v13895_v10 }
  0xa6   :  { %6094 = vperm.xlu0 %9879, %v11371_v56   ;;  %v9955_v56 = vld [vmem:[#allocation15 + $0x94] ss:$12 sps:$4 sm:$0xff]  }
  0xa8   :  { %9234 = vmatpush3.bf16.msra.mxu1 %v11296_v41 }
  0xa9   :  { %8029 = vmatmul.mubr.msk.bf16.gmra.mxu0 %vm369_vm0, %v11190_v20  ;;  %9235 = vmatprep.subr.bf16.mxu1 %v13895_v10  ;;  %v11481_v20 = vld [vmem:[#allocation14 + $0x34] ss:$12 sps:$4 sm:$0xff]  }
  0xaa   :  { %570 = vmatprep.mubr.bf16.mxu0 %v13871_v0  ;;  %6179 = vperm.xlu0 %9879, %v11359_v53  }
  0xab   :  { %8136 = vmatmul.mubr.msk.bf16.gmra.mxu1 %vm369_vm0, %v11306_v43 }
  0xac   :  { %1425 = vmatprep.mubr.bf16.mxu1 %v13871_v0  ;;  %9236 = vmatpush3.bf16.msra.mxu1 %v9954_v44  ;;  %v11519_v44 = vld [vmem:[#allocation15 + $0xac] ss:$12 sps:$4 sm:$0xff]  }
  0xad   :  { %9237 = vmatprep.subr.bf16.mxu1 %v13895_v10 }
  0xae   :  { %6444 = vperm.xlu0 %9879, %v11343_v51   ;;  %v9941_v51 = vld [vmem:[#allocation9 + $0x68] sm:$0xff]  }
  0xb0   :  { %9238 = vmatpush3.bf16.msra.mxu1 %v9967_v46  ;;  %v9936_v46 = vld [vmem:[#allocation9 + $0x58] sm:$0xff]  }
  0xb1   :  { %8030 = vmatmul.mubr.msk.bf16.gmra.mxu0 %vm369_vm0, %v11193_v21  ;;  %9243 = vmatprep.subr.bf16.mxu1 %v13895_v10  ;;  %v4692_v21 = vsel %vm4690_vm14, 1, %v13871_v0 }
  0xb2   :  { %580 = vmatprep.mubr.bf16.mxu0 %v13871_v0  ;;  %4697 = vperm.xlu1 %9880, %v4692_v21  }
  0xb3   :  { %8137 = vmatmul.mubr.msk.bf16.gmra.mxu1 %vm369_vm0, %v11332_v49  ;;  %6529 = vperm.xlu0 %9879, %v11330_v48   ;;  %v9946_v48 = vld [vmem:[#allocation9 + $0x70] sm:$0xff]  }
  0xb4   :  { %1435 = vmatprep.mubr.bf16.mxu1 %v13871_v0 }
  0xb6   :  { %4782 = vperm.xlu1 %9880, %v4777_v25  }
  0xb7   :  { %6794 = vperm.xlu0 %9879, %v11313_v45   ;;  %v258_v45 = vlaneseq }
  0xb9   :  { %8031 = vmatmul.mubr.msk.bf16.gmra.mxu0 %vm369_vm0, %v11201_v22  ;;  %v11493_v22 = vld [vmem:[#allocation14 + $0x30] ss:$12 sps:$4 sm:$0xff]  }
  0xba   :  { %590 = vmatprep.mubr.bf16.mxu0 %v13871_v0 }
  0xbb   :  { %8138 = vmatmul.mubr.msk.bf16.gmra.mxu1 %vm369_vm0, %v11361_v54  ;;  %6879 = vperm.xlu0 %9879, %v11304_v42   ;;  %v9947_v42 = vld [vmem:[#allocation9 + $0x78] sm:$0xff]  }
  0xbc   :  { %1445 = vmatprep.mubr.bf16.mxu1 %v13871_v0 }
  0xbf   :  { %7144 = vperm.xlu0 %9879, %v11289_v40   ;;  %v11546_v40 = vshrl.u32 %v258_v45, 7  ;;  %v9963_v45 = vld [vmem:[#allocation15 + $0x60] ss:$12 sps:$4 sm:$0xff]  }
  0xc1   :  { %8032 = vmatmul.mubr.msk.bf16.gmra.mxu0 %vm369_vm0, %v11203_v23  ;;  %v11496_v23 = vld [vmem:[#allocation14 + $0x1c] ss:$12 sps:$4 sm:$0xff]   ;;  %v264_v53 = vsub.s32 1, %v11546_v40 }
  0xc2   :  { %600 = vmatprep.mubr.bf16.mxu0 %v13871_v0 }
  0xc3   :  { %8139 = vmatmul.mubr.msk.bf16.gmra.mxu1 %vm369_vm0, %v11389_v59  ;;  %7229 = vperm.xlu0 %9879, %v11278_v37   ;;  %v260_v37 = vsub.s32 0, %v11546_v40 }
  0xc4   :  { %1455 = vmatprep.mubr.bf16.mxu1 %v13871_v0 }
  0xc7   :  { %7494 = vperm.xlu0 %9879, %v11264_v35   ;;  %v256_v35 = vld [vmem:[#allocation12] sm:$0x7] }
  0xc8   :  { %v11560_v58 = vrot.slane %v256_v35, %v260_v37 }
  0xc9   :  { %8033 = vmatmul.mubr.msk.bf16.gmra.mxu0 %vm369_vm0, %v11211_v24  ;;  %v9935_v24 = vld [vmem:[#allocation9 + $0x50] sm:$0xff]  }
  0xca   :  { %9191 = vmatprep.mubr.msk.bf16.mxu0 %vm369_vm0, %v11227_v27  ;;  %v11502_v27 = vld [vmem:[#allocation14 + $0x18] ss:$12 sps:$4 sm:$0xff]  }
  0xcb   :  { %8140 = vmatmul.mubr.msk.bf16.gmra.mxu1 %vm369_vm0, %v11413_v1  ;;  %7579 = vperm.xlu0 %9879, %v11253_v32   ;;  %v11564_v32 = vrot.slane %v256_v35, %v264_v53 }
  0xcc   :  { %1465 = vmatprep.mubr.bf16.mxu1 %v13871_v0 }
  0xcf   :  { %7843 = vperm.xlu0 %9879, %v11324_v47  }
  0xd1   :  { %9192 = vmatmul.mubr.msk.bf16.vlgmr.msra.gmra.mxu0 %vm369_vm0, %v11255_v33  ;;  %v11506_v33 = vld [vmem:[#allocation14 + $0x4] ss:$12 sps:$4 sm:$0xff]  }
  0xd2   :  { %2237 = vmatpush1.bf16.msra.mxu0 %v11420_v3  ;;  %9195 = vmatprep.mubr.msk.bf16.mxu0 %vm369_vm0, %v11280_v38  ;;  %v5042_v38 = vsel %vm5040_vm1, 1, %v13871_v0 }
  0xd3   :  { %2238 = vmatprep.subr.bf16.mxu0 %v11424_v5  ;;  %8141 = vmatmul.mubr.msk.bf16.gmra.mxu1 %vm369_vm0, %v9926_v9 }
  0xd4   :  { %1475 = vmatprep.mubr.bf16.mxu1 %v13871_v0  ;;  %5047 = vperm.xlu1 %9880, %v5042_v38  }
  0xd5   :  { %7927 = vperm.xlu0 %9879, %v11225_v26  }
  0xd6   :  { %2239 = vmatpush1.bf16.msra.mxu0 %v11438_v7 }
  0xd7   :  { %2240 = vmatprep.subr.bf16.mxu0 %v11441_v8 }
  0xd9   :  { %9196 = vmatmul.mubr.msk.bf16.gmra.mxu0 %vm369_vm0, %v11306_v43  ;;  %v11516_v43 = vld [vmem:[#allocation14] ss:$12 sps:$4 sm:$0xff]  }
  0xda   :  { %9199 = vmatprep.mubr.msk.bf16.mxu0 %vm369_vm0, %v11332_v49  ;;  %2241 = vmatpush1.bf16.msra.mxu0 %v11449_v12  ;;  %v5127_v49 = vsel %vm5125_vm2, 1, %v13871_v0 }
  0xdb   :  { %2242 = vmatprep.subr.bf16.mxu0 %v11453_v13  ;;  %8142 = vmatmul.mubr.msk.bf16.gmra.mxu1 %vm369_vm0, %v9930_v16 }
  0xdc   :  { %1485 = vmatprep.mubr.bf16.mxu1 %v13871_v0  ;;  %5132 = vperm.xlu1 %9880, %v5127_v49  }
  0xde   :  { %2243 = vmatpush1.bf16.msra.mxu0 %v11466_v15 }
  0xdf   :  { %2244 = vmatprep.subr.bf16.mxu0 %v11469_v17 }
  0xe0   :  { %5397 = vperm.xlu1 %9880, %v5127_v49  }
  0xe1   :  { %9200 = vmatmul.mubr.msk.bf16.gmra.mxu0 %vm369_vm0, %v11361_v54  ;;  %v9953_v54 = vld [vmem:[#allocation15 + $0xa8] ss:$12 sps:$4 sm:$0xff]  }
  0xe2   :  { %9203 = vmatprep.mubr.msk.bf16.mxu0 %vm369_vm0, %v11389_v59  ;;  %2245 = vmatpush1.bf16.msra.mxu0 %v11477_v19  ;;  %v268_v59 = vsub.s32 2, %v11546_v40 }
  0xe3   :  { %2246 = vmatprep.subr.bf16.mxu0 %v11481_v20  ;;  %8143 = vmatmul.mubr.msk.bf16.gmra.mxu1 %vm369_vm0, %v9935_v24 }
  0xe4   :  { %1495 = vmatprep.mubr.bf16.mxu1 %v13871_v0  ;;  %5482 = vperm.xlu1 %9880, %v5042_v38  }
  0xe6   :  { %2247 = vmatpush1.bf16.msra.mxu0 %v11493_v22 }
  0xe7   :  { %2248 = vmatprep.subr.bf16.mxu0 %v11496_v23 }
  0xe8   :  { %5747 = vperm.xlu1 %9880, %v4777_v25  }
  0xe9   :  { %9204 = vmatmul.mubr.msk.bf16.gmra.mxu0 %vm369_vm0, %v11413_v1 }
  0xea   :  { %9207 = vmatprep.mubr.msk.bf16.mxu0 %vm369_vm0, %v9926_v9  ;;  %2249 = vmatpush1.bf16.msra.mxu0 %v11502_v27 }
  0xeb   :  { %2250 = vmatprep.subr.bf16.mxu0 %v11506_v33  ;;  %8144 = vmatmul.mubr.msk.bf16.gmra.mxu1 %vm369_vm0, %v9936_v46 }
  0xec   :  { %1505 = vmatprep.mubr.bf16.mxu1 %v13871_v0  ;;  %5832 = vperm.xlu1 %9880, %v4692_v21  }
  0xee   :  { %2251 = vmatpush1.bf16.msra.mxu0 %v11516_v43 }
  0xef   :  { %2449 = vmatprep.subr.bf16.mxu0 %v11519_v44 }
  0xf0   :  { %6097 = vperm.xlu1 %9880, %v11474_v18   ;;  %v9960_v18 = vld [vmem:[#allocation15 + $0x78] ss:$12 sps:$4 sm:$0xff]  }
  0xf1   :  { %9208 = vmatmul.mubr.msk.bf16.gmra.mxu0 %vm369_vm0, %v9930_v16 }
  0xf2   :  { %9211 = vmatprep.mubr.msk.bf16.mxu0 %vm369_vm0, %v9935_v24  ;;  %v9961_v24 = vld [vmem:[#allocation15 + $0x64] ss:$12 sps:$4 sm:$0xff]  }
  0xf3   :  { %8145 = vmatmul.mubr.msk.bf16.gmra.mxu1 %vm369_vm0, %v9940_v29 }
  0xf4   :  { %1515 = vmatprep.mubr.bf16.mxu1 %v13871_v0  ;;  %6182 = vperm.xlu1 %9880, %v11461_v14   ;;  %v9976_v14 = vld [vmem:[#allocation15 + $0xb0] ss:$12 sps:$4 sm:$0xff]  }
  0xf8   :  { %6447 = vperm.xlu1 %9880, %v11446_v11  }
  0xf9   :  { %9212 = vmatmul.mubr.msk.bf16.gmra.mxu0 %vm369_vm0, %v9936_v46 }
  0xfa   :  { %9215 = vmatprep.mubr.msk.bf16.mxu0 %vm369_vm0, %v9940_v29  ;;  %v9978_v29 = vld [vmem:[#allocation15 + $0x98] ss:$12 sps:$4 sm:$0xff]  }
  0xfb   :  { %8146 = vmatmul.mubr.msk.bf16.gmra.mxu1 %vm369_vm0, %v9941_v51 }
  0xfc   :  { %1525 = vmatprep.mubr.bf16.mxu1 %v13871_v0  ;;  %6532 = vperm.xlu1 %9880, %v11433_v6   ;;  %v11577_v6 = vrot.slane %v256_v35, %v268_v59 }
 0x100   :  { %6797 = vperm.xlu1 %9880, %v11417_v2  }
 0x101   :  { %9216 = vmatmul.mubr.msk.bf16.gmra.mxu0 %vm369_vm0, %v9941_v51 }
 0x102   :  { %9219 = vmatprep.mubr.msk.bf16.mxu0 %vm369_vm0, %v9946_v48 }
 0x103   :  { %8147 = vmatmul.mubr.msk.bf16.gmra.mxu1 %vm369_vm0, %v9946_v48 }
 0x104   :  { %1535 = vmatprep.mubr.bf16.mxu1 %v13871_v0  ;;  %6882 = vperm.xlu1 %9880, %v11406_v62   ;;  %v9979_v62 = vld [vmem:[#allocation15 + $0x80] ss:$12 sps:$4 sm:$0xff]  }
 0x108   :  { %7147 = vperm.xlu1 %9880, %v11394_v60  }
 0x109   :  { %9220 = vmatmul.mubr.msk.bf16.gmra.mxu0 %vm369_vm0, %v9947_v42 }
 0x10a   :  { %2268 = vmatprep.mubr.bf16.mxu0 %v13871_v0 }
 0x10b   :  { %8148 = vmatmul.mubr.msk.bf16.gmra.mxu1 %vm369_vm0, %v9947_v42 }
 0x10c   :  { %9239 = vmatprep.mubr.msk.bf16.mxu1 %vm11062_vm3, %v13895_v10  ;;  %7232 = vperm.xlu1 %9880, %v11381_v57  }
 0x110   :  { %7497 = vperm.xlu1 %9880, %v11366_v55  }
 0x111   :  { %v452_v47 = vpop.f32.mrf.mxu0  ;;  %2269 = vmatmul.mubr.bf16.vlgmr.msra.gmra.mxu0 %v11063_v61 }
 0x112   :  { %2450 = vmatpush1.bf16.msra.mxu0 %v9953_v54  ;;  %2481 = vmatprep.mubr.bf16.mxu0 %v13871_v0  ;;  %v453_v9 = vadd.f32 %v452_v47, %v11560_v58 }
 0x113   :  { %v454_v1 = vpop.f32.mrf.mxu0  ;;  %2451 = vmatprep.subr.bf16.mxu0 %v9955_v56  ;;  %v9159_v25 = vpop.f32.mrf.mxu1  ;;  %9240 = vmatmul.mubr.bf16.vlgmr.msra.gmra.mxu1 %v11063_v61  ;;  %v9964_v56 = vld [vmem:[#allocation15 + $0x4c] ss:$12 sps:$4 sm:$0xff]  }
 0x114   :  { %v455_v11 = vadd.f32 %v454_v1, %v11564_v32  ;;  %v654_v49 = vadd.f32 %v9159_v25, %v11577_v6  ;;  %9244 = vmatpush3.bf16.msra.mxu1 %v9976_v14  ;;  %9259 = vmatprep.mubr.msk.bf16.mxu1 %vm11062_vm3, %v13895_v10  ;;  %v9968_v25 = vld [vmem:[#allocation15 + $0x34] ss:$12 sps:$4 sm:$0xff]  }
 0x115   :  { %v456_v16 = vpop.f32.mrf.mxu0  ;;  %v645_v51 = vpop.f32.mrf.mxu1  ;;  %9245 = vmatprep.subr.bf16.mxu1 %v13895_v10  ;;  %7582 = vperm.xlu1 %9880, %v11353_v52   ;;  %v9983_v52 = vld [vmem:[#allocation15 + $0x20] ss:$12 sps:$4 sm:$0xff]  }
 0x116   :  { %v8469_v26 = vpack.c.bf16 %v455_v11, %v453_v9  ;;  %2452 = vmatpush1.bf16.msra.mxu0 %v9957_v63  ;;  %v457_v38 = vadd.f32 %v456_v16, %v11560_v58  ;;  %v8474_v42 = vpack.c.bf16 %v654_v49, %v654_v49  ;;  %v646_v35 = vadd.f32 %v645_v51, %v11577_v6 }
 0x117   :  { %v458_v21 = vpop.f32.mrf.mxu0  ;;  %2453 = vmatprep.subr.bf16.mxu0 %v9958_v4  ;;  %v9160_v47 = vpop.f32.mrf.mxu1 }
 0x118   :  { %1092 = vst [vmem:[#allocation4] sm:$0xff] %v8469_v26  ;;  %v459_v46 = vadd.f32 %v458_v21, %v11564_v32  ;;  %1097 = vst [vmem:[#allocation4 + $0x20] sm:$0xf] %v8474_v42  ;;  %v8470_v4 = vpack.c.bf16 %v646_v35, %v646_v35  ;;  %v657_v9 = vadd.f32 %v9160_v47, %v11577_v6  ;;  %9246 = vmatpush3.bf16.msra.mxu1 %v9978_v29  ;;  %v9966_v26 = vld [vmem:[#allocation15 + $0x48] ss:$12 sps:$4 sm:$0xff]  }
 0x119   :  { %v462_v2 = vpop.f32.mrf.mxu0  ;;  %v648_v14 = vpop.f32.mrf.mxu1  ;;  %9247 = vmatprep.subr.bf16.mxu1 %v13895_v10  ;;  %v9970_v42 = vld [vmem:[#allocation15 + $0x30] ss:$12 sps:$4 sm:$0xff]   ;;  %7846 = vperm.xlu1 %9880, %v11338_v50   ;;  %v9984_v50 = vld [vmem:[#allocation15 + $0x8] ss:$12 sps:$4 sm:$0xff]  }
 0x11a   :  { %v8471_v48 = vpack.c.bf16 %v459_v46, %v457_v38  ;;  %2454 = vmatpush1.bf16.msra.mxu0 %v9960_v18  ;;  %v463_v63 = vadd.f32 %v462_v2, %v11560_v58  ;;  %1093 = vst [vmem:[#allocation4 + $0x8] sm:$0xf] %v8470_v4  ;;  %v8476_v18 = vpack.c.bf16 %v657_v9, %v657_v9  ;;  %v9980_v2 = vld [vmem:[#allocation15 + $0x68] ss:$12 sps:$4 sm:$0xff]  }
 0x11b   :  { %v464_v54 = vpop.f32.mrf.mxu0  ;;  %2455 = vmatprep.subr.bf16.mxu0 %v9961_v24  ;;  %v649_v21 = vadd.f32 %v648_v14, %v11577_v6  ;;  %v9163_v38 = vpop.f32.mrf.mxu1  ;;  %v9971_v47 = vld [vmem:[#allocation15 + $0x1c] ss:$12 sps:$4 sm:$0xff]  }
 0x11c   :  { %1094 = vst [vmem:[#allocation4 + $0xc] sm:$0xff] %v8471_v48  ;;  %v465_v1 = vadd.f32 %v464_v54, %v11564_v32  ;;  %1099 = vst [vmem:[#allocation4 + $0x2c] sm:$0xf] %v8476_v18  ;;  %v670_v60 = vadd.f32 %v9163_v38, %v11577_v6  ;;  %9248 = vmatpush3.bf16.msra.mxu1 %v9979_v62  ;;  %v9981_v62 = vld [vmem:[#allocation15 + $0x50] ss:$12 sps:$4 sm:$0xff]  }
 0x11d   :  { %v466_v11 = vpop.f32.mrf.mxu0  ;;  %v8472_v29 = vpack.c.bf16 %v649_v21, %v649_v21  ;;  %v661_v48 = vpop.f32.mrf.mxu1  ;;  %9249 = vmatprep.subr.bf16.mxu1 %v13895_v10  ;;  %7930 = vperm.xlu1 %9880, %v11239_v30  }
 0x11e   :  { %v8473_v16 = vpack.c.bf16 %v465_v1, %v463_v63  ;;  %2456 = vmatpush1.bf16.msra.mxu0 %v9963_v45  ;;  %v467_v46 = vadd.f32 %v466_v11, %v11560_v58  ;;  %v8482_v35 = vpack.c.bf16 %v670_v60, %v670_v60  ;;  %v662_v54 = vadd.f32 %v661_v48, %v11577_v6  ;;  %v9982_v60 = vld [vmem:[#allocation15 + $0x38] ss:$12 sps:$4 sm:$0xff]  }
 0x11f   :  { %v468_v24 = vpop.f32.mrf.mxu0  ;;  %2457 = vmatprep.subr.bf16.mxu0 %v9964_v56  ;;  %1095 = vst [vmem:[#allocation4 + $0x14] sm:$0xf] %v8472_v29  ;;  %v9164_v63 = vpop.f32.mrf.mxu1 }
 0x120   :  { %1096 = vst [vmem:[#allocation4 + $0x18] sm:$0xff] %v8473_v16  ;;  %v469_v49 = vadd.f32 %v468_v24, %v11564_v32  ;;  %1105 = vst [vmem:[#allocation4 + $0x50] sm:$0xf] %v8482_v35  ;;  %v8478_v9 = vpack.c.bf16 %v662_v54, %v662_v54  ;;  %v673_v57 = vadd.f32 %v9164_v63, %v11577_v6  ;;  %9250 = vmatpush3.bf16.msra.mxu1 %v9980_v2 }
 0x121   :  { %v472_v51 = vpop.f32.mrf.mxu0  ;;  %v664_v14 = vpop.f32.mrf.mxu1  ;;  %9251 = vmatprep.subr.bf16.mxu1 %v13895_v10 }
 0x122   :  { %v8475_v45 = vpack.c.bf16 %v469_v49, %v467_v46  ;;  %2458 = vmatpush1.bf16.msra.mxu0 %v9966_v26  ;;  %v473_v1 = vadd.f32 %v472_v51, %v11560_v58  ;;  %v9973_v26 = vld [vmem:[#allocation15 + $0x18] ss:$12 sps:$4 sm:$0xff]   ;;  %1101 = vst [vmem:[#allocation4 + $0x38] sm:$0xf] %v8478_v9  ;;  %v8484_v18 = vpack.c.bf16 %v673_v57, %v673_v57 }
 0x123   :  { %v474_v56 = vpop.f32.mrf.mxu0  ;;  %2459 = vmatprep.subr.bf16.mxu0 %v9968_v25  ;;  %v665_v21 = vadd.f32 %v664_v14, %v11577_v6  ;;  %v9974_v25 = vld [vmem:[#allocation15 + $0x4] ss:$12 sps:$4 sm:$0xff]   ;;  %v9167_v38 = vpop.f32.mrf.mxu1 }
 0x124   :  { %1098 = vst [vmem:[#allocation4 + $0x24] sm:$0xff] %v8475_v45  ;;  %v475_v4 = vadd.f32 %v474_v56, %v11564_v32  ;;  %1107 = vst [vmem:[#allocation4 + $0x5c] sm:$0xf] %v8484_v18  ;;  %v686_v55 = vadd.f32 %v9167_v38, %v11577_v6  ;;  %9252 = vmatpush3.bf16.msra.mxu1 %v9981_v62  ;;  %v9977_v45 = vld [vmem:[#allocation15] ss:$12 sps:$4 sm:$0xff]  }
 0x125   :  { %v476_v11 = vpop.f32.mrf.mxu0  ;;  %v8480_v29 = vpack.c.bf16 %v665_v21, %v665_v21  ;;  %v677_v51 = vpop.f32.mrf.mxu1  ;;  %9253 = vmatprep.subr.bf16.mxu1 %v13895_v10  ;;  %v10625_v18 = vld [vmem:[#allocation14 + $0xac] ss:$12 sps:$4 sm:$0xff]  }
 0x126   :  { %v8477_v16 = vpack.c.bf16 %v475_v4, %v473_v1  ;;  %2460 = vmatpush1.bf16.msra.mxu0 %v9970_v42  ;;  %v477_v46 = vadd.f32 %v476_v11, %v11560_v58  ;;  %v8490_v42 = vpack.c.bf16 %v686_v55, %v686_v55  ;;  %v678_v35 = vadd.f32 %v677_v51, %v11577_v6 }
 0x127   :  { %v478_v24 = vpop.f32.mrf.mxu0  ;;  %2461 = vmatprep.subr.bf16.mxu0 %v9971_v47  ;;  %1103 = vst [vmem:[#allocation4 + $0x44] sm:$0xf] %v8480_v29  ;;  %v9168_v56 = vpop.f32.mrf.mxu1 }
 0x128   :  { %1100 = vst [vmem:[#allocation4 + $0x30] sm:$0xff] %v8477_v16  ;;  %v479_v49 = vadd.f32 %v478_v24, %v11564_v32  ;;  %1113 = vst [vmem:[#allocation4 + $0x80] sm:$0xf] %v8490_v42  ;;  %v8486_v1 = vpack.c.bf16 %v678_v35, %v678_v35  ;;  %v689_v4 = vadd.f32 %v9168_v56, %v11577_v6  ;;  %9254 = vmatpush3.bf16.msra.mxu1 %v9982_v60 }
 0x129   :  { %v482_v2 = vpop.f32.mrf.mxu0  ;;  %v680_v57 = vpop.f32.mrf.mxu1  ;;  %9255 = vmatprep.subr.bf16.mxu1 %v13895_v10 }
 0x12a   :  { %v8479_v48 = vpack.c.bf16 %v479_v49, %v477_v46  ;;  %2462 = vmatpush1.bf16.msra.mxu0 %v9973_v26  ;;  %v483_v47 = vadd.f32 %v482_v2, %v11560_v58  ;;  %1109 = vst [vmem:[#allocation4 + $0x68] sm:$0xf] %v8486_v1  ;;  %v8492_v11 = vpack.c.bf16 %v689_v4, %v689_v4 }
 0x12b   :  { %v484_v54 = vpop.f32.mrf.mxu0  ;;  %2463 = vmatprep.subr.bf16.mxu0 %v9974_v25  ;;  %v681_v14 = vadd.f32 %v680_v57, %v11577_v6  ;;  %v9171_v26 = vpop.f32.mrf.mxu1 }
 0x12c   :  { %1102 = vst [vmem:[#allocation4 + $0x3c] sm:$0xff] %v8479_v48  ;;  %v485_v63 = vadd.f32 %v484_v54, %v11564_v32  ;;  %1115 = vst [vmem:[#allocation4 + $0x8c] sm:$0xf] %v8492_v11  ;;  %v702_v38 = vadd.f32 %v9171_v26, %v11577_v6  ;;  %9256 = vmatpush3.bf16.msra.mxu1 %v9983_v52 }
 0x12d   :  { %v486_v9 = vpop.f32.mrf.mxu0  ;;  %v8488_v25 = vpack.c.bf16 %v681_v14, %v681_v14  ;;  %v693_v49 = vpop.f32.mrf.mxu1  ;;  %9257 = vmatprep.subr.bf16.mxu1 %v13895_v10 }
 0x12e   :  { %v8481_v62 = vpack.c.bf16 %v485_v63, %v483_v47  ;;  %2464 = vmatpush1.bf16.msra.mxu0 %v9977_v45  ;;  %v487_v21 = vadd.f32 %v486_v9, %v11560_v58  ;;  %v8498_v55 = vpack.c.bf16 %v702_v38, %v702_v38  ;;  %v694_v60 = vadd.f32 %v693_v49, %v11577_v6 }
 0x12f   :  { %v488_v16 = vpop.f32.mrf.mxu0  ;;  %2712 = vmatprep.subr.bf16.mxu0 %v10625_v18  ;;  %1111 = vst [vmem:[#allocation4 + $0x74] sm:$0xf] %v8488_v25  ;;  %v9172_v48 = vpop.f32.mrf.mxu1 }
 0x130   :  { %1104 = vst [vmem:[#allocation4 + $0x48] sm:$0xff] %v8481_v62  ;;  %v489_v24 = vadd.f32 %v488_v16, %v11564_v32  ;;  %1121 = vst [vmem:[#allocation4 + $0xb0] sm:$0xf] %v8498_v55  ;;  %v8494_v42 = vpack.c.bf16 %v694_v60, %v694_v60  ;;  %v705_v35 = vadd.f32 %v9172_v48, %v11577_v6  ;;  %9258 = vmatpush3.bf16.msra.mxu1 %v9984_v50 }
 0x131   :  { %2482 = vmatmul.mubr.bf16.vlgmr.msra.gmra.mxu0 %v11063_v61  ;;  %v492_v46 = vpop.f32.mrf.mxu0  ;;  %v696_v30 = vpop.f32.mrf.mxu1  ;;  %9263 = vmatprep.subr.bf16.mxu1 %v13895_v10 }
 0x132   :  { %v8483_v29 = vpack.c.bf16 %v489_v24, %v487_v21  ;;  %v493_v2 = vadd.f32 %v492_v46, %v11560_v58  ;;  %2713 = vmatpush1.bf16.msra.mxu0 %v11420_v3  ;;  %2744 = vmatprep.mubr.bf16.mxu0 %v13871_v0  ;;  %1117 = vst [vmem:[#allocation4 + $0x98] sm:$0xf] %v8494_v42 }
 0x133   :  { %v494_v51 = vpop.f32.mrf.mxu0  ;;  %2714 = vmatprep.subr.bf16.mxu0 %v11424_v5  ;;  %v8500_v47 = vpack.c.bf16 %v705_v35, %v705_v35  ;;  %v697_v3 = vadd.f32 %v696_v30, %v11577_v6  ;;  %v9175_v4 = vpop.f32.mrf.mxu1  ;;  %9260 = vmatmul.mubr.bf16.vlgmr.msra.gmra.mxu1 %v11063_v61 }
 0x134   :  { %1106 = vst [vmem:[#allocation4 + $0x54] sm:$0xff] %v8483_v29  ;;  %v495_v45 = vadd.f32 %v494_v51, %v11564_v32  ;;  %v718_v9 = vadd.f32 %v9175_v4, %v11577_v6  ;;  %9264 = vmatpush3.bf16.msra.mxu1 %v11230_v28  ;;  %9279 = vmatprep.mubr.msk.bf16.mxu1 %vm11062_vm3, %v13895_v10 }
 0x135   :  { %v496_v54 = vpop.f32.mrf.mxu0  ;;  %1123 = vst [vmem:[#allocation4 + $0xbc] sm:$0xf] %v8500_v47  ;;  %v8496_v52 = vpack.c.bf16 %v697_v3, %v697_v3  ;;  %v709_v62 = vpop.f32.mrf.mxu1  ;;  %9265 = vmatprep.subr.bf16.mxu1 %v13895_v10 }
 0x136   :  { %v8485_v56 = vpack.c.bf16 %v495_v45, %v493_v2  ;;  %v497_v63 = vadd.f32 %v496_v54, %v11560_v58  ;;  %2715 = vmatpush1.bf16.msra.mxu0 %v11438_v7  ;;  %v8506_v7 = vpack.c.bf16 %v718_v9, %v718_v9  ;;  %v710_v11 = vadd.f32 %v709_v62, %v11577_v6 }
 0x137   :  { %v498_v1 = vpop.f32.mrf.mxu0  ;;  %2716 = vmatprep.subr.bf16.mxu0 %v11441_v8  ;;  %1119 = vst [vmem:[#allocation4 + $0xa4] sm:$0xf] %v8496_v52  ;;  %v9176_v26 = vpop.f32.mrf.mxu1 }
 0x138   :  { %1108 = vst [vmem:[#allocation4 + $0x60] sm:$0xff] %v8485_v56  ;;  %v499_v5 = vadd.f32 %v498_v1, %v11564_v32  ;;  %1129 = vst [vmem:[#allocation4 + $0xe0] sm:$0xf] %v8506_v7  ;;  %v8502_v8 = vpack.c.bf16 %v710_v11, %v710_v11  ;;  %v721_v18 = vadd.f32 %v9176_v26, %v11577_v6  ;;  %9266 = vmatpush3.bf16.msra.mxu1 %v11246_v31 }
 0x139   :  { %v502_v57 = vpop.f32.mrf.mxu0  ;;  %v712_v24 = vpop.f32.mrf.mxu1  ;;  %9267 = vmatprep.subr.bf16.mxu1 %v13895_v10 }
 0x13a   :  { %v8487_v61 = vpack.c.bf16 %v499_v5, %v497_v63  ;;  %v503_v14 = vadd.f32 %v502_v57, %v11560_v58  ;;  %2717 = vmatpush1.bf16.msra.mxu0 %v11449_v12  ;;  %1125 = vst [vmem:[#allocation4 + $0xc8] sm:$0xf] %v8502_v8  ;;  %v8508_v38 = vpack.c.bf16 %v721_v18, %v721_v18 }
 0x13b   :  { %v504_v16 = vpop.f32.mrf.mxu0  ;;  %2718 = vmatprep.subr.bf16.mxu0 %v11453_v13  ;;  %v713_v12 = vadd.f32 %v712_v24, %v11577_v6  ;;  %v9179_v49 = vpop.f32.mrf.mxu1 }
 0x13c   :  { %1110 = vst [vmem:[#allocation4 + $0x6c] sm:$0xff] %v8487_v61  ;;  %v505_v28 = vadd.f32 %v504_v16, %v11564_v32  ;;  %1131 = vst [vmem:[#allocation4 + $0xec] sm:$0xf] %v8508_v38  ;;  %v734_v29 = vadd.f32 %v9179_v49, %v11577_v6  ;;  %9268 = vmatpush3.bf16.msra.mxu1 %v11259_v34  ;;  %v10626_v38 = vld [vmem:[#allocation14 + $0x20] ss:$12 sps:$4 sm:$0xff]  }
 0x13d   :  { %v506_v21 = vpop.f32.mrf.mxu0  ;;  %v8504_v13 = vpack.c.bf16 %v713_v12, %v713_v12  ;;  %v725_v60 = vpop.f32.mrf.mxu1  ;;  %9269 = vmatprep.subr.bf16.mxu1 %v13895_v10 }
 0x13e   :  { %v8489_v25 = vpack.c.bf16 %v505_v28, %v503_v14  ;;  %v507_v50 = vadd.f32 %v506_v21, %v11560_v58  ;;  %2719 = vmatpush1.bf16.msra.mxu0 %v11466_v15  ;;  %v8514_v51 = vpack.c.bf16 %v734_v29, %v734_v29  ;;  %v726_v15 = vadd.f32 %v725_v60, %v11577_v6 }
 0x13f   :  { %v508_v46 = vpop.f32.mrf.mxu0  ;;  %2720 = vmatprep.subr.bf16.mxu0 %v11469_v17  ;;  %1127 = vst [vmem:[#allocation4 + $0xd4] sm:$0xf] %v8504_v13  ;;  %v9180_v42 = vpop.f32.mrf.mxu1 }
 0x140   :  { %1112 = vst [vmem:[#allocation4 + $0x78] sm:$0xff] %v8489_v25  ;;  %v509_v31 = vadd.f32 %v508_v46, %v11564_v32  ;;  %1137 = vst [vmem:[#allocation4 + $0x110] sm:$0xf] %v8514_v51  ;;  %v8510_v17 = vpack.c.bf16 %v726_v15, %v726_v15  ;;  %v737_v35 = vadd.f32 %v9180_v42, %v11577_v6  ;;  %9270 = vmatpush3.bf16.msra.mxu1 %v11271_v36  ;;  %v11692_v25 = vld [vmem:[%s13864_s6] sm:$0x7] }
 0x141   :  { %v512_v55 = vpop.f32.mrf.mxu0  ;;  %v728_v30 = vpop.f32.mrf.mxu1  ;;  %9271 = vmatprep.subr.bf16.mxu1 %v13895_v10  ;;  %v11700_v29 = vrot.slane %v11692_v25, %v260_v37  ;;  %v10627_v51 = vld [vmem:[#allocation14 + $0x8] ss:$12 sps:$4 sm:$0xff]  }
 0x142   :  { %v8491_v2 = vpack.c.bf16 %v509_v31, %v507_v50  ;;  %v513_v48 = vadd.f32 %v512_v55, %v11560_v58  ;;  %2721 = vmatpush1.bf16.msra.mxu0 %v11477_v19  ;;  %1133 = vst [vmem:[#allocation4 + $0xf8] sm:$0xf] %v8510_v17  ;;  %v8516_v47 = vpack.c.bf16 %v737_v35, %v737_v35 }
 0x143   :  { %v514_v45 = vpop.f32.mrf.mxu0  ;;  %2722 = vmatprep.subr.bf16.mxu0 %v11481_v20  ;;  %v729_v19 = vadd.f32 %v728_v30, %v11577_v6  ;;  %v9183_v1 = vpop.f32.mrf.mxu1 }
 0x144   :  { %1114 = vst [vmem:[#allocation4 + $0x84] sm:$0xff] %v8491_v2  ;;  %v515_v34 = vadd.f32 %v514_v45, %v11564_v32  ;;  %1139 = vst [vmem:[#allocation4 + $0x11c] sm:$0xf] %v8516_v47  ;;  %v750_v4 = vadd.f32 %v9183_v1, %v11577_v6  ;;  %9272 = vmatpush3.bf16.msra.mxu1 %v11284_v39 }
 0x145   :  { %v516_v54 = vpop.f32.mrf.mxu0  ;;  %v8512_v20 = vpack.c.bf16 %v729_v19, %v729_v19  ;;  %v741_v52 = vpop.f32.mrf.mxu1  ;;  %9273 = vmatprep.subr.bf16.mxu1 %v13895_v10 }
 0x146   :  { %v8493_v56 = vpack.c.bf16 %v515_v34, %v513_v48  ;;  %v517_v3 = vadd.f32 %v516_v54, %v11560_v58  ;;  %2723 = vmatpush1.bf16.msra.mxu0 %v11493_v22  ;;  %v8522_v57 = vpack.c.bf16 %v750_v4, %v750_v4  ;;  %v742_v22 = vadd.f32 %v741_v52, %v11577_v6 }
 0x147   :  { %v518_v63 = vpop.f32.mrf.mxu0  ;;  %2724 = vmatprep.subr.bf16.mxu0 %v11496_v23  ;;  %1135 = vst [vmem:[#allocation4 + $0x104] sm:$0xf] %v8512_v20  ;;  %v9184_v7 = vpop.f32.mrf.mxu1  ;;  %v11710_v34 = vrot.slane %v11692_v25, %v264_v53 }
 0x148   :  { %1116 = vst [vmem:[#allocation4 + $0x90] sm:$0xff] %v8493_v56  ;;  %v519_v36 = vadd.f32 %v518_v63, %v11564_v32  ;;  %1145 = vst [vmem:[#allocation4 + $0x140] sm:$0xf] %v8522_v57  ;;  %v8518_v23 = vpack.c.bf16 %v742_v22, %v742_v22  ;;  %v753_v11 = vadd.f32 %v9184_v7, %v11577_v6  ;;  %9274 = vmatpush3.bf16.msra.mxu1 %v11296_v41 }
 0x149   :  { %v522_v5 = vpop.f32.mrf.mxu0  ;;  %v744_v16 = vpop.f32.mrf.mxu1  ;;  %9275 = vmatprep.subr.bf16.mxu1 %v13895_v10 }
 0x14a   :  { %v8495_v9 = vpack.c.bf16 %v519_v36, %v517_v3  ;;  %v523_v62 = vadd.f32 %v522_v5, %v11560_v58  ;;  %2725 = vmatpush1.bf16.msra.mxu0 %v11502_v27  ;;  %1141 = vst [vmem:[#allocation4 + $0x128] sm:$0xf] %v8518_v23  ;;  %v8524_v28 = vpack.c.bf16 %v753_v11, %v753_v11 }
 0x14b   :  { %v524_v61 = vpop.f32.mrf.mxu0  ;;  %2726 = vmatprep.subr.bf16.mxu0 %v11506_v33  ;;  %v745_v27 = vadd.f32 %v744_v16, %v11577_v6  ;;  %v9187_v21 = vpop.f32.mrf.mxu1 }
 0x14c   :  { %1118 = vst [vmem:[#allocation4 + $0x9c] sm:$0xff] %v8495_v9  ;;  %v525_v39 = vadd.f32 %v524_v61, %v11564_v32  ;;  %1147 = vst [vmem:[#allocation4 + $0x14c] sm:$0xf] %v8524_v28  ;;  %v766_v24 = vadd.f32 %v9187_v21, %v11577_v6  ;;  %9276 = vmatpush3.bf16.msra.mxu1 %v10626_v38 }
 0x14d   :  { %v526_v14 = vpop.f32.mrf.mxu0  ;;  %v8520_v33 = vpack.c.bf16 %v745_v27, %v745_v27  ;;  %v757_v50 = vpop.f32.mrf.mxu1  ;;  %9277 = vmatprep.subr.bf16.mxu1 %v13895_v10 }
 0x14e   :  { %v8497_v26 = vpack.c.bf16 %v525_v39, %v523_v62  ;;  %v527_v8 = vadd.f32 %v526_v14, %v11560_v58  ;;  %2727 = vmatpush1.bf16.msra.mxu0 %v11516_v43  ;;  %v8530_v46 = vpack.c.bf16 %v766_v24, %v766_v24  ;;  %v758_v49 = vadd.f32 %v757_v50, %v11577_v6 }
 0x14f   :  { %v528_v18 = vpop.f32.mrf.mxu0  ;;  %2797 = vmatprep.subr.bf16.mxu0 %v11519_v44  ;;  %1143 = vst [vmem:[#allocation4 + $0x134] sm:$0xf] %v8520_v33  ;;  %v9188_v13 = vpop.f32.mrf.mxu1 }
 0x150   :  { %1120 = vst [vmem:[#allocation4 + $0xa8] sm:$0xff] %v8497_v26  ;;  %v529_v41 = vadd.f32 %v528_v18, %v11564_v32  ;;  %1153 = vst [vmem:[#allocation4 + $0x170] sm:$0xf] %v8530_v46  ;;  %v8526_v60 = vpack.c.bf16 %v758_v49, %v758_v49  ;;  %v769_v2 = vadd.f32 %v9188_v13, %v11577_v6  ;;  %9278 = vmatpush3.bf16.msra.mxu1 %v10627_v51 }
 0x151   :  { %v532_v12 = vpop.f32.mrf.mxu0  ;;  %v760_v48 = vpop.f32.mrf.mxu1  ;;  %9283 = vmatprep.subr.bf16.mxu1 %v13895_v10 }
 0x152   :  { %v8499_v43 = vpack.c.bf16 %v529_v41, %v527_v8  ;;  %v533_v55 = vadd.f32 %v532_v12, %v11560_v58  ;;  %1149 = vst [vmem:[#allocation4 + $0x158] sm:$0xf] %v8526_v60  ;;  %v8532_v42 = vpack.c.bf16 %v769_v2, %v769_v2  ;;  %v761_v37 = vadd.f32 %v760_v48, %v11577_v6 }
 0x153   :  { %v534_v31 = vpop.f32.mrf.mxu0  ;;  %v1387_v35 = vpop.f32.mrf.mxu1 }
 0x154   :  { %1122 = vst [vmem:[#allocation4 + $0xb4] sm:$0xff] %v8499_v43  ;;  %v535_v44 = vadd.f32 %v534_v31, %v11564_v32  ;;  %1155 = vst [vmem:[#allocation4 + $0x17c] sm:$0xf] %v8532_v42  ;;  %v8528_v56 = vpack.c.bf16 %v761_v37, %v761_v37  ;;  %v1388_v47 = vadd.f32 %v1387_v35, %v11700_v29 }
 0x155   :  { %v536_v15 = vpop.f32.mrf.mxu0  ;;  %v1389_v3 = vpop.f32.mrf.mxu1 }
 0x156   :  { %v8501_v45 = vpack.c.bf16 %v535_v44, %v533_v55  ;;  %v537_v54 = vadd.f32 %v536_v15, %v11560_v58  ;;  %1151 = vst [vmem:[#allocation4 + $0x164] sm:$0xf] %v8528_v56  ;;  %v1390_v6 = vadd.f32 %v1389_v3, %v11710_v34 }
 0x157   :  { %v538_v17 = vpop.f32.mrf.mxu0  ;;  %v1391_v53 = vpop.f32.mrf.mxu1 }
 0x158   :  { %1124 = vst [vmem:[#allocation4 + $0xc0] sm:$0xff] %v8501_v45  ;;  %v539_v30 = vadd.f32 %v538_v17, %v11564_v32  ;;  %v8533_v4 = vpack.c.bf16 %v1390_v6, %v1388_v47  ;;  %v1392_v5 = vadd.f32 %v1391_v53, %v11700_v29 }
 0x159   :  { %v542_v19 = vpop.f32.mrf.mxu0  ;;  %v1393_v9 = vpop.f32.mrf.mxu1 }
 0x15a   :  { %v8503_v63 = vpack.c.bf16 %v539_v30, %v537_v54  ;;  %v543_v36 = vadd.f32 %v542_v19, %v11560_v58  ;;  %2027 = vst [vmem:[#allocation5] sm:$0xff] %v8533_v4  ;;  %v1394_v22 = vadd.f32 %v1393_v9, %v11710_v34 }
 0x15b   :  { %v544_v1 = vpop.f32.mrf.mxu0  ;;  %v1397_v61 = vpop.f32.mrf.mxu1 }
 0x15c   :  { %1126 = vst [vmem:[#allocation4 + $0xcc] sm:$0xff] %v8503_v63  ;;  %v545_v20 = vadd.f32 %v544_v1, %v11564_v32  ;;  %v8535_v23 = vpack.c.bf16 %v1394_v22, %v1392_v5  ;;  %v1398_v11 = vadd.f32 %v1397_v61, %v11700_v29 }
 0x15d   :  { %v546_v52 = vpop.f32.mrf.mxu0  ;;  %v1399_v16 = vpop.f32.mrf.mxu1 }
 0x15e   :  { %v8505_v57 = vpack.c.bf16 %v545_v20, %v543_v36  ;;  %v547_v7 = vadd.f32 %v546_v52, %v11560_v58  ;;  %2029 = vst [vmem:[#allocation5 + $0xc] sm:$0xff] %v8535_v23  ;;  %v1400_v28 = vadd.f32 %v1399_v16, %v11710_v34 }
 0x15f   :  { %v548_v62 = vpop.f32.mrf.mxu0  ;;  %v1401_v8 = vpop.f32.mrf.mxu1 }
 0x160   :  { %1128 = vst [vmem:[#allocation4 + $0xd8] sm:$0xff] %v8505_v57  ;;  %v549_v39 = vadd.f32 %v548_v62, %v11564_v32  ;;  %v8537_v41 = vpack.c.bf16 %v1400_v28, %v1398_v11  ;;  %v1402_v33 = vadd.f32 %v1401_v8, %v11700_v29 }
 0x161   :  { %v552_v14 = vpop.f32.mrf.mxu0  ;;  %v1403_v38 = vpop.f32.mrf.mxu1 }
 0x162   :  { %v8507_v26 = vpack.c.bf16 %v549_v39, %v547_v7  ;;  %v553_v18 = vadd.f32 %v552_v14, %v11560_v58  ;;  %2031 = vst [vmem:[#allocation5 + $0x18] sm:$0xff] %v8537_v41  ;;  %v1404_v50 = vadd.f32 %v1403_v38, %v11710_v34 }
 0x163   :  { %v554_v27 = vpop.f32.mrf.mxu0  ;;  %v1407_v46 = vpop.f32.mrf.mxu1 }
 0x164   :  { %1130 = vst [vmem:[#allocation4 + $0xe4] sm:$0xff] %v8507_v26  ;;  %v555_v21 = vadd.f32 %v554_v27, %v11564_v32  ;;  %v8539_v13 = vpack.c.bf16 %v1404_v50, %v1402_v33  ;;  %v1408_v55 = vadd.f32 %v1407_v46, %v11700_v29 }
 0x165   :  { %v556_v24 = vpop.f32.mrf.mxu0  ;;  %v1409_v60 = vpop.f32.mrf.mxu1 }
 0x166   :  { %v8509_v12 = vpack.c.bf16 %v555_v21, %v553_v18  ;;  %v557_v49 = vadd.f32 %v556_v24, %v11560_v58  ;;  %2033 = vst [vmem:[#allocation5 + $0x24] sm:$0xff] %v8539_v13  ;;  %v1410_v51 = vadd.f32 %v1409_v60, %v11710_v34 }
 0x167   :  { %v558_v43 = vpop.f32.mrf.mxu0  ;;  %v1411_v48 = vpop.f32.mrf.mxu1 }
 0x168   :  { %1132 = vst [vmem:[#allocation4 + $0xf0] sm:$0xff] %v8509_v12  ;;  %v559_v31 = vadd.f32 %v558_v43, %v11564_v32  ;;  %v8541_v37 = vpack.c.bf16 %v1410_v51, %v1408_v55  ;;  %v1412_v17 = vadd.f32 %v1411_v48, %v11700_v29 }
 0x169   :  { %v562_v44 = vpop.f32.mrf.mxu0  ;;  %v1413_v54 = vpop.f32.mrf.mxu1 }
 0x16a   :  { %v8511_v2 = vpack.c.bf16 %v559_v31, %v557_v49  ;;  %v563_v45 = vadd.f32 %v562_v44, %v11560_v58  ;;  %2035 = vst [vmem:[#allocation5 + $0x30] sm:$0xff] %v8541_v37  ;;  %v1414_v56 = vadd.f32 %v1413_v54, %v11710_v34 }
 0x16b   :  { %v564_v15 = vpop.f32.mrf.mxu0  ;;  %v1417_v19 = vpop.f32.mrf.mxu1 }
 0x16c   :  { %1134 = vst [vmem:[#allocation4 + $0xfc] sm:$0xff] %v8511_v2  ;;  %v565_v42 = vadd.f32 %v564_v15, %v11564_v32  ;;  %v8543_v6 = vpack.c.bf16 %v1414_v56, %v1412_v17  ;;  %v1418_v1 = vadd.f32 %v1417_v19, %v11700_v29 }
 0x16d   :  { %v566_v35 = vpop.f32.mrf.mxu0  ;;  %v1419_v36 = vpop.f32.mrf.mxu1 }
 0x16e   :  { %v8513_v30 = vpack.c.bf16 %v565_v42, %v563_v45  ;;  %v567_v3 = vadd.f32 %v566_v35, %v11560_v58  ;;  %2037 = vst [vmem:[#allocation5 + $0x3c] sm:$0xff] %v8543_v6  ;;  %v1420_v4 = vadd.f32 %v1419_v36, %v11710_v34 }
 0x16f   :  { %v568_v47 = vpop.f32.mrf.mxu0  ;;  %v1421_v52 = vpop.f32.mrf.mxu1 }
 0x170   :  { %1136 = vst [vmem:[#allocation4 + $0x108] sm:$0xff] %v8513_v30  ;;  %v569_v63 = vadd.f32 %v568_v47, %v11564_v32  ;;  %v8545_v22 = vpack.c.bf16 %v1420_v4, %v1418_v1  ;;  %v1422_v62 = vadd.f32 %v1421_v52, %v11700_v29 }
 0x171   :  { %v572_v53 = vpop.f32.mrf.mxu0  ;;  %v1423_v7 = vpop.f32.mrf.mxu1 }
 0x172   :  { %v8515_v20 = vpack.c.bf16 %v569_v63, %v567_v3  ;;  %v573_v9 = vadd.f32 %v572_v53, %v11560_v58  ;;  %2039 = vst [vmem:[#allocation5 + $0x48] sm:$0xff] %v8545_v22  ;;  %v1424_v23 = vadd.f32 %v1423_v7, %v11710_v34 }
 0x173   :  { %v574_v5 = vpop.f32.mrf.mxu0  ;;  %v1427_v14 = vpop.f32.mrf.mxu1 }
 0x174   :  { %1138 = vst [vmem:[#allocation4 + $0x114] sm:$0xff] %v8515_v20  ;;  %v575_v57 = vadd.f32 %v574_v5, %v11564_v32  ;;  %v8547_v28 = vpack.c.bf16 %v1424_v23, %v1422_v62  ;;  %v1428_v27 = vadd.f32 %v1427_v14, %v11700_v29 }
 0x175   :  { %v576_v61 = vpop.f32.mrf.mxu0  ;;  %v1429_v18 = vpop.f32.mrf.mxu1 }
 0x176   :  { %v8517_v39 = vpack.c.bf16 %v575_v57, %v573_v9  ;;  %v577_v16 = vadd.f32 %v576_v61, %v11560_v58  ;;  %2041 = vst [vmem:[#allocation5 + $0x54] sm:$0xff] %v8547_v28  ;;  %v1430_v41 = vadd.f32 %v1429_v18, %v11710_v34  ;;  %v11770_v28 = vrot.slane %v11692_v25, %v268_v59 }
 0x177   :  { %v578_v11 = vpop.f32.mrf.mxu0  ;;  %v1431_v24 = vpop.f32.mrf.mxu1 }
 0x178   :  { %1140 = vst [vmem:[#allocation4 + $0x120] sm:$0xff] %v8517_v39  ;;  %v579_v26 = vadd.f32 %v578_v11, %v11564_v32  ;;  %v8549_v50 = vpack.c.bf16 %v1430_v41, %v1428_v27  ;;  %v1432_v43 = vadd.f32 %v1431_v24, %v11700_v29 }
 0x179   :  { %v582_v8 = vpop.f32.mrf.mxu0  ;;  %v1433_v49 = vpop.f32.mrf.mxu1 }
 0x17a   :  { %v8519_v21 = vpack.c.bf16 %v579_v26, %v577_v16  ;;  %v583_v38 = vadd.f32 %v582_v8, %v11560_v58  ;;  %2043 = vst [vmem:[#allocation5 + $0x60] sm:$0xff] %v8549_v50  ;;  %v1434_v13 = vadd.f32 %v1433_v49, %v11710_v34 }
 0x17b   :  { %v584_v33 = vpop.f32.mrf.mxu0  ;;  %v1437_v44 = vpop.f32.mrf.mxu1 }
 0x17c   :  { %1142 = vst [vmem:[#allocation4 + $0x12c] sm:$0xff] %v8519_v21  ;;  %v585_v12 = vadd.f32 %v584_v33, %v11564_v32  ;;  %v8551_v51 = vpack.c.bf16 %v1434_v13, %v1432_v43  ;;  %v1438_v15 = vadd.f32 %v1437_v44, %v11700_v29 }
 0x17d   :  { %v586_v46 = vpop.f32.mrf.mxu0  ;;  %v1439_v45 = vpop.f32.mrf.mxu1 }
 0x17e   :  { %v8521_v31 = vpack.c.bf16 %v585_v12, %v583_v38  ;;  %v587_v60 = vadd.f32 %v586_v46, %v11560_v58  ;;  %2045 = vst [vmem:[#allocation5 + $0x6c] sm:$0xff] %v8551_v51  ;;  %v1440_v37 = vadd.f32 %v1439_v45, %v11710_v34 }
 0x17f   :  { %v588_v55 = vpop.f32.mrf.mxu0  ;;  %v1441_v35 = vpop.f32.mrf.mxu1 }
 0x180   :  { %1144 = vst [vmem:[#allocation4 + $0x138] sm:$0xff] %v8521_v31  ;;  %v589_v2 = vadd.f32 %v588_v55, %v11564_v32  ;;  %v8553_v56 = vpack.c.bf16 %v1440_v37, %v1438_v15  ;;  %v1442_v47 = vadd.f32 %v1441_v35, %v11700_v29 }
 0x181   :  { %v592_v48 = vpop.f32.mrf.mxu0  ;;  %v1443_v3 = vpop.f32.mrf.mxu1 }
 0x182   :  { %v8523_v42 = vpack.c.bf16 %v589_v2, %v587_v60  ;;  %v593_v54 = vadd.f32 %v592_v48, %v11560_v58  ;;  %2047 = vst [vmem:[#allocation5 + $0x78] sm:$0xff] %v8553_v56  ;;  %v1444_v6 = vadd.f32 %v1443_v3, %v11710_v34 }
 0x183   :  { %v594_v17 = vpop.f32.mrf.mxu0  ;;  %v1447_v53 = vpop.f32.mrf.mxu1 }
 0x184   :  { %1146 = vst [vmem:[#allocation4 + $0x144] sm:$0xff] %v8523_v42  ;;  %v595_v30 = vadd.f32 %v594_v17, %v11564_v32  ;;  %v8555_v4 = vpack.c.bf16 %v1444_v6, %v1442_v47  ;;  %v1448_v5 = vadd.f32 %v1447_v53, %v11700_v29 }
 0x185   :  { %v596_v19 = vpop.f32.mrf.mxu0  ;;  %v1449_v9 = vpop.f32.mrf.mxu1 }
 0x186   :  { %v8525_v63 = vpack.c.bf16 %v595_v30, %v593_v54  ;;  %v597_v36 = vadd.f32 %v596_v19, %v11560_v58  ;;  %2049 = vst [vmem:[#allocation5 + $0x84] sm:$0xff] %v8555_v4  ;;  %v1450_v22 = vadd.f32 %v1449_v9, %v11710_v34 }
 0x187   :  { %v598_v1 = vpop.f32.mrf.mxu0  ;;  %v1451_v61 = vpop.f32.mrf.mxu1 }
 0x188   :  { %1148 = vst [vmem:[#allocation4 + $0x150] sm:$0xff] %v8525_v63  ;;  %v599_v20 = vadd.f32 %v598_v1, %v11564_v32  ;;  %v8557_v23 = vpack.c.bf16 %v1450_v22, %v1448_v5  ;;  %v1452_v11 = vadd.f32 %v1451_v61, %v11700_v29 }
 0x189   :  { %v602_v52 = vpop.f32.mrf.mxu0  ;;  %v1453_v16 = vpop.f32.mrf.mxu1 }
 0x18a   :  { %v8527_v57 = vpack.c.bf16 %v599_v20, %v597_v36  ;;  %v603_v7 = vadd.f32 %v602_v52, %v11560_v58  ;;  %2051 = vst [vmem:[#allocation5 + $0x90] sm:$0xff] %v8557_v23  ;;  %v1454_v27 = vadd.f32 %v1453_v16, %v11710_v34 }
 0x18b   :  { %v604_v62 = vpop.f32.mrf.mxu0  ;;  %v1457_v18 = vpop.f32.mrf.mxu1 }
 0x18c   :  { %1150 = vst [vmem:[#allocation4 + $0x15c] sm:$0xff] %v8527_v57  ;;  %v605_v39 = vadd.f32 %v604_v62, %v11564_v32  ;;  %v8559_v33 = vpack.c.bf16 %v1454_v27, %v1452_v11  ;;  %v1458_v24 = vadd.f32 %v1457_v18, %v11700_v29 }
 0x18d   :  { %v606_v14 = vpop.f32.mrf.mxu0  ;;  %v1459_v12 = vpop.f32.mrf.mxu1 }
 0x18e   :  { %v8529_v26 = vpack.c.bf16 %v605_v39, %v603_v7  ;;  %v607_v21 = vadd.f32 %v606_v14, %v11560_v58  ;;  %2053 = vst [vmem:[#allocation5 + $0x9c] sm:$0xff] %v8559_v33  ;;  %v1460_v59 = vadd.f32 %v1459_v12, %v11710_v34 }
 0x18f   :  { %v608_v8 = vpop.f32.mrf.mxu0  ;;  %v1461_v43 = vpop.f32.mrf.mxu1 }
 0x190   :  { %1152 = vst [vmem:[#allocation4 + $0x168] sm:$0xff] %v8529_v26  ;;  %v609_v41 = vadd.f32 %v608_v8, %v11564_v32  ;;  %v8561_v58 = vpack.c.bf16 %v1460_v59, %v1458_v24  ;;  %v1462_v32 = vadd.f32 %v1461_v43, %v11700_v29 }
 0x191   :  { %v9193_v38 = vpop.f32.mrf.mxu0  ;;  %v1463_v13 = vpop.f32.mrf.mxu1 }
 0x192   :  { %v8531_v50 = vpack.c.bf16 %v609_v41, %v607_v21  ;;  %v1589_v40 = vadd.f32 %v9193_v38, %v11770_v28  ;;  %2055 = vst [vmem:[#allocation5 + $0xa8] sm:$0xff] %v8561_v58  ;;  %v1464_v60 = vadd.f32 %v1463_v13, %v11710_v34 }
 0x193   :  { %v1580_v25 = vpop.f32.mrf.mxu0  ;;  %v1467_v51 = vpop.f32.mrf.mxu1 }
 0x194   :  { %1154 = vst [vmem:[#allocation4 + $0x174] sm:$0xff] %v8531_v50  ;;  %v8538_v46 = vpack.c.bf16 %v1589_v40, %v1589_v40  ;;  %v1581_v49 = vadd.f32 %v1580_v25, %v11770_v28  ;;  %v8563_v45 = vpack.c.bf16 %v1464_v60, %v1462_v32  ;;  %v1468_v42 = vadd.f32 %v1467_v51, %v11700_v29 }
 0x195   :  { %v9194_v31 = vpop.f32.mrf.mxu0  ;;  %v1469_v17 = vpop.f32.mrf.mxu1 }
 0x196   :  { %2032 = vst [vmem:[#allocation5 + $0x20] sm:$0xf] %v8538_v46  ;;  %v8534_v55 = vpack.c.bf16 %v1581_v49, %v1581_v49  ;;  %v1592_v44 = vadd.f32 %v9194_v31, %v11770_v28  ;;  %2057 = vst [vmem:[#allocation5 + $0xb4] sm:$0xff] %v8563_v45  ;;  %v1470_v30 = vadd.f32 %v1469_v17, %v11710_v34 }
 0x197   :  { %v1583_v2 = vpop.f32.mrf.mxu0  ;;  %v1471_v47 = vpop.f32.mrf.mxu1 }
 0x198   :  { %2028 = vst [vmem:[#allocation5 + $0x8] sm:$0xf] %v8534_v55  ;;  %v8540_v15 = vpack.c.bf16 %v1592_v44, %v1592_v44  ;;  %v1584_v48 = vadd.f32 %v1583_v2, %v11770_v28  ;;  %v8565_v63 = vpack.c.bf16 %v1470_v30, %v1468_v42  ;;  %v1472_v6 = vadd.f32 %v1471_v47, %v11700_v29 }
 0x199   :  { %v9197_v37 = vpop.f32.mrf.mxu0  ;;  %v1473_v53 = vpop.f32.mrf.mxu1 }
 0x19a   :  { %2034 = vst [vmem:[#allocation5 + $0x2c] sm:$0xf] %v8540_v15  ;;  %v8536_v35 = vpack.c.bf16 %v1584_v48, %v1584_v48  ;;  %v1605_v54 = vadd.f32 %v9197_v37, %v11770_v28  ;;  %2059 = vst [vmem:[#allocation5 + $0xc0] sm:$0xff] %v8565_v63  ;;  %v1474_v4 = vadd.f32 %v1473_v53, %v11710_v34 }
 0x19b   :  { %v1596_v56 = vpop.f32.mrf.mxu0  ;;  %v1477_v52 = vpop.f32.mrf.mxu1 }
 0x19c   :  { %2030 = vst [vmem:[#allocation5 + $0x14] sm:$0xf] %v8536_v35  ;;  %v8546_v19 = vpack.c.bf16 %v1605_v54, %v1605_v54  ;;  %v1597_v3 = vadd.f32 %v1596_v56, %v11770_v28  ;;  %v8567_v22 = vpack.c.bf16 %v1474_v4, %v1472_v6  ;;  %v1478_v62 = vadd.f32 %v1477_v52, %v11700_v29 }
 0x19d   :  { %v9198_v1 = vpop.f32.mrf.mxu0  ;;  %v1479_v7 = vpop.f32.mrf.mxu1 }
 0x19e   :  { %2040 = vst [vmem:[#allocation5 + $0x50] sm:$0xf] %v8546_v19  ;;  %v8542_v36 = vpack.c.bf16 %v1597_v3, %v1597_v3  ;;  %v1608_v20 = vadd.f32 %v9198_v1, %v11770_v28  ;;  %2061 = vst [vmem:[#allocation5 + $0xcc] sm:$0xff] %v8567_v22  ;;  %v1480_v11 = vadd.f32 %v1479_v7, %v11710_v34 }
 0x19f   :  { %v1599_v5 = vpop.f32.mrf.mxu0  ;;  %v1481_v16 = vpop.f32.mrf.mxu1 }
 0x1a0   :  { %2036 = vst [vmem:[#allocation5 + $0x38] sm:$0xf] %v8542_v36  ;;  %v8548_v9 = vpack.c.bf16 %v1608_v20, %v1608_v20  ;;  %v1600_v57 = vadd.f32 %v1599_v5, %v11770_v28  ;;  %v8569_v8 = vpack.c.bf16 %v1480_v11, %v1478_v62  ;;  %v1482_v18 = vadd.f32 %v1481_v16, %v11700_v29 }
 0x1a1   :  { %v9201_v61 = vpop.f32.mrf.mxu0  ;;  %v1483_v41 = vpop.f32.mrf.mxu1 }
 0x1a2   :  { %2042 = vst [vmem:[#allocation5 + $0x5c] sm:$0xf] %v8548_v9  ;;  %v8544_v39 = vpack.c.bf16 %v1600_v57, %v1600_v57  ;;  %v1621_v23 = vadd.f32 %v9201_v61, %v11770_v28  ;;  %2063 = vst [vmem:[#allocation5 + $0xd8] sm:$0xff] %v8569_v8  ;;  %v1484_v38 = vadd.f32 %v1483_v41, %v11710_v34 }
 0x1a3   :  { %v1612_v14 = vpop.f32.mrf.mxu0  ;;  %v1487_v50 = vpop.f32.mrf.mxu1 }
 0x1a4   :  { %2038 = vst [vmem:[#allocation5 + $0x44] sm:$0xf] %v8544_v39  ;;  %v8554_v26 = vpack.c.bf16 %v1621_v23, %v1621_v23  ;;  %v1613_v27 = vadd.f32 %v1612_v14, %v11770_v28  ;;  %v8571_v25 = vpack.c.bf16 %v1484_v38, %v1482_v18  ;;  %v1488_v43 = vadd.f32 %v1487_v50, %v11700_v29 }
 0x1a5   :  { %v9202_v21 = vpop.f32.mrf.mxu0  ;;  %v1489_v49 = vpop.f32.mrf.mxu1 }
 0x1a6   :  { %2048 = vst [vmem:[#allocation5 + $0x80] sm:$0xf] %v8554_v26  ;;  %v8550_v33 = vpack.c.bf16 %v1613_v27, %v1613_v27  ;;  %v1624_v24 = vadd.f32 %v9202_v21, %v11770_v28  ;;  %2065 = vst [vmem:[#allocation5 + $0xe4] sm:$0xff] %v8571_v25  ;;  %v1490_v31 = vadd.f32 %v1489_v49, %v11710_v34 }
 0x1a7   :  { %v1615_v12 = vpop.f32.mrf.mxu0  ;;  %v1491_v55 = vpop.f32.mrf.mxu1 }
 0x1a8   :  { %2044 = vst [vmem:[#allocation5 + $0x68] sm:$0xf] %v8550_v33  ;;  %v8556_v40 = vpack.c.bf16 %v1624_v24, %v1624_v24  ;;  %v1616_v59 = vadd.f32 %v1615_v12, %v11770_v28  ;;  %v8573_v2 = vpack.c.bf16 %v1490_v31, %v1488_v43  ;;  %v1492_v51 = vadd.f32 %v1491_v55, %v11700_v29 }
 0x1a9   :  { %v9205_v46 = vpop.f32.mrf.mxu0  ;;  %v1493_v48 = vpop.f32.mrf.mxu1 }
 0x1aa   :  { %2050 = vst [vmem:[#allocation5 + $0x8c] sm:$0xf] %v8556_v40  ;;  %v8552_v58 = vpack.c.bf16 %v1616_v59, %v1616_v59  ;;  %v1637_v32 = vadd.f32 %v9205_v46, %v11770_v28  ;;  %2067 = vst [vmem:[#allocation5 + $0xf0] sm:$0xff] %v8573_v2  ;;  %v1494_v37 = vadd.f32 %v1493_v48, %v11710_v34 }
 0x1ab   :  { %v1628_v13 = vpop.f32.mrf.mxu0  ;;  %v1497_v35 = vpop.f32.mrf.mxu1 }
 0x1ac   :  { %2046 = vst [vmem:[#allocation5 + $0x74] sm:$0xf] %v8552_v58  ;;  %v8562_v44 = vpack.c.bf16 %v1637_v32, %v1637_v32  ;;  %v1629_v60 = vadd.f32 %v1628_v13, %v11770_v28  ;;  %v8575_v56 = vpack.c.bf16 %v1494_v37, %v1492_v51  ;;  %v1498_v47 = vadd.f32 %v1497_v35, %v11700_v29 }
 0x1ad   :  { %v9206_v15 = vpop.f32.mrf.mxu0  ;;  %v1499_v3 = vpop.f32.mrf.mxu1 }
 0x1ae   :  { %2056 = vst [vmem:[#allocation5 + $0xb0] sm:$0xf] %v8562_v44  ;;  %v8558_v45 = vpack.c.bf16 %v1629_v60, %v1629_v60  ;;  %v1640_v42 = vadd.f32 %v9206_v15, %v11770_v28  ;;  %2069 = vst [vmem:[#allocation5 + $0xfc] sm:$0xff] %v8575_v56  ;;  %v1500_v1 = vadd.f32 %v1499_v3, %v11710_v34 }
 0x1af   :  { %v1631_v17 = vpop.f32.mrf.mxu0  ;;  %v1501_v36 = vpop.f32.mrf.mxu1 }
 0x1b0   :  { %2052 = vst [vmem:[#allocation5 + $0x98] sm:$0xf] %v8558_v45  ;;  %v8564_v54 = vpack.c.bf16 %v1640_v42, %v1640_v42  ;;  %v1632_v30 = vadd.f32 %v1631_v17, %v11770_v28  ;;  %v8577_v5 = vpack.c.bf16 %v1500_v1, %v1498_v47  ;;  %v1502_v52 = vadd.f32 %v1501_v36, %v11700_v29 }
 0x1b1   :  { %v9209_v19 = vpop.f32.mrf.mxu0  ;;  %v1503_v57 = vpop.f32.mrf.mxu1 }
 0x1b2   :  { %2058 = vst [vmem:[#allocation5 + $0xbc] sm:$0xf] %v8564_v54  ;;  %v8560_v63 = vpack.c.bf16 %v1632_v30, %v1632_v30  ;;  %v1653_v6 = vadd.f32 %v9209_v19, %v11770_v28  ;;  %2071 = vst [vmem:[#allocation5 + $0x108] sm:$0xff] %v8577_v5  ;;  %v1504_v61 = vadd.f32 %v1503_v57, %v11710_v34 }
 0x1b3   :  { %v1644_v53 = vpop.f32.mrf.mxu0  ;;  %v1507_v39 = vpop.f32.mrf.mxu1 }
 0x1b4   :  { %2054 = vst [vmem:[#allocation5 + $0xa4] sm:$0xf] %v8560_v63  ;;  %v8570_v20 = vpack.c.bf16 %v1653_v6, %v1653_v6  ;;  %v1645_v4 = vadd.f32 %v1644_v53, %v11770_v28  ;;  %v8579_v14 = vpack.c.bf16 %v1504_v61, %v1502_v52  ;;  %v1508_v16 = vadd.f32 %v1507_v39, %v11700_v29 }
 0x1b5   :  { %v9210_v9 = vpop.f32.mrf.mxu0  ;;  %v1509_v27 = vpop.f32.mrf.mxu1 }
 0x1b6   :  { %2064 = vst [vmem:[#allocation5 + $0xe0] sm:$0xf] %v8570_v20  ;;  %v8566_v22 = vpack.c.bf16 %v1645_v4, %v1645_v4  ;;  %v1656_v62 = vadd.f32 %v9210_v9, %v11770_v28  ;;  %2073 = vst [vmem:[#allocation5 + $0x114] sm:$0xff] %v8579_v14  ;;  %v1510_v21 = vadd.f32 %v1509_v27, %v11710_v34 }
 0x1b7   :  { %v1647_v7 = vpop.f32.mrf.mxu0  ;;  %v1511_v33 = vpop.f32.mrf.mxu1 }
 0x1b8   :  { %2060 = vst [vmem:[#allocation5 + $0xc8] sm:$0xf] %v8566_v22  ;;  %v8572_v23 = vpack.c.bf16 %v1656_v62, %v1656_v62  ;;  %v1648_v11 = vadd.f32 %v1647_v7, %v11770_v28  ;;  %v8581_v12 = vpack.c.bf16 %v1510_v21, %v1508_v16  ;;  %v1512_v50 = vadd.f32 %v1511_v33, %v11700_v29  ;;  %v2098_v7 = vld [vmem:[#allocation4] sm:$0xff] }
 0x1b9   :  { %v9213_v26 = vpop.f32.mrf.mxu0  ;;  %v1513_v59 = vpop.f32.mrf.mxu1 }
 0x1ba   :  { %2066 = vst [vmem:[#allocation5 + $0xec] sm:$0xf] %v8572_v23  ;;  %v8568_v8 = vpack.c.bf16 %v1648_v11, %v1648_v11  ;;  %v1669_v18 = vadd.f32 %v9213_v26, %v11770_v28  ;;  %2075 = vst [vmem:[#allocation5 + $0x120] sm:$0xff] %v8581_v12  ;;  %v1514_v46 = vadd.f32 %v1513_v59, %v11710_v34 }
 0x1bb   :  { %v1660_v41 = vpop.f32.mrf.mxu0  ;;  %v1517_v58 = vpop.f32.mrf.mxu1 }
 0x1bc   :  { %2062 = vst [vmem:[#allocation5 + $0xd4] sm:$0xf] %v8568_v8  ;;  %v8578_v24 = vpack.c.bf16 %v1669_v18, %v1669_v18  ;;  %v1661_v38 = vadd.f32 %v1660_v41, %v11770_v28  ;;  %v8583_v13 = vpack.c.bf16 %v1514_v46, %v1512_v50  ;;  %v1518_v55 = vadd.f32 %v1517_v58, %v11700_v29  ;;  %v2100_v50 = vld [vmem:[#allocation4 + $0xc] sm:$0xff] }
 0x1bd   :  { %v9214_v40 = vpop.f32.mrf.mxu0  ;;  %v1519_v60 = vpop.f32.mrf.mxu1  ;;  %v2533_v18 = vunpack.c.l.bf16 %v2098_v7 }
 0x1be   :  { %2072 = vst [vmem:[#allocation5 + $0x110] sm:$0xf] %v8578_v24  ;;  %v8574_v25 = vpack.c.bf16 %v1661_v38, %v1661_v38  ;;  %v1672_v43 = vadd.f32 %v9214_v40, %v11770_v28  ;;  %2077 = vst [vmem:[#allocation5 + $0x12c] sm:$0xff] %v8583_v13  ;;  %v1520_v15 = vadd.f32 %v1519_v60, %v11710_v34 }
 0x1bf   :  { %v1663_v49 = vpop.f32.mrf.mxu0  ;;  %v1521_v45 = vpop.f32.mrf.mxu1 }
 0x1c0   :  { %2068 = vst [vmem:[#allocation5 + $0xf8] sm:$0xf] %v8574_v25  ;;  %v8580_v32 = vpack.c.bf16 %v1672_v43, %v1672_v43  ;;  %v1664_v31 = vadd.f32 %v1663_v49, %v11770_v28  ;;  %v8585_v17 = vpack.c.bf16 %v1520_v15, %v1518_v55  ;;  %v1522_v35 = vadd.f32 %v1521_v45, %v11700_v29 }
 0x1c1   :  { %v9217_v44 = vpop.f32.mrf.mxu0  ;;  %v1523_v30 = vpop.f32.mrf.mxu1  ;;  %v2551_v43 = vrot.slane %v2098_v7, 4 }
 0x1c2   :  { %2074 = vst [vmem:[#allocation5 + $0x11c] sm:$0xf] %v8580_v32  ;;  %v8576_v2 = vpack.c.bf16 %v1664_v31, %v1664_v31  ;;  %v1685_v51 = vadd.f32 %v9217_v44, %v11770_v28  ;;  %2079 = vst [vmem:[#allocation5 + $0x138] sm:$0xff] %v8585_v17  ;;  %v1524_v19 = vadd.f32 %v1523_v30, %v11710_v34  ;;  %v2534_v31 = vunpack.c.l.bf16 %v2100_v50 }
 0x1c3   :  { %v1676_v48 = vpop.f32.mrf.mxu0  ;;  %v1527_v63 = vpop.f32.mrf.mxu1  ;;  %v2552_v44 = vrot.slane %v2100_v50, 4 }
 0x1c4   :  { %2070 = vst [vmem:[#allocation5 + $0x104] sm:$0xf] %v8576_v2  ;;  %v8586_v42 = vpack.c.bf16 %v1685_v51, %v1685_v51  ;;  %v1677_v37 = vadd.f32 %v1676_v48, %v11770_v28  ;;  %v8587_v53 = vpack.c.bf16 %v1524_v19, %v1522_v35  ;;  %v1528_v36 = vadd.f32 %v1527_v63, %v11700_v29 }
 0x1c5   :  { %v9218_v54 = vpop.f32.mrf.mxu0  ;;  %v1529_v4 = vpop.f32.mrf.mxu1  ;;  %v2555_v2 = vunpack.c.l.bf16 %v2551_v43  ;;  %v2556_v35 = vunpack.c.l.bf16 %v2552_v44 }
 0x1c6   :  { %2080 = vst [vmem:[#allocation5 + $0x140] sm:$0xf] %v8586_v42  ;;  %v8582_v56 = vpack.c.bf16 %v1677_v37, %v1677_v37  ;;  %v1688_v47 = vadd.f32 %v9218_v54, %v11770_v28  ;;  %2081 = vst [vmem:[#allocation5 + $0x144] sm:$0xff] %v8587_v53  ;;  %v1530_v9 = vadd.f32 %v1529_v4, %v11710_v34  ;;  %v11850_v53 = vld [vmem:[%s13867_s9] ss:$0 sm:$0xff] }
 0x1c7   :  { %v1679_v3 = vpop.f32.mrf.mxu0  ;;  %v1531_v22 = vpop.f32.mrf.mxu1  ;;  %v2099_v4 = vld [vmem:[#allocation4 + $0x8] ss:$12 sps:$4 sm:$0xff]  }
 0x1c8   :  { %2076 = vst [vmem:[#allocation5 + $0x128] sm:$0xf] %v8582_v56  ;;  %v8588_v6 = vpack.c.bf16 %v1688_v47, %v1688_v47  ;;  %v1680_v1 = vadd.f32 %v1679_v3, %v11770_v28  ;;  %v11835_v39 = vpack.c.bf16 %v1530_v9, %v1528_v36  ;;  %v1532_v23 = vadd.f32 %v1531_v22, %v11700_v29 }
 0x1c9   :  { %v9221_v20 = vpop.f32.mrf.mxu0  ;;  %v1533_v14 = vpop.f32.mrf.mxu1  ;;  %v2575_v7 = vunpack.c.l.bf16 %v2099_v4 }
 0x1ca   :  { %2082 = vst [vmem:[#allocation5 + $0x14c] sm:$0xf] %v8588_v6  ;;  %v8584_v5 = vpack.c.bf16 %v1680_v1, %v1680_v1  ;;  %v1701_v52 = vadd.f32 %v9221_v20, %v11770_v28  ;;  %v1534_v27 = vadd.f32 %v1533_v14, %v11710_v34 }
 0x1cb   :  { %v1692_v57 = vpop.f32.mrf.mxu0  ;;  %v1537_v21 = vpop.f32.mrf.mxu1 }
 0x1cc   :  { %2078 = vst [vmem:[#allocation5 + $0x134] sm:$0xf] %v8584_v5  ;;  %v8594_v62 = vpack.c.bf16 %v1701_v52, %v1701_v52  ;;  %v1693_v61 = vadd.f32 %v1692_v57, %v11770_v28  ;;  %v11841_v24 = vpack.c.bf16 %v1534_v27, %v1532_v23  ;;  %v1538_v38 = vadd.f32 %v1537_v21, %v11700_v29 }
 0x1cd   :  { %v9222_v11 = vpop.f32.mrf.mxu0  ;;  %v1539_v40 = vpop.f32.mrf.mxu1 }
 0x1ce   :  { %2088 = vst [vmem:[#allocation5 + $0x170] sm:$0xf] %v8594_v62  ;;  %v8590_v16 = vpack.c.bf16 %v1693_v61, %v1693_v61  ;;  %v1704_v26 = vadd.f32 %v9222_v11, %v11770_v28  ;;  %v1540_v46 = vadd.f32 %v1539_v40, %v11710_v34 }
 0x1cf   :  { %v1695_v8 = vpop.f32.mrf.mxu0  ;;  %v1541_v58 = vpop.f32.mrf.mxu1 }
 0x1d0   :  { %2084 = vst [vmem:[#allocation5 + $0x158] sm:$0xf] %v8590_v16  ;;  %v8596_v41 = vpack.c.bf16 %v1704_v26, %v1704_v26  ;;  %v1696_v33 = vadd.f32 %v1695_v8, %v11770_v28  ;;  %v8593_v13 = vpack.c.bf16 %v1540_v46, %v1538_v38  ;;  %v1542_v28 = vadd.f32 %v1541_v58, %v11700_v29 }
 0x1d1   :  { %v2270_v12 = vpop.f32.mrf.mxu0  ;;  %v1543_v60 = vpop.f32.mrf.mxu1  ;;  %v2576_v38 = vunpack.c.h.bf16 %v2099_v4 }
 0x1d2   :  { %2090 = vst [vmem:[#allocation5 + $0x17c] sm:$0xf] %v8596_v41  ;;  %v8592_v59 = vpack.c.bf16 %v1696_v33, %v1696_v33  ;;  %v2535_v25 = vadd.f32 %v2533_v18, %v2270_v12  ;;  %v1544_v15 = vadd.f32 %v1543_v60, %v11710_v34  ;;  %v2616_v52 = vunpack.c.l.bf16 %v8593_v13 }
 0x1d3   :  { %v2272_v49 = vpop.f32.mrf.mxu0  ;;  %v2313_v48 = vpop.f32.mrf.mxu1  ;;  %v2634_v57 = vrot.slane %v8593_v13, 4 }
 0x1d4   :  { %2086 = vst [vmem:[#allocation5 + $0x164] sm:$0xf] %v8592_v59  ;;  %v8277_v32 = vmul.f32 -1.442695, %v2535_v25  ;;  %v2557_v45 = vadd.f32 %v2555_v2, %v2272_v49  ;;  %v8595_v17 = vpack.c.bf16 %v1544_v15, %v1542_v28  ;;  %v2571_v5 = vadd.f32 %v11850_v53, %v2313_v48  ;;  %v2596_v48 = vpop.permute.xlu0 %2595 }
 0x1d5   :  { %v2274_v55 = vpop.f32.mrf.mxu0  ;;  %v9241_v54 = vpop.f32.mrf.mxu1  ;;  %v2638_v26 = vunpack.c.l.bf16 %v2634_v57  ;;  %vm2600_vm0 = vcmp.eq.s32.totalorder %v2596_v48, 1  ;;  %v11869_v57 = vld [vmem:[#allocation15 + $0xb0] ss:$12 sps:$4 sm:$0xff]   ;;  %v11930_v48 = vld [vmem:[#allocation15 + $0x18] ss:$12 sps:$4 sm:$0xff]  }
 0x1d6   :  { %9985 = vpow2.f32 %v8277_v32  ;;  %v2536_v51 = vadd.f32 %v2534_v31, %v2274_v55  ;;  %v8279_v47 = vmul.f32 -1.442695, %v2557_v45  ;;  %v2617_v16 = vunpack.c.l.bf16 %v8595_v17 }
 0x1d7   :  { %v2276_v37 = vpop.f32.mrf.mxu0  ;;  %v2316_v56 = vpop.f32.mrf.mxu1  ;;  %v2635_v8 = vrot.slane %v8595_v17, 4 }
 0x1d8   :  { %v8278_v42 = vmul.f32 -1.442695, %v2536_v51  ;;  %v2558_v30 = vadd.f32 %v2556_v35, %v2276_v37  ;;  %v2572_v21 = vadd.f32 %v11850_v53, %v2316_v56 }
 0x1d9   :  { %v9242_v29 = vpop.f32.mrf.mxu1  ;;  %v2639_v43 = vunpack.c.l.bf16 %v2635_v8 }
 0x1da   :  { %9987 = vpow2.f32 %v8278_v42  ;;  %v8280_v19 = vmul.f32 -1.442695, %v2558_v30  ;;  %v2599_v29 = vpop.permute.xlu0 %2598 }
 0x1db   :  { %9989 = vpow2.f32 %v8279_v47  ;;  %vm2601_vm4 = vcmp.eq.s32.totalorder %v2599_v29, 1 }
 0x1dc   :  { %9991 = vpow2.f32 %v8280_v19  ;;  %vm8821_vm5 = vmpackc.low %vm2601_vm4, %vm2600_vm0 }
 0x1e3   :  { %v9986_v3 = vpop.eup %9985 }
 0x1e4   :  { %v2543_v63 = vadd.f32 1.0, %v9986_v3 }
 0x1e6   :  { %9993 = vrcp.f32 %v2543_v63  ;;  %v11857_v63 = vld [vmem:[%s13868_s10] ss:$0 sm:$0xff] }
 0x1e7   :  { %v9988_v6 = vpop.eup %9987 }
 0x1e8   :  { %v2544_v34 = vadd.f32 1.0, %v9988_v6  ;;  %v9990_v1 = vpop.eup %9989 }
 0x1e9   :  { %v9992_v36 = vpop.eup %9991  ;;  %v2565_v20 = vadd.f32 1.0, %v9990_v1 }
 0x1ea   :  { %9995 = vrcp.f32 %v2544_v34  ;;  %v2566_v61 = vadd.f32 1.0, %v9992_v36 }
 0x1eb   :  { %9997 = vrcp.f32 %v2565_v20 }
 0x1f1   :  { %v2483_v9 = vpop.f32.mrf.mxu0 }
 0x1f2   :  { %v2618_v22 = vadd.f32 %v2616_v52, %v2483_v9  ;;  %v2104_v52 = vld [vmem:[#allocation5 + $0x170] ss:$12 sps:$4 sm:$0xff]  }
 0x1f3   :  { %v9994_v62 = vpop.eup %9993  ;;  %v2485_v23 = vpop.f32.mrf.mxu0  ;;  %v11866_v9 = vld [vmem:[#allocation15 + $0xa8] ss:$12 sps:$4 sm:$0xff]  }
 0x1f4   :  { %v2573_v11 = vmul.f32 %v9994_v62, %v2571_v5  ;;  %v8283_v14 = vmul.f32 -1.442695, %v2618_v22  ;;  %v2526_v12 = vpop.f32.mrf.mxu1  ;;  %v2640_v40 = vadd.f32 %v2638_v26, %v2485_v23  ;;  %v11872_v22 = vld [vmem:[#allocation15 + $0x94] ss:$12 sps:$4 sm:$0xff]   ;;  %v2658_v23 = vunpack.c.l.bf16 %v2104_v52 }
 0x1f5   :  { %v2487_v27 = vpop.f32.mrf.mxu0  ;;  %v2654_v5 = vadd.f32 %v11857_v63, %v2526_v12  ;;  %v11896_v12 = vld [vmem:[#allocation15 + $0x64] ss:$12 sps:$4 sm:$0xff]  }
 0x1f6   :  { %v2577_v18 = vadd.f32 %v2575_v7, %v2573_v11  ;;  %9999 = vpow2.f32 %v8283_v14  ;;  %v2619_v41 = vadd.f32 %v2617_v16, %v2487_v27  ;;  %v9261_v46 = vpop.f32.mrf.mxu1  ;;  %v8285_v31 = vmul.f32 -1.442695, %v2640_v40  ;;  %v11879_v11 = vld [vmem:[#allocation15 + $0x90] ss:$12 sps:$4 sm:$0xff]   ;;  %v11882_v14 = vld [vmem:[#allocation15 + $0x98] ss:$12 sps:$4 sm:$0xff]  }
 0x1f7   :  { %v9996_v33 = vpop.eup %9995  ;;  %10001 = vrcp.f32 %v2566_v61  ;;  %v2489_v25 = vpop.f32.mrf.mxu0  ;;  %v11886_v27 = vld [vmem:[#allocation15 + $0x7c] ss:$12 sps:$4 sm:$0xff]  }
 0x1f8   :  { %10003 = vtanh.f32 %v2577_v18  ;;  %v2574_v50 = vmul.f32 %v9996_v33, %v2572_v21  ;;  %v8284_v59 = vmul.f32 -1.442695, %v2619_v41  ;;  %v2641_v58 = vadd.f32 %v2639_v43, %v2489_v25  ;;  %v2529_v32 = vpop.f32.mrf.mxu1  ;;  %v9998_v55 = vpop.eup %9997  ;;  %v11890_v41 = vld [vmem:[#allocation15 + $0x78] ss:$12 sps:$4 sm:$0xff]   ;;  %v11893_v33 = vld [vmem:[#allocation15 + $0x80] ss:$12 sps:$4 sm:$0xff]  }
 0x1f9   :  { %v2581_v51 = vsub.f32 1.0, %v9998_v55  ;;  %v2585_v35 = vmul.f32 0.0, %v9998_v55  ;;  %v2655_v26 = vadd.f32 %v11857_v63, %v2529_v32  ;;  %v2659_v21 = vunpack.c.h.bf16 %v2104_v52  ;;  %v11903_v40 = vld [vmem:[#allocation15 + $0x68] ss:$12 sps:$4 sm:$0xff]   ;;  %v11913_v46 = vld [vmem:[#allocation15 + $0x50] ss:$12 sps:$4 sm:$0xff]  }
 0x1fa   :  { %v2578_v49 = vadd.f32 %v2576_v38, %v2574_v50  ;;  %10005 = vpow2.f32 %v8284_v59  ;;  %v9262_v13 = vpop.f32.mrf.mxu1  ;;  %v8286_v28 = vmul.f32 -1.442695, %v2641_v58  ;;  %v11900_v50 = vld [vmem:[#allocation15 + $0x60] ss:$12 sps:$4 sm:$0xff]   ;;  %v11910_v43 = vld [vmem:[#allocation15 + $0x48] ss:$12 sps:$4 sm:$0xff]  }
 0x1fb   :  { %v11906_v59 = vld [vmem:[#allocation15 + $0x4c] ss:$12 sps:$4 sm:$0xff]   ;;  %v2680_v13 = vpop.permute.xlu1 %2679  ;;  %v11969_v52 = vld [vmem:[#allocation14 + $0x90] ss:$12 sps:$4 sm:$0xff]  }
 0x1fc   :  { %10007 = vtanh.f32 %v2578_v49  ;;  %v11916_v49 = vld [vmem:[#allocation15 + $0x34] ss:$12 sps:$4 sm:$0xff]   ;;  %v11923_v55 = vld [vmem:[#allocation15 + $0x38] ss:$12 sps:$4 sm:$0xff]   ;;  %vm2684_vm6 = vcmp.eq.s32.totalorder %v2680_v13, 1 }
 0x1fd   :  { %10009 = vpow2.f32 %v8285_v31  ;;  %v12019_v13 = vld [vmem:[#allocation14 + $0x18] ss:$12 sps:$4 sm:$0xff]  }
 0x1fe   :  { %10011 = vpow2.f32 %v8286_v28  ;;  %v11920_v28 = vld [vmem:[#allocation15 + $0x30] ss:$12 sps:$4 sm:$0xff]   ;;  %14056 = vst [vmem:[#allocation38_spill] sm:$0xff] %v12019_v13 }
 0x203   :  { %v10000_v44 = vpop.eup %9999 }
 0x204   :  { %v10002_v60 = vpop.eup %10001  ;;  %v2626_v2 = vadd.f32 1.0, %v10000_v44  ;;  %v11926_v44 = vld [vmem:[#allocation15 + $0x1c] ss:$12 sps:$4 sm:$0xff]  }
 0x205   :  { %v10004_v15 = vpop.eup %10003  ;;  %v2582_v17 = vsub.f32 1.0, %v10002_v60  ;;  %v2586_v56 = vmul.f32 0.0, %v10002_v60 }
 0x206   :  { %10013 = vrcp.f32 %v2626_v2  ;;  %v2583_v45 = vmul.f32 %v10004_v15, %v2581_v51 }
 0x207   :  { %v10006_v42 = vpop.eup %10005 }
 0x208   :  { %v2627_v37 = vadd.f32 1.0, %v10006_v42  ;;  %v2587_v47 = vadd.f32 %v2585_v35, %v2583_v45  ;;  %v11933_v45 = vld [vmem:[#allocation15 + $0x20] ss:$12 sps:$4 sm:$0xff]   ;;  %v11936_v42 = vld [vmem:[#allocation15 + $0x4] ss:$12 sps:$4 sm:$0xff]  }
 0x209   :  { %v10008_v54 = vpop.eup %10007 }
 0x20a   :  { %10015 = vrcp.f32 %v2627_v37  ;;  %v2584_v30 = vmul.f32 %v10008_v54, %v2582_v17  ;;  %v10010_v3 = vpop.eup %10009  ;;  %v11859_v6 = vsel %vm2600_vm0, %v2587_v47, 0.0  ;;  %v2683_v54 = vpop.permute.xlu1 %2682 }
 0x20b   :  { %v10012_v20 = vpop.eup %10011  ;;  %v2648_v4 = vadd.f32 1.0, %v10010_v3  ;;  %vm2685_vm7 = vcmp.eq.s32.totalorder %v2683_v54, 1 }
 0x20c   :  { %v2588_v19 = vadd.f32 %v2586_v56, %v2584_v30  ;;  %v2649_v61 = vadd.f32 1.0, %v10012_v20  ;;  %v11940_v56 = vld [vmem:[#allocation15] ss:$12 sps:$4 sm:$0xff]   ;;  %vm8827_vm8 = vmpackc.low %vm2685_vm7, %vm2684_vm6  ;;  %v11956_v20 = vld [vmem:[#allocation14 + $0xa8] ss:$12 sps:$4 sm:$0xff]  }
 0x20d   :  { %10017 = vrcp.f32 %v2648_v4  ;;  %v11959_v4 = vld [vmem:[#allocation14 + $0xb0] ss:$12 sps:$4 sm:$0xff]  }
 0x20e   :  { %v11861_v34 = vsel %vm2601_vm4, %v2588_v19, 0.0  ;;  %v8822_v1 = vpack.c.bf16 %v2588_v19, %v2587_v47  ;;  %10019 = vrcp.f32 %v2649_v61  ;;  %v11943_v47 = vld [vmem:[#allocation15 + $0x8] ss:$12 sps:$4 sm:$0xff]  }
 0x20f   :  { %v8664_v36 = vpack.c.bf16 %v11861_v34, %v11859_v6  ;;  %v11975_v61 = vld [vmem:[#allocation14 + $0x7c] ss:$12 sps:$4 sm:$0xff]  }
 0x210   :  { %8823 = vmatmul.mubr.msk.bf16.vlgmr.msra.gmra.mxu0 %vm8821_vm5, %v8822_v1  ;;  %9280 = vmatmul.mubr.msk.bf16.vlgmr.msra.gmra.mxu1 %vm8821_vm5, %v8822_v1  ;;  %v11950_v1 = vld [vmem:[#allocation14 + $0xac] ss:$12 sps:$4 sm:$0xff]  }
 0x211   :  { %8665 = vst [vmem:[#allocation17] sm:$0xff] %v8664_v36   ;;  %2798 = vmatpush1.bf16.msra.mxu0 %v11866_v9  ;;  %9284 = vmatpush3.bf16.msra.mxu1 %v11869_v57 }
 0x212   :  { %2799 = vmatprep.subr.bf16.mxu0 %v11872_v22  ;;  %9285 = vmatprep.subr.bf16.mxu1 %v13895_v10 }
 0x213   :  { %v10014_v62 = vpop.eup %10013  ;;  %2829 = vmatprep.mubr.bf16.mxu0 %v13871_v0  ;;  %9299 = vmatprep.mubr.msk.bf16.mxu1 %vm11062_vm3, %v13895_v10 }
 0x214   :  { %v2656_v7 = vmul.f32 %v10014_v62, %v2654_v5  ;;  %v11962_v5 = vld [vmem:[#allocation14 + $0x94] ss:$12 sps:$4 sm:$0xff]   ;;  %v11972_v62 = vld [vmem:[#allocation14 + $0x98] ss:$12 sps:$4 sm:$0xff]  }
 0x215   :  { %2800 = vmatpush1.bf16.msra.mxu0 %v11879_v11  ;;  %9286 = vmatpush3.bf16.msra.mxu1 %v11882_v14 }
 0x216   :  { %v2660_v16 = vadd.f32 %v2658_v23, %v2656_v7  ;;  %2801 = vmatprep.subr.bf16.mxu0 %v11886_v27  ;;  %9287 = vmatprep.subr.bf16.mxu1 %v13895_v10  ;;  %v11979_v7 = vld [vmem:[#allocation14 + $0x78] ss:$12 sps:$4 sm:$0xff]   ;;  %v11982_v23 = vld [vmem:[#allocation14 + $0x80] ss:$12 sps:$4 sm:$0xff]  }
 0x217   :  { %v10016_v8 = vpop.eup %10015  ;;  %14044 = vst [vmem:[#allocation26_spill] sm:$0xff] %v11979_v7  ;;  %14045 = vst [vmem:[#allocation27_spill] sm:$0xff] %v11982_v23 }
 0x218   :  { %10021 = vtanh.f32 %v2660_v16  ;;  %v2657_v18 = vmul.f32 %v10016_v8, %v2655_v26  ;;  %v11985_v16 = vld [vmem:[#allocation14 + $0x64] ss:$12 sps:$4 sm:$0xff]   ;;  %v11989_v26 = vld [vmem:[#allocation14 + $0x60] ss:$12 sps:$4 sm:$0xff]   ;;  %v11992_v8 = vld [vmem:[#allocation14 + $0x68] ss:$12 sps:$4 sm:$0xff]  }
 0x219   :  { %2802 = vmatpush1.bf16.msra.mxu0 %v11890_v41  ;;  %9288 = vmatpush3.bf16.msra.mxu1 %v11893_v33  ;;  %14046 = vst [vmem:[#allocation28_spill] sm:$0xff] %v11985_v16  ;;  %14047 = vst [vmem:[#allocation29_spill] sm:$0xff] %v11989_v26 }
 0x21a   :  { %v2661_v38 = vadd.f32 %v2659_v21, %v2657_v18  ;;  %2803 = vmatprep.subr.bf16.mxu0 %v11896_v12  ;;  %9289 = vmatprep.subr.bf16.mxu1 %v13895_v10  ;;  %v10018_v25 = vpop.eup %10017  ;;  %14048 = vst [vmem:[#allocation30_spill] sm:$0xff] %v11992_v8  ;;  %v11995_v18 = vld [vmem:[#allocation14 + $0x4c] ss:$12 sps:$4 sm:$0xff]   ;;  %v11999_v21 = vld [vmem:[#allocation14 + $0x48] ss:$12 sps:$4 sm:$0xff]  }
 0x21b   :  { %v10020_v58 = vpop.eup %10019  ;;  %v2664_v32 = vsub.f32 1.0, %v10018_v25  ;;  %v2668_v51 = vmul.f32 0.0, %v10018_v25  ;;  %14049 = vst [vmem:[#allocation31_spill] sm:$0xff] %v11995_v18  ;;  %14050 = vst [vmem:[#allocation32_spill] sm:$0xff] %v11999_v21  ;;  %v12005_v25 = vld [vmem:[#allocation14 + $0x34] ss:$12 sps:$4 sm:$0xff]  }
 0x21c   :  { %10023 = vtanh.f32 %v2661_v38  ;;  %v2665_v2 = vsub.f32 1.0, %v10020_v58  ;;  %v2669_v17 = vmul.f32 0.0, %v10020_v58  ;;  %v12002_v38 = vld [vmem:[#allocation14 + $0x50] ss:$12 sps:$4 sm:$0xff]   ;;  %14052 = vst [vmem:[#allocation34_spill] sm:$0xff] %v12005_v25 }
 0x21d   :  { %2804 = vmatpush1.bf16.msra.mxu0 %v11900_v50  ;;  %9290 = vmatpush3.bf16.msra.mxu1 %v11903_v40  ;;  %14051 = vst [vmem:[#allocation33_spill] sm:$0xff] %v12002_v38  ;;  %v12009_v58 = vld [vmem:[#allocation14 + $0x30] ss:$12 sps:$4 sm:$0xff]  }
 0x21e   :  { %2805 = vmatprep.subr.bf16.mxu0 %v11906_v59  ;;  %9291 = vmatprep.subr.bf16.mxu1 %v13895_v10  ;;  %14053 = vst [vmem:[#allocation35_spill] sm:$0xff] %v12009_v58 }
 0x221   :  { %2806 = vmatpush1.bf16.msra.mxu0 %v11910_v43  ;;  %9292 = vmatpush3.bf16.msra.mxu1 %v11913_v46 }
 0x222   :  { %2807 = vmatprep.subr.bf16.mxu0 %v11916_v49  ;;  %9293 = vmatprep.subr.bf16.mxu1 %v13895_v10 }
 0x225   :  { %v10022_v31 = vpop.eup %10021  ;;  %2808 = vmatpush1.bf16.msra.mxu0 %v11920_v28  ;;  %9294 = vmatpush3.bf16.msra.mxu1 %v11923_v55 }
 0x226   :  { %2809 = vmatprep.subr.bf16.mxu0 %v11926_v44  ;;  %9295 = vmatprep.subr.bf16.mxu1 %v13895_v10  ;;  %v2666_v60 = vmul.f32 %v10022_v31, %v2664_v32  ;;  %v12012_v32 = vld [vmem:[#allocation14 + $0x38] ss:$12 sps:$4 sm:$0xff]   ;;  %v12015_v31 = vld [vmem:[#allocation14 + $0x1c] ss:$12 sps:$4 sm:$0xff]  }
 0x227   :  { %14054 = vst [vmem:[#allocation36_spill] sm:$0xff] %v12012_v32  ;;  %14055 = vst [vmem:[#allocation37_spill] sm:$0xff] %v12015_v31 }
 0x228   :  { %v2670_v35 = vadd.f32 %v2668_v51, %v2666_v60  ;;  %v12022_v60 = vld [vmem:[#allocation14 + $0x20] ss:$12 sps:$4 sm:$0xff]  }
 0x229   :  { %v10024_v15 = vpop.eup %10023  ;;  %2810 = vmatpush1.bf16.msra.mxu0 %v11930_v48  ;;  %9296 = vmatpush3.bf16.msra.mxu1 %v11933_v45  ;;  %14057 = vst [vmem:[#allocation39_spill] sm:$0xff] %v12022_v60  ;;  %v12029_v51 = vld [vmem:[#allocation14] ss:$12 sps:$4 sm:$0xff]  }
 0x22a   :  { %2811 = vmatprep.subr.bf16.mxu0 %v11936_v42  ;;  %9297 = vmatprep.subr.bf16.mxu1 %v13895_v10  ;;  %v2667_v37 = vmul.f32 %v10024_v15, %v2665_v2  ;;  %v11946_v29 = vsel %vm2684_vm6, %v2670_v35, 0.0  ;;  %v12025_v2 = vld [vmem:[#allocation14 + $0x4] ss:$12 sps:$4 sm:$0xff]   ;;  %14059 = vst [vmem:[#allocation41_spill] sm:$0xff] %v12029_v51  ;;  %v12032_v15 = vld [vmem:[#allocation14 + $0x8] ss:$12 sps:$4 sm:$0xff]  }
 0x22b   :  { %14058 = vst [vmem:[#allocation40_spill] sm:$0xff] %v12025_v2  ;;  %14060 = vst [vmem:[#allocation42_spill] sm:$0xff] %v12032_v15 }
 0x22c   :  { %v2671_v30 = vadd.f32 %v2669_v17, %v2667_v37  ;;  %v12035_v37 = vld [vmem:[#allocation15 + $0xac] ss:$12 sps:$4 sm:$0xff]   ;;  %v2702_v17 = vld [vmem:[#allocation4 + $0x18] sm:$0xff] }
 0x22d   :  { %2812 = vmatpush1.bf16.msra.mxu0 %v11940_v56  ;;  %9298 = vmatpush3.bf16.msra.mxu1 %v11943_v47  ;;  %14061 = vst [vmem:[#allocation43_spill] sm:$0xff] %v12035_v37 }
 0x22e   :  { %v11948_v19 = vsel %vm2685_vm7, %v2671_v30, 0.0  ;;  %v8828_v3 = vpack.c.bf16 %v2671_v30, %v2670_v35  ;;  %3062 = vmatprep.subr.bf16.mxu0 %v11950_v1  ;;  %9303 = vmatprep.subr.bf16.mxu1 %v13895_v10  ;;  %v2881_v35 = vunpack.c.l.bf16 %v2702_v17 }
 0x22f   :  { %v8669_v36 = vpack.c.bf16 %v11948_v19, %v11946_v29 }
 0x230   :  { %8829 = vmatmul.mubr.msk.bf16.vlgmr.msra.gmra.mxu0 %vm8827_vm8, %v8828_v3  ;;  %9300 = vmatmul.mubr.msk.bf16.vlgmr.msra.gmra.mxu1 %vm8827_vm8, %v8828_v3  ;;  %v2704_v3 = vld [vmem:[#allocation4 + $0x24] sm:$0xff] }
 0x231   :  { %8670 = vst [vmem:[#allocation18 + $0x78] sm:$0xff] %v8669_v36   ;;  %3063 = vmatpush1.bf16.msra.mxu0 %v11956_v20  ;;  %9304 = vmatpush3.bf16.msra.mxu1 %v11959_v4 }
 0x232   :  { %3064 = vmatprep.subr.bf16.mxu0 %v11962_v5  ;;  %9305 = vmatprep.subr.bf16.mxu1 %v13895_v10 }
 0x233   :  { %3094 = vmatprep.mubr.bf16.mxu0 %v13871_v0  ;;  %9319 = vmatprep.mubr.msk.bf16.mxu1 %vm11062_vm3, %v13895_v10  ;;  %v2899_v0 = vrot.slane %v2702_v17, 4 }
 0x235   :  { %3065 = vmatpush1.bf16.msra.mxu0 %v11969_v52  ;;  %9306 = vmatpush3.bf16.msra.mxu1 %v11972_v62 }
 0x236   :  { %3066 = vmatprep.subr.bf16.mxu0 %v11975_v61  ;;  %9307 = vmatprep.subr.bf16.mxu1 %v13895_v10 }
 0x239   :  { %3067 = vmatpush1.bf16.msra.mxu0 %v11979_v7  ;;  %9308 = vmatpush3.bf16.msra.mxu1 %v11982_v23 }
 0x23a   :  { %3068 = vmatprep.subr.bf16.mxu0 %v11985_v16  ;;  %9309 = vmatprep.subr.bf16.mxu1 %v13895_v10 }
 0x23d   :  { %3069 = vmatpush1.bf16.msra.mxu0 %v11989_v26  ;;  %9310 = vmatpush3.bf16.msra.mxu1 %v11992_v8 }
 0x23e   :  { %3070 = vmatprep.subr.bf16.mxu0 %v11995_v18  ;;  %9311 = vmatprep.subr.bf16.mxu1 %v13895_v10 }
 0x241   :  { %3071 = vmatpush1.bf16.msra.mxu0 %v11999_v21  ;;  %9312 = vmatpush3.bf16.msra.mxu1 %v12002_v38 }
 0x242   :  { %3072 = vmatprep.subr.bf16.mxu0 %v12005_v25  ;;  %9313 = vmatprep.subr.bf16.mxu1 %v13895_v10 }
 0x245   :  { %3073 = vmatpush1.bf16.msra.mxu0 %v12009_v58  ;;  %9314 = vmatpush3.bf16.msra.mxu1 %v12012_v32  ;;  %v2903_v58 = vunpack.c.l.bf16 %v2899_v0 }
 0x246   :  { %3074 = vmatprep.subr.bf16.mxu0 %v12015_v31  ;;  %9315 = vmatprep.subr.bf16.mxu1 %v13895_v10 }
 0x249   :  { %3075 = vmatpush1.bf16.msra.mxu0 %v12019_v13  ;;  %9316 = vmatpush3.bf16.msra.mxu1 %v12022_v60  ;;  %v2882_v13 = vunpack.c.l.bf16 %v2704_v3 }
 0x24a   :  { %3076 = vmatprep.subr.bf16.mxu0 %v12025_v2  ;;  %9317 = vmatprep.subr.bf16.mxu1 %v13895_v10 }
 0x24d   :  { %3077 = vmatpush1.bf16.msra.mxu0 %v12029_v51  ;;  %9318 = vmatpush3.bf16.msra.mxu1 %v12032_v15  ;;  %v2900_v15 = vrot.slane %v2704_v3, 4 }
 0x24e   :  { %3147 = vmatprep.subr.bf16.mxu0 %v12035_v37  ;;  %9323 = vmatprep.subr.bf16.mxu1 %v13895_v10 }
 0x24f   :  { %v2904_v18 = vunpack.c.l.bf16 %v2900_v15 }
 0x2d0   :  { %v2746_v54 = vpop.f32.mrf.mxu0  ;;  %v2789_v30 = vpop.f32.mrf.mxu1 }
 0x2d1   :  { %v2883_v36 = vadd.f32 %v2881_v35, %v2746_v54 }
 0x2d2   :  { %v2748_v2 = vpop.f32.mrf.mxu0  ;;  %v9281_v60 = vpop.f32.mrf.mxu1 }
 0x2d3   :  { %v8289_v51 = vmul.f32 -1.442695, %v2883_v36  ;;  %v2905_v38 = vadd.f32 %v2903_v58, %v2748_v2  ;;  %v2966_v58 = vunpack.c.l.bf16 %v11835_v39 }
 0x2d4   :  { %v2750_v31 = vpop.f32.mrf.mxu0  ;;  %v2792_v32 = vpop.f32.mrf.mxu1 }
 0x2d5   :  { %10025 = vpow2.f32 %v8289_v51  ;;  %v2884_v25 = vadd.f32 %v2882_v13, %v2750_v31  ;;  %v8291_v26 = vmul.f32 -1.442695, %v2905_v38  ;;  %v2984_v38 = vrot.slane %v11835_v39, 4 }
 0x2d6   :  { %v9282_v37 = vpop.f32.mrf.mxu1  ;;  %v2752_v21 = vpop.f32.mrf.mxu0  ;;  %v2985_v39 = vrot.slane %v11841_v24, 4 }
 0x2d7   :  { %v8290_v10 = vmul.f32 -1.442695, %v2884_v25  ;;  %v2906_v8 = vadd.f32 %v2904_v18, %v2752_v21  ;;  %v2703_v25 = vld [vmem:[#allocation4 + $0x20] ss:$12 sps:$4 sm:$0xff]  }
 0x2d8   :  { %v2923_v3 = vunpack.c.l.bf16 %v2703_v25  ;;  %v2989_v23 = vunpack.c.l.bf16 %v2985_v39  ;;  %v2945_v39 = vpop.permute.xlu0 %2944 }
 0x2d9   :  { %10027 = vpow2.f32 %v8290_v10  ;;  %v8292_v35 = vmul.f32 -1.442695, %v2906_v8  ;;  %v2919_v10 = vadd.f32 %v11850_v53, %v2789_v30  ;;  %vm2949_vm9 = vcmp.eq.s32.totalorder %v2945_v39, 1 }
 0x2da   :  { %10029 = vpow2.f32 %v8291_v26 }
 0x2db   :  { %10031 = vpow2.f32 %v8292_v35 }
 0x2e2   :  { %v10026_v17 = vpop.eup %10025 }
 0x2e3   :  { %v2891_v60 = vadd.f32 1.0, %v10026_v17 }
 0x2e5   :  { %10033 = vrcp.f32 %v2891_v60  ;;  %v2967_v60 = vunpack.c.l.bf16 %v11841_v24 }
 0x2e6   :  { %v10028_v54 = vpop.eup %10027 }
 0x2e7   :  { %v2892_v36 = vadd.f32 1.0, %v10028_v54  ;;  %v10030_v51 = vpop.eup %10029 }
 0x2e8   :  { %v10032_v0 = vpop.eup %10031  ;;  %v2913_v31 = vadd.f32 1.0, %v10030_v51  ;;  %v2920_v51 = vadd.f32 %v11850_v53, %v2792_v32 }
 0x2e9   :  { %10035 = vrcp.f32 %v2892_v36  ;;  %v2914_v18 = vadd.f32 1.0, %v10032_v0  ;;  %v2988_v0 = vunpack.c.l.bf16 %v2984_v38 }
 0x2ea   :  { %10037 = vrcp.f32 %v2913_v31  ;;  %v2924_v31 = vunpack.c.h.bf16 %v2703_v25 }
 0x2f0   :  { %v2831_v13 = vpop.f32.mrf.mxu0  ;;  %v12040_v2 = vpop.f32.mrf.mxu1 }
 0x2f1   :  { %v2968_v8 = vadd.f32 %v2966_v58, %v2831_v13 }
 0x2f2   :  { %v10034_v26 = vpop.eup %10033  ;;  %v2833_v21 = vpop.f32.mrf.mxu0 }
 0x2f3   :  { %v9301_v15 = vpop.f32.mrf.mxu1  ;;  %v2921_v37 = vmul.f32 %v10034_v26, %v2919_v10  ;;  %v8295_v35 = vmul.f32 -1.442695, %v2968_v8  ;;  %v2990_v8 = vadd.f32 %v2988_v0, %v2833_v21 }
 0x2f4   :  { %v2835_v17 = vpop.f32.mrf.mxu0 }
 0x2f5   :  { %v12045_v54 = vpop.f32.mrf.mxu1  ;;  %v2925_v36 = vadd.f32 %v2923_v3, %v2921_v37  ;;  %10039 = vpow2.f32 %v8295_v35  ;;  %v2969_v58 = vadd.f32 %v2967_v60, %v2835_v17  ;;  %v8297_v37 = vmul.f32 -1.442695, %v2990_v8 }
 0x2f6   :  { %v10036_v30 = vpop.eup %10035  ;;  %10041 = vrcp.f32 %v2914_v18  ;;  %v2837_v16 = vpop.f32.mrf.mxu0 }
 0x2f7   :  { %v9302_v13 = vpop.f32.mrf.mxu1  ;;  %10043 = vtanh.f32 %v2925_v36  ;;  %v2922_v10 = vmul.f32 %v10036_v30, %v2920_v51  ;;  %v8296_v26 = vmul.f32 -1.442695, %v2969_v58  ;;  %v2991_v32 = vadd.f32 %v2989_v23, %v2837_v16  ;;  %v10038_v3 = vpop.eup %10037 }
 0x2f8   :  { %v2929_v17 = vsub.f32 1.0, %v10038_v3  ;;  %v2933_v36 = vmul.f32 %v10038_v3, %v11859_v6  ;;  %v2948_v13 = vpop.permute.xlu1 %2947 }
 0x2f9   :  { %v2926_v15 = vadd.f32 %v2924_v31, %v2922_v10  ;;  %10045 = vpow2.f32 %v8296_v26  ;;  %v8298_v18 = vmul.f32 -1.442695, %v2991_v32  ;;  %vm2950_vm10 = vcmp.eq.s32.totalorder %v2948_v13, 1 }
 0x2fb   :  { %10047 = vtanh.f32 %v2926_v15 }
 0x2fc   :  { %10049 = vpow2.f32 %v8297_v37 }
 0x2fd   :  { %10051 = vpow2.f32 %v8298_v18  ;;  %v2708_v18 = vld [vmem:[#allocation5 + $0x158] ss:$12 sps:$4 sm:$0xff]  }
 0x302   :  { %v10040_v38 = vpop.eup %10039 }
 0x303   :  { %v10042_v35 = vpop.eup %10041  ;;  %v2976_v24 = vadd.f32 1.0, %v10040_v38 }
 0x304   :  { %v10044_v60 = vpop.eup %10043  ;;  %v2930_v51 = vsub.f32 1.0, %v10042_v35  ;;  %v2934_v23 = vmul.f32 %v10042_v35, %v11861_v34 }
 0x305   :  { %10053 = vrcp.f32 %v2976_v24  ;;  %v2931_v25 = vmul.f32 %v10044_v60, %v2929_v17  ;;  %v3004_v17 = vadd.f32 %v11857_v63, %v12040_v2  ;;  %v3008_v60 = vunpack.c.l.bf16 %v2708_v18 }
 0x306   :  { %v10046_v21 = vpop.eup %10045  ;;  %v3005_v2 = vadd.f32 %v11857_v63, %v12045_v54 }
 0x307   :  { %v2977_v0 = vadd.f32 1.0, %v10046_v21  ;;  %v2935_v16 = vadd.f32 %v2933_v36, %v2931_v25  ;;  %v14063_v25 = vmov 0  }
 0x308   :  { %v10048_v30 = vpop.eup %10047 }
 0x309   :  { %v2932_v58 = vmul.f32 %v10048_v30, %v2930_v51  ;;  %10055 = vrcp.f32 %v2977_v0  ;;  %v10050_v31 = vpop.eup %10049  ;;  %v12052_v8 = vsel %vm2949_vm9, %v2935_v16, %v11859_v6  ;;  %v2953_v15 = vsel %vm2949_vm9, %v2935_v16, 0.0 }
 0x30a   :  { %v2998_v38 = vadd.f32 1.0, %v10050_v31  ;;  %v10052_v35 = vpop.eup %10051  ;;  %v3009_v0 = vunpack.c.h.bf16 %v2708_v18  ;;  %v3030_v18 = vpop.permute.xlu0 %3029 }
 0x30b   :  { %v2936_v10 = vadd.f32 %v2934_v23, %v2932_v58  ;;  %v2999_v21 = vadd.f32 1.0, %v10052_v35  ;;  %vm3034_vm11 = vcmp.eq.s32.totalorder %v3030_v18, 1 }
 0x30c   :  { %10057 = vrcp.f32 %v2998_v38  ;;  %v3033_v38 = vpop.permute.xlu1 %3032 }
 0x30d   :  { %v12055_v26 = vsel %vm2950_vm10, %v2936_v10, %v11861_v34  ;;  %v2954_v37 = vsel %vm2950_vm10, %v2936_v10, 0.0  ;;  %v14062_v34 = vmov 0.0   ;;  %vm3035_vm12 = vcmp.eq.s32.totalorder %v3033_v38, 1 }
 0x30e   :  { %v8674_v32 = vpack.c.bf16 %v2954_v37, %v2953_v15  ;;  %v3061_v3 = vpack.c.bf16 %v12055_v26, %v12052_v8 }
 0x310   :  { %8675 = vst [vmem:[#allocation17 + $0x8] sm:$0xff] %v8674_v32   ;;  %3095 = vmatmul.mubr.bf16.vlgmr.msra.gmra.mxu0 %v3061_v3  ;;  %9320 = vmatmul.mubr.bf16.vlgmr.msra.gmra.mxu1 %v3061_v3 }
 0x311   :  { %3148 = vmatpush1.bf16.msra.mxu0 %v11866_v9  ;;  %9324 = vmatpush3.bf16.msra.mxu1 %v11869_v57 }
 0x312   :  { %v10054_v6 = vpop.eup %10053  ;;  %3149 = vmatprep.subr.bf16.mxu0 %v11872_v22  ;;  %9325 = vmatprep.subr.bf16.mxu1 %v14062_v34 }
 0x313   :  { %v3006_v24 = vmul.f32 %v10054_v6, %v3004_v17  ;;  %3179 = vmatprep.mubr.bf16.mxu0 %v14063_v25  ;;  %9339 = vmatprep.mubr.msk.bf16.mxu1 %vm11062_vm3, %v14062_v34 }
 0x315   :  { %v3010_v36 = vadd.f32 %v3008_v60, %v3006_v24  ;;  %3150 = vmatpush1.bf16.msra.mxu0 %v11879_v11  ;;  %9326 = vmatpush3.bf16.msra.mxu1 %v11882_v14 }
 0x316   :  { %3151 = vmatprep.subr.bf16.mxu0 %v11886_v27  ;;  %9327 = vmatprep.subr.bf16.mxu1 %v14062_v34  ;;  %v10056_v51 = vpop.eup %10055 }
 0x317   :  { %10059 = vtanh.f32 %v3010_v36  ;;  %v3007_v30 = vmul.f32 %v10056_v51, %v3005_v2  ;;  %v14066_v2 = vld [vmem:[#allocation29_spill] sm:$0xff]  ;;  %v14067_v51 = vld [vmem:[#allocation30_spill] sm:$0xff] }
 0x318   :  { %10061 = vrcp.f32 %v2999_v21 }
 0x319   :  { %3152 = vmatpush1.bf16.msra.mxu0 %v11890_v41  ;;  %9328 = vmatpush3.bf16.msra.mxu1 %v11893_v33  ;;  %v3011_v58 = vadd.f32 %v3009_v0, %v3007_v30  ;;  %v10058_v54 = vpop.eup %10057  ;;  %v14068_v30 = vld [vmem:[#allocation31_spill] sm:$0xff]  ;;  %v14069_v0 = vld [vmem:[#allocation32_spill] sm:$0xff] }
 0x31a   :  { %3153 = vmatprep.subr.bf16.mxu0 %v11896_v12  ;;  %9329 = vmatprep.subr.bf16.mxu1 %v14062_v34  ;;  %v3014_v16 = vsub.f32 1.0, %v10058_v54  ;;  %v3018_v10 = vmul.f32 %v10058_v54, %v11946_v29  ;;  %v14071_v54 = vld [vmem:[#allocation34_spill] sm:$0xff] }
 0x31b   :  { %10063 = vtanh.f32 %v3011_v58  ;;  %v14070_v58 = vld [vmem:[#allocation33_spill] sm:$0xff] }
 0x31d   :  { %3154 = vmatpush1.bf16.msra.mxu0 %v11900_v50  ;;  %9330 = vmatpush3.bf16.msra.mxu1 %v11903_v40 }
 0x31e   :  { %3155 = vmatprep.subr.bf16.mxu0 %v11906_v59  ;;  %9331 = vmatprep.subr.bf16.mxu1 %v14062_v34 }
 0x321   :  { %3156 = vmatpush1.bf16.msra.mxu0 %v11910_v43  ;;  %9332 = vmatpush3.bf16.msra.mxu1 %v11913_v46 }
 0x322   :  { %3157 = vmatprep.subr.bf16.mxu0 %v11916_v49  ;;  %9333 = vmatprep.subr.bf16.mxu1 %v14062_v34 }
 0x324   :  { %v10060_v23 = vpop.eup %10059 }
 0x325   :  { %v10062_v39 = vpop.eup %10061  ;;  %3158 = vmatpush1.bf16.msra.mxu0 %v11920_v28  ;;  %9334 = vmatpush3.bf16.msra.mxu1 %v11923_v55  ;;  %v3016_v13 = vmul.f32 %v10060_v23, %v3014_v16  ;;  %v14072_v23 = vld [vmem:[#allocation35_spill] sm:$0xff]  ;;  %v14073_v16 = vld [vmem:[#allocation36_spill] sm:$0xff] }
 0x326   :  { %3159 = vmatprep.subr.bf16.mxu0 %v11926_v44  ;;  %9335 = vmatprep.subr.bf16.mxu1 %v14062_v34  ;;  %v3015_v31 = vsub.f32 1.0, %v10062_v39  ;;  %v3019_v32 = vmul.f32 %v10062_v39, %v11948_v19  ;;  %v14074_v39 = vld [vmem:[#allocation37_spill] sm:$0xff] }
 0x327   :  { %v3020_v3 = vadd.f32 %v3018_v10, %v3016_v13  ;;  %v14075_v13 = vld [vmem:[#allocation38_spill] sm:$0xff]  ;;  %v14076_v10 = vld [vmem:[#allocation39_spill] sm:$0xff] }
 0x328   :  { %v10064_v15 = vpop.eup %10063 }
 0x329   :  { %3160 = vmatpush1.bf16.msra.mxu0 %v11930_v48  ;;  %9336 = vmatpush3.bf16.msra.mxu1 %v11933_v45  ;;  %v3017_v37 = vmul.f32 %v10064_v15, %v3015_v31  ;;  %v12099_v17 = vsel %vm3034_vm11, %v3020_v3, %v11946_v29  ;;  %v3038_v24 = vsel %vm3034_vm11, %v3020_v3, 0.0  ;;  %v14064_v29 = vld [vmem:[#allocation27_spill] sm:$0xff]  ;;  %v14077_v31 = vld [vmem:[#allocation40_spill] sm:$0xff]  ;;  %v14078_v15 = vld [vmem:[#allocation41_spill] sm:$0xff] }
 0x32a   :  { %3161 = vmatprep.subr.bf16.mxu0 %v11936_v42  ;;  %9337 = vmatprep.subr.bf16.mxu1 %v14062_v34  ;;  %v3052_v3 = vld [vmem:[#allocation4 + $0x30] sm:$0xff] }
 0x32b   :  { %v3021_v35 = vadd.f32 %v3019_v32, %v3017_v37  ;;  %v14079_v37 = vld [vmem:[#allocation42_spill] sm:$0xff]  ;;  %v14080_v32 = vld [vmem:[#allocation43_spill] sm:$0xff]  ;;  %v3231_v18 = vunpack.c.l.bf16 %v3052_v3 }
 0x32d   :  { %3162 = vmatpush1.bf16.msra.mxu0 %v11940_v56  ;;  %9338 = vmatpush3.bf16.msra.mxu1 %v11943_v47  ;;  %v12102_v6 = vsel %vm3035_vm12, %v3021_v35, %v11948_v19  ;;  %v3039_v60 = vsel %vm3035_vm12, %v3021_v35, 0.0  ;;  %v14065_v19 = vld [vmem:[#allocation28_spill] sm:$0xff] }
 0x32e   :  { %3412 = vmatprep.subr.bf16.mxu0 %v11950_v1  ;;  %9343 = vmatprep.subr.bf16.mxu1 %v14062_v34  ;;  %v8679_v21 = vpack.c.bf16 %v3039_v60, %v3038_v24  ;;  %v3146_v36 = vpack.c.bf16 %v12102_v6, %v12099_v17  ;;  %v3054_v24 = vld [vmem:[#allocation4 + $0x3c] sm:$0xff] }
 0x330   :  { %8680 = vst [vmem:[#allocation18 + $0x70] sm:$0xff] %v8679_v21   ;;  %3180 = vmatmul.mubr.bf16.vlgmr.msra.gmra.mxu0 %v3146_v36  ;;  %9340 = vmatmul.mubr.bf16.vlgmr.msra.gmra.mxu1 %v3146_v36  ;;  %v3249_v21 = vrot.slane %v3052_v3, 4 }
 0x331   :  { %3413 = vmatpush1.bf16.msra.mxu0 %v11956_v20  ;;  %9344 = vmatpush3.bf16.msra.mxu1 %v11959_v4 }
 0x332   :  { %3414 = vmatprep.subr.bf16.mxu0 %v11962_v5  ;;  %9345 = vmatprep.subr.bf16.mxu1 %v14062_v34 }
 0x333   :  { %3444 = vmatprep.mubr.bf16.mxu0 %v14063_v25  ;;  %9359 = vmatprep.mubr.msk.bf16.mxu1 %vm11062_vm3, %v14062_v34 }
 0x335   :  { %3415 = vmatpush1.bf16.msra.mxu0 %v11969_v52  ;;  %9346 = vmatpush3.bf16.msra.mxu1 %v11972_v62 }
 0x336   :  { %3416 = vmatprep.subr.bf16.mxu0 %v11975_v61  ;;  %9347 = vmatprep.subr.bf16.mxu1 %v14062_v34 }
 0x339   :  { %3417 = vmatpush1.bf16.msra.mxu0 %v11979_v7  ;;  %9348 = vmatpush3.bf16.msra.mxu1 %v14064_v29 }
 0x33a   :  { %3418 = vmatprep.subr.bf16.mxu0 %v14065_v19  ;;  %9349 = vmatprep.subr.bf16.mxu1 %v14062_v34 }
 0x33d   :  { %3419 = vmatpush1.bf16.msra.mxu0 %v14066_v2  ;;  %9350 = vmatpush3.bf16.msra.mxu1 %v14067_v51 }
 0x33e   :  { %3420 = vmatprep.subr.bf16.mxu0 %v14068_v30  ;;  %9351 = vmatprep.subr.bf16.mxu1 %v14062_v34 }
 0x341   :  { %3421 = vmatpush1.bf16.msra.mxu0 %v14069_v0  ;;  %9352 = vmatpush3.bf16.msra.mxu1 %v14070_v58 }
 0x342   :  { %3422 = vmatprep.subr.bf16.mxu0 %v14071_v54  ;;  %9353 = vmatprep.subr.bf16.mxu1 %v14062_v34 }
 0x345   :  { %3423 = vmatpush1.bf16.msra.mxu0 %v14072_v23  ;;  %9354 = vmatpush3.bf16.msra.mxu1 %v14073_v16 }
 0x346   :  { %3424 = vmatprep.subr.bf16.mxu0 %v14074_v39  ;;  %9355 = vmatprep.subr.bf16.mxu1 %v14062_v34  ;;  %v3250_v39 = vrot.slane %v3054_v24, 4 }
 0x348   :  { %v3254_v30 = vunpack.c.l.bf16 %v3250_v39 }
 0x349   :  { %3425 = vmatpush1.bf16.msra.mxu0 %v14075_v13  ;;  %9356 = vmatpush3.bf16.msra.mxu1 %v14076_v10  ;;  %v3232_v13 = vunpack.c.l.bf16 %v3054_v24 }
 0x34a   :  { %3426 = vmatprep.subr.bf16.mxu0 %v14077_v31  ;;  %9357 = vmatprep.subr.bf16.mxu1 %v14062_v34 }
 0x34d   :  { %3427 = vmatpush1.bf16.msra.mxu0 %v14078_v15  ;;  %9358 = vmatpush3.bf16.msra.mxu1 %v14079_v37  ;;  %v3253_v37 = vunpack.c.l.bf16 %v3249_v21 }
 0x34e   :  { %3497 = vmatprep.subr.bf16.mxu0 %v14080_v32  ;;  %9363 = vmatprep.subr.bf16.mxu1 %v14062_v34 }
 0x3d0   :  { %v3096_v38 = vpop.f32.mrf.mxu0  ;;  %v3139_v35 = vpop.f32.mrf.mxu1 }
 0x3d1   :  { %v3233_v60 = vadd.f32 %v3231_v18, %v3096_v38 }
 0x3d2   :  { %v3098_v36 = vpop.f32.mrf.mxu0  ;;  %v9321_v10 = vpop.f32.mrf.mxu1 }
 0x3d3   :  { %v8301_v31 = vmul.f32 -1.442695, %v3233_v60  ;;  %v3255_v58 = vadd.f32 %v3253_v37, %v3098_v36  ;;  %v3057_v60 = vld [vmem:[#allocation5 + $0x138] sm:$0xff] }
 0x3d4   :  { %v3100_v16 = vpop.f32.mrf.mxu0  ;;  %v3142_v15 = vpop.f32.mrf.mxu1  ;;  %v3316_v37 = vunpack.c.l.bf16 %v3057_v60 }
 0x3d5   :  { %10065 = vpow2.f32 %v8301_v31  ;;  %v3234_v23 = vadd.f32 %v3232_v13, %v3100_v16  ;;  %v8303_v2 = vmul.f32 -1.442695, %v3255_v58 }
 0x3d6   :  { %v3102_v32 = vpop.f32.mrf.mxu0  ;;  %v9322_v54 = vpop.f32.mrf.mxu1 }
 0x3d7   :  { %v8302_v0 = vmul.f32 -1.442695, %v3234_v23  ;;  %v3256_v51 = vadd.f32 %v3254_v30, %v3102_v32  ;;  %v3053_v54 = vld [vmem:[#allocation4 + $0x38] ss:$12 sps:$4 sm:$0xff]   ;;  %v3269_v23 = vadd.f32 %v11850_v53, %v3139_v35  ;;  %v3334_v32 = vrot.slane %v3057_v60, 4 }
 0x3d8   :  { %v3273_v36 = vunpack.c.l.bf16 %v3053_v54 }
 0x3d9   :  { %10067 = vpow2.f32 %v8302_v0  ;;  %v8304_v18 = vmul.f32 -1.442695, %v3256_v51  ;;  %v3338_v7 = vunpack.c.l.bf16 %v3334_v32 }
 0x3da   :  { %10069 = vpow2.f32 %v8303_v2  ;;  %v3059_v2 = vld [vmem:[#allocation5 + $0x144] sm:$0xff] }
 0x3db   :  { %10071 = vpow2.f32 %v8304_v18  ;;  %v3335_v19 = vrot.slane %v3059_v2, 4 }
 0x3e2   :  { %v10066_v10 = vpop.eup %10065 }
 0x3e3   :  { %v3241_v3 = vadd.f32 1.0, %v10066_v10 }
 0x3e5   :  { %10073 = vrcp.f32 %v3241_v3 }
 0x3e6   :  { %v10068_v38 = vpop.eup %10067 }
 0x3e7   :  { %v3242_v24 = vadd.f32 1.0, %v10068_v38  ;;  %v10070_v31 = vpop.eup %10069  ;;  %v3317_v38 = vunpack.c.l.bf16 %v3059_v2 }
 0x3e8   :  { %v10072_v16 = vpop.eup %10071  ;;  %v3263_v13 = vadd.f32 1.0, %v10070_v31  ;;  %v3270_v31 = vadd.f32 %v11850_v53, %v3142_v15 }
 0x3e9   :  { %10075 = vrcp.f32 %v3242_v24  ;;  %v3264_v0 = vadd.f32 1.0, %v10072_v16 }
 0x3ea   :  { %10077 = vrcp.f32 %v3263_v13 }
 0x3eb   :  { %10079 = vrcp.f32 %v3264_v0 }
 0x3f0   :  { %v3181_v30 = vpop.f32.mrf.mxu0  ;;  %v12144_v58 = vpop.f32.mrf.mxu1 }
 0x3f1   :  { %v3318_v39 = vadd.f32 %v3316_v37, %v3181_v30 }
 0x3f2   :  { %v10074_v51 = vpop.eup %10073  ;;  %v3183_v18 = vpop.f32.mrf.mxu0 }
 0x3f3   :  { %v3271_v21 = vmul.f32 %v10074_v51, %v3269_v23  ;;  %v9341_v10 = vpop.f32.mrf.mxu1  ;;  %v8307_v3 = vmul.f32 -1.442695, %v3318_v39  ;;  %v3274_v23 = vunpack.c.h.bf16 %v3053_v54  ;;  %v3340_v30 = vadd.f32 %v3338_v7, %v3183_v18 }
 0x3f4   :  { %v3185_v35 = vpop.f32.mrf.mxu0 }
 0x3f5   :  { %v3275_v24 = vadd.f32 %v3273_v36, %v3271_v21  ;;  %v12147_v16 = vpop.f32.mrf.mxu1  ;;  %10081 = vpow2.f32 %v8307_v3  ;;  %v3319_v37 = vadd.f32 %v3317_v38, %v3185_v35  ;;  %v3339_v21 = vunpack.c.l.bf16 %v3335_v19 }
 0x3f6   :  { %v10076_v29 = vpop.eup %10075  ;;  %v3187_v39 = vpop.f32.mrf.mxu0  ;;  %v8309_v15 = vmul.f32 -1.442695, %v3340_v30 }
 0x3f7   :  { %10083 = vtanh.f32 %v3275_v24  ;;  %v3272_v60 = vmul.f32 %v10076_v29, %v3270_v31  ;;  %v9342_v13 = vpop.f32.mrf.mxu1  ;;  %v8308_v51 = vmul.f32 -1.442695, %v3319_v37  ;;  %v3341_v53 = vadd.f32 %v3339_v21, %v3187_v39  ;;  %v10078_v36 = vpop.eup %10077 }
 0x3f8   :  { %v10080_v2 = vpop.eup %10079  ;;  %v3279_v32 = vsub.f32 1.0, %v10078_v36  ;;  %v3283_v18 = vmul.f32 %v10078_v36, %v12052_v8  ;;  %v3298_v13 = vpop.permute.xlu1 %3297 }
 0x3f9   :  { %v3276_v10 = vadd.f32 %v3274_v23, %v3272_v60  ;;  %10085 = vpow2.f32 %v8308_v51  ;;  %v8310_v0 = vmul.f32 -1.442695, %v3341_v53  ;;  %v3280_v24 = vsub.f32 1.0, %v10080_v2  ;;  %v3295_v23 = vpop.permute.xlu0 %3294 }
 0x3fa   :  { %v3284_v35 = vmul.f32 %v10080_v2, %v12055_v26  ;;  %vm3299_vm13 = vcmp.eq.s32.totalorder %v3295_v23, 1  ;;  %vm3300_vm14 = vcmp.eq.s32.totalorder %v3298_v13, 1  ;;  %v3402_v23 = vld [vmem:[#allocation4 + $0x48] sm:$0xff] }
 0x3fb   :  { %10087 = vtanh.f32 %v3276_v10  ;;  %v3581_v13 = vunpack.c.l.bf16 %v3402_v23 }
 0x3fc   :  { %10089 = vpow2.f32 %v8309_v15 }
 0x3fd   :  { %10091 = vpow2.f32 %v8310_v0 }
 0x402   :  { %v10082_v3 = vpop.eup %10081 }
 0x403   :  { %v3326_v29 = vadd.f32 1.0, %v10082_v3  ;;  %v3058_v3 = vld [vmem:[#allocation5 + $0x140] ss:$12 sps:$4 sm:$0xff]  }
 0x404   :  { %v10084_v38 = vpop.eup %10083 }
 0x405   :  { %v3281_v54 = vmul.f32 %v10084_v38, %v3279_v32  ;;  %10093 = vrcp.f32 %v3326_v29  ;;  %v3358_v29 = vunpack.c.l.bf16 %v3058_v3 }
 0x406   :  { %v10086_v7 = vpop.eup %10085 }
 0x407   :  { %v3327_v31 = vadd.f32 1.0, %v10086_v7  ;;  %v3285_v60 = vadd.f32 %v3283_v18, %v3281_v54  ;;  %v3359_v54 = vunpack.c.h.bf16 %v3058_v3  ;;  %v14092_v18 = vld [vmem:[#allocation37_spill] sm:$0xff] }
 0x408   :  { %v10088_v19 = vpop.eup %10087 }
 0x409   :  { %v3282_v37 = vmul.f32 %v10088_v19, %v3280_v24  ;;  %10095 = vrcp.f32 %v3327_v31  ;;  %v10090_v51 = vpop.eup %10089  ;;  %v12152_v39 = vsel %vm3299_vm13, %v3285_v60, %v12052_v8  ;;  %v3303_v21 = vsel %vm3299_vm13, %v3285_v60, 0.0  ;;  %v14093_v24 = vld [vmem:[#allocation38_spill] sm:$0xff]  ;;  %v14094_v19 = vld [vmem:[#allocation39_spill] sm:$0xff]  ;;  %v14095_v31 = vld [vmem:[#allocation40_spill] sm:$0xff] }
 0x40a   :  { %v10092_v36 = vpop.eup %10091  ;;  %v3348_v2 = vadd.f32 1.0, %v10090_v51  ;;  %v3354_v8 = vadd.f32 %v11857_v63, %v12144_v58  ;;  %v14098_v60 = vld [vmem:[#allocation43_spill] sm:$0xff] }
 0x40b   :  { %v3286_v30 = vadd.f32 %v3284_v35, %v3282_v37  ;;  %v3349_v32 = vadd.f32 1.0, %v10092_v36  ;;  %v14096_v35 = vld [vmem:[#allocation41_spill] sm:$0xff]  ;;  %v14097_v37 = vld [vmem:[#allocation42_spill] sm:$0xff] }
 0x40c   :  { %10097 = vrcp.f32 %v3348_v2 }
 0x40d   :  { %v12155_v10 = vsel %vm3300_vm14, %v3286_v30, %v12055_v26  ;;  %v3304_v53 = vsel %vm3300_vm14, %v3286_v30, 0.0  ;;  %10099 = vrcp.f32 %v3349_v32 }
 0x40e   :  { %v8684_v15 = vpack.c.bf16 %v3304_v53, %v3303_v21  ;;  %v3411_v0 = vpack.c.bf16 %v12155_v10, %v12152_v39  ;;  %v3404_v21 = vld [vmem:[#allocation4 + $0x54] sm:$0xff] }
 0x40f   :  { %v3582_v3 = vunpack.c.l.bf16 %v3404_v21 }
 0x410   :  { %8685 = vst [vmem:[#allocation17 + $0x10] sm:$0xff] %v8684_v15   ;;  %3445 = vmatmul.mubr.bf16.vlgmr.msra.gmra.mxu0 %v3411_v0  ;;  %9360 = vmatmul.mubr.bf16.vlgmr.msra.gmra.mxu1 %v3411_v0  ;;  %v3599_v15 = vrot.slane %v3402_v23, 4 }
 0x411   :  { %3498 = vmatpush1.bf16.msra.mxu0 %v11866_v9  ;;  %9364 = vmatpush3.bf16.msra.mxu1 %v11869_v57  ;;  %v3355_v57 = vadd.f32 %v11857_v63, %v12147_v16 }
 0x412   :  { %3499 = vmatprep.subr.bf16.mxu0 %v11872_v22  ;;  %9365 = vmatprep.subr.bf16.mxu1 %v14062_v34  ;;  %v10094_v26 = vpop.eup %10093 }
 0x413   :  { %3529 = vmatprep.mubr.bf16.mxu0 %v14063_v25  ;;  %9379 = vmatprep.mubr.msk.bf16.mxu1 %vm11062_vm3, %v14062_v34  ;;  %v3356_v38 = vmul.f32 %v10094_v26, %v3354_v8  ;;  %v3600_v8 = vrot.slane %v3404_v21, 4 }
 0x415   :  { %3500 = vmatpush1.bf16.msra.mxu0 %v11879_v11  ;;  %9366 = vmatpush3.bf16.msra.mxu1 %v11882_v14  ;;  %v3360_v9 = vadd.f32 %v3358_v29, %v3356_v38  ;;  %v3603_v38 = vunpack.c.l.bf16 %v3599_v15 }
 0x416   :  { %3501 = vmatprep.subr.bf16.mxu0 %v11886_v27  ;;  %9367 = vmatprep.subr.bf16.mxu1 %v14062_v34  ;;  %v10096_v22 = vpop.eup %10095 }
 0x417   :  { %10101 = vtanh.f32 %v3360_v9  ;;  %v3357_v58 = vmul.f32 %v10096_v22, %v3355_v57 }
 0x419   :  { %3502 = vmatpush1.bf16.msra.mxu0 %v11890_v41  ;;  %9368 = vmatpush3.bf16.msra.mxu1 %v11893_v33  ;;  %v3361_v11 = vadd.f32 %v3359_v54, %v3357_v58  ;;  %v10098_v63 = vpop.eup %10097  ;;  %v3604_v54 = vunpack.c.l.bf16 %v3600_v8 }
 0x41a   :  { %3503 = vmatprep.subr.bf16.mxu0 %v11896_v12  ;;  %9369 = vmatprep.subr.bf16.mxu1 %v14062_v34  ;;  %v10100_v14 = vpop.eup %10099  ;;  %v3364_v27 = vsub.f32 1.0, %v10098_v63  ;;  %v3368_v12 = vmul.f32 %v10098_v63, %v12099_v17 }
 0x41b   :  { %10103 = vtanh.f32 %v3361_v11 }
 0x41d   :  { %3504 = vmatpush1.bf16.msra.mxu0 %v11900_v50  ;;  %9370 = vmatpush3.bf16.msra.mxu1 %v11903_v40  ;;  %v3365_v50 = vsub.f32 1.0, %v10100_v14 }
 0x41e   :  { %3505 = vmatprep.subr.bf16.mxu0 %v11906_v59  ;;  %9371 = vmatprep.subr.bf16.mxu1 %v14062_v34  ;;  %v3369_v59 = vmul.f32 %v10100_v14, %v12102_v6 }
 0x421   :  { %3506 = vmatpush1.bf16.msra.mxu0 %v11910_v43  ;;  %9372 = vmatpush3.bf16.msra.mxu1 %v11913_v46 }
 0x422   :  { %3507 = vmatprep.subr.bf16.mxu0 %v11916_v49  ;;  %9373 = vmatprep.subr.bf16.mxu1 %v14062_v34  ;;  %v3380_v49 = vpop.permute.xlu0 %3379 }
 0x423   :  { %vm3384_vm15 = vcmp.eq.s32.totalorder %v3380_v49, 1 }
 0x424   :  { %v10102_v41 = vpop.eup %10101 }
 0x425   :  { %3508 = vmatpush1.bf16.msra.mxu0 %v11920_v28  ;;  %9374 = vmatpush3.bf16.msra.mxu1 %v11923_v55  ;;  %v3366_v33 = vmul.f32 %v10102_v41, %v3364_v27  ;;  %v3383_v28 = vpop.permute.xlu1 %3382 }
 0x426   :  { %3509 = vmatprep.subr.bf16.mxu0 %v11926_v44  ;;  %9375 = vmatprep.subr.bf16.mxu1 %v14062_v34  ;;  %vm3385_vm1 = vcmp.eq.s32.totalorder %v3383_v28, 1  ;;  %v12246_v28 = vld [vmem:[%s13867_s9] ss:$0 sm:$0xff] }
 0x427   :  { %v3370_v46 = vadd.f32 %v3368_v12, %v3366_v33 }
 0x428   :  { %v10104_v40 = vpop.eup %10103 }
 0x429   :  { %3510 = vmatpush1.bf16.msra.mxu0 %v11930_v48  ;;  %9376 = vmatpush3.bf16.msra.mxu1 %v11933_v45  ;;  %v3367_v43 = vmul.f32 %v10104_v40, %v3365_v50  ;;  %v12199_v44 = vsel %vm3384_vm15, %v3370_v46, %v12099_v17  ;;  %v3388_v45 = vsel %vm3384_vm15, %v3370_v46, 0.0  ;;  %v14090_v17 = vld [vmem:[#allocation35_spill] sm:$0xff]  ;;  %v3403_v46 = vld [vmem:[#allocation4 + $0x50] ss:$12 sps:$4 sm:$0xff]  }
 0x42a   :  { %3511 = vmatprep.subr.bf16.mxu0 %v11936_v42  ;;  %9377 = vmatprep.subr.bf16.mxu1 %v14062_v34  ;;  %v3407_v40 = vld [vmem:[#allocation5 + $0x120] sm:$0xff]  ;;  %v3624_v23 = vunpack.c.h.bf16 %v3403_v46 }
 0x42b   :  { %v3371_v55 = vadd.f32 %v3369_v59, %v3367_v43  ;;  %v3666_v49 = vunpack.c.l.bf16 %v3407_v40 }
 0x42d   :  { %3512 = vmatpush1.bf16.msra.mxu0 %v11940_v56  ;;  %9378 = vmatpush3.bf16.msra.mxu1 %v11943_v47  ;;  %v12202_v48 = vsel %vm3385_vm1, %v3371_v55, %v12102_v6  ;;  %v3389_v42 = vsel %vm3385_vm1, %v3371_v55, 0.0  ;;  %v14081_v56 = vld [vmem:[#allocation26_spill] sm:$0xff]  ;;  %v14082_v47 = vld [vmem:[#allocation27_spill] sm:$0xff]  ;;  %v14091_v6 = vld [vmem:[#allocation36_spill] sm:$0xff] }
 0x42e   :  { %3762 = vmatprep.subr.bf16.mxu0 %v11950_v1  ;;  %9383 = vmatprep.subr.bf16.mxu1 %v14062_v34  ;;  %v8689_v16 = vpack.c.bf16 %v3389_v42, %v3388_v45  ;;  %v3496_v7 = vpack.c.bf16 %v12202_v48, %v12199_v44  ;;  %v14083_v1 = vld [vmem:[#allocation28_spill] sm:$0xff]  ;;  %14099 = vst [vmem:[#allocation26_spill] sm:$0xff] %v12246_v28 }
 0x430   :  { %8690 = vst [vmem:[#allocation18 + $0x68] sm:$0xff] %v8689_v16   ;;  %3530 = vmatmul.mubr.bf16.vlgmr.msra.gmra.mxu0 %v3496_v7  ;;  %9380 = vmatmul.mubr.bf16.vlgmr.msra.gmra.mxu1 %v3496_v7  ;;  %v3409_v7 = vld [vmem:[#allocation5 + $0x12c] sm:$0xff] }
 0x431   :  { %3763 = vmatpush1.bf16.msra.mxu0 %v11956_v20  ;;  %9384 = vmatpush3.bf16.msra.mxu1 %v11959_v4  ;;  %v14084_v20 = vld [vmem:[#allocation29_spill] sm:$0xff]  ;;  %v14085_v4 = vld [vmem:[#allocation30_spill] sm:$0xff] }
 0x432   :  { %3764 = vmatprep.subr.bf16.mxu0 %v11962_v5  ;;  %9385 = vmatprep.subr.bf16.mxu1 %v14062_v34  ;;  %v14086_v5 = vld [vmem:[#allocation31_spill] sm:$0xff] }
 0x433   :  { %3794 = vmatprep.mubr.bf16.mxu0 %v14063_v25  ;;  %9399 = vmatprep.mubr.msk.bf16.mxu1 %vm11062_vm3, %v14062_v34 }
 0x435   :  { %3765 = vmatpush1.bf16.msra.mxu0 %v11969_v52  ;;  %9386 = vmatpush3.bf16.msra.mxu1 %v11972_v62  ;;  %v14087_v52 = vld [vmem:[#allocation32_spill] sm:$0xff]  ;;  %v14088_v62 = vld [vmem:[#allocation33_spill] sm:$0xff] }
 0x436   :  { %3766 = vmatprep.subr.bf16.mxu0 %v11975_v61  ;;  %9387 = vmatprep.subr.bf16.mxu1 %v14062_v34  ;;  %v14089_v61 = vld [vmem:[#allocation34_spill] sm:$0xff] }
 0x439   :  { %3767 = vmatpush1.bf16.msra.mxu0 %v14081_v56  ;;  %9388 = vmatpush3.bf16.msra.mxu1 %v14082_v47 }
 0x43a   :  { %3768 = vmatprep.subr.bf16.mxu0 %v14083_v1  ;;  %9389 = vmatprep.subr.bf16.mxu1 %v14062_v34  ;;  %v3684_v1 = vrot.slane %v3407_v40, 4 }
 0x43d   :  { %3769 = vmatpush1.bf16.msra.mxu0 %v14084_v20  ;;  %9390 = vmatpush3.bf16.msra.mxu1 %v14085_v4  ;;  %v3623_v4 = vunpack.c.l.bf16 %v3403_v46 }
 0x43e   :  { %3770 = vmatprep.subr.bf16.mxu0 %v14086_v5  ;;  %9391 = vmatprep.subr.bf16.mxu1 %v14062_v34 }
 0x441   :  { %3771 = vmatpush1.bf16.msra.mxu0 %v14087_v52  ;;  %9392 = vmatpush3.bf16.msra.mxu1 %v14088_v62 }
 0x442   :  { %3772 = vmatprep.subr.bf16.mxu0 %v14089_v61  ;;  %9393 = vmatprep.subr.bf16.mxu1 %v14062_v34  ;;  %v3667_v61 = vunpack.c.l.bf16 %v3409_v7 }
 0x445   :  { %3773 = vmatpush1.bf16.msra.mxu0 %v14090_v17  ;;  %9394 = vmatpush3.bf16.msra.mxu1 %v14091_v6 }
 0x446   :  { %3774 = vmatprep.subr.bf16.mxu0 %v14092_v18  ;;  %9395 = vmatprep.subr.bf16.mxu1 %v14062_v34 }
 0x449   :  { %3775 = vmatpush1.bf16.msra.mxu0 %v14093_v24  ;;  %9396 = vmatpush3.bf16.msra.mxu1 %v14094_v19  ;;  %v3685_v19 = vrot.slane %v3409_v7, 4  ;;  %v3408_v7 = vld [vmem:[#allocation5 + $0x128] ss:$12 sps:$4 sm:$0xff]  }
 0x44a   :  { %3776 = vmatprep.subr.bf16.mxu0 %v14095_v31  ;;  %9397 = vmatprep.subr.bf16.mxu1 %v14062_v34 }
 0x44b   :  { %v3689_v15 = vunpack.c.l.bf16 %v3685_v19 }
 0x44d   :  { %3777 = vmatpush1.bf16.msra.mxu0 %v14096_v35  ;;  %9398 = vmatpush3.bf16.msra.mxu1 %v14097_v37  ;;  %v3688_v35 = vunpack.c.l.bf16 %v3684_v1  ;;  %v12277_v1 = vld [vmem:[#allocation15 + $0x94] ss:$12 sps:$4 sm:$0xff]  }
 0x44e   :  { %3847 = vmatprep.subr.bf16.mxu0 %v14098_v60  ;;  %9403 = vmatprep.subr.bf16.mxu1 %v14062_v34 }
 0x4d0   :  { %v3446_v30 = vpop.f32.mrf.mxu0  ;;  %v3489_v51 = vpop.f32.mrf.mxu1 }
 0x4d1   :  { %v3583_v53 = vadd.f32 %v3581_v13, %v3446_v30  ;;  %v3619_v55 = vadd.f32 %v12246_v28, %v3489_v51 }
 0x4d2   :  { %v3448_v0 = vpop.f32.mrf.mxu0  ;;  %v9361_v36 = vpop.f32.mrf.mxu1 }
 0x4d3   :  { %v8313_v2 = vmul.f32 -1.442695, %v3583_v53  ;;  %v3605_v22 = vadd.f32 %v3603_v38, %v3448_v0 }
 0x4d4   :  { %v3450_v26 = vpop.f32.mrf.mxu0  ;;  %v3492_v32 = vpop.f32.mrf.mxu1 }
 0x4d5   :  { %10105 = vpow2.f32 %v8313_v2  ;;  %v3584_v29 = vadd.f32 %v3582_v3, %v3450_v26  ;;  %v8315_v63 = vmul.f32 -1.442695, %v3605_v22  ;;  %v3620_v6 = vadd.f32 %v12246_v28, %v3492_v32 }
 0x4d6   :  { %v3452_v9 = vpop.f32.mrf.mxu0  ;;  %v9362_v57 = vpop.f32.mrf.mxu1 }
 0x4d7   :  { %v8314_v58 = vmul.f32 -1.442695, %v3584_v29  ;;  %v3606_v11 = vadd.f32 %v3604_v54, %v3452_v9 }
 0x4d9   :  { %10107 = vpow2.f32 %v8314_v58  ;;  %v8316_v14 = vmul.f32 -1.442695, %v3606_v11 }
 0x4da   :  { %10109 = vpow2.f32 %v8315_v63 }
 0x4db   :  { %10111 = vpow2.f32 %v8316_v14 }
 0x4e2   :  { %v10106_v27 = vpop.eup %10105 }
 0x4e3   :  { %v3591_v41 = vadd.f32 1.0, %v10106_v27 }
 0x4e5   :  { %10113 = vrcp.f32 %v3591_v41  ;;  %v3645_v41 = vpop.permute.xlu0 %3644 }
 0x4e6   :  { %v10108_v33 = vpop.eup %10107  ;;  %vm3649_vm2 = vcmp.eq.s32.totalorder %v3645_v41, 1 }
 0x4e7   :  { %v3592_v12 = vadd.f32 1.0, %v10108_v33  ;;  %v10110_v50 = vpop.eup %10109  ;;  %v3648_v33 = vpop.permute.xlu1 %3647 }
 0x4e8   :  { %v10112_v59 = vpop.eup %10111  ;;  %v3613_v43 = vadd.f32 1.0, %v10110_v50  ;;  %vm3650_vm0 = vcmp.eq.s32.totalorder %v3648_v33, 1  ;;  %v12348_v33 = vld [vmem:[#allocation15] ss:$12 sps:$4 sm:$0xff]  }
 0x4e9   :  { %10115 = vrcp.f32 %v3592_v12  ;;  %v3614_v45 = vadd.f32 1.0, %v10112_v59 }
 0x4ea   :  { %10117 = vrcp.f32 %v3613_v43 }
 0x4eb   :  { %10119 = vrcp.f32 %v3614_v45 }
 0x4f0   :  { %v3531_v42 = vpop.f32.mrf.mxu0  ;;  %v12249_v16 = vpop.f32.mrf.mxu1 }
 0x4f1   :  { %v3668_v47 = vadd.f32 %v3666_v49, %v3531_v42 }
 0x4f2   :  { %v10114_v56 = vpop.eup %10113  ;;  %v3533_v5 = vpop.f32.mrf.mxu0 }
 0x4f3   :  { %v3621_v20 = vmul.f32 %v10114_v56, %v3619_v55  ;;  %v9381_v52 = vpop.f32.mrf.mxu1  ;;  %v8319_v62 = vmul.f32 -1.442695, %v3668_v47  ;;  %v3690_v30 = vadd.f32 %v3688_v35, %v3533_v5  ;;  %v12264_v56 = vld [vmem:[#allocation15 + $0xa8] ss:$12 sps:$4 sm:$0xff]   ;;  %v12296_v35 = vld [vmem:[#allocation15 + $0x78] ss:$12 sps:$4 sm:$0xff]  }
 0x4f4   :  { %v3535_v18 = vpop.f32.mrf.mxu0  ;;  %v3708_v52 = vunpack.c.l.bf16 %v3408_v7 }
 0x4f5   :  { %v3625_v17 = vadd.f32 %v3623_v4, %v3621_v20  ;;  %v12252_v24 = vpop.f32.mrf.mxu1  ;;  %10121 = vpow2.f32 %v8319_v62  ;;  %v3669_v37 = vadd.f32 %v3667_v61, %v3535_v18  ;;  %v8321_v36 = vmul.f32 -1.442695, %v3690_v30  ;;  %v12284_v62 = vld [vmem:[#allocation15 + $0x90] ss:$12 sps:$4 sm:$0xff]   ;;  %v12312_v30 = vld [vmem:[#allocation15 + $0x4c] ss:$12 sps:$4 sm:$0xff]  }
 0x4f6   :  { %v10116_v31 = vpop.eup %10115  ;;  %v3537_v21 = vpop.f32.mrf.mxu0 }
 0x4f7   :  { %10123 = vtanh.f32 %v3625_v17  ;;  %v3622_v60 = vmul.f32 %v10116_v31, %v3620_v6  ;;  %v9382_v13 = vpop.f32.mrf.mxu1  ;;  %v8320_v51 = vmul.f32 -1.442695, %v3669_v37  ;;  %v3691_v0 = vadd.f32 %v3689_v15, %v3537_v21  ;;  %v10118_v3 = vpop.eup %10117  ;;  %v12292_v6 = vld [vmem:[#allocation15 + $0x7c] ss:$12 sps:$4 sm:$0xff]   ;;  %v12299_v37 = vld [vmem:[#allocation15 + $0x80] ss:$12 sps:$4 sm:$0xff]  }
 0x4f8   :  { %v10120_v8 = vpop.eup %10119  ;;  %v3629_v32 = vsub.f32 1.0, %v10118_v3  ;;  %v3633_v22 = vmul.f32 %v10118_v3, %v12152_v39  ;;  %v3709_v31 = vunpack.c.h.bf16 %v3408_v7  ;;  %v12309_v13 = vld [vmem:[#allocation15 + $0x68] ss:$12 sps:$4 sm:$0xff]   ;;  %v12326_v3 = vld [vmem:[#allocation15 + $0x30] ss:$12 sps:$4 sm:$0xff]  }
 0x4f9   :  { %v3626_v53 = vadd.f32 %v3624_v23, %v3622_v60  ;;  %10125 = vpow2.f32 %v8320_v51  ;;  %v8322_v2 = vmul.f32 -1.442695, %v3691_v0  ;;  %v3630_v58 = vsub.f32 1.0, %v10120_v8  ;;  %v12302_v60 = vld [vmem:[#allocation15 + $0x64] ss:$12 sps:$4 sm:$0xff]  }
 0x4fa   :  { %v3634_v63 = vmul.f32 %v10120_v8, %v12155_v10  ;;  %v12306_v23 = vld [vmem:[#allocation15 + $0x60] ss:$12 sps:$4 sm:$0xff]   ;;  %v12316_v21 = vld [vmem:[#allocation15 + $0x48] ss:$12 sps:$4 sm:$0xff]   ;;  %v12329_v8 = vld [vmem:[#allocation15 + $0x38] ss:$12 sps:$4 sm:$0xff]  }
 0x4fb   :  { %10127 = vtanh.f32 %v3626_v53  ;;  %v12319_v53 = vld [vmem:[#allocation15 + $0x50] ss:$12 sps:$4 sm:$0xff]   ;;  %v12322_v15 = vld [vmem:[#allocation15 + $0x34] ss:$12 sps:$4 sm:$0xff]  }
 0x4fc   :  { %10129 = vpow2.f32 %v8321_v36  ;;  %v12372_v7 = vld [vmem:[#allocation14 + $0x94] ss:$12 sps:$4 sm:$0xff]  }
 0x4fd   :  { %10131 = vpow2.f32 %v8322_v2 }
 0x502   :  { %v10122_v26 = vpop.eup %10121 }
 0x503   :  { %v3676_v29 = vadd.f32 1.0, %v10122_v26  ;;  %v12332_v26 = vld [vmem:[#allocation15 + $0x1c] ss:$12 sps:$4 sm:$0xff]  }
 0x504   :  { %v10124_v38 = vpop.eup %10123 }
 0x505   :  { %v3631_v9 = vmul.f32 %v10124_v38, %v3629_v32  ;;  %10133 = vrcp.f32 %v3676_v29 }
 0x506   :  { %v10126_v57 = vpop.eup %10125 }
 0x507   :  { %v3677_v11 = vadd.f32 1.0, %v10126_v57  ;;  %v3635_v27 = vadd.f32 %v3633_v22, %v3631_v9  ;;  %v12337_v57 = vld [vmem:[#allocation15 + $0x18] ss:$12 sps:$4 sm:$0xff]   ;;  %v12340_v22 = vld [vmem:[#allocation15 + $0x20] ss:$12 sps:$4 sm:$0xff]  }
 0x508   :  { %v10128_v54 = vpop.eup %10127 }
 0x509   :  { %v3632_v14 = vmul.f32 %v10128_v54, %v3630_v58  ;;  %10135 = vrcp.f32 %v3677_v11  ;;  %v10130_v50 = vpop.eup %10129  ;;  %v12257_v40 = vsel %vm3649_vm2, %v3635_v27, %v12152_v39  ;;  %v3653_v43 = vsel %vm3649_vm2, %v3635_v27, 0.0  ;;  %v12267_v39 = vld [vmem:[#allocation15 + $0xb0] ss:$12 sps:$4 sm:$0xff]   ;;  %v3733_v27 = vpop.permute.xlu1 %3732 }
 0x50a   :  { %v10132_v45 = vpop.eup %10131  ;;  %v3698_v42 = vadd.f32 1.0, %v10130_v50  ;;  %v12344_v54 = vld [vmem:[#allocation15 + $0x4] ss:$12 sps:$4 sm:$0xff]   ;;  %vm3735_vm5 = vcmp.eq.s32.totalorder %v3733_v27, 1 }
 0x50b   :  { %v3636_v12 = vadd.f32 %v3634_v63, %v3632_v14  ;;  %v3699_v4 = vadd.f32 1.0, %v10132_v45  ;;  %v3730_v14 = vpop.permute.xlu0 %3729 }
 0x50c   :  { %10137 = vrcp.f32 %v3698_v42  ;;  %vm3734_vm4 = vcmp.eq.s32.totalorder %v3730_v14, 1 }
 0x50d   :  { %v12260_v59 = vsel %vm3650_vm0, %v3636_v12, %v12155_v10  ;;  %v3654_v46 = vsel %vm3650_vm0, %v3636_v12, 0.0  ;;  %v12273_v10 = vld [vmem:[%s13868_s10] ss:$0 sm:$0xff]  ;;  %10139 = vrcp.f32 %v3699_v4  ;;  %v12351_v12 = vld [vmem:[#allocation15 + $0x8] ss:$12 sps:$4 sm:$0xff]  }
 0x50e   :  { %v8694_v49 = vpack.c.bf16 %v3654_v46, %v3653_v43  ;;  %v3761_v55 = vpack.c.bf16 %v12260_v59, %v12257_v40  ;;  %v3704_v47 = vadd.f32 %v12273_v10, %v12249_v16  ;;  %v12287_v16 = vld [vmem:[#allocation15 + $0x98] ss:$12 sps:$4 sm:$0xff]   ;;  %v3705_v17 = vadd.f32 %v12273_v10, %v12252_v24  ;;  %v12385_v4 = vld [vmem:[#allocation14 + $0x7c] ss:$12 sps:$4 sm:$0xff]  }
 0x510   :  { %8695 = vst [vmem:[#allocation17 + $0x18] sm:$0xff] %v8694_v49   ;;  %3795 = vmatmul.mubr.bf16.vlgmr.msra.gmra.mxu0 %v3761_v55  ;;  %9400 = vmatmul.mubr.bf16.vlgmr.msra.gmra.mxu1 %v3761_v55  ;;  %v12360_v55 = vld [vmem:[#allocation14 + $0xac] ss:$12 sps:$4 sm:$0xff]  }
 0x511   :  { %3848 = vmatpush1.bf16.msra.mxu0 %v12264_v56  ;;  %9404 = vmatpush3.bf16.msra.mxu1 %v12267_v39 }
 0x512   :  { %3849 = vmatprep.subr.bf16.mxu0 %v12277_v1  ;;  %9405 = vmatprep.subr.bf16.mxu1 %v14062_v34  ;;  %v10134_v20 = vpop.eup %10133 }
 0x513   :  { %3879 = vmatprep.mubr.bf16.mxu0 %v14063_v25  ;;  %9419 = vmatprep.mubr.msk.bf16.mxu1 %vm11062_vm3, %v14062_v34  ;;  %v3706_v5 = vmul.f32 %v10134_v20, %v3704_v47  ;;  %v12379_v47 = vld [vmem:[#allocation14 + $0x90] ss:$12 sps:$4 sm:$0xff]   ;;  %v12382_v20 = vld [vmem:[#allocation14 + $0x98] ss:$12 sps:$4 sm:$0xff]  }
 0x515   :  { %3850 = vmatpush1.bf16.msra.mxu0 %v12284_v62  ;;  %9406 = vmatpush3.bf16.msra.mxu1 %v12287_v16  ;;  %v3710_v61 = vadd.f32 %v3708_v52, %v3706_v5  ;;  %v12389_v5 = vld [vmem:[#allocation14 + $0x78] ss:$12 sps:$4 sm:$0xff]   ;;  %v12392_v52 = vld [vmem:[#allocation14 + $0x80] ss:$12 sps:$4 sm:$0xff]  }
 0x516   :  { %3851 = vmatprep.subr.bf16.mxu0 %v12292_v6  ;;  %9407 = vmatprep.subr.bf16.mxu1 %v14062_v34  ;;  %v10136_v18 = vpop.eup %10135  ;;  %14100 = vst [vmem:[#allocation27_spill] sm:$0xff] %v12389_v5  ;;  %14101 = vst [vmem:[#allocation28_spill] sm:$0xff] %v12392_v52 }
 0x517   :  { %10141 = vtanh.f32 %v3710_v61  ;;  %v3707_v19 = vmul.f32 %v10136_v18, %v3705_v17  ;;  %v12395_v61 = vld [vmem:[#allocation14 + $0x64] ss:$12 sps:$4 sm:$0xff]   ;;  %v12399_v17 = vld [vmem:[#allocation14 + $0x60] ss:$12 sps:$4 sm:$0xff]   ;;  %v12402_v18 = vld [vmem:[#allocation14 + $0x68] ss:$12 sps:$4 sm:$0xff]  }
 0x518   :  { %14102 = vst [vmem:[#allocation29_spill] sm:$0xff] %v12395_v61  ;;  %14103 = vst [vmem:[#allocation30_spill] sm:$0xff] %v12399_v17 }
 0x519   :  { %3852 = vmatpush1.bf16.msra.mxu0 %v12296_v35  ;;  %9408 = vmatpush3.bf16.msra.mxu1 %v12299_v37  ;;  %v3711_v24 = vadd.f32 %v3709_v31, %v3707_v19  ;;  %v10138_v51 = vpop.eup %10137  ;;  %14104 = vst [vmem:[#allocation31_spill] sm:$0xff] %v12402_v18  ;;  %v12405_v19 = vld [vmem:[#allocation14 + $0x4c] ss:$12 sps:$4 sm:$0xff]   ;;  %v12409_v31 = vld [vmem:[#allocation14 + $0x48] ss:$12 sps:$4 sm:$0xff]  }
 0x51a   :  { %3853 = vmatprep.subr.bf16.mxu0 %v12302_v60  ;;  %9409 = vmatprep.subr.bf16.mxu1 %v14062_v34  ;;  %v10140_v0 = vpop.eup %10139  ;;  %v3714_v36 = vsub.f32 1.0, %v10138_v51  ;;  %v3718_v38 = vmul.f32 %v10138_v51, %v12199_v44  ;;  %14105 = vst [vmem:[#allocation32_spill] sm:$0xff] %v12405_v19  ;;  %14106 = vst [vmem:[#allocation33_spill] sm:$0xff] %v12409_v31  ;;  %v12415_v51 = vld [vmem:[#allocation14 + $0x34] ss:$12 sps:$4 sm:$0xff]  }
 0x51b   :  { %10143 = vtanh.f32 %v3711_v24  ;;  %v3715_v29 = vsub.f32 1.0, %v10140_v0  ;;  %v3719_v58 = vmul.f32 %v10140_v0, %v12202_v48  ;;  %v12412_v24 = vld [vmem:[#allocation14 + $0x50] ss:$12 sps:$4 sm:$0xff]   ;;  %14108 = vst [vmem:[#allocation35_spill] sm:$0xff] %v12415_v51 }
 0x51c   :  { %14107 = vst [vmem:[#allocation34_spill] sm:$0xff] %v12412_v24  ;;  %v12419_v0 = vld [vmem:[#allocation14 + $0x30] ss:$12 sps:$4 sm:$0xff]  }
 0x51d   :  { %3854 = vmatpush1.bf16.msra.mxu0 %v12306_v23  ;;  %9410 = vmatpush3.bf16.msra.mxu1 %v12309_v13  ;;  %14109 = vst [vmem:[#allocation36_spill] sm:$0xff] %v12419_v0 }
 0x51e   :  { %3855 = vmatprep.subr.bf16.mxu0 %v12312_v30  ;;  %9411 = vmatprep.subr.bf16.mxu1 %v14062_v34 }
 0x521   :  { %3856 = vmatpush1.bf16.msra.mxu0 %v12316_v21  ;;  %9412 = vmatpush3.bf16.msra.mxu1 %v12319_v53 }
 0x522   :  { %3857 = vmatprep.subr.bf16.mxu0 %v12322_v15  ;;  %9413 = vmatprep.subr.bf16.mxu1 %v14062_v34 }
 0x524   :  { %v10142_v2 = vpop.eup %10141 }
 0x525   :  { %3858 = vmatpush1.bf16.msra.mxu0 %v12326_v3  ;;  %9414 = vmatpush3.bf16.msra.mxu1 %v12329_v8  ;;  %v3716_v32 = vmul.f32 %v10142_v2, %v3714_v36  ;;  %v12422_v36 = vld [vmem:[#allocation14 + $0x38] ss:$12 sps:$4 sm:$0xff]   ;;  %v12425_v2 = vld [vmem:[#allocation14 + $0x1c] ss:$12 sps:$4 sm:$0xff]  }
 0x526   :  { %3859 = vmatprep.subr.bf16.mxu0 %v12332_v26  ;;  %9415 = vmatprep.subr.bf16.mxu1 %v14062_v34  ;;  %14110 = vst [vmem:[#allocation37_spill] sm:$0xff] %v12422_v36  ;;  %14111 = vst [vmem:[#allocation38_spill] sm:$0xff] %v12425_v2 }
 0x527   :  { %v3720_v63 = vadd.f32 %v3718_v38, %v3716_v32  ;;  %v12429_v32 = vld [vmem:[#allocation14 + $0x18] ss:$12 sps:$4 sm:$0xff]   ;;  %v12432_v38 = vld [vmem:[#allocation14 + $0x20] ss:$12 sps:$4 sm:$0xff]  }
 0x528   :  { %v10144_v9 = vpop.eup %10143  ;;  %14112 = vst [vmem:[#allocation39_spill] sm:$0xff] %v12429_v32  ;;  %14113 = vst [vmem:[#allocation40_spill] sm:$0xff] %v12432_v38 }
 0x529   :  { %3860 = vmatpush1.bf16.msra.mxu0 %v12337_v57  ;;  %9416 = vmatpush3.bf16.msra.mxu1 %v12340_v22  ;;  %v3717_v11 = vmul.f32 %v10144_v9, %v3715_v29  ;;  %v12355_v50 = vsel %vm3734_vm4, %v3720_v63, %v12199_v44  ;;  %v3738_v46 = vsel %vm3734_vm4, %v3720_v63, 0.0  ;;  %v12366_v44 = vld [vmem:[#allocation14 + $0xa8] ss:$12 sps:$4 sm:$0xff]   ;;  %v12435_v29 = vld [vmem:[#allocation14 + $0x4] ss:$12 sps:$4 sm:$0xff]  }
 0x52a   :  { %3861 = vmatprep.subr.bf16.mxu0 %v12344_v54  ;;  %9417 = vmatprep.subr.bf16.mxu1 %v14062_v34  ;;  %14114 = vst [vmem:[#allocation41_spill] sm:$0xff] %v12435_v29  ;;  %v12439_v9 = vld [vmem:[#allocation14] ss:$12 sps:$4 sm:$0xff]   ;;  %v3752_v63 = vld [vmem:[#allocation4 + $0x60] sm:$0xff] }
 0x52b   :  { %v3721_v41 = vadd.f32 %v3719_v58, %v3717_v11  ;;  %14115 = vst [vmem:[#allocation42_spill] sm:$0xff] %v12439_v9  ;;  %v12442_v58 = vld [vmem:[#allocation14 + $0x8] ss:$12 sps:$4 sm:$0xff]   ;;  %v12445_v11 = vld [vmem:[#allocation15 + $0xac] ss:$12 sps:$4 sm:$0xff]   ;;  %v3931_v14 = vunpack.c.l.bf16 %v3752_v63 }
 0x52c   :  { %14116 = vst [vmem:[#allocation43_spill] sm:$0xff] %v12442_v58  ;;  %14117 = vst [vmem:[#allocation44_spill] sm:$0xff] %v12445_v11 }
 0x52d   :  { %3862 = vmatpush1.bf16.msra.mxu0 %v12348_v33  ;;  %9418 = vmatpush3.bf16.msra.mxu1 %v12351_v12  ;;  %v12358_v43 = vsel %vm3735_vm5, %v3721_v41, %v12202_v48  ;;  %v3739_v49 = vsel %vm3735_vm5, %v3721_v41, 0.0  ;;  %v12369_v48 = vld [vmem:[#allocation14 + $0xb0] ss:$12 sps:$4 sm:$0xff]  }
 0x52e   :  { %4112 = vmatprep.subr.bf16.mxu0 %v12360_v55  ;;  %9423 = vmatprep.subr.bf16.mxu1 %v14062_v34  ;;  %v8699_v45 = vpack.c.bf16 %v3739_v49, %v3738_v46  ;;  %v3846_v42 = vpack.c.bf16 %v12358_v43, %v12355_v50  ;;  %v3754_v46 = vld [vmem:[#allocation4 + $0x6c] sm:$0xff] }
 0x530   :  { %8700 = vst [vmem:[#allocation18 + $0x60] sm:$0xff] %v8699_v45   ;;  %3880 = vmatmul.mubr.bf16.vlgmr.msra.gmra.mxu0 %v3846_v42  ;;  %9420 = vmatmul.mubr.bf16.vlgmr.msra.gmra.mxu1 %v3846_v42  ;;  %v3949_v45 = vrot.slane %v3752_v63, 4 }
 0x531   :  { %4113 = vmatpush1.bf16.msra.mxu0 %v12366_v44  ;;  %9424 = vmatpush3.bf16.msra.mxu1 %v12369_v48 }
 0x532   :  { %4114 = vmatprep.subr.bf16.mxu0 %v12372_v7  ;;  %9425 = vmatprep.subr.bf16.mxu1 %v14062_v34 }
 0x533   :  { %4144 = vmatprep.mubr.bf16.mxu0 %v14063_v25  ;;  %9439 = vmatprep.mubr.msk.bf16.mxu1 %vm11062_vm3, %v14062_v34 }
 0x535   :  { %4115 = vmatpush1.bf16.msra.mxu0 %v12379_v47  ;;  %9426 = vmatpush3.bf16.msra.mxu1 %v12382_v20 }
 0x536   :  { %4116 = vmatprep.subr.bf16.mxu0 %v12385_v4  ;;  %9427 = vmatprep.subr.bf16.mxu1 %v14062_v34 }
 0x539   :  { %4117 = vmatpush1.bf16.msra.mxu0 %v12389_v5  ;;  %9428 = vmatpush3.bf16.msra.mxu1 %v12392_v52 }
 0x53a   :  { %4118 = vmatprep.subr.bf16.mxu0 %v12395_v61  ;;  %9429 = vmatprep.subr.bf16.mxu1 %v14062_v34 }
 0x53d   :  { %4119 = vmatpush1.bf16.msra.mxu0 %v12399_v17  ;;  %9430 = vmatpush3.bf16.msra.mxu1 %v12402_v18 }
 0x53e   :  { %4120 = vmatprep.subr.bf16.mxu0 %v12405_v19  ;;  %9431 = vmatprep.subr.bf16.mxu1 %v14062_v34 }
 0x541   :  { %4121 = vmatpush1.bf16.msra.mxu0 %v12409_v31  ;;  %9432 = vmatpush3.bf16.msra.mxu1 %v12412_v24 }
 0x542   :  { %4122 = vmatprep.subr.bf16.mxu0 %v12415_v51  ;;  %9433 = vmatprep.subr.bf16.mxu1 %v14062_v34 }
 0x545   :  { %4123 = vmatpush1.bf16.msra.mxu0 %v12419_v0  ;;  %9434 = vmatpush3.bf16.msra.mxu1 %v12422_v36  ;;  %v3953_v36 = vunpack.c.l.bf16 %v3949_v45 }
 0x546   :  { %4124 = vmatprep.subr.bf16.mxu0 %v12425_v2  ;;  %9435 = vmatprep.subr.bf16.mxu1 %v14062_v34 }
 0x549   :  { %4125 = vmatpush1.bf16.msra.mxu0 %v12429_v32  ;;  %9436 = vmatpush3.bf16.msra.mxu1 %v12432_v38  ;;  %v3932_v38 = vunpack.c.l.bf16 %v3754_v46  ;;  %v3950_v32 = vrot.slane %v3754_v46, 4 }
 0x54a   :  { %4126 = vmatprep.subr.bf16.mxu0 %v12435_v29  ;;  %9437 = vmatprep.subr.bf16.mxu1 %v14062_v34 }
 0x54b   :  { %v3954_v19 = vunpack.c.l.bf16 %v3950_v32 }
 0x54d   :  { %4127 = vmatpush1.bf16.msra.mxu0 %v12439_v9  ;;  %9438 = vmatpush3.bf16.msra.mxu1 %v12442_v58 }
 0x54e   :  { %4197 = vmatprep.subr.bf16.mxu0 %v12445_v11  ;;  %9443 = vmatprep.subr.bf16.mxu1 %v14062_v34 }
 0x5d0   :  { %v3796_v27 = vpop.f32.mrf.mxu0  ;;  %v3839_v41 = vpop.f32.mrf.mxu1 }
 0x5d1   :  { %v3933_v49 = vadd.f32 %v3931_v14, %v3796_v27 }
 0x5d2   :  { %v3798_v42 = vpop.f32.mrf.mxu0  ;;  %v9401_v29 = vpop.f32.mrf.mxu1 }
 0x5d3   :  { %v8325_v9 = vmul.f32 -1.442695, %v3933_v49  ;;  %v3955_v24 = vadd.f32 %v3953_v36, %v3798_v42  ;;  %v3757_v49 = vld [vmem:[#allocation5 + $0x108] sm:$0xff] }
 0x5d4   :  { %v3800_v2 = vpop.f32.mrf.mxu0  ;;  %v3842_v58 = vpop.f32.mrf.mxu1  ;;  %v4016_v36 = vunpack.c.l.bf16 %v3757_v49 }
 0x5d5   :  { %10145 = vpow2.f32 %v8325_v9  ;;  %v3934_v0 = vadd.f32 %v3932_v38, %v3800_v2  ;;  %v8327_v17 = vmul.f32 -1.442695, %v3955_v24 }
 0x5d6   :  { %v3802_v11 = vpop.f32.mrf.mxu0  ;;  %v9402_v51 = vpop.f32.mrf.mxu1 }
 0x5d7   :  { %v8326_v31 = vmul.f32 -1.442695, %v3934_v0  ;;  %v3956_v18 = vadd.f32 %v3954_v19, %v3802_v11  ;;  %v3753_v51 = vld [vmem:[#allocation4 + $0x68] ss:$12 sps:$4 sm:$0xff]   ;;  %v3969_v0 = vadd.f32 %v12246_v28, %v3839_v41  ;;  %v4034_v11 = vrot.slane %v3757_v49, 4 }
 0x5d8   :  { %v3973_v42 = vunpack.c.l.bf16 %v3753_v51 }
 0x5d9   :  { %10147 = vpow2.f32 %v8326_v31  ;;  %v8328_v14 = vmul.f32 -1.442695, %v3956_v18  ;;  %v4038_v5 = vunpack.c.l.bf16 %v4034_v11 }
 0x5da   :  { %10149 = vpow2.f32 %v8327_v17  ;;  %v3759_v17 = vld [vmem:[#allocation5 + $0x114] sm:$0xff] }
 0x5db   :  { %10151 = vpow2.f32 %v8328_v14  ;;  %v4035_v61 = vrot.slane %v3759_v17, 4 }
 0x5e2   :  { %v10146_v29 = vpop.eup %10145 }
 0x5e3   :  { %v3941_v63 = vadd.f32 1.0, %v10146_v29 }
 0x5e5   :  { %10153 = vrcp.f32 %v3941_v63 }
 0x5e6   :  { %v10148_v27 = vpop.eup %10147 }
 0x5e7   :  { %v3942_v46 = vadd.f32 1.0, %v10148_v27  ;;  %v10150_v9 = vpop.eup %10149  ;;  %v4017_v27 = vunpack.c.l.bf16 %v3759_v17 }
 0x5e8   :  { %v10152_v2 = vpop.eup %10151  ;;  %v3963_v38 = vadd.f32 1.0, %v10150_v9  ;;  %v3970_v9 = vadd.f32 %v12246_v28, %v3842_v58 }
 0x5e9   :  { %10155 = vrcp.f32 %v3942_v46  ;;  %v3964_v31 = vadd.f32 1.0, %v10152_v2 }
 0x5ea   :  { %10157 = vrcp.f32 %v3963_v38 }
 0x5eb   :  { %10159 = vrcp.f32 %v3964_v31 }
 0x5f0   :  { %v3881_v19 = vpop.f32.mrf.mxu0  ;;  %v12450_v24 = vpop.f32.mrf.mxu1 }
 0x5f1   :  { %v4018_v32 = vadd.f32 %v4016_v36, %v3881_v19 }
 0x5f2   :  { %v10154_v18 = vpop.eup %10153  ;;  %v3883_v14 = vpop.f32.mrf.mxu0 }
 0x5f3   :  { %v3971_v45 = vmul.f32 %v10154_v18, %v3969_v0  ;;  %v9421_v29 = vpop.f32.mrf.mxu1  ;;  %v8331_v63 = vmul.f32 -1.442695, %v4018_v32  ;;  %v3974_v0 = vunpack.c.h.bf16 %v3753_v51  ;;  %v4040_v19 = vadd.f32 %v4038_v5, %v3883_v14 }
 0x5f4   :  { %v3885_v41 = vpop.f32.mrf.mxu0 }
 0x5f5   :  { %v3975_v46 = vadd.f32 %v3973_v42, %v3971_v45  ;;  %v12453_v2 = vpop.f32.mrf.mxu1  ;;  %10161 = vpow2.f32 %v8331_v63  ;;  %v4019_v36 = vadd.f32 %v4017_v27, %v3885_v41  ;;  %v4039_v45 = vunpack.c.l.bf16 %v4035_v61 }
 0x5f6   :  { %v10156_v52 = vpop.eup %10155  ;;  %v3887_v32 = vpop.f32.mrf.mxu0  ;;  %v8333_v31 = vmul.f32 -1.442695, %v4040_v19 }
 0x5f7   :  { %10163 = vtanh.f32 %v3975_v46  ;;  %v3972_v49 = vmul.f32 %v10156_v52, %v3970_v9  ;;  %v9422_v38 = vpop.f32.mrf.mxu1  ;;  %v8332_v18 = vmul.f32 -1.442695, %v4019_v36  ;;  %v4041_v58 = vadd.f32 %v4039_v45, %v3887_v32  ;;  %v10158_v28 = vpop.eup %10157 }
 0x5f8   :  { %v10160_v17 = vpop.eup %10159  ;;  %v3979_v11 = vsub.f32 1.0, %v10158_v28  ;;  %v3983_v14 = vmul.f32 %v10158_v28, %v12257_v40  ;;  %v3998_v38 = vpop.permute.xlu1 %3997 }
 0x5f9   :  { %v3976_v29 = vadd.f32 %v3974_v0, %v3972_v49  ;;  %10165 = vpow2.f32 %v8332_v18  ;;  %v8334_v42 = vmul.f32 -1.442695, %v4041_v58  ;;  %v3980_v46 = vsub.f32 1.0, %v10160_v17  ;;  %v3995_v0 = vpop.permute.xlu0 %3994 }
 0x5fa   :  { %v3984_v41 = vmul.f32 %v10160_v17, %v12260_v59  ;;  %vm3999_vm6 = vcmp.eq.s32.totalorder %v3995_v0, 1  ;;  %vm4000_vm7 = vcmp.eq.s32.totalorder %v3998_v38, 1 }
 0x5fb   :  { %10167 = vtanh.f32 %v3976_v29 }
 0x5fc   :  { %10169 = vpow2.f32 %v8333_v31 }
 0x5fd   :  { %10171 = vpow2.f32 %v8334_v42 }
 0x602   :  { %v10162_v63 = vpop.eup %10161 }
 0x603   :  { %v4026_v52 = vadd.f32 1.0, %v10162_v63  ;;  %v3758_v63 = vld [vmem:[#allocation5 + $0x110] ss:$12 sps:$4 sm:$0xff]  }
 0x604   :  { %v10164_v27 = vpop.eup %10163 }
 0x605   :  { %v3981_v51 = vmul.f32 %v10164_v27, %v3979_v11  ;;  %10173 = vrcp.f32 %v4026_v52  ;;  %v4058_v52 = vunpack.c.l.bf16 %v3758_v63 }
 0x606   :  { %v10166_v5 = vpop.eup %10165 }
 0x607   :  { %v4027_v9 = vadd.f32 1.0, %v10166_v5  ;;  %v3985_v49 = vadd.f32 %v3983_v14, %v3981_v51 }
 0x608   :  { %v10168_v61 = vpop.eup %10167 }
 0x609   :  { %v3982_v36 = vmul.f32 %v10168_v61, %v3980_v46  ;;  %10175 = vrcp.f32 %v4027_v9  ;;  %v10170_v18 = vpop.eup %10169  ;;  %v12458_v32 = vsel %vm3999_vm6, %v3985_v49, %v12257_v40  ;;  %v4003_v28 = vsel %vm3999_vm6, %v3985_v49, 0.0 }
 0x60a   :  { %v10172_v42 = vpop.eup %10171  ;;  %v4048_v17 = vadd.f32 1.0, %v10170_v18  ;;  %v4054_v40 = vadd.f32 %v12273_v10, %v12450_v24  ;;  %v4055_v24 = vadd.f32 %v12273_v10, %v12453_v2  ;;  %v4059_v46 = vunpack.c.h.bf16 %v3758_v63 }
 0x60b   :  { %v3986_v19 = vadd.f32 %v3984_v41, %v3982_v36  ;;  %v4049_v11 = vadd.f32 1.0, %v10172_v42 }
 0x60c   :  { %10177 = vrcp.f32 %v4048_v17 }
 0x60d   :  { %v12461_v29 = vsel %vm4000_vm7, %v3986_v19, %v12260_v59  ;;  %v4004_v45 = vsel %vm4000_vm7, %v3986_v19, 0.0  ;;  %10179 = vrcp.f32 %v4049_v11 }
 0x60e   :  { %v8704_v58 = vpack.c.bf16 %v4004_v45, %v4003_v28  ;;  %v4111_v31 = vpack.c.bf16 %v12461_v29, %v12458_v32 }
 0x610   :  { %8705 = vst [vmem:[#allocation17 + $0x20] sm:$0xff] %v8704_v58   ;;  %4145 = vmatmul.mubr.bf16.vlgmr.msra.gmra.mxu0 %v4111_v31  ;;  %9440 = vmatmul.mubr.bf16.vlgmr.msra.gmra.mxu1 %v4111_v31  ;;  %v4080_v58 = vpop.permute.xlu0 %4079  ;;  %v4083_v31 = vpop.permute.xlu1 %4082 }
 0x611   :  { %4198 = vmatpush1.bf16.msra.mxu0 %v12264_v56  ;;  %9444 = vmatpush3.bf16.msra.mxu1 %v12267_v39  ;;  %vm4084_vm8 = vcmp.eq.s32.totalorder %v4080_v58, 1  ;;  %vm4085_vm9 = vcmp.eq.s32.totalorder %v4083_v31, 1 }
 0x612   :  { %4199 = vmatprep.subr.bf16.mxu0 %v12277_v1  ;;  %9445 = vmatprep.subr.bf16.mxu1 %v14062_v34  ;;  %v10174_v59 = vpop.eup %10173 }
 0x613   :  { %4229 = vmatprep.mubr.bf16.mxu0 %v14063_v25  ;;  %9459 = vmatprep.mubr.msk.bf16.mxu1 %vm11062_vm3, %v14062_v34  ;;  %v4056_v27 = vmul.f32 %v10174_v59, %v4054_v40 }
 0x615   :  { %4200 = vmatpush1.bf16.msra.mxu0 %v12284_v62  ;;  %9446 = vmatpush3.bf16.msra.mxu1 %v12287_v16  ;;  %v4060_v51 = vadd.f32 %v4058_v52, %v4056_v27  ;;  %v14120_v52 = vld [vmem:[#allocation29_spill] sm:$0xff] }
 0x616   :  { %4201 = vmatprep.subr.bf16.mxu0 %v12292_v6  ;;  %9447 = vmatprep.subr.bf16.mxu1 %v14062_v34  ;;  %v10176_v5 = vpop.eup %10175 }
 0x617   :  { %10181 = vtanh.f32 %v4060_v51  ;;  %v4057_v14 = vmul.f32 %v10176_v5, %v4055_v24  ;;  %v14121_v51 = vld [vmem:[#allocation30_spill] sm:$0xff]  ;;  %v14122_v24 = vld [vmem:[#allocation31_spill] sm:$0xff]  ;;  %v14123_v5 = vld [vmem:[#allocation32_spill] sm:$0xff] }
 0x619   :  { %4202 = vmatpush1.bf16.msra.mxu0 %v12296_v35  ;;  %9448 = vmatpush3.bf16.msra.mxu1 %v12299_v37  ;;  %v4061_v61 = vadd.f32 %v4059_v46, %v4057_v14  ;;  %v10178_v2 = vpop.eup %10177  ;;  %v14124_v14 = vld [vmem:[#allocation33_spill] sm:$0xff]  ;;  %v14125_v46 = vld [vmem:[#allocation34_spill] sm:$0xff] }
 0x61a   :  { %4203 = vmatprep.subr.bf16.mxu0 %v12302_v60  ;;  %9449 = vmatprep.subr.bf16.mxu1 %v14062_v34  ;;  %v10180_v9 = vpop.eup %10179  ;;  %v4064_v41 = vsub.f32 1.0, %v10178_v2  ;;  %v4068_v0 = vmul.f32 %v10178_v2, %v12355_v50  ;;  %v14127_v2 = vld [vmem:[#allocation36_spill] sm:$0xff] }
 0x61b   :  { %10183 = vtanh.f32 %v4061_v61  ;;  %v4065_v38 = vsub.f32 1.0, %v10180_v9  ;;  %v4069_v18 = vmul.f32 %v10180_v9, %v12358_v43  ;;  %v14126_v61 = vld [vmem:[#allocation35_spill] sm:$0xff]  ;;  %v14128_v9 = vld [vmem:[#allocation37_spill] sm:$0xff] }
 0x61d   :  { %4204 = vmatpush1.bf16.msra.mxu0 %v12306_v23  ;;  %9450 = vmatpush3.bf16.msra.mxu1 %v12309_v13 }
 0x61e   :  { %4205 = vmatprep.subr.bf16.mxu0 %v12312_v30  ;;  %9451 = vmatprep.subr.bf16.mxu1 %v14062_v34 }
 0x621   :  { %4206 = vmatpush1.bf16.msra.mxu0 %v12316_v21  ;;  %9452 = vmatpush3.bf16.msra.mxu1 %v12319_v53 }
 0x622   :  { %4207 = vmatprep.subr.bf16.mxu0 %v12322_v15  ;;  %9453 = vmatprep.subr.bf16.mxu1 %v14062_v34 }
 0x624   :  { %v10182_v36 = vpop.eup %10181 }
 0x625   :  { %4208 = vmatpush1.bf16.msra.mxu0 %v12326_v3  ;;  %9454 = vmatpush3.bf16.msra.mxu1 %v12329_v8  ;;  %v4066_v49 = vmul.f32 %v10182_v36, %v4064_v41  ;;  %v14129_v41 = vld [vmem:[#allocation38_spill] sm:$0xff]  ;;  %v14130_v36 = vld [vmem:[#allocation39_spill] sm:$0xff] }
 0x626   :  { %4209 = vmatprep.subr.bf16.mxu0 %v12332_v26  ;;  %9455 = vmatprep.subr.bf16.mxu1 %v14062_v34 }
 0x627   :  { %v4070_v45 = vadd.f32 %v4068_v0, %v4066_v49  ;;  %v14131_v49 = vld [vmem:[#allocation40_spill] sm:$0xff]  ;;  %v14132_v0 = vld [vmem:[#allocation41_spill] sm:$0xff] }
 0x628   :  { %v10184_v19 = vpop.eup %10183 }
 0x629   :  { %4210 = vmatpush1.bf16.msra.mxu0 %v12337_v57  ;;  %9456 = vmatpush3.bf16.msra.mxu1 %v12340_v22  ;;  %v4067_v28 = vmul.f32 %v10184_v19, %v4065_v38  ;;  %v12505_v17 = vsel %vm4084_vm8, %v4070_v45, %v12355_v50  ;;  %v4088_v40 = vsel %vm4084_vm8, %v4070_v45, 0.0  ;;  %v14118_v50 = vld [vmem:[#allocation27_spill] sm:$0xff]  ;;  %v14133_v38 = vld [vmem:[#allocation42_spill] sm:$0xff] }
 0x62a   :  { %4211 = vmatprep.subr.bf16.mxu0 %v12344_v54  ;;  %9457 = vmatprep.subr.bf16.mxu1 %v14062_v34  ;;  %v14134_v19 = vld [vmem:[#allocation43_spill] sm:$0xff] }
 0x62b   :  { %v4071_v42 = vadd.f32 %v4069_v18, %v4067_v28  ;;  %v14135_v18 = vld [vmem:[#allocation44_spill] sm:$0xff]  ;;  %v4102_v28 = vld [vmem:[#allocation4 + $0x78] sm:$0xff] }
 0x62c   :  { %v4281_v45 = vunpack.c.l.bf16 %v4102_v28 }
 0x62d   :  { %4212 = vmatpush1.bf16.msra.mxu0 %v12348_v33  ;;  %9458 = vmatpush3.bf16.msra.mxu1 %v12351_v12  ;;  %v12508_v63 = vsel %vm4085_vm9, %v4071_v42, %v12358_v43  ;;  %v4089_v59 = vsel %vm4085_vm9, %v4071_v42, 0.0  ;;  %v14119_v43 = vld [vmem:[#allocation28_spill] sm:$0xff]  ;;  %v4104_v42 = vld [vmem:[#allocation4 + $0x84] sm:$0xff] }
 0x62e   :  { %4462 = vmatprep.subr.bf16.mxu0 %v12360_v55  ;;  %9463 = vmatprep.subr.bf16.mxu1 %v14062_v34  ;;  %v8709_v11 = vpack.c.bf16 %v4089_v59, %v4088_v40  ;;  %v4196_v27 = vpack.c.bf16 %v12508_v63, %v12505_v17  ;;  %v4299_v59 = vrot.slane %v4102_v28, 4 }
 0x630   :  { %8710 = vst [vmem:[#allocation18 + $0x58] sm:$0xff] %v8709_v11   ;;  %4230 = vmatmul.mubr.bf16.vlgmr.msra.gmra.mxu0 %v4196_v27  ;;  %9460 = vmatmul.mubr.bf16.vlgmr.msra.gmra.mxu1 %v4196_v27 }
 0x631   :  { %4463 = vmatpush1.bf16.msra.mxu0 %v12366_v44  ;;  %9464 = vmatpush3.bf16.msra.mxu1 %v12369_v48 }
 0x632   :  { %4464 = vmatprep.subr.bf16.mxu0 %v12372_v7  ;;  %9465 = vmatprep.subr.bf16.mxu1 %v14062_v34 }
 0x633   :  { %4494 = vmatprep.mubr.bf16.mxu0 %v14063_v25  ;;  %9479 = vmatprep.mubr.msk.bf16.mxu1 %vm11062_vm3, %v14062_v34 }
 0x635   :  { %4465 = vmatpush1.bf16.msra.mxu0 %v12379_v47  ;;  %9466 = vmatpush3.bf16.msra.mxu1 %v12382_v20 }
 0x636   :  { %4466 = vmatprep.subr.bf16.mxu0 %v12385_v4  ;;  %9467 = vmatprep.subr.bf16.mxu1 %v14062_v34 }
 0x639   :  { %4467 = vmatpush1.bf16.msra.mxu0 %v14118_v50  ;;  %9468 = vmatpush3.bf16.msra.mxu1 %v14119_v43 }
 0x63a   :  { %4468 = vmatprep.subr.bf16.mxu0 %v14120_v52  ;;  %9469 = vmatprep.subr.bf16.mxu1 %v14062_v34 }
 0x63d   :  { %4469 = vmatpush1.bf16.msra.mxu0 %v14121_v51  ;;  %9470 = vmatpush3.bf16.msra.mxu1 %v14122_v24 }
 0x63e   :  { %4470 = vmatprep.subr.bf16.mxu0 %v14123_v5  ;;  %9471 = vmatprep.subr.bf16.mxu1 %v14062_v34 }
 0x641   :  { %4471 = vmatpush1.bf16.msra.mxu0 %v14124_v14  ;;  %9472 = vmatpush3.bf16.msra.mxu1 %v14125_v46 }
 0x642   :  { %4472 = vmatprep.subr.bf16.mxu0 %v14126_v61  ;;  %9473 = vmatprep.subr.bf16.mxu1 %v14062_v34 }
 0x645   :  { %4473 = vmatpush1.bf16.msra.mxu0 %v14127_v2  ;;  %9474 = vmatpush3.bf16.msra.mxu1 %v14128_v9 }
 0x646   :  { %4474 = vmatprep.subr.bf16.mxu0 %v14129_v41  ;;  %9475 = vmatprep.subr.bf16.mxu1 %v14062_v34 }
 0x649   :  { %4475 = vmatpush1.bf16.msra.mxu0 %v14130_v36  ;;  %9476 = vmatpush3.bf16.msra.mxu1 %v14131_v49  ;;  %v4282_v49 = vunpack.c.l.bf16 %v4104_v42  ;;  %v4300_v36 = vrot.slane %v4104_v42, 4 }
 0x64a   :  { %4476 = vmatprep.subr.bf16.mxu0 %v14132_v0  ;;  %9477 = vmatprep.subr.bf16.mxu1 %v14062_v34 }
 0x64b   :  { %v4304_v14 = vunpack.c.l.bf16 %v4300_v36 }
 0x64d   :  { %4477 = vmatpush1.bf16.msra.mxu0 %v14133_v38  ;;  %9478 = vmatpush3.bf16.msra.mxu1 %v14134_v19  ;;  %v4303_v19 = vunpack.c.l.bf16 %v4299_v59  ;;  %v4107_v59 = vld [vmem:[#allocation5 + $0xf0] sm:$0xff] }
 0x64e   :  { %4547 = vmatprep.subr.bf16.mxu0 %v14135_v18  ;;  %9483 = vmatprep.subr.bf16.mxu1 %v14062_v34 }
 0x6d0   :  { %v4146_v58 = vpop.f32.mrf.mxu0  ;;  %v4189_v31 = vpop.f32.mrf.mxu1 }
 0x6d1   :  { %v4283_v40 = vadd.f32 %v4281_v45, %v4146_v58 }
 0x6d2   :  { %v4148_v11 = vpop.f32.mrf.mxu0  ;;  %v9441_v27 = vpop.f32.mrf.mxu1 }
 0x6d3   :  { %v8337_v0 = vmul.f32 -1.442695, %v4283_v40  ;;  %v4305_v61 = vadd.f32 %v4303_v19, %v4148_v11  ;;  %v4366_v19 = vunpack.c.l.bf16 %v4107_v59  ;;  %v4384_v11 = vrot.slane %v4107_v59, 4 }
 0x6d4   :  { %v4150_v41 = vpop.f32.mrf.mxu0  ;;  %v4192_v38 = vpop.f32.mrf.mxu1 }
 0x6d5   :  { %10185 = vpow2.f32 %v8337_v0  ;;  %v4284_v9 = vadd.f32 %v4282_v49, %v4150_v41  ;;  %v8339_v24 = vmul.f32 -1.442695, %v4305_v61  ;;  %v4388_v50 = vunpack.c.l.bf16 %v4384_v11 }
 0x6d6   :  { %v4152_v18 = vpop.f32.mrf.mxu0  ;;  %v9442_v2 = vpop.f32.mrf.mxu1 }
 0x6d7   :  { %v8338_v46 = vmul.f32 -1.442695, %v4284_v9  ;;  %v4306_v5 = vadd.f32 %v4304_v14, %v4152_v18  ;;  %v4103_v2 = vld [vmem:[#allocation4 + $0x80] ss:$12 sps:$4 sm:$0xff]  }
 0x6d8   :  { %v14136_v9 = vld [vmem:[#allocation26_spill] sm:$0xff] }
 0x6d9   :  { %10187 = vpow2.f32 %v8338_v46  ;;  %v8340_v45 = vmul.f32 -1.442695, %v4306_v5  ;;  %v4319_v36 = vadd.f32 %v14136_v9, %v4189_v31  ;;  %v4320_v51 = vadd.f32 %v14136_v9, %v4192_v38 }
 0x6da   :  { %10189 = vpow2.f32 %v8339_v24  ;;  %v4109_v24 = vld [vmem:[#allocation5 + $0xfc] sm:$0xff] }
 0x6db   :  { %10191 = vpow2.f32 %v8340_v45  ;;  %v4323_v45 = vunpack.c.l.bf16 %v4103_v2  ;;  %v4385_v52 = vrot.slane %v4109_v24, 4 }
 0x6e2   :  { %v10186_v28 = vpop.eup %10185 }
 0x6e3   :  { %v4291_v58 = vadd.f32 1.0, %v10186_v28 }
 0x6e5   :  { %10193 = vrcp.f32 %v4291_v58 }
 0x6e6   :  { %v10188_v42 = vpop.eup %10187 }
 0x6e7   :  { %v4292_v40 = vadd.f32 1.0, %v10188_v42  ;;  %v10190_v0 = vpop.eup %10189 }
 0x6e8   :  { %v10192_v41 = vpop.eup %10191  ;;  %v4313_v49 = vadd.f32 1.0, %v10190_v0 }
 0x6e9   :  { %10195 = vrcp.f32 %v4292_v40  ;;  %v4314_v46 = vadd.f32 1.0, %v10192_v41  ;;  %v4367_v40 = vunpack.c.l.bf16 %v4109_v24 }
 0x6ea   :  { %10197 = vrcp.f32 %v4313_v49 }
 0x6eb   :  { %10199 = vrcp.f32 %v4314_v46 }
 0x6f0   :  { %v4231_v14 = vpop.f32.mrf.mxu0  ;;  %v12550_v61 = vpop.f32.mrf.mxu1 }
 0x6f1   :  { %v4368_v18 = vadd.f32 %v4366_v19, %v4231_v14 }
 0x6f2   :  { %v10194_v5 = vpop.eup %10193  ;;  %v4233_v28 = vpop.f32.mrf.mxu0 }
 0x6f3   :  { %v4321_v27 = vmul.f32 %v10194_v5, %v4319_v36  ;;  %v9461_v58 = vpop.f32.mrf.mxu1  ;;  %v8343_v42 = vmul.f32 -1.442695, %v4368_v18  ;;  %v4324_v36 = vunpack.c.h.bf16 %v4103_v2  ;;  %v4390_v14 = vadd.f32 %v4388_v50, %v4233_v28 }
 0x6f4   :  { %v4235_v31 = vpop.f32.mrf.mxu0 }
 0x6f5   :  { %v4325_v0 = vadd.f32 %v4323_v45, %v4321_v27  ;;  %v12553_v41 = vpop.f32.mrf.mxu1  ;;  %10201 = vpow2.f32 %v8343_v42  ;;  %v4369_v19 = vadd.f32 %v4367_v40, %v4235_v31  ;;  %v4389_v27 = vunpack.c.l.bf16 %v4385_v52 }
 0x6f6   :  { %v10196_v43 = vpop.eup %10195  ;;  %v4237_v18 = vpop.f32.mrf.mxu0  ;;  %v8345_v9 = vmul.f32 -1.442695, %v4390_v14 }
 0x6f7   :  { %10203 = vtanh.f32 %v4325_v0  ;;  %v4322_v59 = vmul.f32 %v10196_v43, %v4320_v51  ;;  %v9462_v49 = vpop.f32.mrf.mxu1  ;;  %v8344_v5 = vmul.f32 -1.442695, %v4369_v19  ;;  %v4391_v38 = vadd.f32 %v4389_v27, %v4237_v18  ;;  %v10198_v45 = vpop.eup %10197 }
 0x6f8   :  { %v10200_v24 = vpop.eup %10199  ;;  %v4329_v11 = vsub.f32 1.0, %v10198_v45  ;;  %v4333_v2 = vmul.f32 %v10198_v45, %v12458_v32  ;;  %v4348_v49 = vpop.permute.xlu1 %4347 }
 0x6f9   :  { %v4326_v58 = vadd.f32 %v4324_v36, %v4322_v59  ;;  %10205 = vpow2.f32 %v8344_v5  ;;  %v8346_v46 = vmul.f32 -1.442695, %v4391_v38  ;;  %v4330_v28 = vsub.f32 1.0, %v10200_v24  ;;  %v4345_v36 = vpop.permute.xlu0 %4344 }
 0x6fa   :  { %v4334_v31 = vmul.f32 %v10200_v24, %v12461_v29  ;;  %vm4349_vm10 = vcmp.eq.s32.totalorder %v4345_v36, 1  ;;  %vm4350_vm11 = vcmp.eq.s32.totalorder %v4348_v49, 1  ;;  %v4452_v36 = vld [vmem:[#allocation4 + $0x90] sm:$0xff] }
 0x6fb   :  { %10207 = vtanh.f32 %v4326_v58  ;;  %v4631_v49 = vunpack.c.l.bf16 %v4452_v36 }
 0x6fc   :  { %10209 = vpow2.f32 %v8345_v9 }
 0x6fd   :  { %10211 = vpow2.f32 %v8346_v46 }
 0x702   :  { %v10202_v42 = vpop.eup %10201 }
 0x703   :  { %v4376_v43 = vadd.f32 1.0, %v10202_v42  ;;  %v4108_v42 = vld [vmem:[#allocation5 + $0xf8] ss:$12 sps:$4 sm:$0xff]  }
 0x704   :  { %v10204_v40 = vpop.eup %10203 }
 0x705   :  { %v4331_v51 = vmul.f32 %v10204_v40, %v4329_v11  ;;  %10213 = vrcp.f32 %v4376_v43  ;;  %v4408_v43 = vunpack.c.l.bf16 %v4108_v42 }
 0x706   :  { %v10206_v50 = vpop.eup %10205 }
 0x707   :  { %v4377_v0 = vadd.f32 1.0, %v10206_v50  ;;  %v4335_v59 = vadd.f32 %v4333_v2, %v4331_v51  ;;  %v4409_v51 = vunpack.c.h.bf16 %v4108_v42  ;;  %v14148_v2 = vld [vmem:[#allocation38_spill] sm:$0xff] }
 0x708   :  { %v10208_v52 = vpop.eup %10207 }
 0x709   :  { %v4332_v19 = vmul.f32 %v10208_v52, %v4330_v28  ;;  %10215 = vrcp.f32 %v4377_v0  ;;  %v10210_v5 = vpop.eup %10209  ;;  %v12558_v18 = vsel %vm4349_vm10, %v4335_v59, %v12458_v32  ;;  %v4353_v27 = vsel %vm4349_vm10, %v4335_v59, 0.0  ;;  %v14149_v28 = vld [vmem:[#allocation39_spill] sm:$0xff]  ;;  %v14150_v52 = vld [vmem:[#allocation40_spill] sm:$0xff]  ;;  %v14151_v0 = vld [vmem:[#allocation41_spill] sm:$0xff] }
 0x70a   :  { %v10212_v45 = vpop.eup %10211  ;;  %v4398_v24 = vadd.f32 1.0, %v10210_v5  ;;  %v4404_v32 = vadd.f32 %v12273_v10, %v12550_v61  ;;  %v14154_v59 = vld [vmem:[#allocation44_spill] sm:$0xff] }
 0x70b   :  { %v4336_v14 = vadd.f32 %v4334_v31, %v4332_v19  ;;  %v4399_v11 = vadd.f32 1.0, %v10212_v45  ;;  %v14152_v31 = vld [vmem:[#allocation42_spill] sm:$0xff]  ;;  %v14153_v19 = vld [vmem:[#allocation43_spill] sm:$0xff] }
 0x70c   :  { %10217 = vrcp.f32 %v4398_v24 }
 0x70d   :  { %v12561_v58 = vsel %vm4350_vm11, %v4336_v14, %v12461_v29  ;;  %v4354_v38 = vsel %vm4350_vm11, %v4336_v14, 0.0  ;;  %10219 = vrcp.f32 %v4399_v11 }
 0x70e   :  { %v8714_v9 = vpack.c.bf16 %v4354_v38, %v4353_v27  ;;  %v4461_v46 = vpack.c.bf16 %v12561_v58, %v12558_v18  ;;  %v4454_v27 = vld [vmem:[#allocation4 + $0x9c] sm:$0xff] }
 0x70f   :  { %v4632_v42 = vunpack.c.l.bf16 %v4454_v27 }
 0x710   :  { %8715 = vst [vmem:[#allocation17 + $0x28] sm:$0xff] %v8714_v9   ;;  %4495 = vmatmul.mubr.bf16.vlgmr.msra.gmra.mxu0 %v4461_v46  ;;  %9480 = vmatmul.mubr.bf16.vlgmr.msra.gmra.mxu1 %v4461_v46  ;;  %v4649_v9 = vrot.slane %v4452_v36, 4 }
 0x711   :  { %4548 = vmatpush1.bf16.msra.mxu0 %v12264_v56  ;;  %9484 = vmatpush3.bf16.msra.mxu1 %v12267_v39  ;;  %v4405_v39 = vadd.f32 %v12273_v10, %v12553_v41 }
 0x712   :  { %4549 = vmatprep.subr.bf16.mxu0 %v12277_v1  ;;  %9485 = vmatprep.subr.bf16.mxu1 %v14062_v34  ;;  %v10214_v29 = vpop.eup %10213 }
 0x713   :  { %4579 = vmatprep.mubr.bf16.mxu0 %v14063_v25  ;;  %9499 = vmatprep.mubr.msk.bf16.mxu1 %vm11062_vm3, %v14062_v34  ;;  %v4406_v40 = vmul.f32 %v10214_v29, %v4404_v32  ;;  %v4650_v32 = vrot.slane %v4454_v27, 4 }
 0x715   :  { %4550 = vmatpush1.bf16.msra.mxu0 %v12284_v62  ;;  %9486 = vmatpush3.bf16.msra.mxu1 %v12287_v16  ;;  %v4410_v56 = vadd.f32 %v4408_v43, %v4406_v40  ;;  %v4653_v40 = vunpack.c.l.bf16 %v4649_v9 }
 0x716   :  { %4551 = vmatprep.subr.bf16.mxu0 %v12292_v6  ;;  %9487 = vmatprep.subr.bf16.mxu1 %v14062_v34  ;;  %v10216_v1 = vpop.eup %10215 }
 0x717   :  { %10221 = vtanh.f32 %v4410_v56  ;;  %v4407_v61 = vmul.f32 %v10216_v1, %v4405_v39 }
 0x719   :  { %4552 = vmatpush1.bf16.msra.mxu0 %v12296_v35  ;;  %9488 = vmatpush3.bf16.msra.mxu1 %v12299_v37  ;;  %v4411_v62 = vadd.f32 %v4409_v51, %v4407_v61  ;;  %v10218_v10 = vpop.eup %10217  ;;  %v4654_v51 = vunpack.c.l.bf16 %v4650_v32 }
 0x71a   :  { %4553 = vmatprep.subr.bf16.mxu0 %v12302_v60  ;;  %9489 = vmatprep.subr.bf16.mxu1 %v14062_v34  ;;  %v10220_v16 = vpop.eup %10219  ;;  %v4414_v6 = vsub.f32 1.0, %v10218_v10  ;;  %v4418_v60 = vmul.f32 %v10218_v10, %v12505_v17 }
 0x71b   :  { %10223 = vtanh.f32 %v4411_v62 }
 0x71d   :  { %4554 = vmatpush1.bf16.msra.mxu0 %v12306_v23  ;;  %9490 = vmatpush3.bf16.msra.mxu1 %v12309_v13  ;;  %v4415_v23 = vsub.f32 1.0, %v10220_v16 }
 0x71e   :  { %4555 = vmatprep.subr.bf16.mxu0 %v12312_v30  ;;  %9491 = vmatprep.subr.bf16.mxu1 %v14062_v34  ;;  %v4419_v30 = vmul.f32 %v10220_v16, %v12508_v63 }
 0x721   :  { %4556 = vmatpush1.bf16.msra.mxu0 %v12316_v21  ;;  %9492 = vmatpush3.bf16.msra.mxu1 %v12319_v53 }
 0x722   :  { %4557 = vmatprep.subr.bf16.mxu0 %v12322_v15  ;;  %9493 = vmatprep.subr.bf16.mxu1 %v14062_v34  ;;  %v4430_v15 = vpop.permute.xlu0 %4429 }
 0x723   :  { %vm4434_vm12 = vcmp.eq.s32.totalorder %v4430_v15, 1 }
 0x724   :  { %v10222_v35 = vpop.eup %10221 }
 0x725   :  { %4558 = vmatpush1.bf16.msra.mxu0 %v12326_v3  ;;  %9494 = vmatpush3.bf16.msra.mxu1 %v12329_v8  ;;  %v4416_v37 = vmul.f32 %v10222_v35, %v4414_v6  ;;  %v4433_v3 = vpop.permute.xlu1 %4432 }
 0x726   :  { %4559 = vmatprep.subr.bf16.mxu0 %v12332_v26  ;;  %9495 = vmatprep.subr.bf16.mxu1 %v14062_v34  ;;  %vm4435_vm13 = vcmp.eq.s32.totalorder %v4433_v3, 1  ;;  %v12652_v3 = vld [vmem:[%s13867_s9] ss:$0 sm:$0xff] }
 0x727   :  { %v4420_v53 = vadd.f32 %v4418_v60, %v4416_v37  ;;  %14155 = vst [vmem:[#allocation26_spill] sm:$0xff] %v12652_v3 }
 0x728   :  { %v10224_v13 = vpop.eup %10223 }
 0x729   :  { %4560 = vmatpush1.bf16.msra.mxu0 %v12337_v57  ;;  %9496 = vmatpush3.bf16.msra.mxu1 %v12340_v22  ;;  %v4417_v21 = vmul.f32 %v10224_v13, %v4415_v23  ;;  %v12605_v26 = vsel %vm4434_vm12, %v4420_v53, %v12505_v17  ;;  %v4438_v22 = vsel %vm4434_vm12, %v4420_v53, 0.0  ;;  %v14146_v17 = vld [vmem:[#allocation36_spill] sm:$0xff]  ;;  %v4457_v13 = vld [vmem:[#allocation5 + $0xd8] sm:$0xff] }
 0x72a   :  { %4561 = vmatprep.subr.bf16.mxu0 %v12344_v54  ;;  %9497 = vmatprep.subr.bf16.mxu1 %v14062_v34  ;;  %v4453_v53 = vld [vmem:[#allocation4 + $0x98] ss:$12 sps:$4 sm:$0xff]   ;;  %v4716_v15 = vunpack.c.l.bf16 %v4457_v13 }
 0x72b   :  { %v4421_v8 = vadd.f32 %v4419_v30, %v4417_v21  ;;  %v4674_v36 = vunpack.c.h.bf16 %v4453_v53 }
 0x72d   :  { %4562 = vmatpush1.bf16.msra.mxu0 %v12348_v33  ;;  %9498 = vmatpush3.bf16.msra.mxu1 %v12351_v12  ;;  %v12608_v57 = vsel %vm4435_vm13, %v4421_v8, %v12508_v63  ;;  %v4439_v54 = vsel %vm4435_vm13, %v4421_v8, 0.0  ;;  %v14137_v33 = vld [vmem:[#allocation27_spill] sm:$0xff]  ;;  %v14138_v12 = vld [vmem:[#allocation28_spill] sm:$0xff]  ;;  %v14147_v63 = vld [vmem:[#allocation37_spill] sm:$0xff] }
 0x72e   :  { %4812 = vmatprep.subr.bf16.mxu0 %v12360_v55  ;;  %9503 = vmatprep.subr.bf16.mxu1 %v14062_v34  ;;  %v8719_v41 = vpack.c.bf16 %v4439_v54, %v4438_v22  ;;  %v4546_v50 = vpack.c.bf16 %v12608_v57, %v12605_v26  ;;  %v14139_v55 = vld [vmem:[#allocation29_spill] sm:$0xff] }
 0x730   :  { %8720 = vst [vmem:[#allocation18 + $0x50] sm:$0xff] %v8719_v41   ;;  %4580 = vmatmul.mubr.bf16.vlgmr.msra.gmra.mxu0 %v4546_v50  ;;  %9500 = vmatmul.mubr.bf16.vlgmr.msra.gmra.mxu1 %v4546_v50  ;;  %v4459_v50 = vld [vmem:[#allocation5 + $0xe4] sm:$0xff] }
 0x731   :  { %4813 = vmatpush1.bf16.msra.mxu0 %v12366_v44  ;;  %9504 = vmatpush3.bf16.msra.mxu1 %v12369_v48  ;;  %v14140_v44 = vld [vmem:[#allocation30_spill] sm:$0xff]  ;;  %v14141_v48 = vld [vmem:[#allocation31_spill] sm:$0xff] }
 0x732   :  { %4814 = vmatprep.subr.bf16.mxu0 %v12372_v7  ;;  %9505 = vmatprep.subr.bf16.mxu1 %v14062_v34  ;;  %v14142_v7 = vld [vmem:[#allocation32_spill] sm:$0xff] }
 0x733   :  { %4844 = vmatprep.mubr.bf16.mxu0 %v14063_v25  ;;  %9519 = vmatprep.mubr.msk.bf16.mxu1 %vm11062_vm3, %v14062_v34 }
 0x735   :  { %4815 = vmatpush1.bf16.msra.mxu0 %v12379_v47  ;;  %9506 = vmatpush3.bf16.msra.mxu1 %v12382_v20  ;;  %v14143_v47 = vld [vmem:[#allocation33_spill] sm:$0xff]  ;;  %v14144_v20 = vld [vmem:[#allocation34_spill] sm:$0xff] }
 0x736   :  { %4816 = vmatprep.subr.bf16.mxu0 %v12385_v4  ;;  %9507 = vmatprep.subr.bf16.mxu1 %v14062_v34  ;;  %v14145_v4 = vld [vmem:[#allocation35_spill] sm:$0xff] }
 0x739   :  { %4817 = vmatpush1.bf16.msra.mxu0 %v14137_v33  ;;  %9508 = vmatpush3.bf16.msra.mxu1 %v14138_v12 }
 0x73a   :  { %4818 = vmatprep.subr.bf16.mxu0 %v14139_v55  ;;  %9509 = vmatprep.subr.bf16.mxu1 %v14062_v34  ;;  %v4734_v55 = vrot.slane %v4457_v13, 4 }
 0x73d   :  { %4819 = vmatpush1.bf16.msra.mxu0 %v14140_v44  ;;  %9510 = vmatpush3.bf16.msra.mxu1 %v14141_v48  ;;  %v4673_v48 = vunpack.c.l.bf16 %v4453_v53 }
 0x73e   :  { %4820 = vmatprep.subr.bf16.mxu0 %v14142_v7  ;;  %9511 = vmatprep.subr.bf16.mxu1 %v14062_v34 }
 0x741   :  { %4821 = vmatpush1.bf16.msra.mxu0 %v14143_v47  ;;  %9512 = vmatpush3.bf16.msra.mxu1 %v14144_v20 }
 0x742   :  { %4822 = vmatprep.subr.bf16.mxu0 %v14145_v4  ;;  %9513 = vmatprep.subr.bf16.mxu1 %v14062_v34  ;;  %v4717_v4 = vunpack.c.l.bf16 %v4459_v50 }
 0x745   :  { %4823 = vmatpush1.bf16.msra.mxu0 %v14146_v17  ;;  %9514 = vmatpush3.bf16.msra.mxu1 %v14147_v63 }
 0x746   :  { %4824 = vmatprep.subr.bf16.mxu0 %v14148_v2  ;;  %9515 = vmatprep.subr.bf16.mxu1 %v14062_v34 }
 0x749   :  { %4825 = vmatpush1.bf16.msra.mxu0 %v14149_v28  ;;  %9516 = vmatpush3.bf16.msra.mxu1 %v14150_v52  ;;  %v4735_v52 = vrot.slane %v4459_v50, 4  ;;  %v4458_v50 = vld [vmem:[#allocation5 + $0xe0] ss:$12 sps:$4 sm:$0xff]  }
 0x74a   :  { %4826 = vmatprep.subr.bf16.mxu0 %v14151_v0  ;;  %9517 = vmatprep.subr.bf16.mxu1 %v14062_v34 }
 0x74b   :  { %v4739_v9 = vunpack.c.l.bf16 %v4735_v52 }
 0x74d   :  { %4827 = vmatpush1.bf16.msra.mxu0 %v14152_v31  ;;  %9518 = vmatpush3.bf16.msra.mxu1 %v14153_v19  ;;  %v4738_v31 = vunpack.c.l.bf16 %v4734_v55  ;;  %v12683_v55 = vld [vmem:[#allocation15 + $0x94] ss:$12 sps:$4 sm:$0xff]  }
 0x74e   :  { %4897 = vmatprep.subr.bf16.mxu0 %v14154_v59  ;;  %9523 = vmatprep.subr.bf16.mxu1 %v14062_v34 }
 0x7d0   :  { %v4496_v14 = vpop.f32.mrf.mxu0  ;;  %v4539_v5 = vpop.f32.mrf.mxu1 }
 0x7d1   :  { %v4633_v38 = vadd.f32 %v4631_v49, %v4496_v14  ;;  %v4669_v8 = vadd.f32 %v12652_v3, %v4539_v5 }
 0x7d2   :  { %v4498_v46 = vpop.f32.mrf.mxu0  ;;  %v9481_v45 = vpop.f32.mrf.mxu1 }
 0x7d3   :  { %v8349_v24 = vmul.f32 -1.442695, %v4633_v38  ;;  %v4655_v1 = vadd.f32 %v4653_v40, %v4498_v46 }
 0x7d4   :  { %v4500_v29 = vpop.f32.mrf.mxu0  ;;  %v4542_v11 = vpop.f32.mrf.mxu1 }
 0x7d5   :  { %10225 = vpow2.f32 %v8349_v24  ;;  %v4634_v43 = vadd.f32 %v4632_v42, %v4500_v29  ;;  %v8351_v10 = vmul.f32 -1.442695, %v4655_v1  ;;  %v4670_v63 = vadd.f32 %v12652_v3, %v4542_v11 }
 0x7d6   :  { %v4502_v56 = vpop.f32.mrf.mxu0  ;;  %v9482_v39 = vpop.f32.mrf.mxu1 }
 0x7d7   :  { %v8350_v61 = vmul.f32 -1.442695, %v4634_v43  ;;  %v4656_v62 = vadd.f32 %v4654_v51, %v4502_v56 }
 0x7d9   :  { %10227 = vpow2.f32 %v8350_v61  ;;  %v8352_v16 = vmul.f32 -1.442695, %v4656_v62 }
 0x7da   :  { %10229 = vpow2.f32 %v8351_v10 }
 0x7db   :  { %10231 = vpow2.f32 %v8352_v16 }
 0x7e2   :  { %v10226_v6 = vpop.eup %10225 }
 0x7e3   :  { %v4641_v35 = vadd.f32 1.0, %v10226_v6 }
 0x7e5   :  { %10233 = vrcp.f32 %v4641_v35  ;;  %v4695_v35 = vpop.permute.xlu0 %4694 }
 0x7e6   :  { %v10228_v37 = vpop.eup %10227  ;;  %vm4699_vm14 = vcmp.eq.s32.totalorder %v4695_v35, 1 }
 0x7e7   :  { %v4642_v60 = vadd.f32 1.0, %v10228_v37  ;;  %v10230_v23 = vpop.eup %10229  ;;  %v4698_v37 = vpop.permute.xlu1 %4697 }
 0x7e8   :  { %v10232_v30 = vpop.eup %10231  ;;  %v4663_v21 = vadd.f32 1.0, %v10230_v23  ;;  %vm4700_vm15 = vcmp.eq.s32.totalorder %v4698_v37, 1  ;;  %v12754_v37 = vld [vmem:[#allocation15] ss:$12 sps:$4 sm:$0xff]  }
 0x7e9   :  { %10235 = vrcp.f32 %v4642_v60  ;;  %v4664_v22 = vadd.f32 1.0, %v10232_v30 }
 0x7ea   :  { %10237 = vrcp.f32 %v4663_v21 }
 0x7eb   :  { %10239 = vrcp.f32 %v4664_v22 }
 0x7f0   :  { %v4581_v54 = vpop.f32.mrf.mxu0  ;;  %v12655_v41 = vpop.f32.mrf.mxu1 }
 0x7f1   :  { %v4718_v12 = vadd.f32 %v4716_v15, %v4581_v54 }
 0x7f2   :  { %v10234_v33 = vpop.eup %10233  ;;  %v4583_v7 = vpop.f32.mrf.mxu0 }
 0x7f3   :  { %v4671_v44 = vmul.f32 %v10234_v33, %v4669_v8  ;;  %v9501_v47 = vpop.f32.mrf.mxu1  ;;  %v8355_v20 = vmul.f32 -1.442695, %v4718_v12  ;;  %v4740_v14 = vadd.f32 %v4738_v31, %v4583_v7  ;;  %v12670_v33 = vld [vmem:[#allocation15 + $0xa8] ss:$12 sps:$4 sm:$0xff]   ;;  %v12702_v31 = vld [vmem:[#allocation15 + $0x78] ss:$12 sps:$4 sm:$0xff]  }
 0x7f4   :  { %v4585_v2 = vpop.f32.mrf.mxu0  ;;  %v4758_v47 = vunpack.c.l.bf16 %v4458_v50 }
 0x7f5   :  { %v4675_v17 = vadd.f32 %v4673_v48, %v4671_v44  ;;  %v12658_v28 = vpop.f32.mrf.mxu1  ;;  %10241 = vpow2.f32 %v8355_v20  ;;  %v4719_v19 = vadd.f32 %v4717_v4, %v4585_v2  ;;  %v8357_v45 = vmul.f32 -1.442695, %v4740_v14  ;;  %v12690_v20 = vld [vmem:[#allocation15 + $0x90] ss:$12 sps:$4 sm:$0xff]   ;;  %v12718_v14 = vld [vmem:[#allocation15 + $0x4c] ss:$12 sps:$4 sm:$0xff]  }
 0x7f6   :  { %v10236_v0 = vpop.eup %10235  ;;  %v4587_v27 = vpop.f32.mrf.mxu0 }
 0x7f7   :  { %10243 = vtanh.f32 %v4675_v17  ;;  %v4672_v59 = vmul.f32 %v10236_v0, %v4670_v63  ;;  %v9502_v49 = vpop.f32.mrf.mxu1  ;;  %v8356_v5 = vmul.f32 -1.442695, %v4719_v19  ;;  %v4741_v46 = vadd.f32 %v4739_v9, %v4587_v27  ;;  %v10238_v42 = vpop.eup %10237  ;;  %v12698_v63 = vld [vmem:[#allocation15 + $0x7c] ss:$12 sps:$4 sm:$0xff]   ;;  %v12705_v19 = vld [vmem:[#allocation15 + $0x80] ss:$12 sps:$4 sm:$0xff]  }
 0x7f8   :  { %v10240_v32 = vpop.eup %10239  ;;  %v4679_v11 = vsub.f32 1.0, %v10238_v42  ;;  %v4683_v1 = vmul.f32 %v10238_v42, %v12558_v18  ;;  %v4759_v0 = vunpack.c.h.bf16 %v4458_v50  ;;  %v12715_v49 = vld [vmem:[#allocation15 + $0x68] ss:$12 sps:$4 sm:$0xff]   ;;  %v12732_v42 = vld [vmem:[#allocation15 + $0x30] ss:$12 sps:$4 sm:$0xff]  }
 0x7f9   :  { %v4676_v38 = vadd.f32 %v4674_v36, %v4672_v59  ;;  %10245 = vpow2.f32 %v8356_v5  ;;  %v8358_v24 = vmul.f32 -1.442695, %v4741_v46  ;;  %v4680_v61 = vsub.f32 1.0, %v10240_v32  ;;  %v12708_v59 = vld [vmem:[#allocation15 + $0x64] ss:$12 sps:$4 sm:$0xff]  }
 0x7fa   :  { %v4684_v10 = vmul.f32 %v10240_v32, %v12561_v58  ;;  %v12712_v36 = vld [vmem:[#allocation15 + $0x60] ss:$12 sps:$4 sm:$0xff]   ;;  %v12722_v27 = vld [vmem:[#allocation15 + $0x48] ss:$12 sps:$4 sm:$0xff]   ;;  %v12735_v32 = vld [vmem:[#allocation15 + $0x38] ss:$12 sps:$4 sm:$0xff]  }
 0x7fb   :  { %10247 = vtanh.f32 %v4676_v38  ;;  %v12725_v38 = vld [vmem:[#allocation15 + $0x50] ss:$12 sps:$4 sm:$0xff]   ;;  %v12728_v9 = vld [vmem:[#allocation15 + $0x34] ss:$12 sps:$4 sm:$0xff]  }
 0x7fc   :  { %10249 = vpow2.f32 %v8357_v45  ;;  %v12778_v50 = vld [vmem:[#allocation14 + $0x94] ss:$12 sps:$4 sm:$0xff]  }
 0x7fd   :  { %10251 = vpow2.f32 %v8358_v24 }
 0x802   :  { %v10242_v29 = vpop.eup %10241 }
 0x803   :  { %v4726_v43 = vadd.f32 1.0, %v10242_v29  ;;  %v12738_v29 = vld [vmem:[#allocation15 + $0x1c] ss:$12 sps:$4 sm:$0xff]  }
 0x804   :  { %v10244_v40 = vpop.eup %10243 }
 0x805   :  { %v4681_v56 = vmul.f32 %v10244_v40, %v4679_v11  ;;  %10253 = vrcp.f32 %v4726_v43 }
 0x806   :  { %v10246_v39 = vpop.eup %10245 }
 0x807   :  { %v4727_v62 = vadd.f32 1.0, %v10246_v39  ;;  %v4685_v6 = vadd.f32 %v4683_v1, %v4681_v56  ;;  %v12743_v39 = vld [vmem:[#allocation15 + $0x18] ss:$12 sps:$4 sm:$0xff]   ;;  %v12746_v1 = vld [vmem:[#allocation15 + $0x20] ss:$12 sps:$4 sm:$0xff]  }
 0x808   :  { %v10248_v51 = vpop.eup %10247 }
 0x809   :  { %v4682_v16 = vmul.f32 %v10248_v51, %v4680_v61  ;;  %10255 = vrcp.f32 %v4727_v62  ;;  %v10250_v23 = vpop.eup %10249  ;;  %v12663_v13 = vsel %vm4699_vm14, %v4685_v6, %v12558_v18  ;;  %v4703_v21 = vsel %vm4699_vm14, %v4685_v6, 0.0  ;;  %v12673_v18 = vld [vmem:[#allocation15 + $0xb0] ss:$12 sps:$4 sm:$0xff]   ;;  %v4783_v6 = vpop.permute.xlu1 %4782 }
 0x80a   :  { %v10252_v22 = vpop.eup %10251  ;;  %v4748_v54 = vadd.f32 1.0, %v10250_v23  ;;  %v12750_v51 = vld [vmem:[#allocation15 + $0x4] ss:$12 sps:$4 sm:$0xff]   ;;  %vm4785_vm2 = vcmp.eq.s32.totalorder %v4783_v6, 1 }
 0x80b   :  { %v4686_v60 = vadd.f32 %v4684_v10, %v4682_v16  ;;  %v4749_v48 = vadd.f32 1.0, %v10252_v22  ;;  %v4780_v16 = vpop.permute.xlu0 %4779 }
 0x80c   :  { %10257 = vrcp.f32 %v4748_v54  ;;  %vm4784_vm1 = vcmp.eq.s32.totalorder %v4780_v16, 1 }
 0x80d   :  { %v12666_v30 = vsel %vm4700_vm15, %v4686_v60, %v12561_v58  ;;  %v4704_v53 = vsel %vm4700_vm15, %v4686_v60, 0.0  ;;  %v12679_v58 = vld [vmem:[%s13868_s10] ss:$0 sm:$0xff]  ;;  %10259 = vrcp.f32 %v4749_v48  ;;  %v12757_v60 = vld [vmem:[#allocation15 + $0x8] ss:$12 sps:$4 sm:$0xff]  }
 0x80e   :  { %v8724_v15 = vpack.c.bf16 %v4704_v53, %v4703_v21  ;;  %v4811_v8 = vpack.c.bf16 %v12666_v30, %v12663_v13  ;;  %v4754_v12 = vadd.f32 %v12679_v58, %v12655_v41  ;;  %v12693_v41 = vld [vmem:[#allocation15 + $0x98] ss:$12 sps:$4 sm:$0xff]   ;;  %v4755_v17 = vadd.f32 %v12679_v58, %v12658_v28  ;;  %v12791_v48 = vld [vmem:[#allocation14 + $0x7c] ss:$12 sps:$4 sm:$0xff]  }
 0x810   :  { %8725 = vst [vmem:[#allocation17 + $0x30] sm:$0xff] %v8724_v15   ;;  %4845 = vmatmul.mubr.bf16.vlgmr.msra.gmra.mxu0 %v4811_v8  ;;  %9520 = vmatmul.mubr.bf16.vlgmr.msra.gmra.mxu1 %v4811_v8  ;;  %v12766_v8 = vld [vmem:[#allocation14 + $0xac] ss:$12 sps:$4 sm:$0xff]  }
 0x811   :  { %4898 = vmatpush1.bf16.msra.mxu0 %v12670_v33  ;;  %9524 = vmatpush3.bf16.msra.mxu1 %v12673_v18 }
 0x812   :  { %4899 = vmatprep.subr.bf16.mxu0 %v12683_v55  ;;  %9525 = vmatprep.subr.bf16.mxu1 %v14062_v34  ;;  %v10254_v44 = vpop.eup %10253 }
 0x813   :  { %4929 = vmatprep.mubr.bf16.mxu0 %v14063_v25  ;;  %9539 = vmatprep.mubr.msk.bf16.mxu1 %vm11062_vm3, %v14062_v34  ;;  %v4756_v7 = vmul.f32 %v10254_v44, %v4754_v12  ;;  %v12785_v12 = vld [vmem:[#allocation14 + $0x90] ss:$12 sps:$4 sm:$0xff]   ;;  %v12788_v44 = vld [vmem:[#allocation14 + $0x98] ss:$12 sps:$4 sm:$0xff]  }
 0x815   :  { %4900 = vmatpush1.bf16.msra.mxu0 %v12690_v20  ;;  %9526 = vmatpush3.bf16.msra.mxu1 %v12693_v41  ;;  %v4760_v4 = vadd.f32 %v4758_v47, %v4756_v7  ;;  %v12795_v7 = vld [vmem:[#allocation14 + $0x78] ss:$12 sps:$4 sm:$0xff]   ;;  %v12798_v47 = vld [vmem:[#allocation14 + $0x80] ss:$12 sps:$4 sm:$0xff]  }
 0x816   :  { %4901 = vmatprep.subr.bf16.mxu0 %v12698_v63  ;;  %9527 = vmatprep.subr.bf16.mxu1 %v14062_v34  ;;  %v10256_v2 = vpop.eup %10255  ;;  %14156 = vst [vmem:[#allocation27_spill] sm:$0xff] %v12795_v7  ;;  %14157 = vst [vmem:[#allocation28_spill] sm:$0xff] %v12798_v47 }
 0x817   :  { %10261 = vtanh.f32 %v4760_v4  ;;  %v4757_v52 = vmul.f32 %v10256_v2, %v4755_v17  ;;  %v12801_v4 = vld [vmem:[#allocation14 + $0x64] ss:$12 sps:$4 sm:$0xff]   ;;  %v12805_v17 = vld [vmem:[#allocation14 + $0x60] ss:$12 sps:$4 sm:$0xff]   ;;  %v12808_v2 = vld [vmem:[#allocation14 + $0x68] ss:$12 sps:$4 sm:$0xff]  }
 0x818   :  { %14158 = vst [vmem:[#allocation29_spill] sm:$0xff] %v12801_v4  ;;  %14159 = vst [vmem:[#allocation30_spill] sm:$0xff] %v12805_v17 }
 0x819   :  { %4902 = vmatpush1.bf16.msra.mxu0 %v12702_v31  ;;  %9528 = vmatpush3.bf16.msra.mxu1 %v12705_v19  ;;  %v4761_v28 = vadd.f32 %v4759_v0, %v4757_v52  ;;  %v10258_v5 = vpop.eup %10257  ;;  %14160 = vst [vmem:[#allocation31_spill] sm:$0xff] %v12808_v2  ;;  %v12811_v52 = vld [vmem:[#allocation14 + $0x4c] ss:$12 sps:$4 sm:$0xff]   ;;  %v12815_v0 = vld [vmem:[#allocation14 + $0x48] ss:$12 sps:$4 sm:$0xff]  }
 0x81a   :  { %4903 = vmatprep.subr.bf16.mxu0 %v12708_v59  ;;  %9529 = vmatprep.subr.bf16.mxu1 %v14062_v34  ;;  %v10260_v46 = vpop.eup %10259  ;;  %v4764_v45 = vsub.f32 1.0, %v10258_v5  ;;  %v4768_v40 = vmul.f32 %v10258_v5, %v12605_v26  ;;  %14161 = vst [vmem:[#allocation32_spill] sm:$0xff] %v12811_v52  ;;  %14162 = vst [vmem:[#allocation33_spill] sm:$0xff] %v12815_v0  ;;  %v12821_v5 = vld [vmem:[#allocation14 + $0x34] ss:$12 sps:$4 sm:$0xff]  }
 0x81b   :  { %10263 = vtanh.f32 %v4761_v28  ;;  %v4765_v43 = vsub.f32 1.0, %v10260_v46  ;;  %v4769_v61 = vmul.f32 %v10260_v46, %v12608_v57  ;;  %v12818_v28 = vld [vmem:[#allocation14 + $0x50] ss:$12 sps:$4 sm:$0xff]   ;;  %14164 = vst [vmem:[#allocation35_spill] sm:$0xff] %v12821_v5 }
 0x81c   :  { %14163 = vst [vmem:[#allocation34_spill] sm:$0xff] %v12818_v28  ;;  %v12825_v46 = vld [vmem:[#allocation14 + $0x30] ss:$12 sps:$4 sm:$0xff]  }
 0x81d   :  { %4904 = vmatpush1.bf16.msra.mxu0 %v12712_v36  ;;  %9530 = vmatpush3.bf16.msra.mxu1 %v12715_v49  ;;  %14165 = vst [vmem:[#allocation36_spill] sm:$0xff] %v12825_v46 }
 0x81e   :  { %4905 = vmatprep.subr.bf16.mxu0 %v12718_v14  ;;  %9531 = vmatprep.subr.bf16.mxu1 %v14062_v34 }
 0x821   :  { %4906 = vmatpush1.bf16.msra.mxu0 %v12722_v27  ;;  %9532 = vmatpush3.bf16.msra.mxu1 %v12725_v38 }
 0x822   :  { %4907 = vmatprep.subr.bf16.mxu0 %v12728_v9  ;;  %9533 = vmatprep.subr.bf16.mxu1 %v14062_v34 }
 0x824   :  { %v10262_v24 = vpop.eup %10261 }
 0x825   :  { %4908 = vmatpush1.bf16.msra.mxu0 %v12732_v42  ;;  %9534 = vmatpush3.bf16.msra.mxu1 %v12735_v32  ;;  %v4766_v11 = vmul.f32 %v10262_v24, %v4764_v45  ;;  %v12828_v45 = vld [vmem:[#allocation14 + $0x38] ss:$12 sps:$4 sm:$0xff]   ;;  %v12831_v24 = vld [vmem:[#allocation14 + $0x1c] ss:$12 sps:$4 sm:$0xff]  }
 0x826   :  { %4909 = vmatprep.subr.bf16.mxu0 %v12738_v29  ;;  %9535 = vmatprep.subr.bf16.mxu1 %v14062_v34  ;;  %14166 = vst [vmem:[#allocation37_spill] sm:$0xff] %v12828_v45  ;;  %14167 = vst [vmem:[#allocation38_spill] sm:$0xff] %v12831_v24 }
 0x827   :  { %v4770_v10 = vadd.f32 %v4768_v40, %v4766_v11  ;;  %v12835_v11 = vld [vmem:[#allocation14 + $0x18] ss:$12 sps:$4 sm:$0xff]   ;;  %v12838_v40 = vld [vmem:[#allocation14 + $0x20] ss:$12 sps:$4 sm:$0xff]  }
 0x828   :  { %v10264_v56 = vpop.eup %10263  ;;  %14168 = vst [vmem:[#allocation39_spill] sm:$0xff] %v12835_v11  ;;  %14169 = vst [vmem:[#allocation40_spill] sm:$0xff] %v12838_v40 }
 0x829   :  { %4910 = vmatpush1.bf16.msra.mxu0 %v12743_v39  ;;  %9536 = vmatpush3.bf16.msra.mxu1 %v12746_v1  ;;  %v4767_v62 = vmul.f32 %v10264_v56, %v4765_v43  ;;  %v12761_v23 = vsel %vm4784_vm1, %v4770_v10, %v12605_v26  ;;  %v4788_v53 = vsel %vm4784_vm1, %v4770_v10, 0.0  ;;  %v12772_v26 = vld [vmem:[#allocation14 + $0xa8] ss:$12 sps:$4 sm:$0xff]   ;;  %v12841_v43 = vld [vmem:[#allocation14 + $0x4] ss:$12 sps:$4 sm:$0xff]  }
 0x82a   :  { %4911 = vmatprep.subr.bf16.mxu0 %v12750_v51  ;;  %9537 = vmatprep.subr.bf16.mxu1 %v14062_v34  ;;  %14170 = vst [vmem:[#allocation41_spill] sm:$0xff] %v12841_v43  ;;  %v12845_v56 = vld [vmem:[#allocation14] ss:$12 sps:$4 sm:$0xff]  }
 0x82b   :  { %v4771_v35 = vadd.f32 %v4769_v61, %v4767_v62  ;;  %14171 = vst [vmem:[#allocation42_spill] sm:$0xff] %v12845_v56  ;;  %v12848_v61 = vld [vmem:[#allocation14 + $0x8] ss:$12 sps:$4 sm:$0xff]   ;;  %v12851_v62 = vld [vmem:[#allocation15 + $0xac] ss:$12 sps:$4 sm:$0xff]  }
 0x82c   :  { %14172 = vst [vmem:[#allocation43_spill] sm:$0xff] %v12848_v61  ;;  %14173 = vst [vmem:[#allocation44_spill] sm:$0xff] %v12851_v62  ;;  %v4802_v10 = vld [vmem:[#allocation4 + $0xa8] sm:$0xff] }
 0x82d   :  { %4912 = vmatpush1.bf16.msra.mxu0 %v12754_v37  ;;  %9538 = vmatpush3.bf16.msra.mxu1 %v12757_v60  ;;  %v12764_v21 = vsel %vm4785_vm2, %v4771_v35, %v12608_v57  ;;  %v4789_v15 = vsel %vm4785_vm2, %v4771_v35, 0.0  ;;  %v12775_v57 = vld [vmem:[#allocation14 + $0xb0] ss:$12 sps:$4 sm:$0xff]   ;;  %v4981_v16 = vunpack.c.l.bf16 %v4802_v10 }
 0x82e   :  { %5162 = vmatprep.subr.bf16.mxu0 %v12766_v8  ;;  %9543 = vmatprep.subr.bf16.mxu1 %v14062_v34  ;;  %v8729_v22 = vpack.c.bf16 %v4789_v15, %v4788_v53  ;;  %v4896_v54 = vpack.c.bf16 %v12764_v21, %v12761_v23  ;;  %v4804_v53 = vld [vmem:[#allocation4 + $0xb4] sm:$0xff] }
 0x830   :  { %8730 = vst [vmem:[#allocation18 + $0x48] sm:$0xff] %v8729_v22   ;;  %4930 = vmatmul.mubr.bf16.vlgmr.msra.gmra.mxu0 %v4896_v54  ;;  %9540 = vmatmul.mubr.bf16.vlgmr.msra.gmra.mxu1 %v4896_v54  ;;  %v4999_v22 = vrot.slane %v4802_v10, 4 }
 0x831   :  { %5163 = vmatpush1.bf16.msra.mxu0 %v12772_v26  ;;  %9544 = vmatpush3.bf16.msra.mxu1 %v12775_v57 }
 0x832   :  { %5164 = vmatprep.subr.bf16.mxu0 %v12778_v50  ;;  %9545 = vmatprep.subr.bf16.mxu1 %v14062_v34 }
 0x833   :  { %5194 = vmatprep.mubr.bf16.mxu0 %v14063_v25  ;;  %9559 = vmatprep.mubr.msk.bf16.mxu1 %vm11062_vm3, %v14062_v34 }
 0x835   :  { %5165 = vmatpush1.bf16.msra.mxu0 %v12785_v12  ;;  %9546 = vmatpush3.bf16.msra.mxu1 %v12788_v44 }
 0x836   :  { %5166 = vmatprep.subr.bf16.mxu0 %v12791_v48  ;;  %9547 = vmatprep.subr.bf16.mxu1 %v14062_v34 }
 0x839   :  { %5167 = vmatpush1.bf16.msra.mxu0 %v12795_v7  ;;  %9548 = vmatpush3.bf16.msra.mxu1 %v12798_v47 }
 0x83a   :  { %5168 = vmatprep.subr.bf16.mxu0 %v12801_v4  ;;  %9549 = vmatprep.subr.bf16.mxu1 %v14062_v34 }
 0x83d   :  { %5169 = vmatpush1.bf16.msra.mxu0 %v12805_v17  ;;  %9550 = vmatpush3.bf16.msra.mxu1 %v12808_v2 }
 0x83e   :  { %5170 = vmatprep.subr.bf16.mxu0 %v12811_v52  ;;  %9551 = vmatprep.subr.bf16.mxu1 %v14062_v34 }
 0x841   :  { %5171 = vmatpush1.bf16.msra.mxu0 %v12815_v0  ;;  %9552 = vmatpush3.bf16.msra.mxu1 %v12818_v28 }
 0x842   :  { %5172 = vmatprep.subr.bf16.mxu0 %v12821_v5  ;;  %9553 = vmatprep.subr.bf16.mxu1 %v14062_v34 }
 0x845   :  { %5173 = vmatpush1.bf16.msra.mxu0 %v12825_v46  ;;  %9554 = vmatpush3.bf16.msra.mxu1 %v12828_v45  ;;  %v5003_v45 = vunpack.c.l.bf16 %v4999_v22 }
 0x846   :  { %5174 = vmatprep.subr.bf16.mxu0 %v12831_v24  ;;  %9555 = vmatprep.subr.bf16.mxu1 %v14062_v34 }
 0x849   :  { %5175 = vmatpush1.bf16.msra.mxu0 %v12835_v11  ;;  %9556 = vmatpush3.bf16.msra.mxu1 %v12838_v40  ;;  %v4982_v40 = vunpack.c.l.bf16 %v4804_v53  ;;  %v5000_v11 = vrot.slane %v4804_v53, 4 }
 0x84a   :  { %5176 = vmatprep.subr.bf16.mxu0 %v12841_v43  ;;  %9557 = vmatprep.subr.bf16.mxu1 %v14062_v34 }
 0x84b   :  { %v5004_v52 = vunpack.c.l.bf16 %v5000_v11 }
 0x84d   :  { %5177 = vmatpush1.bf16.msra.mxu0 %v12845_v56  ;;  %9558 = vmatpush3.bf16.msra.mxu1 %v12848_v61 }
 0x84e   :  { %5247 = vmatprep.subr.bf16.mxu0 %v12851_v62  ;;  %9563 = vmatprep.subr.bf16.mxu1 %v14062_v34 }
 0x8d0   :  { %v4846_v6 = vpop.f32.mrf.mxu0  ;;  %v4889_v35 = vpop.f32.mrf.mxu1 }
 0x8d1   :  { %v4983_v15 = vadd.f32 %v4981_v16, %v4846_v6 }
 0x8d2   :  { %v4848_v54 = vpop.f32.mrf.mxu0  ;;  %v9521_v43 = vpop.f32.mrf.mxu1 }
 0x8d3   :  { %v8361_v56 = vmul.f32 -1.442695, %v4983_v15  ;;  %v5005_v28 = vadd.f32 %v5003_v45, %v4848_v54  ;;  %v4807_v15 = vld [vmem:[#allocation5 + $0xc0] sm:$0xff] }
 0x8d4   :  { %v4850_v24 = vpop.f32.mrf.mxu0  ;;  %v4892_v61 = vpop.f32.mrf.mxu1  ;;  %v5066_v45 = vunpack.c.l.bf16 %v4807_v15 }
 0x8d5   :  { %10265 = vpow2.f32 %v8361_v56  ;;  %v4984_v46 = vadd.f32 %v4982_v40, %v4850_v24  ;;  %v8363_v17 = vmul.f32 -1.442695, %v5005_v28 }
 0x8d6   :  { %v4852_v62 = vpop.f32.mrf.mxu0  ;;  %v9522_v5 = vpop.f32.mrf.mxu1 }
 0x8d7   :  { %v8362_v0 = vmul.f32 -1.442695, %v4984_v46  ;;  %v5006_v2 = vadd.f32 %v5004_v52, %v4852_v62  ;;  %v4803_v5 = vld [vmem:[#allocation4 + $0xb0] ss:$12 sps:$4 sm:$0xff]   ;;  %v5019_v46 = vadd.f32 %v12652_v3, %v4889_v35  ;;  %v5084_v62 = vrot.slane %v4807_v15, 4 }
 0x8d8   :  { %v5023_v54 = vunpack.c.l.bf16 %v4803_v5 }
 0x8d9   :  { %10267 = vpow2.f32 %v8362_v0  ;;  %v8364_v16 = vmul.f32 -1.442695, %v5006_v2  ;;  %v5088_v7 = vunpack.c.l.bf16 %v5084_v62 }
 0x8da   :  { %10269 = vpow2.f32 %v8363_v17  ;;  %v4809_v17 = vld [vmem:[#allocation5 + $0xcc] sm:$0xff] }
 0x8db   :  { %10271 = vpow2.f32 %v8364_v16  ;;  %v5085_v4 = vrot.slane %v4809_v17, 4 }
 0x8e2   :  { %v10266_v43 = vpop.eup %10265 }
 0x8e3   :  { %v4991_v10 = vadd.f32 1.0, %v10266_v43 }
 0x8e5   :  { %10273 = vrcp.f32 %v4991_v10 }
 0x8e6   :  { %v10268_v6 = vpop.eup %10267 }
 0x8e7   :  { %v4992_v53 = vadd.f32 1.0, %v10268_v6  ;;  %v10270_v56 = vpop.eup %10269  ;;  %v5067_v6 = vunpack.c.l.bf16 %v4809_v17 }
 0x8e8   :  { %v10272_v24 = vpop.eup %10271  ;;  %v5013_v40 = vadd.f32 1.0, %v10270_v56  ;;  %v5020_v56 = vadd.f32 %v12652_v3, %v4892_v61 }
 0x8e9   :  { %10275 = vrcp.f32 %v4992_v53  ;;  %v5014_v0 = vadd.f32 1.0, %v10272_v24 }
 0x8ea   :  { %10277 = vrcp.f32 %v5013_v40 }
 0x8eb   :  { %10279 = vrcp.f32 %v5014_v0 }
 0x8f0   :  { %v4931_v52 = vpop.f32.mrf.mxu0  ;;  %v12856_v28 = vpop.f32.mrf.mxu1 }
 0x8f1   :  { %v5068_v11 = vadd.f32 %v5066_v45, %v4931_v52 }
 0x8f2   :  { %v10274_v2 = vpop.eup %10273  ;;  %v4933_v16 = vpop.f32.mrf.mxu0 }
 0x8f3   :  { %v5021_v22 = vmul.f32 %v10274_v2, %v5019_v46  ;;  %v9541_v43 = vpop.f32.mrf.mxu1  ;;  %v8367_v10 = vmul.f32 -1.442695, %v5068_v11  ;;  %v5024_v46 = vunpack.c.h.bf16 %v4803_v5  ;;  %v5090_v52 = vadd.f32 %v5088_v7, %v4933_v16 }
 0x8f4   :  { %v4935_v35 = vpop.f32.mrf.mxu0 }
 0x8f5   :  { %v5025_v53 = vadd.f32 %v5023_v54, %v5021_v22  ;;  %v12859_v24 = vpop.f32.mrf.mxu1  ;;  %10281 = vpow2.f32 %v8367_v10  ;;  %v5069_v45 = vadd.f32 %v5067_v6, %v4935_v35  ;;  %v5089_v22 = vunpack.c.l.bf16 %v5085_v4 }
 0x8f6   :  { %v10276_v47 = vpop.eup %10275  ;;  %v4937_v11 = vpop.f32.mrf.mxu0  ;;  %v8369_v0 = vmul.f32 -1.442695, %v5090_v52 }
 0x8f7   :  { %10283 = vtanh.f32 %v5025_v53  ;;  %v5022_v15 = vmul.f32 %v10276_v47, %v5020_v56  ;;  %v9542_v40 = vpop.f32.mrf.mxu1  ;;  %v8368_v2 = vmul.f32 -1.442695, %v5069_v45  ;;  %v5091_v61 = vadd.f32 %v5089_v22, %v4937_v11  ;;  %v10278_v3 = vpop.eup %10277 }
 0x8f8   :  { %v10280_v17 = vpop.eup %10279  ;;  %v5029_v62 = vsub.f32 1.0, %v10278_v3  ;;  %v5033_v16 = vmul.f32 %v10278_v3, %v12663_v13  ;;  %v5048_v40 = vpop.permute.xlu1 %5047 }
 0x8f9   :  { %v5026_v43 = vadd.f32 %v5024_v46, %v5022_v15  ;;  %10285 = vpow2.f32 %v8368_v2  ;;  %v8370_v54 = vmul.f32 -1.442695, %v5091_v61  ;;  %v5030_v53 = vsub.f32 1.0, %v10280_v17  ;;  %v5045_v46 = vpop.permute.xlu0 %5044 }
 0x8fa   :  { %v5034_v35 = vmul.f32 %v10280_v17, %v12666_v30  ;;  %vm5049_vm0 = vcmp.eq.s32.totalorder %v5045_v46, 1  ;;  %vm5050_vm4 = vcmp.eq.s32.totalorder %v5048_v40, 1 }
 0x8fb   :  { %10287 = vtanh.f32 %v5026_v43 }
 0x8fc   :  { %10289 = vpow2.f32 %v8369_v0 }
 0x8fd   :  { %10291 = vpow2.f32 %v8370_v54 }
 0x902   :  { %v10282_v10 = vpop.eup %10281 }
 0x903   :  { %v5076_v47 = vadd.f32 1.0, %v10282_v10  ;;  %v4808_v10 = vld [vmem:[#allocation5 + $0xc8] ss:$12 sps:$4 sm:$0xff]  }
 0x904   :  { %v10284_v6 = vpop.eup %10283 }
 0x905   :  { %v5031_v5 = vmul.f32 %v10284_v6, %v5029_v62  ;;  %10293 = vrcp.f32 %v5076_v47  ;;  %v5108_v47 = vunpack.c.l.bf16 %v4808_v10 }
 0x906   :  { %v10286_v7 = vpop.eup %10285 }
 0x907   :  { %v5077_v56 = vadd.f32 1.0, %v10286_v7  ;;  %v5035_v15 = vadd.f32 %v5033_v16, %v5031_v5 }
 0x908   :  { %v10288_v4 = vpop.eup %10287 }
 0x909   :  { %v5032_v45 = vmul.f32 %v10288_v4, %v5030_v53  ;;  %10295 = vrcp.f32 %v5077_v56  ;;  %v10290_v2 = vpop.eup %10289  ;;  %v12864_v11 = vsel %vm5049_vm0, %v5035_v15, %v12663_v13  ;;  %v5053_v3 = vsel %vm5049_vm0, %v5035_v15, 0.0 }
 0x90a   :  { %v10292_v54 = vpop.eup %10291  ;;  %v5098_v17 = vadd.f32 1.0, %v10290_v2  ;;  %v5104_v13 = vadd.f32 %v12679_v58, %v12856_v28  ;;  %v5105_v28 = vadd.f32 %v12679_v58, %v12859_v24  ;;  %v5109_v53 = vunpack.c.h.bf16 %v4808_v10 }
 0x90b   :  { %v5036_v52 = vadd.f32 %v5034_v35, %v5032_v45  ;;  %v5099_v62 = vadd.f32 1.0, %v10292_v54 }
 0x90c   :  { %10297 = vrcp.f32 %v5098_v17 }
 0x90d   :  { %v12867_v43 = vsel %vm5050_vm4, %v5036_v52, %v12666_v30  ;;  %v5054_v22 = vsel %vm5050_vm4, %v5036_v52, 0.0  ;;  %10299 = vrcp.f32 %v5099_v62 }
 0x90e   :  { %v8734_v61 = vpack.c.bf16 %v5054_v22, %v5053_v3  ;;  %v5161_v0 = vpack.c.bf16 %v12867_v43, %v12864_v11 }
 0x910   :  { %8735 = vst [vmem:[#allocation17 + $0x38] sm:$0xff] %v8734_v61   ;;  %5195 = vmatmul.mubr.bf16.vlgmr.msra.gmra.mxu0 %v5161_v0  ;;  %9560 = vmatmul.mubr.bf16.vlgmr.msra.gmra.mxu1 %v5161_v0  ;;  %v5130_v61 = vpop.permute.xlu0 %5129  ;;  %v5133_v0 = vpop.permute.xlu1 %5132 }
 0x911   :  { %5248 = vmatpush1.bf16.msra.mxu0 %v12670_v33  ;;  %9564 = vmatpush3.bf16.msra.mxu1 %v12673_v18  ;;  %vm5134_vm5 = vcmp.eq.s32.totalorder %v5130_v61, 1  ;;  %vm5135_vm6 = vcmp.eq.s32.totalorder %v5133_v0, 1 }
 0x912   :  { %5249 = vmatprep.subr.bf16.mxu0 %v12683_v55  ;;  %9565 = vmatprep.subr.bf16.mxu1 %v14062_v34  ;;  %v10294_v30 = vpop.eup %10293 }
 0x913   :  { %5279 = vmatprep.mubr.bf16.mxu0 %v14063_v25  ;;  %9579 = vmatprep.mubr.msk.bf16.mxu1 %vm11062_vm3, %v14062_v34  ;;  %v5106_v6 = vmul.f32 %v10294_v30, %v5104_v13 }
 0x915   :  { %5250 = vmatpush1.bf16.msra.mxu0 %v12690_v20  ;;  %9566 = vmatpush3.bf16.msra.mxu1 %v12693_v41  ;;  %v5110_v5 = vadd.f32 %v5108_v47, %v5106_v6  ;;  %v14176_v47 = vld [vmem:[#allocation29_spill] sm:$0xff] }
 0x916   :  { %5251 = vmatprep.subr.bf16.mxu0 %v12698_v63  ;;  %9567 = vmatprep.subr.bf16.mxu1 %v14062_v34  ;;  %v10296_v7 = vpop.eup %10295 }
 0x917   :  { %10301 = vtanh.f32 %v5110_v5  ;;  %v5107_v16 = vmul.f32 %v10296_v7, %v5105_v28  ;;  %v14177_v5 = vld [vmem:[#allocation30_spill] sm:$0xff]  ;;  %v14178_v28 = vld [vmem:[#allocation31_spill] sm:$0xff]  ;;  %v14179_v7 = vld [vmem:[#allocation32_spill] sm:$0xff] }
 0x919   :  { %5252 = vmatpush1.bf16.msra.mxu0 %v12702_v31  ;;  %9568 = vmatpush3.bf16.msra.mxu1 %v12705_v19  ;;  %v5111_v4 = vadd.f32 %v5109_v53, %v5107_v16  ;;  %v10298_v24 = vpop.eup %10297  ;;  %v14180_v16 = vld [vmem:[#allocation33_spill] sm:$0xff]  ;;  %v14181_v53 = vld [vmem:[#allocation34_spill] sm:$0xff] }
 0x91a   :  { %5253 = vmatprep.subr.bf16.mxu0 %v12708_v59  ;;  %9569 = vmatprep.subr.bf16.mxu1 %v14062_v34  ;;  %v10300_v56 = vpop.eup %10299  ;;  %v5114_v35 = vsub.f32 1.0, %v10298_v24  ;;  %v5118_v46 = vmul.f32 %v10298_v24, %v12761_v23  ;;  %v14183_v24 = vld [vmem:[#allocation36_spill] sm:$0xff] }
 0x91b   :  { %10303 = vtanh.f32 %v5111_v4  ;;  %v5115_v40 = vsub.f32 1.0, %v10300_v56  ;;  %v5119_v2 = vmul.f32 %v10300_v56, %v12764_v21  ;;  %v14182_v4 = vld [vmem:[#allocation35_spill] sm:$0xff]  ;;  %v14184_v56 = vld [vmem:[#allocation37_spill] sm:$0xff] }
 0x91d   :  { %5254 = vmatpush1.bf16.msra.mxu0 %v12712_v36  ;;  %9570 = vmatpush3.bf16.msra.mxu1 %v12715_v49 }
 0x91e   :  { %5255 = vmatprep.subr.bf16.mxu0 %v12718_v14  ;;  %9571 = vmatprep.subr.bf16.mxu1 %v14062_v34 }
 0x921   :  { %5256 = vmatpush1.bf16.msra.mxu0 %v12722_v27  ;;  %9572 = vmatpush3.bf16.msra.mxu1 %v12725_v38 }
 0x922   :  { %5257 = vmatprep.subr.bf16.mxu0 %v12728_v9  ;;  %9573 = vmatprep.subr.bf16.mxu1 %v14062_v34 }
 0x924   :  { %v10302_v45 = vpop.eup %10301 }
 0x925   :  { %5258 = vmatpush1.bf16.msra.mxu0 %v12732_v42  ;;  %9574 = vmatpush3.bf16.msra.mxu1 %v12735_v32  ;;  %v5116_v15 = vmul.f32 %v10302_v45, %v5114_v35  ;;  %v14185_v35 = vld [vmem:[#allocation38_spill] sm:$0xff]  ;;  %v14186_v45 = vld [vmem:[#allocation39_spill] sm:$0xff] }
 0x926   :  { %5259 = vmatprep.subr.bf16.mxu0 %v12738_v29  ;;  %9575 = vmatprep.subr.bf16.mxu1 %v14062_v34 }
 0x927   :  { %v5120_v22 = vadd.f32 %v5118_v46, %v5116_v15  ;;  %v14187_v15 = vld [vmem:[#allocation40_spill] sm:$0xff]  ;;  %v14188_v46 = vld [vmem:[#allocation41_spill] sm:$0xff] }
 0x928   :  { %v10304_v52 = vpop.eup %10303 }
 0x929   :  { %5260 = vmatpush1.bf16.msra.mxu0 %v12743_v39  ;;  %9576 = vmatpush3.bf16.msra.mxu1 %v12746_v1  ;;  %v5117_v3 = vmul.f32 %v10304_v52, %v5115_v40  ;;  %v12911_v17 = vsel %vm5134_vm5, %v5120_v22, %v12761_v23  ;;  %v5138_v13 = vsel %vm5134_vm5, %v5120_v22, 0.0  ;;  %v14174_v23 = vld [vmem:[#allocation27_spill] sm:$0xff]  ;;  %v14189_v40 = vld [vmem:[#allocation42_spill] sm:$0xff] }
 0x92a   :  { %5261 = vmatprep.subr.bf16.mxu0 %v12750_v51  ;;  %9577 = vmatprep.subr.bf16.mxu1 %v14062_v34  ;;  %v14190_v52 = vld [vmem:[#allocation43_spill] sm:$0xff] }
 0x92b   :  { %v5121_v54 = vadd.f32 %v5119_v2, %v5117_v3  ;;  %v14191_v2 = vld [vmem:[#allocation44_spill] sm:$0xff]  ;;  %v5152_v3 = vld [vmem:[#allocation4 + $0xc0] sm:$0xff] }
 0x92c   :  { %v5331_v22 = vunpack.c.l.bf16 %v5152_v3 }
 0x92d   :  { %5262 = vmatpush1.bf16.msra.mxu0 %v12754_v37  ;;  %9578 = vmatpush3.bf16.msra.mxu1 %v12757_v60  ;;  %v12914_v10 = vsel %vm5135_vm6, %v5121_v54, %v12764_v21  ;;  %v5139_v30 = vsel %vm5135_vm6, %v5121_v54, 0.0  ;;  %v14175_v21 = vld [vmem:[#allocation28_spill] sm:$0xff] }
 0x92e   :  { %5512 = vmatprep.subr.bf16.mxu0 %v12766_v8  ;;  %9583 = vmatprep.subr.bf16.mxu1 %v14062_v34  ;;  %v8739_v62 = vpack.c.bf16 %v5139_v30, %v5138_v13  ;;  %v5246_v6 = vpack.c.bf16 %v12914_v10, %v12911_v17  ;;  %v5154_v54 = vld [vmem:[#allocation4 + $0xcc] sm:$0xff]  ;;  %v5349_v30 = vrot.slane %v5152_v3, 4 }
 0x930   :  { %8740 = vst [vmem:[#allocation18 + $0x40] sm:$0xff] %v8739_v62   ;;  %5280 = vmatmul.mubr.bf16.vlgmr.msra.gmra.mxu0 %v5246_v6  ;;  %9580 = vmatmul.mubr.bf16.vlgmr.msra.gmra.mxu1 %v5246_v6 }
 0x931   :  { %5513 = vmatpush1.bf16.msra.mxu0 %v12772_v26  ;;  %9584 = vmatpush3.bf16.msra.mxu1 %v12775_v57 }
 0x932   :  { %5514 = vmatprep.subr.bf16.mxu0 %v12778_v50  ;;  %9585 = vmatprep.subr.bf16.mxu1 %v14062_v34 }
 0x933   :  { %5544 = vmatprep.mubr.bf16.mxu0 %v14063_v25  ;;  %9599 = vmatprep.mubr.msk.bf16.mxu1 %vm11062_vm3, %v14062_v34 }
 0x935   :  { %5515 = vmatpush1.bf16.msra.mxu0 %v12785_v12  ;;  %9586 = vmatpush3.bf16.msra.mxu1 %v12788_v44 }
 0x936   :  { %5516 = vmatprep.subr.bf16.mxu0 %v12791_v48  ;;  %9587 = vmatprep.subr.bf16.mxu1 %v14062_v34 }
 0x939   :  { %5517 = vmatpush1.bf16.msra.mxu0 %v14174_v23  ;;  %9588 = vmatpush3.bf16.msra.mxu1 %v14175_v21 }
 0x93a   :  { %5518 = vmatprep.subr.bf16.mxu0 %v14176_v47  ;;  %9589 = vmatprep.subr.bf16.mxu1 %v14062_v34 }
 0x93d   :  { %5519 = vmatpush1.bf16.msra.mxu0 %v14177_v5  ;;  %9590 = vmatpush3.bf16.msra.mxu1 %v14178_v28 }
 0x93e   :  { %5520 = vmatprep.subr.bf16.mxu0 %v14179_v7  ;;  %9591 = vmatprep.subr.bf16.mxu1 %v14062_v34 }
 0x941   :  { %5521 = vmatpush1.bf16.msra.mxu0 %v14180_v16  ;;  %9592 = vmatpush3.bf16.msra.mxu1 %v14181_v53 }
 0x942   :  { %5522 = vmatprep.subr.bf16.mxu0 %v14182_v4  ;;  %9593 = vmatprep.subr.bf16.mxu1 %v14062_v34 }
 0x945   :  { %5523 = vmatpush1.bf16.msra.mxu0 %v14183_v24  ;;  %9594 = vmatpush3.bf16.msra.mxu1 %v14184_v56 }
 0x946   :  { %5524 = vmatprep.subr.bf16.mxu0 %v14185_v35  ;;  %9595 = vmatprep.subr.bf16.mxu1 %v14062_v34 }
 0x949   :  { %5525 = vmatpush1.bf16.msra.mxu0 %v14186_v45  ;;  %9596 = vmatpush3.bf16.msra.mxu1 %v14187_v15  ;;  %v5332_v15 = vunpack.c.l.bf16 %v5154_v54  ;;  %v5350_v45 = vrot.slane %v5154_v54, 4 }
 0x94a   :  { %5526 = vmatprep.subr.bf16.mxu0 %v14188_v46  ;;  %9597 = vmatprep.subr.bf16.mxu1 %v14062_v34 }
 0x94b   :  { %v5354_v16 = vunpack.c.l.bf16 %v5350_v45 }
 0x94d   :  { %5527 = vmatpush1.bf16.msra.mxu0 %v14189_v40  ;;  %9598 = vmatpush3.bf16.msra.mxu1 %v14190_v52  ;;  %v5353_v52 = vunpack.c.l.bf16 %v5349_v30  ;;  %v5157_v30 = vld [vmem:[#allocation5 + $0xa8] sm:$0xff] }
 0x94e   :  { %5597 = vmatprep.subr.bf16.mxu0 %v14191_v2  ;;  %9603 = vmatprep.subr.bf16.mxu1 %v14062_v34 }
 0x9d0   :  { %v5196_v61 = vpop.f32.mrf.mxu0  ;;  %v5239_v0 = vpop.f32.mrf.mxu1 }
 0x9d1   :  { %v5333_v13 = vadd.f32 %v5331_v22, %v5196_v61 }
 0x9d2   :  { %v5198_v62 = vpop.f32.mrf.mxu0  ;;  %v9561_v6 = vpop.f32.mrf.mxu1 }
 0x9d3   :  { %v8373_v46 = vmul.f32 -1.442695, %v5333_v13  ;;  %v5355_v4 = vadd.f32 %v5353_v52, %v5198_v62  ;;  %v5416_v52 = vunpack.c.l.bf16 %v5157_v30  ;;  %v5434_v62 = vrot.slane %v5157_v30, 4 }
 0x9d4   :  { %v5200_v35 = vpop.f32.mrf.mxu0  ;;  %v5242_v40 = vpop.f32.mrf.mxu1 }
 0x9d5   :  { %10305 = vpow2.f32 %v8373_v46  ;;  %v5334_v56 = vadd.f32 %v5332_v15, %v5200_v35  ;;  %v8375_v28 = vmul.f32 -1.442695, %v5355_v4  ;;  %v5438_v23 = vunpack.c.l.bf16 %v5434_v62 }
 0x9d6   :  { %v5202_v2 = vpop.f32.mrf.mxu0  ;;  %v9562_v24 = vpop.f32.mrf.mxu1 }
 0x9d7   :  { %v8374_v53 = vmul.f32 -1.442695, %v5334_v56  ;;  %v5356_v7 = vadd.f32 %v5354_v16, %v5202_v2  ;;  %v5153_v24 = vld [vmem:[#allocation4 + $0xc8] ss:$12 sps:$4 sm:$0xff]   ;;  %v14192_v56 = vld [vmem:[#allocation26_spill] sm:$0xff] }
 0x9d8   :  { %v5369_v45 = vadd.f32 %v14192_v56, %v5239_v0  ;;  %v5370_v5 = vadd.f32 %v14192_v56, %v5242_v40 }
 0x9d9   :  { %10307 = vpow2.f32 %v8374_v53  ;;  %v8376_v22 = vmul.f32 -1.442695, %v5356_v7 }
 0x9da   :  { %10309 = vpow2.f32 %v8375_v28  ;;  %v5159_v28 = vld [vmem:[#allocation5 + $0xb4] sm:$0xff] }
 0x9db   :  { %10311 = vpow2.f32 %v8376_v22  ;;  %v5373_v22 = vunpack.c.l.bf16 %v5153_v24  ;;  %v5435_v47 = vrot.slane %v5159_v28, 4 }
 0x9e2   :  { %v10306_v3 = vpop.eup %10305 }
 0x9e3   :  { %v5341_v61 = vadd.f32 1.0, %v10306_v3 }
 0x9e5   :  { %10313 = vrcp.f32 %v5341_v61 }
 0x9e6   :  { %v10308_v54 = vpop.eup %10307 }
 0x9e7   :  { %v5342_v13 = vadd.f32 1.0, %v10308_v54  ;;  %v10310_v46 = vpop.eup %10309 }
 0x9e8   :  { %v10312_v35 = vpop.eup %10311  ;;  %v5363_v15 = vadd.f32 1.0, %v10310_v46 }
 0x9e9   :  { %10315 = vrcp.f32 %v5342_v13  ;;  %v5364_v53 = vadd.f32 1.0, %v10312_v35  ;;  %v5417_v13 = vunpack.c.l.bf16 %v5159_v28 }
 0x9ea   :  { %10317 = vrcp.f32 %v5363_v15 }
 0x9eb   :  { %10319 = vrcp.f32 %v5364_v53 }
 0x9f0   :  { %v5281_v16 = vpop.f32.mrf.mxu0  ;;  %v12956_v4 = vpop.f32.mrf.mxu1 }
 0x9f1   :  { %v5418_v2 = vadd.f32 %v5416_v52, %v5281_v16 }
 0x9f2   :  { %v10314_v7 = vpop.eup %10313  ;;  %v5283_v3 = vpop.f32.mrf.mxu0 }
 0x9f3   :  { %v5371_v6 = vmul.f32 %v10314_v7, %v5369_v45  ;;  %v9581_v61 = vpop.f32.mrf.mxu1  ;;  %v8379_v54 = vmul.f32 -1.442695, %v5418_v2  ;;  %v5374_v45 = vunpack.c.h.bf16 %v5153_v24  ;;  %v5440_v16 = vadd.f32 %v5438_v23, %v5283_v3 }
 0x9f4   :  { %v5285_v0 = vpop.f32.mrf.mxu0 }
 0x9f5   :  { %v5375_v46 = vadd.f32 %v5373_v22, %v5371_v6  ;;  %v12959_v35 = vpop.f32.mrf.mxu1  ;;  %10321 = vpow2.f32 %v8379_v54  ;;  %v5419_v52 = vadd.f32 %v5417_v13, %v5285_v0  ;;  %v5439_v6 = vunpack.c.l.bf16 %v5435_v47 }
 0x9f6   :  { %v10316_v21 = vpop.eup %10315  ;;  %v5287_v2 = vpop.f32.mrf.mxu0  ;;  %v8381_v56 = vmul.f32 -1.442695, %v5440_v16 }
 0x9f7   :  { %10323 = vtanh.f32 %v5375_v46  ;;  %v5372_v30 = vmul.f32 %v10316_v21, %v5370_v5  ;;  %v9582_v15 = vpop.f32.mrf.mxu1  ;;  %v8380_v7 = vmul.f32 -1.442695, %v5419_v52  ;;  %v5441_v40 = vadd.f32 %v5439_v6, %v5287_v2  ;;  %v10318_v22 = vpop.eup %10317 }
 0x9f8   :  { %v10320_v28 = vpop.eup %10319  ;;  %v5379_v62 = vsub.f32 1.0, %v10318_v22  ;;  %v5383_v24 = vmul.f32 %v10318_v22, %v12864_v11  ;;  %v5398_v15 = vpop.permute.xlu1 %5397 }
 0x9f9   :  { %v5376_v61 = vadd.f32 %v5374_v45, %v5372_v30  ;;  %10325 = vpow2.f32 %v8380_v7  ;;  %v8382_v53 = vmul.f32 -1.442695, %v5441_v40  ;;  %v5380_v3 = vsub.f32 1.0, %v10320_v28  ;;  %v5395_v45 = vpop.permute.xlu0 %5394 }
 0x9fa   :  { %v5384_v0 = vmul.f32 %v10320_v28, %v12867_v43  ;;  %vm5399_vm7 = vcmp.eq.s32.totalorder %v5395_v45, 1  ;;  %vm5400_vm8 = vcmp.eq.s32.totalorder %v5398_v15, 1  ;;  %v5502_v45 = vld [vmem:[#allocation4 + $0xd8] sm:$0xff] }
 0x9fb   :  { %10327 = vtanh.f32 %v5376_v61  ;;  %v5681_v15 = vunpack.c.l.bf16 %v5502_v45 }
 0x9fc   :  { %10329 = vpow2.f32 %v8381_v56 }
 0x9fd   :  { %10331 = vpow2.f32 %v8382_v53 }
 0xa02   :  { %v10322_v54 = vpop.eup %10321 }
 0xa03   :  { %v5426_v21 = vadd.f32 1.0, %v10322_v54  ;;  %v5158_v54 = vld [vmem:[#allocation5 + $0xb0] ss:$12 sps:$4 sm:$0xff]  }
 0xa04   :  { %v10324_v13 = vpop.eup %10323 }
 0xa05   :  { %v5381_v5 = vmul.f32 %v10324_v13, %v5379_v62  ;;  %10333 = vrcp.f32 %v5426_v21  ;;  %v5458_v21 = vunpack.c.l.bf16 %v5158_v54 }
 0xa06   :  { %v10326_v23 = vpop.eup %10325 }
 0xa07   :  { %v5427_v46 = vadd.f32 1.0, %v10326_v23  ;;  %v5385_v30 = vadd.f32 %v5383_v24, %v5381_v5  ;;  %v5459_v5 = vunpack.c.h.bf16 %v5158_v54  ;;  %v14204_v24 = vld [vmem:[#allocation38_spill] sm:$0xff] }
 0xa08   :  { %v10328_v47 = vpop.eup %10327 }
 0xa09   :  { %v5382_v52 = vmul.f32 %v10328_v47, %v5380_v3  ;;  %10335 = vrcp.f32 %v5427_v46  ;;  %v10330_v7 = vpop.eup %10329  ;;  %v12964_v2 = vsel %vm5399_vm7, %v5385_v30, %v12864_v11  ;;  %v5403_v6 = vsel %vm5399_vm7, %v5385_v30, 0.0  ;;  %v14205_v3 = vld [vmem:[#allocation39_spill] sm:$0xff]  ;;  %v14206_v47 = vld [vmem:[#allocation40_spill] sm:$0xff]  ;;  %v14207_v46 = vld [vmem:[#allocation41_spill] sm:$0xff] }
 0xa0a   :  { %v10332_v22 = vpop.eup %10331  ;;  %v5448_v28 = vadd.f32 1.0, %v10330_v7  ;;  %v5454_v11 = vadd.f32 %v12679_v58, %v12956_v4  ;;  %v14210_v30 = vld [vmem:[#allocation44_spill] sm:$0xff] }
 0xa0b   :  { %v5386_v16 = vadd.f32 %v5384_v0, %v5382_v52  ;;  %v5449_v62 = vadd.f32 1.0, %v10332_v22  ;;  %v14208_v0 = vld [vmem:[#allocation42_spill] sm:$0xff]  ;;  %v14209_v52 = vld [vmem:[#allocation43_spill] sm:$0xff] }
 0xa0c   :  { %10337 = vrcp.f32 %v5448_v28 }
 0xa0d   :  { %v12967_v61 = vsel %vm5400_vm8, %v5386_v16, %v12867_v43  ;;  %v5404_v40 = vsel %vm5400_vm8, %v5386_v16, 0.0  ;;  %10339 = vrcp.f32 %v5449_v62 }
 0xa0e   :  { %v8744_v56 = vpack.c.bf16 %v5404_v40, %v5403_v6  ;;  %v5511_v53 = vpack.c.bf16 %v12967_v61, %v12964_v2  ;;  %v5504_v6 = vld [vmem:[#allocation4 + $0xe4] sm:$0xff] }
 0xa0f   :  { %v5682_v54 = vunpack.c.l.bf16 %v5504_v6 }
 0xa10   :  { %8745 = vst [vmem:[#allocation17 + $0x40] sm:$0xff] %v8744_v56   ;;  %5545 = vmatmul.mubr.bf16.vlgmr.msra.gmra.mxu0 %v5511_v53  ;;  %9600 = vmatmul.mubr.bf16.vlgmr.msra.gmra.mxu1 %v5511_v53  ;;  %v5699_v56 = vrot.slane %v5502_v45, 4 }
 0xa11   :  { %5598 = vmatpush1.bf16.msra.mxu0 %v12670_v33  ;;  %9604 = vmatpush3.bf16.msra.mxu1 %v12673_v18  ;;  %v5455_v18 = vadd.f32 %v12679_v58, %v12959_v35 }
 0xa12   :  { %5599 = vmatprep.subr.bf16.mxu0 %v12683_v55  ;;  %9605 = vmatprep.subr.bf16.mxu1 %v14062_v34  ;;  %v10334_v43 = vpop.eup %10333 }
 0xa13   :  { %5629 = vmatprep.mubr.bf16.mxu0 %v14063_v25  ;;  %9619 = vmatprep.mubr.msk.bf16.mxu1 %vm11062_vm3, %v14062_v34  ;;  %v5456_v13 = vmul.f32 %v10334_v43, %v5454_v11  ;;  %v5700_v11 = vrot.slane %v5504_v6, 4 }
 0xa15   :  { %5600 = vmatpush1.bf16.msra.mxu0 %v12690_v20  ;;  %9606 = vmatpush3.bf16.msra.mxu1 %v12693_v41  ;;  %v5460_v33 = vadd.f32 %v5458_v21, %v5456_v13  ;;  %v5703_v13 = vunpack.c.l.bf16 %v5699_v56 }
 0xa16   :  { %5601 = vmatprep.subr.bf16.mxu0 %v12698_v63  ;;  %9607 = vmatprep.subr.bf16.mxu1 %v14062_v34  ;;  %v10336_v55 = vpop.eup %10335 }
 0xa17   :  { %10341 = vtanh.f32 %v5460_v33  ;;  %v5457_v4 = vmul.f32 %v10336_v55, %v5455_v18 }
 0xa19   :  { %5602 = vmatpush1.bf16.msra.mxu0 %v12702_v31  ;;  %9608 = vmatpush3.bf16.msra.mxu1 %v12705_v19  ;;  %v5461_v20 = vadd.f32 %v5459_v5, %v5457_v4  ;;  %v10338_v58 = vpop.eup %10337  ;;  %v5704_v5 = vunpack.c.l.bf16 %v5700_v11 }
 0xa1a   :  { %5603 = vmatprep.subr.bf16.mxu0 %v12708_v59  ;;  %9609 = vmatprep.subr.bf16.mxu1 %v14062_v34  ;;  %v10340_v41 = vpop.eup %10339  ;;  %v5464_v63 = vsub.f32 1.0, %v10338_v58  ;;  %v5468_v59 = vmul.f32 %v10338_v58, %v12911_v17 }
 0xa1b   :  { %10343 = vtanh.f32 %v5461_v20 }
 0xa1d   :  { %5604 = vmatpush1.bf16.msra.mxu0 %v12712_v36  ;;  %9610 = vmatpush3.bf16.msra.mxu1 %v12715_v49  ;;  %v5465_v36 = vsub.f32 1.0, %v10340_v41 }
 0xa1e   :  { %5605 = vmatprep.subr.bf16.mxu0 %v12718_v14  ;;  %9611 = vmatprep.subr.bf16.mxu1 %v14062_v34  ;;  %v5469_v14 = vmul.f32 %v10340_v41, %v12914_v10 }
 0xa21   :  { %5606 = vmatpush1.bf16.msra.mxu0 %v12722_v27  ;;  %9612 = vmatpush3.bf16.msra.mxu1 %v12725_v38 }
 0xa22   :  { %5607 = vmatprep.subr.bf16.mxu0 %v12728_v9  ;;  %9613 = vmatprep.subr.bf16.mxu1 %v14062_v34  ;;  %v5480_v9 = vpop.permute.xlu0 %5479 }
 0xa23   :  { %vm5484_vm9 = vcmp.eq.s32.totalorder %v5480_v9, 1 }
 0xa24   :  { %v10342_v31 = vpop.eup %10341 }
 0xa25   :  { %5608 = vmatpush1.bf16.msra.mxu0 %v12732_v42  ;;  %9614 = vmatpush3.bf16.msra.mxu1 %v12735_v32  ;;  %v5466_v19 = vmul.f32 %v10342_v31, %v5464_v63  ;;  %v5483_v42 = vpop.permute.xlu1 %5482 }
 0xa26   :  { %5609 = vmatprep.subr.bf16.mxu0 %v12738_v29  ;;  %9615 = vmatprep.subr.bf16.mxu1 %v14062_v34  ;;  %vm5485_vm10 = vcmp.eq.s32.totalorder %v5483_v42, 1  ;;  %v13058_v42 = vld [vmem:[%s13867_s9] ss:$0 sm:$0xff] }
 0xa27   :  { %v5470_v38 = vadd.f32 %v5468_v59, %v5466_v19  ;;  %14211 = vst [vmem:[#allocation26_spill] sm:$0xff] %v13058_v42 }
 0xa28   :  { %v10344_v49 = vpop.eup %10343 }
 0xa29   :  { %5610 = vmatpush1.bf16.msra.mxu0 %v12743_v39  ;;  %9616 = vmatpush3.bf16.msra.mxu1 %v12746_v1  ;;  %v5467_v27 = vmul.f32 %v10344_v49, %v5465_v36  ;;  %v13011_v29 = vsel %vm5484_vm9, %v5470_v38, %v12911_v17  ;;  %v5488_v1 = vsel %vm5484_vm9, %v5470_v38, 0.0  ;;  %v14202_v17 = vld [vmem:[#allocation36_spill] sm:$0xff] }
 0xa2a   :  { %5611 = vmatprep.subr.bf16.mxu0 %v12750_v51  ;;  %9617 = vmatprep.subr.bf16.mxu1 %v14062_v34  ;;  %v5507_v49 = vld [vmem:[#allocation5 + $0x90] sm:$0xff]  ;;  %v5503_v38 = vld [vmem:[#allocation4 + $0xe0] ss:$12 sps:$4 sm:$0xff]  }
 0xa2b   :  { %v5471_v32 = vadd.f32 %v5469_v14, %v5467_v27  ;;  %v5766_v9 = vunpack.c.l.bf16 %v5507_v49  ;;  %v5724_v45 = vunpack.c.h.bf16 %v5503_v38 }
 0xa2d   :  { %5612 = vmatpush1.bf16.msra.mxu0 %v12754_v37  ;;  %9618 = vmatpush3.bf16.msra.mxu1 %v12757_v60  ;;  %v13014_v39 = vsel %vm5485_vm10, %v5471_v32, %v12914_v10  ;;  %v5489_v51 = vsel %vm5485_vm10, %v5471_v32, 0.0  ;;  %v14193_v37 = vld [vmem:[#allocation27_spill] sm:$0xff]  ;;  %v14194_v60 = vld [vmem:[#allocation28_spill] sm:$0xff]  ;;  %v14203_v10 = vld [vmem:[#allocation37_spill] sm:$0xff] }
 0xa2e   :  { %5862 = vmatprep.subr.bf16.mxu0 %v12766_v8  ;;  %9623 = vmatprep.subr.bf16.mxu1 %v14062_v34  ;;  %v8749_v35 = vpack.c.bf16 %v5489_v51, %v5488_v1  ;;  %v5596_v23 = vpack.c.bf16 %v13014_v39, %v13011_v29  ;;  %v14195_v8 = vld [vmem:[#allocation29_spill] sm:$0xff] }
 0xa30   :  { %8750 = vst [vmem:[#allocation18 + $0x38] sm:$0xff] %v8749_v35   ;;  %5630 = vmatmul.mubr.bf16.vlgmr.msra.gmra.mxu0 %v5596_v23  ;;  %9620 = vmatmul.mubr.bf16.vlgmr.msra.gmra.mxu1 %v5596_v23  ;;  %v5509_v23 = vld [vmem:[#allocation5 + $0x9c] sm:$0xff] }
 0xa31   :  { %5863 = vmatpush1.bf16.msra.mxu0 %v12772_v26  ;;  %9624 = vmatpush3.bf16.msra.mxu1 %v12775_v57  ;;  %v14196_v26 = vld [vmem:[#allocation30_spill] sm:$0xff]  ;;  %v14197_v57 = vld [vmem:[#allocation31_spill] sm:$0xff] }
 0xa32   :  { %5864 = vmatprep.subr.bf16.mxu0 %v12778_v50  ;;  %9625 = vmatprep.subr.bf16.mxu1 %v14062_v34  ;;  %v14198_v50 = vld [vmem:[#allocation32_spill] sm:$0xff] }
 0xa33   :  { %5894 = vmatprep.mubr.bf16.mxu0 %v14063_v25  ;;  %9639 = vmatprep.mubr.msk.bf16.mxu1 %vm11062_vm3, %v14062_v34 }
 0xa35   :  { %5865 = vmatpush1.bf16.msra.mxu0 %v12785_v12  ;;  %9626 = vmatpush3.bf16.msra.mxu1 %v12788_v44  ;;  %v14199_v12 = vld [vmem:[#allocation33_spill] sm:$0xff]  ;;  %v14200_v44 = vld [vmem:[#allocation34_spill] sm:$0xff] }
 0xa36   :  { %5866 = vmatprep.subr.bf16.mxu0 %v12791_v48  ;;  %9627 = vmatprep.subr.bf16.mxu1 %v14062_v34  ;;  %v14201_v48 = vld [vmem:[#allocation35_spill] sm:$0xff] }
 0xa39   :  { %5867 = vmatpush1.bf16.msra.mxu0 %v14193_v37  ;;  %9628 = vmatpush3.bf16.msra.mxu1 %v14194_v60 }
 0xa3a   :  { %5868 = vmatprep.subr.bf16.mxu0 %v14195_v8  ;;  %9629 = vmatprep.subr.bf16.mxu1 %v14062_v34  ;;  %v5784_v8 = vrot.slane %v5507_v49, 4 }
 0xa3d   :  { %5869 = vmatpush1.bf16.msra.mxu0 %v14196_v26  ;;  %9630 = vmatpush3.bf16.msra.mxu1 %v14197_v57  ;;  %v5723_v57 = vunpack.c.l.bf16 %v5503_v38 }
 0xa3e   :  { %5870 = vmatprep.subr.bf16.mxu0 %v14198_v50  ;;  %9631 = vmatprep.subr.bf16.mxu1 %v14062_v34 }
 0xa41   :  { %5871 = vmatpush1.bf16.msra.mxu0 %v14199_v12  ;;  %9632 = vmatpush3.bf16.msra.mxu1 %v14200_v44 }
 0xa42   :  { %5872 = vmatprep.subr.bf16.mxu0 %v14201_v48  ;;  %9633 = vmatprep.subr.bf16.mxu1 %v14062_v34  ;;  %v5767_v48 = vunpack.c.l.bf16 %v5509_v23 }
 0xa45   :  { %5873 = vmatpush1.bf16.msra.mxu0 %v14202_v17  ;;  %9634 = vmatpush3.bf16.msra.mxu1 %v14203_v10 }
 0xa46   :  { %5874 = vmatprep.subr.bf16.mxu0 %v14204_v24  ;;  %9635 = vmatprep.subr.bf16.mxu1 %v14062_v34 }
 0xa49   :  { %5875 = vmatpush1.bf16.msra.mxu0 %v14205_v3  ;;  %9636 = vmatpush3.bf16.msra.mxu1 %v14206_v47  ;;  %v5785_v47 = vrot.slane %v5509_v23, 4  ;;  %v5508_v23 = vld [vmem:[#allocation5 + $0x98] ss:$12 sps:$4 sm:$0xff]  }
 0xa4a   :  { %5876 = vmatprep.subr.bf16.mxu0 %v14207_v46  ;;  %9637 = vmatprep.subr.bf16.mxu1 %v14062_v34 }
 0xa4b   :  { %v5789_v56 = vunpack.c.l.bf16 %v5785_v47 }
 0xa4d   :  { %5877 = vmatpush1.bf16.msra.mxu0 %v14208_v0  ;;  %9638 = vmatpush3.bf16.msra.mxu1 %v14209_v52  ;;  %v5788_v0 = vunpack.c.l.bf16 %v5784_v8  ;;  %v13089_v8 = vld [vmem:[#allocation15 + $0x94] ss:$12 sps:$4 sm:$0xff]  }
 0xa4e   :  { %5947 = vmatprep.subr.bf16.mxu0 %v14210_v30  ;;  %9643 = vmatprep.subr.bf16.mxu1 %v14062_v34 }
 0xad0   :  { %v5546_v16 = vpop.f32.mrf.mxu0  ;;  %v5589_v7 = vpop.f32.mrf.mxu1 }
 0xad1   :  { %v5683_v40 = vadd.f32 %v5681_v15, %v5546_v16  ;;  %v5719_v32 = vadd.f32 %v13058_v42, %v5589_v7 }
 0xad2   :  { %v5548_v53 = vpop.f32.mrf.mxu0  ;;  %v9601_v22 = vpop.f32.mrf.mxu1 }
 0xad3   :  { %v8385_v28 = vmul.f32 -1.442695, %v5683_v40  ;;  %v5705_v55 = vadd.f32 %v5703_v13, %v5548_v53 }
 0xad4   :  { %v5550_v43 = vpop.f32.mrf.mxu0  ;;  %v5592_v62 = vpop.f32.mrf.mxu1 }
 0xad5   :  { %10345 = vpow2.f32 %v8385_v28  ;;  %v5684_v21 = vadd.f32 %v5682_v54, %v5550_v43  ;;  %v8387_v58 = vmul.f32 -1.442695, %v5705_v55  ;;  %v5720_v10 = vadd.f32 %v13058_v42, %v5592_v62 }
 0xad6   :  { %v5552_v33 = vpop.f32.mrf.mxu0  ;;  %v9602_v18 = vpop.f32.mrf.mxu1 }
 0xad7   :  { %v8386_v4 = vmul.f32 -1.442695, %v5684_v21  ;;  %v5706_v20 = vadd.f32 %v5704_v5, %v5552_v33 }
 0xad9   :  { %10347 = vpow2.f32 %v8386_v4  ;;  %v8388_v41 = vmul.f32 -1.442695, %v5706_v20 }
 0xada   :  { %10349 = vpow2.f32 %v8387_v58 }
 0xadb   :  { %10351 = vpow2.f32 %v8388_v41 }
 0xae2   :  { %v10346_v63 = vpop.eup %10345 }
 0xae3   :  { %v5691_v31 = vadd.f32 1.0, %v10346_v63 }
 0xae5   :  { %10353 = vrcp.f32 %v5691_v31  ;;  %v5745_v31 = vpop.permute.xlu0 %5744 }
 0xae6   :  { %v10348_v19 = vpop.eup %10347  ;;  %vm5749_vm11 = vcmp.eq.s32.totalorder %v5745_v31, 1 }
 0xae7   :  { %v5692_v59 = vadd.f32 1.0, %v10348_v19  ;;  %v10350_v36 = vpop.eup %10349  ;;  %v5748_v19 = vpop.permute.xlu1 %5747 }
 0xae8   :  { %v10352_v14 = vpop.eup %10351  ;;  %v5713_v27 = vadd.f32 1.0, %v10350_v36  ;;  %vm5750_vm12 = vcmp.eq.s32.totalorder %v5748_v19, 1  ;;  %v13160_v19 = vld [vmem:[#allocation15] ss:$12 sps:$4 sm:$0xff]  }
 0xae9   :  { %10355 = vrcp.f32 %v5692_v59  ;;  %v5714_v1 = vadd.f32 1.0, %v10352_v14 }
 0xaea   :  { %10357 = vrcp.f32 %v5713_v27 }
 0xaeb   :  { %10359 = vrcp.f32 %v5714_v1 }
 0xaf0   :  { %v5631_v51 = vpop.f32.mrf.mxu0  ;;  %v13061_v35 = vpop.f32.mrf.mxu1 }
 0xaf1   :  { %v5768_v60 = vadd.f32 %v5766_v9, %v5631_v51 }
 0xaf2   :  { %v10354_v37 = vpop.eup %10353  ;;  %v5633_v50 = vpop.f32.mrf.mxu0 }
 0xaf3   :  { %v5721_v26 = vmul.f32 %v10354_v37, %v5719_v32  ;;  %v9621_v12 = vpop.f32.mrf.mxu1  ;;  %v8391_v44 = vmul.f32 -1.442695, %v5768_v60  ;;  %v5790_v16 = vadd.f32 %v5788_v0, %v5633_v50  ;;  %v13076_v37 = vld [vmem:[#allocation15 + $0xa8] ss:$12 sps:$4 sm:$0xff]   ;;  %v13108_v0 = vld [vmem:[#allocation15 + $0x78] ss:$12 sps:$4 sm:$0xff]  }
 0xaf4   :  { %v5635_v24 = vpop.f32.mrf.mxu0  ;;  %v5808_v12 = vunpack.c.l.bf16 %v5508_v23 }
 0xaf5   :  { %v5725_v17 = vadd.f32 %v5723_v57, %v5721_v26  ;;  %v13064_v3 = vpop.f32.mrf.mxu1  ;;  %10361 = vpow2.f32 %v8391_v44  ;;  %v5769_v52 = vadd.f32 %v5767_v48, %v5635_v24  ;;  %v8393_v22 = vmul.f32 -1.442695, %v5790_v16  ;;  %v13096_v44 = vld [vmem:[#allocation15 + $0x90] ss:$12 sps:$4 sm:$0xff]   ;;  %v13124_v16 = vld [vmem:[#allocation15 + $0x4c] ss:$12 sps:$4 sm:$0xff]  }
 0xaf6   :  { %v10356_v46 = vpop.eup %10355  ;;  %v5637_v6 = vpop.f32.mrf.mxu0 }
 0xaf7   :  { %10363 = vtanh.f32 %v5725_v17  ;;  %v5722_v30 = vmul.f32 %v10356_v46, %v5720_v10  ;;  %v9622_v15 = vpop.f32.mrf.mxu1  ;;  %v8392_v7 = vmul.f32 -1.442695, %v5769_v52  ;;  %v5791_v53 = vadd.f32 %v5789_v56, %v5637_v6  ;;  %v10358_v54 = vpop.eup %10357  ;;  %v13104_v10 = vld [vmem:[#allocation15 + $0x7c] ss:$12 sps:$4 sm:$0xff]   ;;  %v13111_v52 = vld [vmem:[#allocation15 + $0x80] ss:$12 sps:$4 sm:$0xff]  }
 0xaf8   :  { %v10360_v11 = vpop.eup %10359  ;;  %v5729_v62 = vsub.f32 1.0, %v10358_v54  ;;  %v5733_v55 = vmul.f32 %v10358_v54, %v12964_v2  ;;  %v5809_v46 = vunpack.c.h.bf16 %v5508_v23  ;;  %v13121_v15 = vld [vmem:[#allocation15 + $0x68] ss:$12 sps:$4 sm:$0xff]   ;;  %v13138_v54 = vld [vmem:[#allocation15 + $0x30] ss:$12 sps:$4 sm:$0xff]  }
 0xaf9   :  { %v5726_v40 = vadd.f32 %v5724_v45, %v5722_v30  ;;  %10365 = vpow2.f32 %v8392_v7  ;;  %v8394_v28 = vmul.f32 -1.442695, %v5791_v53  ;;  %v5730_v4 = vsub.f32 1.0, %v10360_v11  ;;  %v13114_v30 = vld [vmem:[#allocation15 + $0x64] ss:$12 sps:$4 sm:$0xff]  }
 0xafa   :  { %v5734_v58 = vmul.f32 %v10360_v11, %v12967_v61  ;;  %v13118_v45 = vld [vmem:[#allocation15 + $0x60] ss:$12 sps:$4 sm:$0xff]   ;;  %v13128_v6 = vld [vmem:[#allocation15 + $0x48] ss:$12 sps:$4 sm:$0xff]   ;;  %v13141_v11 = vld [vmem:[#allocation15 + $0x38] ss:$12 sps:$4 sm:$0xff]  }
 0xafb   :  { %10367 = vtanh.f32 %v5726_v40  ;;  %v13131_v40 = vld [vmem:[#allocation15 + $0x50] ss:$12 sps:$4 sm:$0xff]   ;;  %v13134_v56 = vld [vmem:[#allocation15 + $0x34] ss:$12 sps:$4 sm:$0xff]  }
 0xafc   :  { %10369 = vpow2.f32 %v8393_v22  ;;  %v13184_v23 = vld [vmem:[#allocation14 + $0x94] ss:$12 sps:$4 sm:$0xff]  }
 0xafd   :  { %10371 = vpow2.f32 %v8394_v28 }
 0xb02   :  { %v10362_v43 = vpop.eup %10361 }
 0xb03   :  { %v5776_v21 = vadd.f32 1.0, %v10362_v43  ;;  %v13144_v43 = vld [vmem:[#allocation15 + $0x1c] ss:$12 sps:$4 sm:$0xff]  }
 0xb04   :  { %v10364_v13 = vpop.eup %10363 }
 0xb05   :  { %v5731_v33 = vmul.f32 %v10364_v13, %v5729_v62  ;;  %10373 = vrcp.f32 %v5776_v21 }
 0xb06   :  { %v10366_v18 = vpop.eup %10365 }
 0xb07   :  { %v5777_v20 = vadd.f32 1.0, %v10366_v18  ;;  %v5735_v63 = vadd.f32 %v5733_v55, %v5731_v33  ;;  %v13149_v18 = vld [vmem:[#allocation15 + $0x18] ss:$12 sps:$4 sm:$0xff]   ;;  %v13152_v55 = vld [vmem:[#allocation15 + $0x20] ss:$12 sps:$4 sm:$0xff]  }
 0xb08   :  { %v10368_v5 = vpop.eup %10367 }
 0xb09   :  { %v5732_v41 = vmul.f32 %v10368_v5, %v5730_v4  ;;  %10375 = vrcp.f32 %v5777_v20  ;;  %v10370_v36 = vpop.eup %10369  ;;  %v13069_v49 = vsel %vm5749_vm11, %v5735_v63, %v12964_v2  ;;  %v5753_v27 = vsel %vm5749_vm11, %v5735_v63, 0.0  ;;  %v13079_v2 = vld [vmem:[#allocation15 + $0xb0] ss:$12 sps:$4 sm:$0xff]   ;;  %v5833_v63 = vpop.permute.xlu1 %5832 }
 0xb0a   :  { %v10372_v1 = vpop.eup %10371  ;;  %v5798_v51 = vadd.f32 1.0, %v10370_v36  ;;  %v13156_v5 = vld [vmem:[#allocation15 + $0x4] ss:$12 sps:$4 sm:$0xff]   ;;  %vm5835_vm14 = vcmp.eq.s32.totalorder %v5833_v63, 1 }
 0xb0b   :  { %v5736_v59 = vadd.f32 %v5734_v58, %v5732_v41  ;;  %v5799_v57 = vadd.f32 1.0, %v10372_v1  ;;  %v5830_v41 = vpop.permute.xlu0 %5829 }
 0xb0c   :  { %10377 = vrcp.f32 %v5798_v51  ;;  %vm5834_vm13 = vcmp.eq.s32.totalorder %v5830_v41, 1 }
 0xb0d   :  { %v13072_v14 = vsel %vm5750_vm12, %v5736_v59, %v12967_v61  ;;  %v5754_v38 = vsel %vm5750_vm12, %v5736_v59, 0.0  ;;  %v13085_v61 = vld [vmem:[%s13868_s10] ss:$0 sm:$0xff]  ;;  %10379 = vrcp.f32 %v5799_v57  ;;  %v13163_v59 = vld [vmem:[#allocation15 + $0x8] ss:$12 sps:$4 sm:$0xff]  }
 0xb0e   :  { %v8754_v9 = vpack.c.bf16 %v5754_v38, %v5753_v27  ;;  %v5861_v32 = vpack.c.bf16 %v13072_v14, %v13069_v49  ;;  %v5804_v60 = vadd.f32 %v13085_v61, %v13061_v35  ;;  %v13099_v35 = vld [vmem:[#allocation15 + $0x98] ss:$12 sps:$4 sm:$0xff]   ;;  %v5805_v17 = vadd.f32 %v13085_v61, %v13064_v3  ;;  %v13197_v57 = vld [vmem:[#allocation14 + $0x7c] ss:$12 sps:$4 sm:$0xff]  }
 0xb10   :  { %8755 = vst [vmem:[#allocation17 + $0x48] sm:$0xff] %v8754_v9   ;;  %5895 = vmatmul.mubr.bf16.vlgmr.msra.gmra.mxu0 %v5861_v32  ;;  %9640 = vmatmul.mubr.bf16.vlgmr.msra.gmra.mxu1 %v5861_v32  ;;  %v13172_v32 = vld [vmem:[#allocation14 + $0xac] ss:$12 sps:$4 sm:$0xff]  }
 0xb11   :  { %5948 = vmatpush1.bf16.msra.mxu0 %v13076_v37  ;;  %9644 = vmatpush3.bf16.msra.mxu1 %v13079_v2 }
 0xb12   :  { %5949 = vmatprep.subr.bf16.mxu0 %v13089_v8  ;;  %9645 = vmatprep.subr.bf16.mxu1 %v14062_v34  ;;  %v10374_v26 = vpop.eup %10373 }
 0xb13   :  { %5979 = vmatprep.mubr.bf16.mxu0 %v14063_v25  ;;  %9659 = vmatprep.mubr.msk.bf16.mxu1 %vm11062_vm3, %v14062_v34  ;;  %v5806_v50 = vmul.f32 %v10374_v26, %v5804_v60  ;;  %v13191_v60 = vld [vmem:[#allocation14 + $0x90] ss:$12 sps:$4 sm:$0xff]   ;;  %v13194_v26 = vld [vmem:[#allocation14 + $0x98] ss:$12 sps:$4 sm:$0xff]  }
 0xb15   :  { %5950 = vmatpush1.bf16.msra.mxu0 %v13096_v44  ;;  %9646 = vmatpush3.bf16.msra.mxu1 %v13099_v35  ;;  %v5810_v48 = vadd.f32 %v5808_v12, %v5806_v50  ;;  %v13201_v50 = vld [vmem:[#allocation14 + $0x78] ss:$12 sps:$4 sm:$0xff]   ;;  %v13204_v12 = vld [vmem:[#allocation14 + $0x80] ss:$12 sps:$4 sm:$0xff]  }
 0xb16   :  { %5951 = vmatprep.subr.bf16.mxu0 %v13104_v10  ;;  %9647 = vmatprep.subr.bf16.mxu1 %v14062_v34  ;;  %v10376_v24 = vpop.eup %10375  ;;  %14212 = vst [vmem:[#allocation27_spill] sm:$0xff] %v13201_v50  ;;  %14213 = vst [vmem:[#allocation28_spill] sm:$0xff] %v13204_v12 }
 0xb17   :  { %10381 = vtanh.f32 %v5810_v48  ;;  %v5807_v47 = vmul.f32 %v10376_v24, %v5805_v17  ;;  %v13207_v48 = vld [vmem:[#allocation14 + $0x64] ss:$12 sps:$4 sm:$0xff]   ;;  %v13211_v17 = vld [vmem:[#allocation14 + $0x60] ss:$12 sps:$4 sm:$0xff]   ;;  %v13214_v24 = vld [vmem:[#allocation14 + $0x68] ss:$12 sps:$4 sm:$0xff]  }
 0xb18   :  { %14214 = vst [vmem:[#allocation29_spill] sm:$0xff] %v13207_v48  ;;  %14215 = vst [vmem:[#allocation30_spill] sm:$0xff] %v13211_v17 }
 0xb19   :  { %5952 = vmatpush1.bf16.msra.mxu0 %v13108_v0  ;;  %9648 = vmatpush3.bf16.msra.mxu1 %v13111_v52  ;;  %v5811_v3 = vadd.f32 %v5809_v46, %v5807_v47  ;;  %v10378_v7 = vpop.eup %10377  ;;  %14216 = vst [vmem:[#allocation31_spill] sm:$0xff] %v13214_v24  ;;  %v13217_v47 = vld [vmem:[#allocation14 + $0x4c] ss:$12 sps:$4 sm:$0xff]   ;;  %v13221_v46 = vld [vmem:[#allocation14 + $0x48] ss:$12 sps:$4 sm:$0xff]  }
 0xb1a   :  { %5953 = vmatprep.subr.bf16.mxu0 %v13114_v30  ;;  %9649 = vmatprep.subr.bf16.mxu1 %v14062_v34  ;;  %v10380_v53 = vpop.eup %10379  ;;  %v5814_v22 = vsub.f32 1.0, %v10378_v7  ;;  %v5818_v13 = vmul.f32 %v10378_v7, %v13011_v29  ;;  %14217 = vst [vmem:[#allocation32_spill] sm:$0xff] %v13217_v47  ;;  %14218 = vst [vmem:[#allocation33_spill] sm:$0xff] %v13221_v46  ;;  %v13227_v7 = vld [vmem:[#allocation14 + $0x34] ss:$12 sps:$4 sm:$0xff]  }
 0xb1b   :  { %10383 = vtanh.f32 %v5811_v3  ;;  %v5815_v21 = vsub.f32 1.0, %v10380_v53  ;;  %v5819_v4 = vmul.f32 %v10380_v53, %v13014_v39  ;;  %v13224_v3 = vld [vmem:[#allocation14 + $0x50] ss:$12 sps:$4 sm:$0xff]   ;;  %14220 = vst [vmem:[#allocation35_spill] sm:$0xff] %v13227_v7 }
 0xb1c   :  { %14219 = vst [vmem:[#allocation34_spill] sm:$0xff] %v13224_v3  ;;  %v13231_v53 = vld [vmem:[#allocation14 + $0x30] ss:$12 sps:$4 sm:$0xff]  }
 0xb1d   :  { %5954 = vmatpush1.bf16.msra.mxu0 %v13118_v45  ;;  %9650 = vmatpush3.bf16.msra.mxu1 %v13121_v15  ;;  %14221 = vst [vmem:[#allocation36_spill] sm:$0xff] %v13231_v53 }
 0xb1e   :  { %5955 = vmatprep.subr.bf16.mxu0 %v13124_v16  ;;  %9651 = vmatprep.subr.bf16.mxu1 %v14062_v34 }
 0xb21   :  { %5956 = vmatpush1.bf16.msra.mxu0 %v13128_v6  ;;  %9652 = vmatpush3.bf16.msra.mxu1 %v13131_v40 }
 0xb22   :  { %5957 = vmatprep.subr.bf16.mxu0 %v13134_v56  ;;  %9653 = vmatprep.subr.bf16.mxu1 %v14062_v34 }
 0xb24   :  { %v10382_v28 = vpop.eup %10381 }
 0xb25   :  { %5958 = vmatpush1.bf16.msra.mxu0 %v13138_v54  ;;  %9654 = vmatpush3.bf16.msra.mxu1 %v13141_v11  ;;  %v5816_v62 = vmul.f32 %v10382_v28, %v5814_v22  ;;  %v13234_v22 = vld [vmem:[#allocation14 + $0x38] ss:$12 sps:$4 sm:$0xff]   ;;  %v13237_v28 = vld [vmem:[#allocation14 + $0x1c] ss:$12 sps:$4 sm:$0xff]  }
 0xb26   :  { %5959 = vmatprep.subr.bf16.mxu0 %v13144_v43  ;;  %9655 = vmatprep.subr.bf16.mxu1 %v14062_v34  ;;  %14222 = vst [vmem:[#allocation37_spill] sm:$0xff] %v13234_v22  ;;  %14223 = vst [vmem:[#allocation38_spill] sm:$0xff] %v13237_v28 }
 0xb27   :  { %v5820_v58 = vadd.f32 %v5818_v13, %v5816_v62  ;;  %v13241_v62 = vld [vmem:[#allocation14 + $0x18] ss:$12 sps:$4 sm:$0xff]   ;;  %v13244_v13 = vld [vmem:[#allocation14 + $0x20] ss:$12 sps:$4 sm:$0xff]  }
 0xb28   :  { %v10384_v33 = vpop.eup %10383  ;;  %14224 = vst [vmem:[#allocation39_spill] sm:$0xff] %v13241_v62  ;;  %14225 = vst [vmem:[#allocation40_spill] sm:$0xff] %v13244_v13 }
 0xb29   :  { %5960 = vmatpush1.bf16.msra.mxu0 %v13149_v18  ;;  %9656 = vmatpush3.bf16.msra.mxu1 %v13152_v55  ;;  %v5817_v20 = vmul.f32 %v10384_v33, %v5815_v21  ;;  %v13167_v36 = vsel %vm5834_vm13, %v5820_v58, %v13011_v29  ;;  %v5838_v38 = vsel %vm5834_vm13, %v5820_v58, 0.0  ;;  %v13178_v29 = vld [vmem:[#allocation14 + $0xa8] ss:$12 sps:$4 sm:$0xff]   ;;  %v13247_v21 = vld [vmem:[#allocation14 + $0x4] ss:$12 sps:$4 sm:$0xff]  }
 0xb2a   :  { %5961 = vmatprep.subr.bf16.mxu0 %v13156_v5  ;;  %9657 = vmatprep.subr.bf16.mxu1 %v14062_v34  ;;  %14226 = vst [vmem:[#allocation41_spill] sm:$0xff] %v13247_v21  ;;  %v13251_v33 = vld [vmem:[#allocation14] ss:$12 sps:$4 sm:$0xff]   ;;  %v5852_v58 = vld [vmem:[#allocation4 + $0xf0] sm:$0xff] }
 0xb2b   :  { %v5821_v31 = vadd.f32 %v5819_v4, %v5817_v20  ;;  %14227 = vst [vmem:[#allocation42_spill] sm:$0xff] %v13251_v33  ;;  %v13254_v4 = vld [vmem:[#allocation14 + $0x8] ss:$12 sps:$4 sm:$0xff]   ;;  %v13257_v20 = vld [vmem:[#allocation15 + $0xac] ss:$12 sps:$4 sm:$0xff]   ;;  %v6031_v41 = vunpack.c.l.bf16 %v5852_v58 }
 0xb2c   :  { %14228 = vst [vmem:[#allocation43_spill] sm:$0xff] %v13254_v4  ;;  %14229 = vst [vmem:[#allocation44_spill] sm:$0xff] %v13257_v20 }
 0xb2d   :  { %5962 = vmatpush1.bf16.msra.mxu0 %v13160_v19  ;;  %9658 = vmatpush3.bf16.msra.mxu1 %v13163_v59  ;;  %v13170_v27 = vsel %vm5835_vm14, %v5821_v31, %v13014_v39  ;;  %v5839_v9 = vsel %vm5835_vm14, %v5821_v31, 0.0  ;;  %v13181_v39 = vld [vmem:[#allocation14 + $0xb0] ss:$12 sps:$4 sm:$0xff]  }
 0xb2e   :  { %6212 = vmatprep.subr.bf16.mxu0 %v13172_v32  ;;  %9663 = vmatprep.subr.bf16.mxu1 %v14062_v34  ;;  %v8759_v1 = vpack.c.bf16 %v5839_v9, %v5838_v38  ;;  %v5946_v51 = vpack.c.bf16 %v13170_v27, %v13167_v36  ;;  %v5854_v38 = vld [vmem:[#allocation4 + $0xfc] sm:$0xff] }
 0xb30   :  { %8760 = vst [vmem:[#allocation18 + $0x30] sm:$0xff] %v8759_v1   ;;  %5980 = vmatmul.mubr.bf16.vlgmr.msra.gmra.mxu0 %v5946_v51  ;;  %9660 = vmatmul.mubr.bf16.vlgmr.msra.gmra.mxu1 %v5946_v51  ;;  %v6049_v1 = vrot.slane %v5852_v58, 4 }
 0xb31   :  { %6213 = vmatpush1.bf16.msra.mxu0 %v13178_v29  ;;  %9664 = vmatpush3.bf16.msra.mxu1 %v13181_v39 }
 0xb32   :  { %6214 = vmatprep.subr.bf16.mxu0 %v13184_v23  ;;  %9665 = vmatprep.subr.bf16.mxu1 %v14062_v34 }
 0xb33   :  { %6244 = vmatprep.mubr.bf16.mxu0 %v14063_v25  ;;  %9679 = vmatprep.mubr.msk.bf16.mxu1 %vm11062_vm3, %v14062_v34 }
 0xb35   :  { %6215 = vmatpush1.bf16.msra.mxu0 %v13191_v60  ;;  %9666 = vmatpush3.bf16.msra.mxu1 %v13194_v26 }
 0xb36   :  { %6216 = vmatprep.subr.bf16.mxu0 %v13197_v57  ;;  %9667 = vmatprep.subr.bf16.mxu1 %v14062_v34 }
 0xb39   :  { %6217 = vmatpush1.bf16.msra.mxu0 %v13201_v50  ;;  %9668 = vmatpush3.bf16.msra.mxu1 %v13204_v12 }
 0xb3a   :  { %6218 = vmatprep.subr.bf16.mxu0 %v13207_v48  ;;  %9669 = vmatprep.subr.bf16.mxu1 %v14062_v34 }
 0xb3d   :  { %6219 = vmatpush1.bf16.msra.mxu0 %v13211_v17  ;;  %9670 = vmatpush3.bf16.msra.mxu1 %v13214_v24 }
 0xb3e   :  { %6220 = vmatprep.subr.bf16.mxu0 %v13217_v47  ;;  %9671 = vmatprep.subr.bf16.mxu1 %v14062_v34 }
 0xb41   :  { %6221 = vmatpush1.bf16.msra.mxu0 %v13221_v46  ;;  %9672 = vmatpush3.bf16.msra.mxu1 %v13224_v3 }
 0xb42   :  { %6222 = vmatprep.subr.bf16.mxu0 %v13227_v7  ;;  %9673 = vmatprep.subr.bf16.mxu1 %v14062_v34 }
 0xb45   :  { %6223 = vmatpush1.bf16.msra.mxu0 %v13231_v53  ;;  %9674 = vmatpush3.bf16.msra.mxu1 %v13234_v22  ;;  %v6053_v22 = vunpack.c.l.bf16 %v6049_v1 }
 0xb46   :  { %6224 = vmatprep.subr.bf16.mxu0 %v13237_v28  ;;  %9675 = vmatprep.subr.bf16.mxu1 %v14062_v34 }
 0xb49   :  { %6225 = vmatpush1.bf16.msra.mxu0 %v13241_v62  ;;  %9676 = vmatpush3.bf16.msra.mxu1 %v13244_v13  ;;  %v6032_v13 = vunpack.c.l.bf16 %v5854_v38  ;;  %v6050_v62 = vrot.slane %v5854_v38, 4 }
 0xb4a   :  { %6226 = vmatprep.subr.bf16.mxu0 %v13247_v21  ;;  %9677 = vmatprep.subr.bf16.mxu1 %v14062_v34 }
 0xb4b   :  { %v6054_v47 = vunpack.c.l.bf16 %v6050_v62 }
 0xb4d   :  { %6227 = vmatpush1.bf16.msra.mxu0 %v13251_v33  ;;  %9678 = vmatpush3.bf16.msra.mxu1 %v13254_v4 }
 0xb4e   :  { %6297 = vmatprep.subr.bf16.mxu0 %v13257_v20  ;;  %9683 = vmatprep.subr.bf16.mxu1 %v14062_v34 }
 0xbd0   :  { %v5896_v63 = vpop.f32.mrf.mxu0  ;;  %v5939_v31 = vpop.f32.mrf.mxu1 }
 0xbd1   :  { %v6033_v9 = vadd.f32 %v6031_v41, %v5896_v63 }
 0xbd2   :  { %v5898_v51 = vpop.f32.mrf.mxu0  ;;  %v9641_v21 = vpop.f32.mrf.mxu1 }
 0xbd3   :  { %v8397_v33 = vmul.f32 -1.442695, %v6033_v9  ;;  %v6055_v3 = vadd.f32 %v6053_v22, %v5898_v51  ;;  %v5857_v9 = vld [vmem:[#allocation5 + $0x78] sm:$0xff] }
 0xbd4   :  { %v5900_v28 = vpop.f32.mrf.mxu0  ;;  %v5942_v4 = vpop.f32.mrf.mxu1  ;;  %v6116_v22 = vunpack.c.l.bf16 %v5857_v9 }
 0xbd5   :  { %10385 = vpow2.f32 %v8397_v33  ;;  %v6034_v53 = vadd.f32 %v6032_v13, %v5900_v28  ;;  %v8399_v17 = vmul.f32 -1.442695, %v6055_v3 }
 0xbd6   :  { %v5902_v20 = vpop.f32.mrf.mxu0  ;;  %v9642_v7 = vpop.f32.mrf.mxu1 }
 0xbd7   :  { %v8398_v46 = vmul.f32 -1.442695, %v6034_v53  ;;  %v6056_v24 = vadd.f32 %v6054_v47, %v5902_v20  ;;  %v5853_v7 = vld [vmem:[#allocation4 + $0xf8] ss:$12 sps:$4 sm:$0xff]   ;;  %v6069_v53 = vadd.f32 %v13058_v42, %v5939_v31  ;;  %v6134_v20 = vrot.slane %v5857_v9, 4 }
 0xbd8   :  { %v6073_v51 = vunpack.c.l.bf16 %v5853_v7 }
 0xbd9   :  { %10387 = vpow2.f32 %v8398_v46  ;;  %v8400_v41 = vmul.f32 -1.442695, %v6056_v24  ;;  %v6138_v50 = vunpack.c.l.bf16 %v6134_v20 }
 0xbda   :  { %10389 = vpow2.f32 %v8399_v17  ;;  %v5859_v17 = vld [vmem:[#allocation5 + $0x84] sm:$0xff] }
 0xbdb   :  { %10391 = vpow2.f32 %v8400_v41  ;;  %v6135_v48 = vrot.slane %v5859_v17, 4 }
 0xbe2   :  { %v10386_v21 = vpop.eup %10385 }
 0xbe3   :  { %v6041_v58 = vadd.f32 1.0, %v10386_v21 }
 0xbe5   :  { %10393 = vrcp.f32 %v6041_v58 }
 0xbe6   :  { %v10388_v63 = vpop.eup %10387 }
 0xbe7   :  { %v6042_v38 = vadd.f32 1.0, %v10388_v63  ;;  %v10390_v33 = vpop.eup %10389  ;;  %v6117_v63 = vunpack.c.l.bf16 %v5859_v17 }
 0xbe8   :  { %v10392_v28 = vpop.eup %10391  ;;  %v6063_v13 = vadd.f32 1.0, %v10390_v33  ;;  %v6070_v33 = vadd.f32 %v13058_v42, %v5942_v4 }
 0xbe9   :  { %10395 = vrcp.f32 %v6042_v38  ;;  %v6064_v46 = vadd.f32 1.0, %v10392_v28 }
 0xbea   :  { %10397 = vrcp.f32 %v6063_v13 }
 0xbeb   :  { %10399 = vrcp.f32 %v6064_v46 }
 0xbf0   :  { %v5981_v47 = vpop.f32.mrf.mxu0  ;;  %v13262_v3 = vpop.f32.mrf.mxu1 }
 0xbf1   :  { %v6118_v62 = vadd.f32 %v6116_v22, %v5981_v47 }
 0xbf2   :  { %v10394_v24 = vpop.eup %10393  ;;  %v5983_v41 = vpop.f32.mrf.mxu0 }
 0xbf3   :  { %v6071_v1 = vmul.f32 %v10394_v24, %v6069_v53  ;;  %v9661_v21 = vpop.f32.mrf.mxu1  ;;  %v8403_v58 = vmul.f32 -1.442695, %v6118_v62  ;;  %v6074_v53 = vunpack.c.h.bf16 %v5853_v7  ;;  %v6140_v47 = vadd.f32 %v6138_v50, %v5983_v41 }
 0xbf4   :  { %v5985_v31 = vpop.f32.mrf.mxu0 }
 0xbf5   :  { %v6075_v38 = vadd.f32 %v6073_v51, %v6071_v1  ;;  %v13265_v28 = vpop.f32.mrf.mxu1  ;;  %10401 = vpow2.f32 %v8403_v58  ;;  %v6119_v22 = vadd.f32 %v6117_v63, %v5985_v31  ;;  %v6139_v1 = vunpack.c.l.bf16 %v6135_v48 }
 0xbf6   :  { %v10396_v12 = vpop.eup %10395  ;;  %v5987_v62 = vpop.f32.mrf.mxu0  ;;  %v8405_v46 = vmul.f32 -1.442695, %v6140_v47 }
 0xbf7   :  { %10403 = vtanh.f32 %v6075_v38  ;;  %v6072_v9 = vmul.f32 %v10396_v12, %v6070_v33  ;;  %v9662_v13 = vpop.f32.mrf.mxu1  ;;  %v8404_v24 = vmul.f32 -1.442695, %v6119_v22  ;;  %v6141_v4 = vadd.f32 %v6139_v1, %v5987_v62  ;;  %v10398_v42 = vpop.eup %10397 }
 0xbf8   :  { %v10400_v17 = vpop.eup %10399  ;;  %v6079_v20 = vsub.f32 1.0, %v10398_v42  ;;  %v6083_v41 = vmul.f32 %v10398_v42, %v13069_v49  ;;  %v6098_v13 = vpop.permute.xlu1 %6097 }
 0xbf9   :  { %v6076_v21 = vadd.f32 %v6074_v53, %v6072_v9  ;;  %10405 = vpow2.f32 %v8404_v24  ;;  %v8406_v51 = vmul.f32 -1.442695, %v6141_v4  ;;  %v6080_v38 = vsub.f32 1.0, %v10400_v17  ;;  %v6095_v53 = vpop.permute.xlu0 %6094 }
 0xbfa   :  { %v6084_v31 = vmul.f32 %v10400_v17, %v13072_v14  ;;  %vm6099_vm15 = vcmp.eq.s32.totalorder %v6095_v53, 1  ;;  %vm6100_vm1 = vcmp.eq.s32.totalorder %v6098_v13, 1 }
 0xbfb   :  { %10407 = vtanh.f32 %v6076_v21 }
 0xbfc   :  { %10409 = vpow2.f32 %v8405_v46 }
 0xbfd   :  { %10411 = vpow2.f32 %v8406_v51 }
 0xc02   :  { %v10402_v58 = vpop.eup %10401 }
 0xc03   :  { %v6126_v12 = vadd.f32 1.0, %v10402_v58  ;;  %v5858_v58 = vld [vmem:[#allocation5 + $0x80] ss:$12 sps:$4 sm:$0xff]  }
 0xc04   :  { %v10404_v63 = vpop.eup %10403 }
 0xc05   :  { %v6081_v7 = vmul.f32 %v10404_v63, %v6079_v20  ;;  %10413 = vrcp.f32 %v6126_v12  ;;  %v6158_v12 = vunpack.c.l.bf16 %v5858_v58 }
 0xc06   :  { %v10406_v50 = vpop.eup %10405 }
 0xc07   :  { %v6127_v33 = vadd.f32 1.0, %v10406_v50  ;;  %v6085_v9 = vadd.f32 %v6083_v41, %v6081_v7 }
 0xc08   :  { %v10408_v48 = vpop.eup %10407 }
 0xc09   :  { %v6082_v22 = vmul.f32 %v10408_v48, %v6080_v38  ;;  %10415 = vrcp.f32 %v6127_v33  ;;  %v10410_v24 = vpop.eup %10409  ;;  %v13270_v62 = vsel %vm6099_vm15, %v6085_v9, %v13069_v49  ;;  %v6103_v42 = vsel %vm6099_vm15, %v6085_v9, 0.0 }
 0xc0a   :  { %v10412_v51 = vpop.eup %10411  ;;  %v6148_v17 = vadd.f32 1.0, %v10410_v24  ;;  %v6154_v49 = vadd.f32 %v13085_v61, %v13262_v3  ;;  %v6155_v3 = vadd.f32 %v13085_v61, %v13265_v28  ;;  %v6159_v38 = vunpack.c.h.bf16 %v5858_v58 }
 0xc0b   :  { %v6086_v47 = vadd.f32 %v6084_v31, %v6082_v22  ;;  %v6149_v20 = vadd.f32 1.0, %v10412_v51 }
 0xc0c   :  { %10417 = vrcp.f32 %v6148_v17 }
 0xc0d   :  { %v13273_v21 = vsel %vm6100_vm1, %v6086_v47, %v13072_v14  ;;  %v6104_v1 = vsel %vm6100_vm1, %v6086_v47, 0.0  ;;  %10419 = vrcp.f32 %v6149_v20 }
 0xc0e   :  { %v8764_v4 = vpack.c.bf16 %v6104_v1, %v6103_v42  ;;  %v6211_v46 = vpack.c.bf16 %v13273_v21, %v13270_v62 }
 0xc10   :  { %8765 = vst [vmem:[#allocation17 + $0x50] sm:$0xff] %v8764_v4   ;;  %6245 = vmatmul.mubr.bf16.vlgmr.msra.gmra.mxu0 %v6211_v46  ;;  %9680 = vmatmul.mubr.bf16.vlgmr.msra.gmra.mxu1 %v6211_v46  ;;  %v6180_v4 = vpop.permute.xlu0 %6179  ;;  %v6183_v46 = vpop.permute.xlu1 %6182 }
 0xc11   :  { %6298 = vmatpush1.bf16.msra.mxu0 %v13076_v37  ;;  %9684 = vmatpush3.bf16.msra.mxu1 %v13079_v2  ;;  %vm6184_vm2 = vcmp.eq.s32.totalorder %v6180_v4, 1  ;;  %vm6185_vm0 = vcmp.eq.s32.totalorder %v6183_v46, 1 }
 0xc12   :  { %6299 = vmatprep.subr.bf16.mxu0 %v13089_v8  ;;  %9685 = vmatprep.subr.bf16.mxu1 %v14062_v34  ;;  %v10414_v14 = vpop.eup %10413 }
 0xc13   :  { %6329 = vmatprep.mubr.bf16.mxu0 %v14063_v25  ;;  %9699 = vmatprep.mubr.msk.bf16.mxu1 %vm11062_vm3, %v14062_v34  ;;  %v6156_v63 = vmul.f32 %v10414_v14, %v6154_v49 }
 0xc15   :  { %6300 = vmatpush1.bf16.msra.mxu0 %v13096_v44  ;;  %9686 = vmatpush3.bf16.msra.mxu1 %v13099_v35  ;;  %v6160_v7 = vadd.f32 %v6158_v12, %v6156_v63  ;;  %v14232_v12 = vld [vmem:[#allocation29_spill] sm:$0xff] }
 0xc16   :  { %6301 = vmatprep.subr.bf16.mxu0 %v13104_v10  ;;  %9687 = vmatprep.subr.bf16.mxu1 %v14062_v34  ;;  %v10416_v50 = vpop.eup %10415 }
 0xc17   :  { %10421 = vtanh.f32 %v6160_v7  ;;  %v6157_v41 = vmul.f32 %v10416_v50, %v6155_v3  ;;  %v14233_v7 = vld [vmem:[#allocation30_spill] sm:$0xff]  ;;  %v14234_v3 = vld [vmem:[#allocation31_spill] sm:$0xff]  ;;  %v14235_v50 = vld [vmem:[#allocation32_spill] sm:$0xff] }
 0xc19   :  { %6302 = vmatpush1.bf16.msra.mxu0 %v13108_v0  ;;  %9688 = vmatpush3.bf16.msra.mxu1 %v13111_v52  ;;  %v6161_v48 = vadd.f32 %v6159_v38, %v6157_v41  ;;  %v10418_v28 = vpop.eup %10417  ;;  %v14236_v41 = vld [vmem:[#allocation33_spill] sm:$0xff]  ;;  %v14237_v38 = vld [vmem:[#allocation34_spill] sm:$0xff] }
 0xc1a   :  { %6303 = vmatprep.subr.bf16.mxu0 %v13114_v30  ;;  %9689 = vmatprep.subr.bf16.mxu1 %v14062_v34  ;;  %v10420_v33 = vpop.eup %10419  ;;  %v6164_v31 = vsub.f32 1.0, %v10418_v28  ;;  %v6168_v53 = vmul.f32 %v10418_v28, %v13167_v36  ;;  %v14239_v28 = vld [vmem:[#allocation36_spill] sm:$0xff] }
 0xc1b   :  { %10423 = vtanh.f32 %v6161_v48  ;;  %v6165_v13 = vsub.f32 1.0, %v10420_v33  ;;  %v6169_v24 = vmul.f32 %v10420_v33, %v13170_v27  ;;  %v14238_v48 = vld [vmem:[#allocation35_spill] sm:$0xff]  ;;  %v14240_v33 = vld [vmem:[#allocation37_spill] sm:$0xff] }
 0xc1d   :  { %6304 = vmatpush1.bf16.msra.mxu0 %v13118_v45  ;;  %9690 = vmatpush3.bf16.msra.mxu1 %v13121_v15 }
 0xc1e   :  { %6305 = vmatprep.subr.bf16.mxu0 %v13124_v16  ;;  %9691 = vmatprep.subr.bf16.mxu1 %v14062_v34 }
 0xc21   :  { %6306 = vmatpush1.bf16.msra.mxu0 %v13128_v6  ;;  %9692 = vmatpush3.bf16.msra.mxu1 %v13131_v40 }
 0xc22   :  { %6307 = vmatprep.subr.bf16.mxu0 %v13134_v56  ;;  %9693 = vmatprep.subr.bf16.mxu1 %v14062_v34 }
 0xc24   :  { %v10422_v22 = vpop.eup %10421 }
 0xc25   :  { %6308 = vmatpush1.bf16.msra.mxu0 %v13138_v54  ;;  %9694 = vmatpush3.bf16.msra.mxu1 %v13141_v11  ;;  %v6166_v9 = vmul.f32 %v10422_v22, %v6164_v31  ;;  %v14241_v31 = vld [vmem:[#allocation38_spill] sm:$0xff]  ;;  %v14242_v22 = vld [vmem:[#allocation39_spill] sm:$0xff] }
 0xc26   :  { %6309 = vmatprep.subr.bf16.mxu0 %v13144_v43  ;;  %9695 = vmatprep.subr.bf16.mxu1 %v14062_v34 }
 0xc27   :  { %v6170_v1 = vadd.f32 %v6168_v53, %v6166_v9  ;;  %v14243_v9 = vld [vmem:[#allocation40_spill] sm:$0xff]  ;;  %v14244_v53 = vld [vmem:[#allocation41_spill] sm:$0xff] }
 0xc28   :  { %v10424_v47 = vpop.eup %10423 }
 0xc29   :  { %6310 = vmatpush1.bf16.msra.mxu0 %v13149_v18  ;;  %9696 = vmatpush3.bf16.msra.mxu1 %v13152_v55  ;;  %v6167_v42 = vmul.f32 %v10424_v47, %v6165_v13  ;;  %v13317_v17 = vsel %vm6184_vm2, %v6170_v1, %v13167_v36  ;;  %v6188_v49 = vsel %vm6184_vm2, %v6170_v1, 0.0  ;;  %v14230_v36 = vld [vmem:[#allocation27_spill] sm:$0xff]  ;;  %v14245_v13 = vld [vmem:[#allocation42_spill] sm:$0xff] }
 0xc2a   :  { %6311 = vmatprep.subr.bf16.mxu0 %v13156_v5  ;;  %9697 = vmatprep.subr.bf16.mxu1 %v14062_v34  ;;  %v14246_v47 = vld [vmem:[#allocation43_spill] sm:$0xff] }
 0xc2b   :  { %v6171_v51 = vadd.f32 %v6169_v24, %v6167_v42  ;;  %v14247_v24 = vld [vmem:[#allocation44_spill] sm:$0xff] }
 0xc2c   :  { %v6202_v42 = vld [vmem:[#allocation4 + $0x108] sm:$0xff] }
 0xc2d   :  { %6312 = vmatpush1.bf16.msra.mxu0 %v13160_v19  ;;  %9698 = vmatpush3.bf16.msra.mxu1 %v13163_v59  ;;  %v13320_v58 = vsel %vm6185_vm0, %v6171_v51, %v13170_v27  ;;  %v6189_v14 = vsel %vm6185_vm0, %v6171_v51, 0.0  ;;  %v14231_v27 = vld [vmem:[#allocation28_spill] sm:$0xff]  ;;  %v6381_v1 = vunpack.c.l.bf16 %v6202_v42  ;;  %v6204_v51 = vld [vmem:[#allocation4 + $0x114] sm:$0xff] }
 0xc2e   :  { %6562 = vmatprep.subr.bf16.mxu0 %v13172_v32  ;;  %9703 = vmatprep.subr.bf16.mxu1 %v14062_v34  ;;  %v8769_v20 = vpack.c.bf16 %v6189_v14, %v6188_v49  ;;  %v6296_v63 = vpack.c.bf16 %v13320_v58, %v13317_v17  ;;  %v6399_v14 = vrot.slane %v6202_v42, 4 }
 0xc30   :  { %8770 = vst [vmem:[#allocation18 + $0x28] sm:$0xff] %v8769_v20   ;;  %6330 = vmatmul.mubr.bf16.vlgmr.msra.gmra.mxu0 %v6296_v63  ;;  %9700 = vmatmul.mubr.bf16.vlgmr.msra.gmra.mxu1 %v6296_v63 }
 0xc31   :  { %6563 = vmatpush1.bf16.msra.mxu0 %v13178_v29  ;;  %9704 = vmatpush3.bf16.msra.mxu1 %v13181_v39 }
 0xc32   :  { %6564 = vmatprep.subr.bf16.mxu0 %v13184_v23  ;;  %9705 = vmatprep.subr.bf16.mxu1 %v14062_v34 }
 0xc33   :  { %6594 = vmatprep.mubr.bf16.mxu0 %v14063_v25  ;;  %9719 = vmatprep.mubr.msk.bf16.mxu1 %vm11062_vm3, %v14062_v34 }
 0xc35   :  { %6565 = vmatpush1.bf16.msra.mxu0 %v13191_v60  ;;  %9706 = vmatpush3.bf16.msra.mxu1 %v13194_v26 }
 0xc36   :  { %6566 = vmatprep.subr.bf16.mxu0 %v13197_v57  ;;  %9707 = vmatprep.subr.bf16.mxu1 %v14062_v34 }
 0xc39   :  { %6567 = vmatpush1.bf16.msra.mxu0 %v14230_v36  ;;  %9708 = vmatpush3.bf16.msra.mxu1 %v14231_v27 }
 0xc3a   :  { %6568 = vmatprep.subr.bf16.mxu0 %v14232_v12  ;;  %9709 = vmatprep.subr.bf16.mxu1 %v14062_v34 }
 0xc3d   :  { %6569 = vmatpush1.bf16.msra.mxu0 %v14233_v7  ;;  %9710 = vmatpush3.bf16.msra.mxu1 %v14234_v3 }
 0xc3e   :  { %6570 = vmatprep.subr.bf16.mxu0 %v14235_v50  ;;  %9711 = vmatprep.subr.bf16.mxu1 %v14062_v34 }
 0xc41   :  { %6571 = vmatpush1.bf16.msra.mxu0 %v14236_v41  ;;  %9712 = vmatpush3.bf16.msra.mxu1 %v14237_v38 }
 0xc42   :  { %6572 = vmatprep.subr.bf16.mxu0 %v14238_v48  ;;  %9713 = vmatprep.subr.bf16.mxu1 %v14062_v34 }
 0xc45   :  { %6573 = vmatpush1.bf16.msra.mxu0 %v14239_v28  ;;  %9714 = vmatpush3.bf16.msra.mxu1 %v14240_v33 }
 0xc46   :  { %6574 = vmatprep.subr.bf16.mxu0 %v14241_v31  ;;  %9715 = vmatprep.subr.bf16.mxu1 %v14062_v34 }
 0xc49   :  { %6575 = vmatpush1.bf16.msra.mxu0 %v14242_v22  ;;  %9716 = vmatpush3.bf16.msra.mxu1 %v14243_v9  ;;  %v6382_v9 = vunpack.c.l.bf16 %v6204_v51  ;;  %v6400_v22 = vrot.slane %v6204_v51, 4 }
 0xc4a   :  { %6576 = vmatprep.subr.bf16.mxu0 %v14244_v53  ;;  %9717 = vmatprep.subr.bf16.mxu1 %v14062_v34 }
 0xc4b   :  { %v6404_v41 = vunpack.c.l.bf16 %v6400_v22 }
 0xc4d   :  { %6577 = vmatpush1.bf16.msra.mxu0 %v14245_v13  ;;  %9718 = vmatpush3.bf16.msra.mxu1 %v14246_v47  ;;  %v6403_v47 = vunpack.c.l.bf16 %v6399_v14  ;;  %v6207_v14 = vld [vmem:[#allocation5 + $0x60] sm:$0xff] }
 0xc4e   :  { %6647 = vmatprep.subr.bf16.mxu0 %v14247_v24  ;;  %9723 = vmatprep.subr.bf16.mxu1 %v14062_v34 }
 0xcd0   :  { %v6246_v4 = vpop.f32.mrf.mxu0  ;;  %v6289_v46 = vpop.f32.mrf.mxu1 }
 0xcd1   :  { %v6383_v49 = vadd.f32 %v6381_v1, %v6246_v4 }
 0xcd2   :  { %v6248_v20 = vpop.f32.mrf.mxu0  ;;  %v9681_v63 = vpop.f32.mrf.mxu1 }
 0xcd3   :  { %v8409_v53 = vmul.f32 -1.442695, %v6383_v49  ;;  %v6405_v48 = vadd.f32 %v6403_v47, %v6248_v20  ;;  %v6466_v47 = vunpack.c.l.bf16 %v6207_v14  ;;  %v6484_v20 = vrot.slane %v6207_v14, 4 }
 0xcd4   :  { %v6250_v31 = vpop.f32.mrf.mxu0  ;;  %v6292_v13 = vpop.f32.mrf.mxu1 }
 0xcd5   :  { %10425 = vpow2.f32 %v8409_v53  ;;  %v6384_v33 = vadd.f32 %v6382_v9, %v6250_v31  ;;  %v8411_v3 = vmul.f32 -1.442695, %v6405_v48  ;;  %v6488_v36 = vunpack.c.l.bf16 %v6484_v20 }
 0xcd6   :  { %v6252_v24 = vpop.f32.mrf.mxu0  ;;  %v9682_v28 = vpop.f32.mrf.mxu1 }
 0xcd7   :  { %v8410_v38 = vmul.f32 -1.442695, %v6384_v33  ;;  %v6406_v50 = vadd.f32 %v6404_v41, %v6252_v24  ;;  %v6203_v28 = vld [vmem:[#allocation4 + $0x110] ss:$12 sps:$4 sm:$0xff]  }
 0xcd8   :  { %v14248_v33 = vld [vmem:[#allocation26_spill] sm:$0xff] }
 0xcd9   :  { %10427 = vpow2.f32 %v8410_v38  ;;  %v8412_v1 = vmul.f32 -1.442695, %v6406_v50  ;;  %v6419_v22 = vadd.f32 %v14248_v33, %v6289_v46  ;;  %v6420_v7 = vadd.f32 %v14248_v33, %v6292_v13 }
 0xcda   :  { %10429 = vpow2.f32 %v8411_v3  ;;  %v6209_v3 = vld [vmem:[#allocation5 + $0x6c] sm:$0xff] }
 0xcdb   :  { %10431 = vpow2.f32 %v8412_v1  ;;  %v6423_v1 = vunpack.c.l.bf16 %v6203_v28  ;;  %v6485_v12 = vrot.slane %v6209_v3, 4 }
 0xce2   :  { %v10426_v42 = vpop.eup %10425 }
 0xce3   :  { %v6391_v4 = vadd.f32 1.0, %v10426_v42 }
 0xce5   :  { %10433 = vrcp.f32 %v6391_v4 }
 0xce6   :  { %v10428_v51 = vpop.eup %10427 }
 0xce7   :  { %v6392_v49 = vadd.f32 1.0, %v10428_v51  ;;  %v10430_v53 = vpop.eup %10429 }
 0xce8   :  { %v10432_v31 = vpop.eup %10431  ;;  %v6413_v9 = vadd.f32 1.0, %v10430_v53 }
 0xce9   :  { %10435 = vrcp.f32 %v6392_v49  ;;  %v6414_v38 = vadd.f32 1.0, %v10432_v31  ;;  %v6467_v49 = vunpack.c.l.bf16 %v6209_v3 }
 0xcea   :  { %10437 = vrcp.f32 %v6413_v9 }
 0xceb   :  { %10439 = vrcp.f32 %v6414_v38 }
 0xcf0   :  { %v6331_v41 = vpop.f32.mrf.mxu0  ;;  %v13362_v48 = vpop.f32.mrf.mxu1 }
 0xcf1   :  { %v6468_v24 = vadd.f32 %v6466_v47, %v6331_v41 }
 0xcf2   :  { %v10434_v50 = vpop.eup %10433  ;;  %v6333_v42 = vpop.f32.mrf.mxu0 }
 0xcf3   :  { %v6421_v63 = vmul.f32 %v10434_v50, %v6419_v22  ;;  %v9701_v4 = vpop.f32.mrf.mxu1  ;;  %v8415_v51 = vmul.f32 -1.442695, %v6468_v24  ;;  %v6424_v22 = vunpack.c.h.bf16 %v6203_v28  ;;  %v6490_v41 = vadd.f32 %v6488_v36, %v6333_v42 }
 0xcf4   :  { %v6335_v46 = vpop.f32.mrf.mxu0 }
 0xcf5   :  { %v6425_v53 = vadd.f32 %v6423_v1, %v6421_v63  ;;  %v13365_v31 = vpop.f32.mrf.mxu1  ;;  %10441 = vpow2.f32 %v8415_v51  ;;  %v6469_v47 = vadd.f32 %v6467_v49, %v6335_v46  ;;  %v6489_v63 = vunpack.c.l.bf16 %v6485_v12 }
 0xcf6   :  { %v10436_v27 = vpop.eup %10435  ;;  %v6337_v24 = vpop.f32.mrf.mxu0  ;;  %v8417_v33 = vmul.f32 -1.442695, %v6490_v41 }
 0xcf7   :  { %10443 = vtanh.f32 %v6425_v53  ;;  %v6422_v14 = vmul.f32 %v10436_v27, %v6420_v7  ;;  %v9702_v9 = vpop.f32.mrf.mxu1  ;;  %v8416_v50 = vmul.f32 -1.442695, %v6469_v47  ;;  %v6491_v13 = vadd.f32 %v6489_v63, %v6337_v24  ;;  %v10438_v1 = vpop.eup %10437 }
 0xcf8   :  { %v10440_v3 = vpop.eup %10439  ;;  %v6429_v20 = vsub.f32 1.0, %v10438_v1  ;;  %v6433_v28 = vmul.f32 %v10438_v1, %v13270_v62  ;;  %v6448_v9 = vpop.permute.xlu1 %6447 }
 0xcf9   :  { %v6426_v4 = vadd.f32 %v6424_v22, %v6422_v14  ;;  %10445 = vpow2.f32 %v8416_v50  ;;  %v8418_v38 = vmul.f32 -1.442695, %v6491_v13  ;;  %v6430_v42 = vsub.f32 1.0, %v10440_v3  ;;  %v6445_v22 = vpop.permute.xlu0 %6444 }
 0xcfa   :  { %v6434_v46 = vmul.f32 %v10440_v3, %v13273_v21  ;;  %vm6449_vm4 = vcmp.eq.s32.totalorder %v6445_v22, 1  ;;  %vm6450_vm5 = vcmp.eq.s32.totalorder %v6448_v9, 1  ;;  %v6552_v22 = vld [vmem:[#allocation4 + $0x120] sm:$0xff] }
 0xcfb   :  { %10447 = vtanh.f32 %v6426_v4  ;;  %v6731_v9 = vunpack.c.l.bf16 %v6552_v22 }
 0xcfc   :  { %10449 = vpow2.f32 %v8417_v33 }
 0xcfd   :  { %10451 = vpow2.f32 %v8418_v38 }
 0xd02   :  { %v10442_v51 = vpop.eup %10441 }
 0xd03   :  { %v6476_v27 = vadd.f32 1.0, %v10442_v51  ;;  %v6208_v51 = vld [vmem:[#allocation5 + $0x68] ss:$12 sps:$4 sm:$0xff]  }
 0xd04   :  { %v10444_v49 = vpop.eup %10443 }
 0xd05   :  { %v6431_v7 = vmul.f32 %v10444_v49, %v6429_v20  ;;  %10453 = vrcp.f32 %v6476_v27  ;;  %v6508_v27 = vunpack.c.l.bf16 %v6208_v51 }
 0xd06   :  { %v10446_v36 = vpop.eup %10445 }
 0xd07   :  { %v6477_v53 = vadd.f32 1.0, %v10446_v36  ;;  %v6435_v14 = vadd.f32 %v6433_v28, %v6431_v7  ;;  %v6509_v7 = vunpack.c.h.bf16 %v6208_v51  ;;  %v14260_v28 = vld [vmem:[#allocation38_spill] sm:$0xff] }
 0xd08   :  { %v10448_v12 = vpop.eup %10447 }
 0xd09   :  { %v6432_v47 = vmul.f32 %v10448_v12, %v6430_v42  ;;  %10455 = vrcp.f32 %v6477_v53  ;;  %v10450_v50 = vpop.eup %10449  ;;  %v13370_v24 = vsel %vm6449_vm4, %v6435_v14, %v13270_v62  ;;  %v6453_v63 = vsel %vm6449_vm4, %v6435_v14, 0.0  ;;  %v14261_v42 = vld [vmem:[#allocation39_spill] sm:$0xff]  ;;  %v14262_v12 = vld [vmem:[#allocation40_spill] sm:$0xff]  ;;  %v14263_v53 = vld [vmem:[#allocation41_spill] sm:$0xff] }
 0xd0a   :  { %v10452_v1 = vpop.eup %10451  ;;  %v6498_v3 = vadd.f32 1.0, %v10450_v50  ;;  %v6504_v62 = vadd.f32 %v13085_v61, %v13362_v48  ;;  %v14266_v14 = vld [vmem:[#allocation44_spill] sm:$0xff] }
 0xd0b   :  { %v6436_v41 = vadd.f32 %v6434_v46, %v6432_v47  ;;  %v6499_v20 = vadd.f32 1.0, %v10452_v1  ;;  %v14264_v46 = vld [vmem:[#allocation42_spill] sm:$0xff]  ;;  %v14265_v47 = vld [vmem:[#allocation43_spill] sm:$0xff] }
 0xd0c   :  { %10457 = vrcp.f32 %v6498_v3 }
 0xd0d   :  { %v13373_v4 = vsel %vm6450_vm5, %v6436_v41, %v13273_v21  ;;  %v6454_v13 = vsel %vm6450_vm5, %v6436_v41, 0.0  ;;  %10459 = vrcp.f32 %v6499_v20 }
 0xd0e   :  { %v8774_v33 = vpack.c.bf16 %v6454_v13, %v6453_v63  ;;  %v6561_v38 = vpack.c.bf16 %v13373_v4, %v13370_v24  ;;  %v6554_v63 = vld [vmem:[#allocation4 + $0x12c] sm:$0xff] }
 0xd0f   :  { %v6732_v51 = vunpack.c.l.bf16 %v6554_v63 }
 0xd10   :  { %8775 = vst [vmem:[#allocation17 + $0x58] sm:$0xff] %v8774_v33   ;;  %6595 = vmatmul.mubr.bf16.vlgmr.msra.gmra.mxu0 %v6561_v38  ;;  %9720 = vmatmul.mubr.bf16.vlgmr.msra.gmra.mxu1 %v6561_v38  ;;  %v6749_v33 = vrot.slane %v6552_v22, 4 }
 0xd11   :  { %6648 = vmatpush1.bf16.msra.mxu0 %v13076_v37  ;;  %9724 = vmatpush3.bf16.msra.mxu1 %v13079_v2  ;;  %v6505_v2 = vadd.f32 %v13085_v61, %v13365_v31 }
 0xd12   :  { %6649 = vmatprep.subr.bf16.mxu0 %v13089_v8  ;;  %9725 = vmatprep.subr.bf16.mxu1 %v14062_v34  ;;  %v10454_v21 = vpop.eup %10453 }
 0xd13   :  { %6679 = vmatprep.mubr.bf16.mxu0 %v14063_v25  ;;  %9739 = vmatprep.mubr.msk.bf16.mxu1 %vm11062_vm3, %v14062_v34  ;;  %v6506_v49 = vmul.f32 %v10454_v21, %v6504_v62  ;;  %v6750_v62 = vrot.slane %v6554_v63, 4 }
 0xd15   :  { %6650 = vmatpush1.bf16.msra.mxu0 %v13096_v44  ;;  %9726 = vmatpush3.bf16.msra.mxu1 %v13099_v35  ;;  %v6510_v37 = vadd.f32 %v6508_v27, %v6506_v49  ;;  %v6753_v49 = vunpack.c.l.bf16 %v6749_v33 }
 0xd16   :  { %6651 = vmatprep.subr.bf16.mxu0 %v13104_v10  ;;  %9727 = vmatprep.subr.bf16.mxu1 %v14062_v34  ;;  %v10456_v8 = vpop.eup %10455 }
 0xd17   :  { %10461 = vtanh.f32 %v6510_v37  ;;  %v6507_v48 = vmul.f32 %v10456_v8, %v6505_v2 }
 0xd19   :  { %6652 = vmatpush1.bf16.msra.mxu0 %v13108_v0  ;;  %9728 = vmatpush3.bf16.msra.mxu1 %v13111_v52  ;;  %v6511_v44 = vadd.f32 %v6509_v7, %v6507_v48  ;;  %v10458_v61 = vpop.eup %10457  ;;  %v6754_v7 = vunpack.c.l.bf16 %v6750_v62 }
 0xd1a   :  { %6653 = vmatprep.subr.bf16.mxu0 %v13114_v30  ;;  %9729 = vmatprep.subr.bf16.mxu1 %v14062_v34  ;;  %v10460_v35 = vpop.eup %10459  ;;  %v6514_v10 = vsub.f32 1.0, %v10458_v61  ;;  %v6518_v30 = vmul.f32 %v10458_v61, %v13317_v17 }
 0xd1b   :  { %10463 = vtanh.f32 %v6511_v44 }
 0xd1d   :  { %6654 = vmatpush1.bf16.msra.mxu0 %v13118_v45  ;;  %9730 = vmatpush3.bf16.msra.mxu1 %v13121_v15  ;;  %v6515_v45 = vsub.f32 1.0, %v10460_v35 }
 0xd1e   :  { %6655 = vmatprep.subr.bf16.mxu0 %v13124_v16  ;;  %9731 = vmatprep.subr.bf16.mxu1 %v14062_v34  ;;  %v6519_v16 = vmul.f32 %v10460_v35, %v13320_v58 }
 0xd21   :  { %6656 = vmatpush1.bf16.msra.mxu0 %v13128_v6  ;;  %9732 = vmatpush3.bf16.msra.mxu1 %v13131_v40 }
 0xd22   :  { %6657 = vmatprep.subr.bf16.mxu0 %v13134_v56  ;;  %9733 = vmatprep.subr.bf16.mxu1 %v14062_v34  ;;  %v6530_v56 = vpop.permute.xlu0 %6529 }
 0xd23   :  { %vm6534_vm6 = vcmp.eq.s32.totalorder %v6530_v56, 1 }
 0xd24   :  { %v10462_v0 = vpop.eup %10461 }
 0xd25   :  { %6658 = vmatpush1.bf16.msra.mxu0 %v13138_v54  ;;  %9734 = vmatpush3.bf16.msra.mxu1 %v13141_v11  ;;  %v6516_v52 = vmul.f32 %v10462_v0, %v6514_v10  ;;  %v6533_v54 = vpop.permute.xlu1 %6532 }
 0xd26   :  { %6659 = vmatprep.subr.bf16.mxu0 %v13144_v43  ;;  %9735 = vmatprep.subr.bf16.mxu1 %v14062_v34  ;;  %vm6535_vm7 = vcmp.eq.s32.totalorder %v6533_v54, 1  ;;  %v13464_v54 = vld [vmem:[%s13867_s9] ss:$0 sm:$0xff] }
 0xd27   :  { %v6520_v40 = vadd.f32 %v6518_v30, %v6516_v52  ;;  %14267 = vst [vmem:[#allocation26_spill] sm:$0xff] %v13464_v54 }
 0xd28   :  { %v10464_v15 = vpop.eup %10463 }
 0xd29   :  { %6660 = vmatpush1.bf16.msra.mxu0 %v13149_v18  ;;  %9736 = vmatpush3.bf16.msra.mxu1 %v13152_v55  ;;  %v6517_v6 = vmul.f32 %v10464_v15, %v6515_v45  ;;  %v13417_v43 = vsel %vm6534_vm6, %v6520_v40, %v13317_v17  ;;  %v6538_v55 = vsel %vm6534_vm6, %v6520_v40, 0.0  ;;  %v14258_v17 = vld [vmem:[#allocation36_spill] sm:$0xff]  ;;  %v6553_v40 = vld [vmem:[#allocation4 + $0x128] ss:$12 sps:$4 sm:$0xff]  }
 0xd2a   :  { %6661 = vmatprep.subr.bf16.mxu0 %v13156_v5  ;;  %9737 = vmatprep.subr.bf16.mxu1 %v14062_v34  ;;  %v6557_v15 = vld [vmem:[#allocation5 + $0x48] sm:$0xff]  ;;  %v6774_v22 = vunpack.c.h.bf16 %v6553_v40 }
 0xd2b   :  { %v6521_v11 = vadd.f32 %v6519_v16, %v6517_v6  ;;  %v6816_v56 = vunpack.c.l.bf16 %v6557_v15 }
 0xd2d   :  { %6662 = vmatpush1.bf16.msra.mxu0 %v13160_v19  ;;  %9738 = vmatpush3.bf16.msra.mxu1 %v13163_v59  ;;  %v13420_v18 = vsel %vm6535_vm7, %v6521_v11, %v13320_v58  ;;  %v6539_v5 = vsel %vm6535_vm7, %v6521_v11, 0.0  ;;  %v14249_v19 = vld [vmem:[#allocation27_spill] sm:$0xff]  ;;  %v14250_v59 = vld [vmem:[#allocation28_spill] sm:$0xff]  ;;  %v14259_v58 = vld [vmem:[#allocation37_spill] sm:$0xff] }
 0xd2e   :  { %6912 = vmatprep.subr.bf16.mxu0 %v13172_v32  ;;  %9743 = vmatprep.subr.bf16.mxu1 %v14062_v34  ;;  %v8779_v31 = vpack.c.bf16 %v6539_v5, %v6538_v55  ;;  %v6646_v36 = vpack.c.bf16 %v13420_v18, %v13417_v43  ;;  %v14251_v32 = vld [vmem:[#allocation29_spill] sm:$0xff] }
 0xd30   :  { %8780 = vst [vmem:[#allocation18 + $0x20] sm:$0xff] %v8779_v31   ;;  %6680 = vmatmul.mubr.bf16.vlgmr.msra.gmra.mxu0 %v6646_v36  ;;  %9740 = vmatmul.mubr.bf16.vlgmr.msra.gmra.mxu1 %v6646_v36  ;;  %v6559_v36 = vld [vmem:[#allocation5 + $0x54] sm:$0xff] }
 0xd31   :  { %6913 = vmatpush1.bf16.msra.mxu0 %v13178_v29  ;;  %9744 = vmatpush3.bf16.msra.mxu1 %v13181_v39  ;;  %v14252_v29 = vld [vmem:[#allocation30_spill] sm:$0xff]  ;;  %v14253_v39 = vld [vmem:[#allocation31_spill] sm:$0xff] }
 0xd32   :  { %6914 = vmatprep.subr.bf16.mxu0 %v13184_v23  ;;  %9745 = vmatprep.subr.bf16.mxu1 %v14062_v34  ;;  %v14254_v23 = vld [vmem:[#allocation32_spill] sm:$0xff] }
 0xd33   :  { %6944 = vmatprep.mubr.bf16.mxu0 %v14063_v25  ;;  %9759 = vmatprep.mubr.msk.bf16.mxu1 %vm11062_vm3, %v14062_v34 }
 0xd35   :  { %6915 = vmatpush1.bf16.msra.mxu0 %v13191_v60  ;;  %9746 = vmatpush3.bf16.msra.mxu1 %v13194_v26  ;;  %v14255_v60 = vld [vmem:[#allocation33_spill] sm:$0xff]  ;;  %v14256_v26 = vld [vmem:[#allocation34_spill] sm:$0xff] }
 0xd36   :  { %6916 = vmatprep.subr.bf16.mxu0 %v13197_v57  ;;  %9747 = vmatprep.subr.bf16.mxu1 %v14062_v34  ;;  %v14257_v57 = vld [vmem:[#allocation35_spill] sm:$0xff] }
 0xd39   :  { %6917 = vmatpush1.bf16.msra.mxu0 %v14249_v19  ;;  %9748 = vmatpush3.bf16.msra.mxu1 %v14250_v59 }
 0xd3a   :  { %6918 = vmatprep.subr.bf16.mxu0 %v14251_v32  ;;  %9749 = vmatprep.subr.bf16.mxu1 %v14062_v34  ;;  %v6834_v32 = vrot.slane %v6557_v15, 4 }
 0xd3d   :  { %6919 = vmatpush1.bf16.msra.mxu0 %v14252_v29  ;;  %9750 = vmatpush3.bf16.msra.mxu1 %v14253_v39  ;;  %v6773_v39 = vunpack.c.l.bf16 %v6553_v40 }
 0xd3e   :  { %6920 = vmatprep.subr.bf16.mxu0 %v14254_v23  ;;  %9751 = vmatprep.subr.bf16.mxu1 %v14062_v34 }
 0xd41   :  { %6921 = vmatpush1.bf16.msra.mxu0 %v14255_v60  ;;  %9752 = vmatpush3.bf16.msra.mxu1 %v14256_v26 }
 0xd42   :  { %6922 = vmatprep.subr.bf16.mxu0 %v14257_v57  ;;  %9753 = vmatprep.subr.bf16.mxu1 %v14062_v34  ;;  %v6817_v57 = vunpack.c.l.bf16 %v6559_v36 }
 0xd45   :  { %6923 = vmatpush1.bf16.msra.mxu0 %v14258_v17  ;;  %9754 = vmatpush3.bf16.msra.mxu1 %v14259_v58 }
 0xd46   :  { %6924 = vmatprep.subr.bf16.mxu0 %v14260_v28  ;;  %9755 = vmatprep.subr.bf16.mxu1 %v14062_v34 }
 0xd49   :  { %6925 = vmatpush1.bf16.msra.mxu0 %v14261_v42  ;;  %9756 = vmatpush3.bf16.msra.mxu1 %v14262_v12  ;;  %v6835_v12 = vrot.slane %v6559_v36, 4  ;;  %v6558_v36 = vld [vmem:[#allocation5 + $0x50] ss:$12 sps:$4 sm:$0xff]  }
 0xd4a   :  { %6926 = vmatprep.subr.bf16.mxu0 %v14263_v53  ;;  %9757 = vmatprep.subr.bf16.mxu1 %v14062_v34 }
 0xd4b   :  { %v6839_v33 = vunpack.c.l.bf16 %v6835_v12 }
 0xd4d   :  { %6927 = vmatpush1.bf16.msra.mxu0 %v14264_v46  ;;  %9758 = vmatpush3.bf16.msra.mxu1 %v14265_v47  ;;  %v6838_v46 = vunpack.c.l.bf16 %v6834_v32  ;;  %v13495_v32 = vld [vmem:[#allocation15 + $0x94] ss:$12 sps:$4 sm:$0xff]  }
 0xd4e   :  { %6997 = vmatprep.subr.bf16.mxu0 %v14266_v14  ;;  %9763 = vmatprep.subr.bf16.mxu1 %v14062_v34 }
 0xdd0   :  { %v6596_v41 = vpop.f32.mrf.mxu0  ;;  %v6639_v50 = vpop.f32.mrf.mxu1 }
 0xdd1   :  { %v6733_v13 = vadd.f32 %v6731_v9, %v6596_v41  ;;  %v6769_v11 = vadd.f32 %v13464_v54, %v6639_v50 }
 0xdd2   :  { %v6598_v38 = vpop.f32.mrf.mxu0  ;;  %v9721_v1 = vpop.f32.mrf.mxu1 }
 0xdd3   :  { %v8421_v3 = vmul.f32 -1.442695, %v6733_v13  ;;  %v6755_v8 = vadd.f32 %v6753_v49, %v6598_v38 }
 0xdd4   :  { %v6600_v21 = vpop.f32.mrf.mxu0  ;;  %v6642_v20 = vpop.f32.mrf.mxu1 }
 0xdd5   :  { %10465 = vpow2.f32 %v8421_v3  ;;  %v6734_v27 = vadd.f32 %v6732_v51, %v6600_v21  ;;  %v8423_v61 = vmul.f32 -1.442695, %v6755_v8  ;;  %v6770_v58 = vadd.f32 %v13464_v54, %v6642_v20 }
 0xdd6   :  { %v6602_v37 = vpop.f32.mrf.mxu0  ;;  %v9722_v2 = vpop.f32.mrf.mxu1 }
 0xdd7   :  { %v8422_v48 = vmul.f32 -1.442695, %v6734_v27  ;;  %v6756_v44 = vadd.f32 %v6754_v7, %v6602_v37 }
 0xdd9   :  { %10467 = vpow2.f32 %v8422_v48  ;;  %v8424_v35 = vmul.f32 -1.442695, %v6756_v44 }
 0xdda   :  { %10469 = vpow2.f32 %v8423_v61 }
 0xddb   :  { %10471 = vpow2.f32 %v8424_v35 }
 0xde2   :  { %v10466_v10 = vpop.eup %10465 }
 0xde3   :  { %v6741_v0 = vadd.f32 1.0, %v10466_v10 }
 0xde5   :  { %10473 = vrcp.f32 %v6741_v0  ;;  %v6795_v0 = vpop.permute.xlu0 %6794 }
 0xde6   :  { %v10468_v52 = vpop.eup %10467  ;;  %vm6799_vm8 = vcmp.eq.s32.totalorder %v6795_v0, 1 }
 0xde7   :  { %v6742_v30 = vadd.f32 1.0, %v10468_v52  ;;  %v10470_v45 = vpop.eup %10469  ;;  %v6798_v52 = vpop.permute.xlu1 %6797 }
 0xde8   :  { %v10472_v16 = vpop.eup %10471  ;;  %v6763_v6 = vadd.f32 1.0, %v10470_v45  ;;  %vm6800_vm9 = vcmp.eq.s32.totalorder %v6798_v52, 1  ;;  %v13566_v52 = vld [vmem:[#allocation15] ss:$12 sps:$4 sm:$0xff]  }
 0xde9   :  { %10475 = vrcp.f32 %v6742_v30  ;;  %v6764_v55 = vadd.f32 1.0, %v10472_v16 }
 0xdea   :  { %10477 = vrcp.f32 %v6763_v6 }
 0xdeb   :  { %10479 = vrcp.f32 %v6764_v55 }
 0xdf0   :  { %v6681_v5 = vpop.f32.mrf.mxu0  ;;  %v13467_v31 = vpop.f32.mrf.mxu1 }
 0xdf1   :  { %v6818_v59 = vadd.f32 %v6816_v56, %v6681_v5 }
 0xdf2   :  { %v10474_v19 = vpop.eup %10473  ;;  %v6683_v23 = vpop.f32.mrf.mxu0 }
 0xdf3   :  { %v6771_v29 = vmul.f32 %v10474_v19, %v6769_v11  ;;  %v9741_v60 = vpop.f32.mrf.mxu1  ;;  %v8427_v26 = vmul.f32 -1.442695, %v6818_v59  ;;  %v6840_v41 = vadd.f32 %v6838_v46, %v6683_v23  ;;  %v13482_v19 = vld [vmem:[#allocation15 + $0xa8] ss:$12 sps:$4 sm:$0xff]   ;;  %v13514_v46 = vld [vmem:[#allocation15 + $0x78] ss:$12 sps:$4 sm:$0xff]  }
 0xdf4   :  { %v6685_v28 = vpop.f32.mrf.mxu0  ;;  %v6858_v60 = vunpack.c.l.bf16 %v6558_v36 }
 0xdf5   :  { %v6775_v17 = vadd.f32 %v6773_v39, %v6771_v29  ;;  %v13470_v42 = vpop.f32.mrf.mxu1  ;;  %10481 = vpow2.f32 %v8427_v26  ;;  %v6819_v47 = vadd.f32 %v6817_v57, %v6685_v28  ;;  %v8429_v1 = vmul.f32 -1.442695, %v6840_v41  ;;  %v13502_v26 = vld [vmem:[#allocation15 + $0x90] ss:$12 sps:$4 sm:$0xff]   ;;  %v13530_v41 = vld [vmem:[#allocation15 + $0x4c] ss:$12 sps:$4 sm:$0xff]  }
 0xdf6   :  { %v10476_v53 = vpop.eup %10475  ;;  %v6687_v63 = vpop.f32.mrf.mxu0 }
 0xdf7   :  { %10483 = vtanh.f32 %v6775_v17  ;;  %v6772_v14 = vmul.f32 %v10476_v53, %v6770_v58  ;;  %v9742_v9 = vpop.f32.mrf.mxu1  ;;  %v8428_v50 = vmul.f32 -1.442695, %v6819_v47  ;;  %v6841_v38 = vadd.f32 %v6839_v33, %v6687_v63  ;;  %v10478_v51 = vpop.eup %10477  ;;  %v13510_v58 = vld [vmem:[#allocation15 + $0x7c] ss:$12 sps:$4 sm:$0xff]   ;;  %v13517_v47 = vld [vmem:[#allocation15 + $0x80] ss:$12 sps:$4 sm:$0xff]  }
 0xdf8   :  { %v10480_v62 = vpop.eup %10479  ;;  %v6779_v20 = vsub.f32 1.0, %v10478_v51  ;;  %v6783_v8 = vmul.f32 %v10478_v51, %v13370_v24  ;;  %v6859_v53 = vunpack.c.h.bf16 %v6558_v36  ;;  %v13527_v9 = vld [vmem:[#allocation15 + $0x68] ss:$12 sps:$4 sm:$0xff]   ;;  %v13544_v51 = vld [vmem:[#allocation15 + $0x30] ss:$12 sps:$4 sm:$0xff]  }
 0xdf9   :  { %v6776_v13 = vadd.f32 %v6774_v22, %v6772_v14  ;;  %10485 = vpow2.f32 %v8428_v50  ;;  %v8430_v3 = vmul.f32 -1.442695, %v6841_v38  ;;  %v6780_v48 = vsub.f32 1.0, %v10480_v62  ;;  %v13520_v14 = vld [vmem:[#allocation15 + $0x64] ss:$12 sps:$4 sm:$0xff]  }
 0xdfa   :  { %v6784_v61 = vmul.f32 %v10480_v62, %v13373_v4  ;;  %v13524_v22 = vld [vmem:[#allocation15 + $0x60] ss:$12 sps:$4 sm:$0xff]   ;;  %v13534_v63 = vld [vmem:[#allocation15 + $0x48] ss:$12 sps:$4 sm:$0xff]   ;;  %v13547_v62 = vld [vmem:[#allocation15 + $0x38] ss:$12 sps:$4 sm:$0xff]  }
 0xdfb   :  { %10487 = vtanh.f32 %v6776_v13  ;;  %v13537_v13 = vld [vmem:[#allocation15 + $0x50] ss:$12 sps:$4 sm:$0xff]   ;;  %v13540_v33 = vld [vmem:[#allocation15 + $0x34] ss:$12 sps:$4 sm:$0xff]  }
 0xdfc   :  { %10489 = vpow2.f32 %v8429_v1  ;;  %v13590_v36 = vld [vmem:[#allocation14 + $0x94] ss:$12 sps:$4 sm:$0xff]  }
 0xdfd   :  { %10491 = vpow2.f32 %v8430_v3 }
 0xe02   :  { %v10482_v21 = vpop.eup %10481 }
 0xe03   :  { %v6826_v27 = vadd.f32 1.0, %v10482_v21  ;;  %v13550_v21 = vld [vmem:[#allocation15 + $0x1c] ss:$12 sps:$4 sm:$0xff]  }
 0xe04   :  { %v10484_v49 = vpop.eup %10483 }
 0xe05   :  { %v6781_v37 = vmul.f32 %v10484_v49, %v6779_v20  ;;  %10493 = vrcp.f32 %v6826_v27 }
 0xe06   :  { %v10486_v2 = vpop.eup %10485 }
 0xe07   :  { %v6827_v44 = vadd.f32 1.0, %v10486_v2  ;;  %v6785_v10 = vadd.f32 %v6783_v8, %v6781_v37  ;;  %v13555_v2 = vld [vmem:[#allocation15 + $0x18] ss:$12 sps:$4 sm:$0xff]   ;;  %v13558_v8 = vld [vmem:[#allocation15 + $0x20] ss:$12 sps:$4 sm:$0xff]  }
 0xe08   :  { %v10488_v7 = vpop.eup %10487 }
 0xe09   :  { %v6782_v35 = vmul.f32 %v10488_v7, %v6780_v48  ;;  %10495 = vrcp.f32 %v6827_v44  ;;  %v10490_v45 = vpop.eup %10489  ;;  %v13475_v15 = vsel %vm6799_vm8, %v6785_v10, %v13370_v24  ;;  %v6803_v6 = vsel %vm6799_vm8, %v6785_v10, 0.0  ;;  %v13485_v24 = vld [vmem:[#allocation15 + $0xb0] ss:$12 sps:$4 sm:$0xff]   ;;  %v6883_v10 = vpop.permute.xlu1 %6882 }
 0xe0a   :  { %v10492_v55 = vpop.eup %10491  ;;  %v6848_v5 = vadd.f32 1.0, %v10490_v45  ;;  %v13562_v7 = vld [vmem:[#allocation15 + $0x4] ss:$12 sps:$4 sm:$0xff]   ;;  %vm6885_vm11 = vcmp.eq.s32.totalorder %v6883_v10, 1 }
 0xe0b   :  { %v6786_v30 = vadd.f32 %v6784_v61, %v6782_v35  ;;  %v6849_v39 = vadd.f32 1.0, %v10492_v55  ;;  %v6880_v35 = vpop.permute.xlu0 %6879 }
 0xe0c   :  { %10497 = vrcp.f32 %v6848_v5  ;;  %vm6884_vm10 = vcmp.eq.s32.totalorder %v6880_v35, 1 }
 0xe0d   :  { %v13478_v16 = vsel %vm6800_vm9, %v6786_v30, %v13373_v4  ;;  %v6804_v40 = vsel %vm6800_vm9, %v6786_v30, 0.0  ;;  %v13491_v4 = vld [vmem:[%s13868_s10] ss:$0 sm:$0xff]  ;;  %10499 = vrcp.f32 %v6849_v39  ;;  %v13569_v30 = vld [vmem:[#allocation15 + $0x8] ss:$12 sps:$4 sm:$0xff]  }
 0xe0e   :  { %v8784_v56 = vpack.c.bf16 %v6804_v40, %v6803_v6  ;;  %v6911_v11 = vpack.c.bf16 %v13478_v16, %v13475_v15  ;;  %v6854_v59 = vadd.f32 %v13491_v4, %v13467_v31  ;;  %v13505_v31 = vld [vmem:[#allocation15 + $0x98] ss:$12 sps:$4 sm:$0xff]   ;;  %v6855_v17 = vadd.f32 %v13491_v4, %v13470_v42  ;;  %v13603_v39 = vld [vmem:[#allocation14 + $0x7c] ss:$12 sps:$4 sm:$0xff]  }
 0xe10   :  { %8785 = vst [vmem:[#allocation17 + $0x60] sm:$0xff] %v8784_v56   ;;  %6945 = vmatmul.mubr.bf16.vlgmr.msra.gmra.mxu0 %v6911_v11  ;;  %9760 = vmatmul.mubr.bf16.vlgmr.msra.gmra.mxu1 %v6911_v11  ;;  %v13578_v11 = vld [vmem:[#allocation14 + $0xac] ss:$12 sps:$4 sm:$0xff]  }
 0xe11   :  { %6998 = vmatpush1.bf16.msra.mxu0 %v13482_v19  ;;  %9764 = vmatpush3.bf16.msra.mxu1 %v13485_v24 }
 0xe12   :  { %6999 = vmatprep.subr.bf16.mxu0 %v13495_v32  ;;  %9765 = vmatprep.subr.bf16.mxu1 %v14062_v34  ;;  %v10494_v29 = vpop.eup %10493 }
 0xe13   :  { %7029 = vmatprep.mubr.bf16.mxu0 %v14063_v25  ;;  %9779 = vmatprep.mubr.msk.bf16.mxu1 %vm11062_vm3, %v14062_v34  ;;  %v6856_v23 = vmul.f32 %v10494_v29, %v6854_v59  ;;  %v13597_v59 = vld [vmem:[#allocation14 + $0x90] ss:$12 sps:$4 sm:$0xff]   ;;  %v13600_v29 = vld [vmem:[#allocation14 + $0x98] ss:$12 sps:$4 sm:$0xff]  }
 0xe15   :  { %7000 = vmatpush1.bf16.msra.mxu0 %v13502_v26  ;;  %9766 = vmatpush3.bf16.msra.mxu1 %v13505_v31  ;;  %v6860_v57 = vadd.f32 %v6858_v60, %v6856_v23  ;;  %v13607_v23 = vld [vmem:[#allocation14 + $0x78] ss:$12 sps:$4 sm:$0xff]   ;;  %v13610_v60 = vld [vmem:[#allocation14 + $0x80] ss:$12 sps:$4 sm:$0xff]  }
 0xe16   :  { %7001 = vmatprep.subr.bf16.mxu0 %v13510_v58  ;;  %9767 = vmatprep.subr.bf16.mxu1 %v14062_v34  ;;  %v10496_v28 = vpop.eup %10495  ;;  %14268 = vst [vmem:[#allocation27_spill] sm:$0xff] %v13607_v23  ;;  %14269 = vst [vmem:[#allocation28_spill] sm:$0xff] %v13610_v60 }
 0xe17   :  { %10501 = vtanh.f32 %v6860_v57  ;;  %v6857_v12 = vmul.f32 %v10496_v28, %v6855_v17  ;;  %v13613_v57 = vld [vmem:[#allocation14 + $0x64] ss:$12 sps:$4 sm:$0xff]   ;;  %v13617_v17 = vld [vmem:[#allocation14 + $0x60] ss:$12 sps:$4 sm:$0xff]   ;;  %v13620_v28 = vld [vmem:[#allocation14 + $0x68] ss:$12 sps:$4 sm:$0xff]  }
 0xe18   :  { %14270 = vst [vmem:[#allocation29_spill] sm:$0xff] %v13613_v57  ;;  %14271 = vst [vmem:[#allocation30_spill] sm:$0xff] %v13617_v17 }
 0xe19   :  { %7002 = vmatpush1.bf16.msra.mxu0 %v13514_v46  ;;  %9768 = vmatpush3.bf16.msra.mxu1 %v13517_v47  ;;  %v6861_v42 = vadd.f32 %v6859_v53, %v6857_v12  ;;  %v10498_v50 = vpop.eup %10497  ;;  %14272 = vst [vmem:[#allocation31_spill] sm:$0xff] %v13620_v28  ;;  %v13623_v12 = vld [vmem:[#allocation14 + $0x4c] ss:$12 sps:$4 sm:$0xff]   ;;  %v13627_v53 = vld [vmem:[#allocation14 + $0x48] ss:$12 sps:$4 sm:$0xff]  }
 0xe1a   :  { %7003 = vmatprep.subr.bf16.mxu0 %v13520_v14  ;;  %9769 = vmatprep.subr.bf16.mxu1 %v14062_v34  ;;  %v10500_v38 = vpop.eup %10499  ;;  %v6864_v1 = vsub.f32 1.0, %v10498_v50  ;;  %v6868_v49 = vmul.f32 %v10498_v50, %v13417_v43  ;;  %14273 = vst [vmem:[#allocation32_spill] sm:$0xff] %v13623_v12  ;;  %14274 = vst [vmem:[#allocation33_spill] sm:$0xff] %v13627_v53  ;;  %v13633_v50 = vld [vmem:[#allocation14 + $0x34] ss:$12 sps:$4 sm:$0xff]  }
 0xe1b   :  { %10503 = vtanh.f32 %v6861_v42  ;;  %v6865_v27 = vsub.f32 1.0, %v10500_v38  ;;  %v6869_v48 = vmul.f32 %v10500_v38, %v13420_v18  ;;  %v13630_v42 = vld [vmem:[#allocation14 + $0x50] ss:$12 sps:$4 sm:$0xff]   ;;  %14276 = vst [vmem:[#allocation35_spill] sm:$0xff] %v13633_v50 }
 0xe1c   :  { %14275 = vst [vmem:[#allocation34_spill] sm:$0xff] %v13630_v42  ;;  %v13637_v38 = vld [vmem:[#allocation14 + $0x30] ss:$12 sps:$4 sm:$0xff]  }
 0xe1d   :  { %7004 = vmatpush1.bf16.msra.mxu0 %v13524_v22  ;;  %9770 = vmatpush3.bf16.msra.mxu1 %v13527_v9  ;;  %14277 = vst [vmem:[#allocation36_spill] sm:$0xff] %v13637_v38 }
 0xe1e   :  { %7005 = vmatprep.subr.bf16.mxu0 %v13530_v41  ;;  %9771 = vmatprep.subr.bf16.mxu1 %v14062_v34 }
 0xe21   :  { %7006 = vmatpush1.bf16.msra.mxu0 %v13534_v63  ;;  %9772 = vmatpush3.bf16.msra.mxu1 %v13537_v13 }
 0xe22   :  { %7007 = vmatprep.subr.bf16.mxu0 %v13540_v33  ;;  %9773 = vmatprep.subr.bf16.mxu1 %v14062_v34 }
 0xe24   :  { %v10502_v3 = vpop.eup %10501 }
 0xe25   :  { %7008 = vmatpush1.bf16.msra.mxu0 %v13544_v51  ;;  %9774 = vmatpush3.bf16.msra.mxu1 %v13547_v62  ;;  %v6866_v20 = vmul.f32 %v10502_v3, %v6864_v1  ;;  %v13640_v1 = vld [vmem:[#allocation14 + $0x38] ss:$12 sps:$4 sm:$0xff]   ;;  %v13643_v3 = vld [vmem:[#allocation14 + $0x1c] ss:$12 sps:$4 sm:$0xff]  }
 0xe26   :  { %7009 = vmatprep.subr.bf16.mxu0 %v13550_v21  ;;  %9775 = vmatprep.subr.bf16.mxu1 %v14062_v34  ;;  %14278 = vst [vmem:[#allocation37_spill] sm:$0xff] %v13640_v1  ;;  %14279 = vst [vmem:[#allocation38_spill] sm:$0xff] %v13643_v3 }
 0xe27   :  { %v6870_v61 = vadd.f32 %v6868_v49, %v6866_v20  ;;  %v13647_v20 = vld [vmem:[#allocation14 + $0x18] ss:$12 sps:$4 sm:$0xff]   ;;  %v13650_v49 = vld [vmem:[#allocation14 + $0x20] ss:$12 sps:$4 sm:$0xff]  }
 0xe28   :  { %v10504_v37 = vpop.eup %10503  ;;  %14280 = vst [vmem:[#allocation39_spill] sm:$0xff] %v13647_v20  ;;  %14281 = vst [vmem:[#allocation40_spill] sm:$0xff] %v13650_v49 }
 0xe29   :  { %7010 = vmatpush1.bf16.msra.mxu0 %v13555_v2  ;;  %9776 = vmatpush3.bf16.msra.mxu1 %v13558_v8  ;;  %v6867_v44 = vmul.f32 %v10504_v37, %v6865_v27  ;;  %v13573_v45 = vsel %vm6884_vm10, %v6870_v61, %v13417_v43  ;;  %v6888_v40 = vsel %vm6884_vm10, %v6870_v61, 0.0  ;;  %v13584_v43 = vld [vmem:[#allocation14 + $0xa8] ss:$12 sps:$4 sm:$0xff]   ;;  %v13653_v27 = vld [vmem:[#allocation14 + $0x4] ss:$12 sps:$4 sm:$0xff]   ;;  %v6902_v61 = vld [vmem:[#allocation4 + $0x138] sm:$0xff] }
 0xe2a   :  { %7011 = vmatprep.subr.bf16.mxu0 %v13562_v7  ;;  %9777 = vmatprep.subr.bf16.mxu1 %v14062_v34  ;;  %14282 = vst [vmem:[#allocation41_spill] sm:$0xff] %v13653_v27  ;;  %v13657_v37 = vld [vmem:[#allocation14] ss:$12 sps:$4 sm:$0xff]   ;;  %v7081_v35 = vunpack.c.l.bf16 %v6902_v61 }
 0xe2b   :  { %v6871_v0 = vadd.f32 %v6869_v48, %v6867_v44  ;;  %14283 = vst [vmem:[#allocation42_spill] sm:$0xff] %v13657_v37  ;;  %v13660_v48 = vld [vmem:[#allocation14 + $0x8] ss:$12 sps:$4 sm:$0xff]   ;;  %v13663_v44 = vld [vmem:[#allocation15 + $0xac] ss:$12 sps:$4 sm:$0xff]  }
 0xe2c   :  { %14284 = vst [vmem:[#allocation43_spill] sm:$0xff] %v13660_v48  ;;  %14285 = vst [vmem:[#allocation44_spill] sm:$0xff] %v13663_v44 }
 0xe2d   :  { %7012 = vmatpush1.bf16.msra.mxu0 %v13566_v52  ;;  %9778 = vmatpush3.bf16.msra.mxu1 %v13569_v30  ;;  %v13576_v6 = vsel %vm6885_vm11, %v6871_v0, %v13420_v18  ;;  %v6889_v56 = vsel %vm6885_vm11, %v6871_v0, 0.0  ;;  %v13587_v18 = vld [vmem:[#allocation14 + $0xb0] ss:$12 sps:$4 sm:$0xff]  }
 0xe2e   :  { %7262 = vmatprep.subr.bf16.mxu0 %v13578_v11  ;;  %9783 = vmatprep.subr.bf16.mxu1 %v14062_v34  ;;  %v8789_v55 = vpack.c.bf16 %v6889_v56, %v6888_v40  ;;  %v6996_v5 = vpack.c.bf16 %v13576_v6, %v13573_v45  ;;  %v6904_v40 = vld [vmem:[#allocation4 + $0x144] sm:$0xff] }
 0xe30   :  { %8790 = vst [vmem:[#allocation18 + $0x18] sm:$0xff] %v8789_v55   ;;  %7030 = vmatmul.mubr.bf16.vlgmr.msra.gmra.mxu0 %v6996_v5  ;;  %9780 = vmatmul.mubr.bf16.vlgmr.msra.gmra.mxu1 %v6996_v5  ;;  %v7099_v55 = vrot.slane %v6902_v61, 4 }
 0xe31   :  { %7263 = vmatpush1.bf16.msra.mxu0 %v13584_v43  ;;  %9784 = vmatpush3.bf16.msra.mxu1 %v13587_v18 }
 0xe32   :  { %7264 = vmatprep.subr.bf16.mxu0 %v13590_v36  ;;  %9785 = vmatprep.subr.bf16.mxu1 %v14062_v34 }
 0xe33   :  { %7294 = vmatprep.mubr.bf16.mxu0 %v14063_v25  ;;  %9799 = vmatprep.mubr.msk.bf16.mxu1 %vm11062_vm3, %v14062_v34 }
 0xe35   :  { %7265 = vmatpush1.bf16.msra.mxu0 %v13597_v59  ;;  %9786 = vmatpush3.bf16.msra.mxu1 %v13600_v29 }
 0xe36   :  { %7266 = vmatprep.subr.bf16.mxu0 %v13603_v39  ;;  %9787 = vmatprep.subr.bf16.mxu1 %v14062_v34 }
 0xe39   :  { %7267 = vmatpush1.bf16.msra.mxu0 %v13607_v23  ;;  %9788 = vmatpush3.bf16.msra.mxu1 %v13610_v60 }
 0xe3a   :  { %7268 = vmatprep.subr.bf16.mxu0 %v13613_v57  ;;  %9789 = vmatprep.subr.bf16.mxu1 %v14062_v34 }
 0xe3d   :  { %7269 = vmatpush1.bf16.msra.mxu0 %v13617_v17  ;;  %9790 = vmatpush3.bf16.msra.mxu1 %v13620_v28 }
 0xe3e   :  { %7270 = vmatprep.subr.bf16.mxu0 %v13623_v12  ;;  %9791 = vmatprep.subr.bf16.mxu1 %v14062_v34 }
 0xe41   :  { %7271 = vmatpush1.bf16.msra.mxu0 %v13627_v53  ;;  %9792 = vmatpush3.bf16.msra.mxu1 %v13630_v42 }
 0xe42   :  { %7272 = vmatprep.subr.bf16.mxu0 %v13633_v50  ;;  %9793 = vmatprep.subr.bf16.mxu1 %v14062_v34 }
 0xe45   :  { %7273 = vmatpush1.bf16.msra.mxu0 %v13637_v38  ;;  %9794 = vmatpush3.bf16.msra.mxu1 %v13640_v1  ;;  %v7103_v1 = vunpack.c.l.bf16 %v7099_v55 }
 0xe46   :  { %7274 = vmatprep.subr.bf16.mxu0 %v13643_v3  ;;  %9795 = vmatprep.subr.bf16.mxu1 %v14062_v34 }
 0xe49   :  { %7275 = vmatpush1.bf16.msra.mxu0 %v13647_v20  ;;  %9796 = vmatpush3.bf16.msra.mxu1 %v13650_v49  ;;  %v7082_v49 = vunpack.c.l.bf16 %v6904_v40  ;;  %v7100_v20 = vrot.slane %v6904_v40, 4 }
 0xe4a   :  { %7276 = vmatprep.subr.bf16.mxu0 %v13653_v27  ;;  %9797 = vmatprep.subr.bf16.mxu1 %v14062_v34 }
 0xe4b   :  { %v7104_v12 = vunpack.c.l.bf16 %v7100_v20 }
 0xe4d   :  { %7277 = vmatpush1.bf16.msra.mxu0 %v13657_v37  ;;  %9798 = vmatpush3.bf16.msra.mxu1 %v13660_v48 }
 0xe4e   :  { %7347 = vmatprep.subr.bf16.mxu0 %v13663_v44  ;;  %9803 = vmatprep.subr.bf16.mxu1 %v14062_v34 }
 0xed0   :  { %v6946_v10 = vpop.f32.mrf.mxu0  ;;  %v6989_v0 = vpop.f32.mrf.mxu1 }
 0xed1   :  { %v7083_v56 = vadd.f32 %v7081_v35, %v6946_v10 }
 0xed2   :  { %v6948_v5 = vpop.f32.mrf.mxu0  ;;  %v9761_v27 = vpop.f32.mrf.mxu1 }
 0xed3   :  { %v8433_v37 = vmul.f32 -1.442695, %v7083_v56  ;;  %v7105_v42 = vadd.f32 %v7103_v1, %v6948_v5  ;;  %v6907_v56 = vld [vmem:[#allocation5 + $0x30] sm:$0xff] }
 0xed4   :  { %v6950_v3 = vpop.f32.mrf.mxu0  ;;  %v6992_v48 = vpop.f32.mrf.mxu1  ;;  %v7166_v1 = vunpack.c.l.bf16 %v6907_v56 }
 0xed5   :  { %10505 = vpow2.f32 %v8433_v37  ;;  %v7084_v38 = vadd.f32 %v7082_v49, %v6950_v3  ;;  %v8435_v17 = vmul.f32 -1.442695, %v7105_v42 }
 0xed6   :  { %v6952_v44 = vpop.f32.mrf.mxu0  ;;  %v9762_v50 = vpop.f32.mrf.mxu1 }
 0xed7   :  { %v8434_v53 = vmul.f32 -1.442695, %v7084_v38  ;;  %v7106_v28 = vadd.f32 %v7104_v12, %v6952_v44  ;;  %v6903_v50 = vld [vmem:[#allocation4 + $0x140] ss:$12 sps:$4 sm:$0xff]   ;;  %v7119_v38 = vadd.f32 %v13464_v54, %v6989_v0  ;;  %v7184_v44 = vrot.slane %v6907_v56, 4 }
 0xed8   :  { %v7123_v5 = vunpack.c.l.bf16 %v6903_v50 }
 0xed9   :  { %10507 = vpow2.f32 %v8434_v53  ;;  %v8436_v35 = vmul.f32 -1.442695, %v7106_v28  ;;  %v7188_v23 = vunpack.c.l.bf16 %v7184_v44 }
 0xeda   :  { %10509 = vpow2.f32 %v8435_v17  ;;  %v6909_v17 = vld [vmem:[#allocation5 + $0x3c] sm:$0xff] }
 0xedb   :  { %10511 = vpow2.f32 %v8436_v35  ;;  %v7185_v57 = vrot.slane %v6909_v17, 4 }
 0xee2   :  { %v10506_v27 = vpop.eup %10505 }
 0xee3   :  { %v7091_v61 = vadd.f32 1.0, %v10506_v27 }
 0xee5   :  { %10513 = vrcp.f32 %v7091_v61 }
 0xee6   :  { %v10508_v10 = vpop.eup %10507 }
 0xee7   :  { %v7092_v40 = vadd.f32 1.0, %v10508_v10  ;;  %v10510_v37 = vpop.eup %10509  ;;  %v7167_v10 = vunpack.c.l.bf16 %v6909_v17 }
 0xee8   :  { %v10512_v3 = vpop.eup %10511  ;;  %v7113_v49 = vadd.f32 1.0, %v10510_v37  ;;  %v7120_v37 = vadd.f32 %v13464_v54, %v6992_v48 }
 0xee9   :  { %10515 = vrcp.f32 %v7092_v40  ;;  %v7114_v53 = vadd.f32 1.0, %v10512_v3 }
 0xeea   :  { %10517 = vrcp.f32 %v7113_v49 }
 0xeeb   :  { %10519 = vrcp.f32 %v7114_v53 }
 0xef0   :  { %v7031_v12 = vpop.f32.mrf.mxu0  ;;  %v13668_v42 = vpop.f32.mrf.mxu1 }
 0xef1   :  { %v7168_v20 = vadd.f32 %v7166_v1, %v7031_v12 }
 0xef2   :  { %v10514_v28 = vpop.eup %10513  ;;  %v7033_v35 = vpop.f32.mrf.mxu0 }
 0xef3   :  { %v7121_v55 = vmul.f32 %v10514_v28, %v7119_v38  ;;  %v9781_v27 = vpop.f32.mrf.mxu1  ;;  %v8439_v61 = vmul.f32 -1.442695, %v7168_v20  ;;  %v7124_v38 = vunpack.c.h.bf16 %v6903_v50  ;;  %v7190_v12 = vadd.f32 %v7188_v23, %v7033_v35 }
 0xef4   :  { %v7035_v0 = vpop.f32.mrf.mxu0 }
 0xef5   :  { %v7125_v40 = vadd.f32 %v7123_v5, %v7121_v55  ;;  %v13671_v3 = vpop.f32.mrf.mxu1  ;;  %10521 = vpow2.f32 %v8439_v61  ;;  %v7169_v1 = vadd.f32 %v7167_v10, %v7035_v0  ;;  %v7189_v55 = vunpack.c.l.bf16 %v7185_v57 }
 0xef6   :  { %v10516_v60 = vpop.eup %10515  ;;  %v7037_v20 = vpop.f32.mrf.mxu0  ;;  %v8441_v53 = vmul.f32 -1.442695, %v7190_v12 }
 0xef7   :  { %10523 = vtanh.f32 %v7125_v40  ;;  %v7122_v56 = vmul.f32 %v10516_v60, %v7120_v37  ;;  %v9782_v49 = vpop.f32.mrf.mxu1  ;;  %v8440_v28 = vmul.f32 -1.442695, %v7169_v1  ;;  %v7191_v48 = vadd.f32 %v7189_v55, %v7037_v20  ;;  %v10518_v54 = vpop.eup %10517 }
 0xef8   :  { %v10520_v17 = vpop.eup %10519  ;;  %v7129_v44 = vsub.f32 1.0, %v10518_v54  ;;  %v7133_v35 = vmul.f32 %v10518_v54, %v13475_v15  ;;  %v7148_v49 = vpop.permute.xlu1 %7147 }
 0xef9   :  { %v7126_v27 = vadd.f32 %v7124_v38, %v7122_v56  ;;  %10525 = vpow2.f32 %v8440_v28  ;;  %v8442_v5 = vmul.f32 -1.442695, %v7191_v48  ;;  %v7130_v40 = vsub.f32 1.0, %v10520_v17  ;;  %v7145_v38 = vpop.permute.xlu0 %7144 }
 0xefa   :  { %v7134_v0 = vmul.f32 %v10520_v17, %v13478_v16  ;;  %vm7149_vm12 = vcmp.eq.s32.totalorder %v7145_v38, 1  ;;  %vm7150_vm13 = vcmp.eq.s32.totalorder %v7148_v49, 1 }
 0xefb   :  { %10527 = vtanh.f32 %v7126_v27 }
 0xefc   :  { %10529 = vpow2.f32 %v8441_v53 }
 0xefd   :  { %10531 = vpow2.f32 %v8442_v5 }
 0xf02   :  { %v10522_v61 = vpop.eup %10521 }
 0xf03   :  { %v7176_v60 = vadd.f32 1.0, %v10522_v61  ;;  %v6908_v61 = vld [vmem:[#allocation5 + $0x38] ss:$12 sps:$4 sm:$0xff]  }
 0xf04   :  { %v10524_v10 = vpop.eup %10523 }
 0xf05   :  { %v7131_v50 = vmul.f32 %v10524_v10, %v7129_v44  ;;  %10533 = vrcp.f32 %v7176_v60  ;;  %v7208_v60 = vunpack.c.l.bf16 %v6908_v61 }
 0xf06   :  { %v10526_v23 = vpop.eup %10525 }
 0xf07   :  { %v7177_v37 = vadd.f32 1.0, %v10526_v23  ;;  %v7135_v56 = vadd.f32 %v7133_v35, %v7131_v50 }
 0xf08   :  { %v10528_v57 = vpop.eup %10527 }
 0xf09   :  { %v7132_v1 = vmul.f32 %v10528_v57, %v7130_v40  ;;  %10535 = vrcp.f32 %v7177_v37  ;;  %v10530_v28 = vpop.eup %10529  ;;  %v13676_v20 = vsel %vm7149_vm12, %v7135_v56, %v13475_v15  ;;  %v7153_v54 = vsel %vm7149_vm12, %v7135_v56, 0.0 }
 0xf0a   :  { %v10532_v5 = vpop.eup %10531  ;;  %v7198_v17 = vadd.f32 1.0, %v10530_v28  ;;  %v7204_v15 = vadd.f32 %v13491_v4, %v13668_v42  ;;  %v7205_v42 = vadd.f32 %v13491_v4, %v13671_v3  ;;  %v7209_v40 = vunpack.c.h.bf16 %v6908_v61 }
 0xf0b   :  { %v7136_v12 = vadd.f32 %v7134_v0, %v7132_v1  ;;  %v7199_v44 = vadd.f32 1.0, %v10532_v5 }
 0xf0c   :  { %10537 = vrcp.f32 %v7198_v17 }
 0xf0d   :  { %v13679_v27 = vsel %vm7150_vm13, %v7136_v12, %v13478_v16  ;;  %v7154_v55 = vsel %vm7150_vm13, %v7136_v12, 0.0  ;;  %10539 = vrcp.f32 %v7199_v44 }
 0xf0e   :  { %v8794_v48 = vpack.c.bf16 %v7154_v55, %v7153_v54  ;;  %v7261_v53 = vpack.c.bf16 %v13679_v27, %v13676_v20 }
 0xf10   :  { %8795 = vst [vmem:[#allocation17 + $0x68] sm:$0xff] %v8794_v48   ;;  %7295 = vmatmul.mubr.bf16.vlgmr.msra.gmra.mxu0 %v7261_v53  ;;  %9800 = vmatmul.mubr.bf16.vlgmr.msra.gmra.mxu1 %v7261_v53  ;;  %v7230_v48 = vpop.permute.xlu0 %7229  ;;  %v7233_v53 = vpop.permute.xlu1 %7232 }
 0xf11   :  { %7348 = vmatpush1.bf16.msra.mxu0 %v13482_v19  ;;  %9804 = vmatpush3.bf16.msra.mxu1 %v13485_v24  ;;  %vm7234_vm14 = vcmp.eq.s32.totalorder %v7230_v48, 1  ;;  %vm7235_vm15 = vcmp.eq.s32.totalorder %v7233_v53, 1 }
 0xf12   :  { %7349 = vmatprep.subr.bf16.mxu0 %v13495_v32  ;;  %9805 = vmatprep.subr.bf16.mxu1 %v14062_v34  ;;  %v10534_v16 = vpop.eup %10533 }
 0xf13   :  { %7379 = vmatprep.mubr.bf16.mxu0 %v14063_v25  ;;  %9819 = vmatprep.mubr.msk.bf16.mxu1 %vm11062_vm3, %v14062_v34  ;;  %v7206_v10 = vmul.f32 %v10534_v16, %v7204_v15 }
 0xf15   :  { %7350 = vmatpush1.bf16.msra.mxu0 %v13502_v26  ;;  %9806 = vmatpush3.bf16.msra.mxu1 %v13505_v31  ;;  %v7210_v50 = vadd.f32 %v7208_v60, %v7206_v10  ;;  %v14295_v60 = vld [vmem:[#allocation36_spill] sm:$0xff] }
 0xf16   :  { %7351 = vmatprep.subr.bf16.mxu0 %v13510_v58  ;;  %9807 = vmatprep.subr.bf16.mxu1 %v14062_v34  ;;  %v10536_v23 = vpop.eup %10535 }
 0xf17   :  { %10541 = vtanh.f32 %v7210_v50  ;;  %v7207_v35 = vmul.f32 %v10536_v23, %v7205_v42  ;;  %v14296_v50 = vld [vmem:[#allocation37_spill] sm:$0xff]  ;;  %v14297_v42 = vld [vmem:[#allocation38_spill] sm:$0xff]  ;;  %v14298_v23 = vld [vmem:[#allocation39_spill] sm:$0xff] }
 0xf19   :  { %7352 = vmatpush1.bf16.msra.mxu0 %v13514_v46  ;;  %9808 = vmatpush3.bf16.msra.mxu1 %v13517_v47  ;;  %v7211_v57 = vadd.f32 %v7209_v40, %v7207_v35  ;;  %v10538_v3 = vpop.eup %10537  ;;  %v14299_v35 = vld [vmem:[#allocation40_spill] sm:$0xff]  ;;  %v14300_v40 = vld [vmem:[#allocation41_spill] sm:$0xff] }
 0xf1a   :  { %7353 = vmatprep.subr.bf16.mxu0 %v13520_v14  ;;  %9809 = vmatprep.subr.bf16.mxu1 %v14062_v34  ;;  %v10540_v37 = vpop.eup %10539  ;;  %v7214_v0 = vsub.f32 1.0, %v10538_v3  ;;  %v7218_v38 = vmul.f32 %v10538_v3, %v13573_v45  ;;  %v14302_v3 = vld [vmem:[#allocation43_spill] sm:$0xff] }
 0xf1b   :  { %10543 = vtanh.f32 %v7211_v57  ;;  %v7215_v49 = vsub.f32 1.0, %v10540_v37  ;;  %v7219_v28 = vmul.f32 %v10540_v37, %v13576_v6  ;;  %v14301_v57 = vld [vmem:[#allocation42_spill] sm:$0xff]  ;;  %v14303_v37 = vld [vmem:[#allocation44_spill] sm:$0xff] }
 0xf1d   :  { %7354 = vmatpush1.bf16.msra.mxu0 %v13524_v22  ;;  %9810 = vmatpush3.bf16.msra.mxu1 %v13527_v9 }
 0xf1e   :  { %7355 = vmatprep.subr.bf16.mxu0 %v13530_v41  ;;  %9811 = vmatprep.subr.bf16.mxu1 %v14062_v34 }
 0xf21   :  { %7356 = vmatpush1.bf16.msra.mxu0 %v13534_v63  ;;  %9812 = vmatpush3.bf16.msra.mxu1 %v13537_v13 }
 0xf22   :  { %7357 = vmatprep.subr.bf16.mxu0 %v13540_v33  ;;  %9813 = vmatprep.subr.bf16.mxu1 %v14062_v34 }
 0xf24   :  { %v10542_v1 = vpop.eup %10541 }
 0xf25   :  { %7358 = vmatpush1.bf16.msra.mxu0 %v13544_v51  ;;  %9814 = vmatpush3.bf16.msra.mxu1 %v13547_v62  ;;  %v7216_v56 = vmul.f32 %v10542_v1, %v7214_v0  ;;  %v7252_v0 = vld [vmem:[#allocation4 + $0x150] sm:$0xff] }
 0xf26   :  { %7359 = vmatprep.subr.bf16.mxu0 %v13550_v21  ;;  %9815 = vmatprep.subr.bf16.mxu1 %v14062_v34  ;;  %v7431_v1 = vunpack.c.l.bf16 %v7252_v0 }
 0xf27   :  { %v7220_v55 = vadd.f32 %v7218_v38, %v7216_v56 }
 0xf28   :  { %v10544_v12 = vpop.eup %10543 }
 0xf29   :  { %7360 = vmatpush1.bf16.msra.mxu0 %v13555_v2  ;;  %9816 = vmatpush3.bf16.msra.mxu1 %v13558_v8  ;;  %v7217_v54 = vmul.f32 %v10544_v12, %v7215_v49  ;;  %v13723_v17 = vsel %vm7234_vm14, %v7220_v55, %v13573_v45  ;;  %v7238_v15 = vsel %vm7234_vm14, %v7220_v55, 0.0  ;;  %v14286_v45 = vld [vmem:[#allocation27_spill] sm:$0xff]  ;;  %v7254_v49 = vld [vmem:[#allocation4 + $0x15c] sm:$0xff] }
 0xf2a   :  { %7361 = vmatprep.subr.bf16.mxu0 %v13562_v7  ;;  %9817 = vmatprep.subr.bf16.mxu1 %v14062_v34  ;;  %v7432_v53 = vunpack.c.l.bf16 %v7254_v49 }
 0xf2b   :  { %v7221_v5 = vadd.f32 %v7219_v28, %v7217_v54  ;;  %v7449_v28 = vrot.slane %v7252_v0, 4  ;;  %v14304_v0 = vld [vmem:[#allocation26_spill] sm:$0xff] }
 0xf2d   :  { %7362 = vmatpush1.bf16.msra.mxu0 %v13566_v52  ;;  %9818 = vmatpush3.bf16.msra.mxu1 %v13569_v30  ;;  %v13726_v61 = vsel %vm7235_vm15, %v7221_v5, %v13576_v6  ;;  %v7239_v16 = vsel %vm7235_vm15, %v7221_v5, 0.0  ;;  %v14287_v6 = vld [vmem:[#allocation28_spill] sm:$0xff]  ;;  %v7450_v5 = vrot.slane %v7254_v49, 4 }
 0xf2e   :  { %7611 = vmatprep.subr.bf16.mxu0 %v13578_v11  ;;  %9823 = vmatprep.subr.bf16.mxu1 %v14062_v34  ;;  %v8799_v44 = vpack.c.bf16 %v7239_v16, %v7238_v15  ;;  %v7346_v10 = vpack.c.bf16 %v13726_v61, %v13723_v17  ;;  %v14288_v11 = vld [vmem:[#allocation29_spill] sm:$0xff] }
 0xf30   :  { %8800 = vst [vmem:[#allocation18 + $0x10] sm:$0xff] %v8799_v44   ;;  %7380 = vmatmul.mubr.bf16.vlgmr.msra.gmra.mxu0 %v7346_v10  ;;  %9820 = vmatmul.mubr.bf16.vlgmr.msra.gmra.mxu1 %v7346_v10  ;;  %v7453_v44 = vunpack.c.l.bf16 %v7449_v28  ;;  %v7259_v28 = vld [vmem:[#allocation5 + $0x24] sm:$0xff] }
 0xf31   :  { %7612 = vmatpush1.bf16.msra.mxu0 %v13584_v43  ;;  %9824 = vmatpush3.bf16.msra.mxu1 %v13587_v18  ;;  %v14289_v43 = vld [vmem:[#allocation30_spill] sm:$0xff]  ;;  %v14290_v18 = vld [vmem:[#allocation31_spill] sm:$0xff] }
 0xf32   :  { %7613 = vmatprep.subr.bf16.mxu0 %v13590_v36  ;;  %9825 = vmatprep.subr.bf16.mxu1 %v14062_v34  ;;  %v14291_v36 = vld [vmem:[#allocation32_spill] sm:$0xff] }
 0xf33   :  { %7643 = vmatprep.mubr.bf16.mxu0 %v14063_v25  ;;  %9839 = vmatprep.mubr.msk.bf16.mxu1 %vm11062_vm3, %v14062_v34 }
 0xf35   :  { %7614 = vmatpush1.bf16.msra.mxu0 %v13597_v59  ;;  %9826 = vmatpush3.bf16.msra.mxu1 %v13600_v29  ;;  %v14292_v59 = vld [vmem:[#allocation33_spill] sm:$0xff]  ;;  %v14293_v29 = vld [vmem:[#allocation34_spill] sm:$0xff] }
 0xf36   :  { %7615 = vmatprep.subr.bf16.mxu0 %v13603_v39  ;;  %9827 = vmatprep.subr.bf16.mxu1 %v14062_v34  ;;  %v14294_v39 = vld [vmem:[#allocation35_spill] sm:$0xff] }
 0xf39   :  { %7616 = vmatpush1.bf16.msra.mxu0 %v14286_v45  ;;  %9828 = vmatpush3.bf16.msra.mxu1 %v14287_v6 }
 0xf3a   :  { %7617 = vmatprep.subr.bf16.mxu0 %v14288_v11  ;;  %9829 = vmatprep.subr.bf16.mxu1 %v14062_v34 }
 0xf3d   :  { %7618 = vmatpush1.bf16.msra.mxu0 %v14289_v43  ;;  %9830 = vmatpush3.bf16.msra.mxu1 %v14290_v18  ;;  %v7454_v18 = vunpack.c.l.bf16 %v7450_v5 }
 0xf3e   :  { %7619 = vmatprep.subr.bf16.mxu0 %v14291_v36  ;;  %9831 = vmatprep.subr.bf16.mxu1 %v14062_v34 }
 0xf41   :  { %7620 = vmatpush1.bf16.msra.mxu0 %v14292_v59  ;;  %9832 = vmatpush3.bf16.msra.mxu1 %v14293_v29 }
 0xf42   :  { %7621 = vmatprep.subr.bf16.mxu0 %v14294_v39  ;;  %9833 = vmatprep.subr.bf16.mxu1 %v14062_v34 }
 0xf45   :  { %7622 = vmatpush1.bf16.msra.mxu0 %v14295_v60  ;;  %9834 = vmatpush3.bf16.msra.mxu1 %v14296_v50 }
 0xf46   :  { %7623 = vmatprep.subr.bf16.mxu0 %v14297_v42  ;;  %9835 = vmatprep.subr.bf16.mxu1 %v14062_v34 }
 0xf49   :  { %7624 = vmatpush1.bf16.msra.mxu0 %v14298_v23  ;;  %9836 = vmatpush3.bf16.msra.mxu1 %v14299_v35  ;;  %v7257_v35 = vld [vmem:[#allocation5 + $0x18] sm:$0xff] }
 0xf4a   :  { %7625 = vmatprep.subr.bf16.mxu0 %v14300_v40  ;;  %9837 = vmatprep.subr.bf16.mxu1 %v14062_v34 }
 0xf4d   :  { %7626 = vmatpush1.bf16.msra.mxu0 %v14301_v57  ;;  %9838 = vmatpush3.bf16.msra.mxu1 %v14302_v3  ;;  %v7253_v3 = vld [vmem:[#allocation4 + $0x158] ss:$12 sps:$4 sm:$0xff]  }
 0xf4e   :  { %7696 = vmatprep.subr.bf16.mxu0 %v14303_v37  ;;  %9843 = vmatprep.subr.bf16.mxu1 %v14062_v34  ;;  %v7516_v37 = vunpack.c.l.bf16 %v7257_v35  ;;  %v7473_v5 = vunpack.c.l.bf16 %v7253_v3 }
 0xfd0   :  { %v7296_v56 = vpop.f32.mrf.mxu0  ;;  %v7339_v38 = vpop.f32.mrf.mxu1 }
 0xfd1   :  { %v7433_v12 = vadd.f32 %v7431_v1, %v7296_v56  ;;  %v7469_v1 = vadd.f32 %v14304_v0, %v7339_v38 }
 0xfd2   :  { %v7298_v54 = vpop.f32.mrf.mxu0  ;;  %v9801_v55 = vpop.f32.mrf.mxu1 }
 0xfd3   :  { %v8445_v48 = vmul.f32 -1.442695, %v7433_v12  ;;  %v7455_v11 = vadd.f32 %v7453_v44, %v7298_v54 }
 0xfd4   :  { %v7300_v15 = vpop.f32.mrf.mxu0  ;;  %v7342_v16 = vpop.f32.mrf.mxu1 }
 0xfd5   :  { %10545 = vpow2.f32 %v8445_v48  ;;  %v7434_v10 = vadd.f32 %v7432_v53, %v7300_v15  ;;  %v8447_v59 = vmul.f32 -1.442695, %v7455_v11  ;;  %v7534_v48 = vrot.slane %v7257_v35, 4 }
 0xfd6   :  { %v7302_v45 = vpop.f32.mrf.mxu0  ;;  %v9802_v6 = vpop.f32.mrf.mxu1  ;;  %v7470_v11 = vadd.f32 %v14304_v0, %v7342_v16 }
 0xfd7   :  { %v8446_v43 = vmul.f32 -1.442695, %v7434_v10  ;;  %v7456_v36 = vadd.f32 %v7454_v18, %v7302_v45  ;;  %v7517_v45 = vunpack.c.l.bf16 %v7259_v28  ;;  %v7535_v18 = vrot.slane %v7259_v28, 4 }
 0xfd9   :  { %10547 = vpow2.f32 %v8446_v43  ;;  %v8448_v29 = vmul.f32 -1.442695, %v7456_v36 }
 0xfda   :  { %10549 = vpow2.f32 %v8447_v59  ;;  %v7538_v59 = vunpack.c.l.bf16 %v7534_v48 }
 0xfdb   :  { %10551 = vpow2.f32 %v8448_v29 }
 0xfe2   :  { %v10546_v39 = vpop.eup %10545 }
 0xfe3   :  { %v7441_v60 = vadd.f32 1.0, %v10546_v39 }
 0xfe5   :  { %10553 = vrcp.f32 %v7441_v60  ;;  %v7474_v60 = vunpack.c.h.bf16 %v7253_v3 }
 0xfe6   :  { %v10548_v50 = vpop.eup %10547 }
 0xfe7   :  { %v7442_v42 = vadd.f32 1.0, %v10548_v50  ;;  %v10550_v23 = vpop.eup %10549 }
 0xfe8   :  { %v10552_v40 = vpop.eup %10551  ;;  %v7463_v57 = vadd.f32 1.0, %v10550_v23 }
 0xfe9   :  { %10555 = vrcp.f32 %v7442_v42  ;;  %v7464_v56 = vadd.f32 1.0, %v10552_v40 }
 0xfea   :  { %10557 = vrcp.f32 %v7463_v57  ;;  %v7539_v57 = vunpack.c.l.bf16 %v7535_v18 }
 0xfeb   :  { %10559 = vrcp.f32 %v7464_v56 }
 0xff0   :  { %v7381_v49 = vpop.f32.mrf.mxu0  ;;  %v13768_v12 = vpop.f32.mrf.mxu1 }
 0xff1   :  { %v7518_v55 = vadd.f32 %v7516_v37, %v7381_v49 }
 0xff2   :  { %v10554_v54 = vpop.eup %10553  ;;  %v7383_v15 = vpop.f32.mrf.mxu0 }
 0xff3   :  { %v7471_v53 = vmul.f32 %v10554_v54, %v7469_v1  ;;  %v9821_v44 = vpop.f32.mrf.mxu1  ;;  %v8451_v10 = vmul.f32 -1.442695, %v7518_v55  ;;  %v7540_v42 = vadd.f32 %v7538_v59, %v7383_v15 }
 0xff4   :  { %v7385_v38 = vpop.f32.mrf.mxu0 }
 0xff5   :  { %v7475_v6 = vadd.f32 %v7473_v5, %v7471_v53  ;;  %v13771_v43 = vpop.f32.mrf.mxu1  ;;  %10561 = vpow2.f32 %v8451_v10  ;;  %v7519_v29 = vadd.f32 %v7517_v45, %v7385_v38  ;;  %v8453_v37 = vmul.f32 -1.442695, %v7540_v42  ;;  %v7498_v38 = vpop.permute.xlu1 %7497 }
 0xff6   :  { %v10556_v36 = vpop.eup %10555  ;;  %v7387_v35 = vpop.f32.mrf.mxu0  ;;  %vm7500_vm2 = vcmp.eq.s32.totalorder %v7498_v38, 1 }
 0xff7   :  { %10563 = vtanh.f32 %v7475_v6  ;;  %v7472_v39 = vmul.f32 %v10556_v36, %v7470_v11  ;;  %v9822_v50 = vpop.f32.mrf.mxu1  ;;  %v8452_v23 = vmul.f32 -1.442695, %v7519_v29  ;;  %v7541_v16 = vadd.f32 %v7539_v57, %v7387_v35  ;;  %v10558_v1 = vpop.eup %10557 }
 0xff8   :  { %v10560_v56 = vpop.eup %10559  ;;  %v7479_v28 = vsub.f32 1.0, %v10558_v1  ;;  %v7483_v5 = vmul.f32 %v10558_v1, %v13676_v20  ;;  %v7495_v11 = vpop.permute.xlu0 %7494 }
 0xff9   :  { %v7476_v40 = vadd.f32 %v7474_v60, %v7472_v39  ;;  %10565 = vpow2.f32 %v8452_v23  ;;  %v8454_v0 = vmul.f32 -1.442695, %v7541_v16  ;;  %v7480_v53 = vsub.f32 1.0, %v10560_v56 }
 0xffa   :  { %v7484_v45 = vmul.f32 %v10560_v56, %v13679_v27  ;;  %vm7499_vm1 = vcmp.eq.s32.totalorder %v7495_v11, 1 }
 0xffb   :  { %10567 = vtanh.f32 %v7476_v40  ;;  %v7258_v40 = vld [vmem:[#allocation5 + $0x20] ss:$12 sps:$4 sm:$0xff]  }
 0xffc   :  { %10569 = vpow2.f32 %v8453_v37  ;;  %v7558_v37 = vunpack.c.l.bf16 %v7258_v40 }
 0xffd   :  { %10571 = vpow2.f32 %v8454_v0  ;;  %v7602_v0 = vld [vmem:[#allocation4 + $0x168] sm:$0xff] }
 0xffe   :  { %v7780_v1 = vunpack.c.l.bf16 %v7602_v0 }
0x1002   :  { %v10562_v49 = vpop.eup %10561 }
0x1003   :  { %v7526_v55 = vadd.f32 1.0, %v10562_v49 }
0x1004   :  { %v10564_v54 = vpop.eup %10563 }
0x1005   :  { %v7481_v3 = vmul.f32 %v10564_v54, %v7479_v28  ;;  %10573 = vrcp.f32 %v7526_v55 }
0x1006   :  { %v10566_v48 = vpop.eup %10565 }
0x1007   :  { %v7527_v44 = vadd.f32 1.0, %v10566_v48  ;;  %v7485_v6 = vadd.f32 %v7483_v5, %v7481_v3 }
0x1008   :  { %v10568_v15 = vpop.eup %10567 }
0x1009   :  { %v7482_v10 = vmul.f32 %v10568_v15, %v7480_v53  ;;  %10575 = vrcp.f32 %v7527_v44  ;;  %v10570_v36 = vpop.eup %10569  ;;  %v13776_v59 = vsel %vm7499_vm1, %v7485_v6, %v13676_v20  ;;  %v7503_v39 = vsel %vm7499_vm1, %v7485_v6, 0.0 }
0x100a   :  { %v10572_v23 = vpop.eup %10571  ;;  %v7548_v35 = vadd.f32 1.0, %v10570_v36  ;;  %v7554_v20 = vadd.f32 %v13491_v4, %v13768_v12  ;;  %v7559_v12 = vunpack.c.h.bf16 %v7258_v40 }
0x100b   :  { %v7486_v18 = vadd.f32 %v7484_v45, %v7482_v10  ;;  %v7549_v57 = vadd.f32 1.0, %v10572_v23 }
0x100c   :  { %10577 = vrcp.f32 %v7548_v35  ;;  %v7606_v35 = vld [vmem:[#allocation5] sm:$0xff] }
0x100d   :  { %v13779_v29 = vsel %vm7500_vm2, %v7486_v18, %v13679_v27  ;;  %v7504_v60 = vsel %vm7500_vm2, %v7486_v18, 0.0  ;;  %10579 = vrcp.f32 %v7549_v57  ;;  %v7865_v57 = vunpack.c.l.bf16 %v7606_v35 }
0x100e   :  { %v8804_v50 = vpack.c.bf16 %v7504_v60, %v7503_v39  ;;  %v7610_v42 = vpack.c.bf16 %v13779_v29, %v13776_v59 }
0x1010   :  { %8805 = vst [vmem:[#allocation17 + $0x70] sm:$0xff] %v8804_v50   ;;  %7644 = vmatmul.mubr.bf16.vlgmr.msra.gmra.mxu0 %v7610_v42  ;;  %9840 = vmatmul.mubr.bf16.vlgmr.msra.gmra.mxu1 %v7610_v42 }
0x1011   :  { %7697 = vmatpush1.bf16.msra.mxu0 %v13482_v19  ;;  %9844 = vmatpush3.bf16.msra.mxu1 %v13485_v24  ;;  %v7555_v24 = vadd.f32 %v13491_v4, %v13771_v43 }
0x1012   :  { %7698 = vmatprep.subr.bf16.mxu0 %v13495_v32  ;;  %9845 = vmatprep.subr.bf16.mxu1 %v14062_v34  ;;  %v10574_v27 = vpop.eup %10573 }
0x1013   :  { %7728 = vmatprep.mubr.bf16.mxu0 %v14063_v25  ;;  %9859 = vmatprep.mubr.msk.bf16.mxu1 %vm11062_vm3, %v14062_v34  ;;  %v7556_v16 = vmul.f32 %v10574_v27, %v7554_v20  ;;  %v7603_v27 = vld [vmem:[#allocation4 + $0x170] ss:$12 sps:$4 sm:$0xff]  }
0x1015   :  { %7699 = vmatpush1.bf16.msra.mxu0 %v13502_v26  ;;  %9846 = vmatpush3.bf16.msra.mxu1 %v13505_v31  ;;  %v7560_v19 = vadd.f32 %v7558_v37, %v7556_v16  ;;  %v10876_v16 = vld [vmem:[%s13867_s9] ss:$0 sm:$0xff]  ;;  %s11064_s9 = smov [#allocation17]  }
0x1016   :  { %7700 = vmatprep.subr.bf16.mxu0 %v13510_v58  ;;  %9847 = vmatprep.subr.bf16.mxu1 %v14062_v34  ;;  %v10576_v32 = vpop.eup %10575  ;;  %s7957_s22 = sshll.u32 %s11064_s9, 4  ;;  %s7958_s22 = int_to_ptr.vmem [resolvable:$true] %s7957_s22 }
0x1017   :  { %10581 = vtanh.f32 %v7560_v19  ;;  %v7557_v25 = vmul.f32 %v10576_v32, %v7555_v24  ;;  %s10998_s0 = scalar_lea.vmem %s7958_s22, 2048  ;;  %p11003_p3 = scmp.lt.s32.totalorder %s7958_s22, %s7958_s22 }
0x1018   :  { %p10999_p2 = scmp.ne.s32.totalorder %s7958_s22, %s10998_s0  ;;  %p11004_p4 = scmp.lt.s32.totalorder %s10998_s0, %s10998_s0 }
0x1019   :  { %7701 = vmatpush1.bf16.msra.mxu0 %v13514_v46  ;;  %9848 = vmatpush3.bf16.msra.mxu1 %v13517_v47  ;;  %v7561_v26 = vadd.f32 %v7559_v12, %v7557_v25  ;;  %v10578_v4 = vpop.eup %10577  ;;  %v7608_v25 = vld [vmem:[#allocation5 + $0xc] sm:$0xff] }
0x101a   :  { %7702 = vmatprep.subr.bf16.mxu0 %v13520_v14  ;;  %9849 = vmatprep.subr.bf16.mxu1 %v14062_v34  ;;  %v10580_v31 = vpop.eup %10579  ;;  %v7564_v58 = vsub.f32 1.0, %v10578_v4  ;;  %p11005_p5 = por %p11004_p4, %p11003_p3 }
0x101b   :  { %10583 = vtanh.f32 %v7561_v26  ;;  %v7565_v14 = vsub.f32 1.0, %v10580_v31 }
0x101c   :  { %p11006_p6 = pnand %p11005_p5, %p10999_p2 }
0x101d   :  { %7703 = vmatpush1.bf16.msra.mxu0 %v13524_v22  ;;  %9850 = vmatpush3.bf16.msra.mxu1 %v13527_v9  ;;  %v7568_v22 = vmul.f32 %v10578_v4, %v13723_v17  ;;  %v7883_v4 = vrot.slane %v7606_v35, 4 }
0x101e   :  { %7704 = vmatprep.subr.bf16.mxu0 %v13530_v41  ;;  %9851 = vmatprep.subr.bf16.mxu1 %v14062_v34 }
0x1021   :  { %7705 = vmatpush1.bf16.msra.mxu0 %v13534_v63  ;;  %9852 = vmatpush3.bf16.msra.mxu1 %v13537_v13  ;;  %v7569_v63 = vmul.f32 %v10580_v31, %v13726_v61 }
0x1022   :  { %7706 = vmatprep.subr.bf16.mxu0 %v13540_v33  ;;  %9853 = vmatprep.subr.bf16.mxu1 %v14062_v34  ;;  %v7580_v33 = vpop.permute.xlu0 %7579 }
0x1023   :  { %vm7584_vm3 = vcmp.eq.s32.totalorder %v7580_v33, 1  ;;  %v7884_v33 = vrot.slane %v7608_v25, 4 }
0x1024   :  { %v10582_v46 = vpop.eup %10581 }
0x1025   :  { %7707 = vmatpush1.bf16.msra.mxu0 %v13544_v51  ;;  %9854 = vmatpush3.bf16.msra.mxu1 %v13547_v62  ;;  %v7566_v47 = vmul.f32 %v10582_v46, %v7564_v58  ;;  %v7583_v51 = vpop.permute.xlu1 %7582  ;;  %v7822_v58 = vunpack.c.l.bf16 %v7603_v27 }
0x1026   :  { %7708 = vmatprep.subr.bf16.mxu0 %v13550_v21  ;;  %9855 = vmatprep.subr.bf16.mxu1 %v14062_v34  ;;  %vm7585_vm0 = vcmp.eq.s32.totalorder %v7583_v51, 1 }
0x1027   :  { %v7570_v13 = vadd.f32 %v7568_v22, %v7566_v47  ;;  %v7866_v22 = vunpack.c.l.bf16 %v7608_v25 }
0x1028   :  { %v10584_v9 = vpop.eup %10583 }
0x1029   :  { %7709 = vmatpush1.bf16.msra.mxu0 %v13555_v2  ;;  %9856 = vmatpush3.bf16.msra.mxu1 %v13558_v8  ;;  %v7567_v41 = vmul.f32 %v10584_v9, %v7565_v14  ;;  %v13823_v21 = vsel %vm7584_vm3, %v7570_v13, %v13723_v17  ;;  %v7798_v17 = vrot.slane %v7602_v0, 4 }
0x102a   :  { %7710 = vmatprep.subr.bf16.mxu0 %v13562_v7  ;;  %9857 = vmatprep.subr.bf16.mxu1 %v14062_v34  ;;  %v7588_v34 = vsel %vm7584_vm3, %v7570_v13, 0.0 }
0x102b   :  { %v7571_v62 = vadd.f32 %v7569_v63, %v7567_v41  ;;  %v7802_v5 = vunpack.c.l.bf16 %v7798_v17 }
0x102d   :  { %7711 = vmatpush1.bf16.msra.mxu0 %v13566_v52  ;;  %9858 = vmatpush3.bf16.msra.mxu1 %v13569_v30  ;;  %v13826_v2 = vsel %vm7585_vm0, %v7571_v62, %v13726_v61  ;;  %v7589_v8 = vsel %vm7585_vm0, %v7571_v62, 0.0  ;;  %v7604_v30 = vld [vmem:[#allocation4 + $0x174] sm:$0xff]  ;;  %v7887_v62 = vunpack.c.l.bf16 %v7883_v4 }
0x102e   :  { %v8809_v7 = vpack.c.bf16 %v7589_v8, %v7588_v34  ;;  %v7695_v43 = vpack.c.bf16 %v13826_v2, %v13823_v21  ;;  %v7781_v55 = vunpack.c.l.bf16 %v7604_v30  ;;  %v7799_v3 = vrot.slane %v7604_v30, 4 }
0x102f   :  { %v7888_v30 = vunpack.c.l.bf16 %v7884_v33 }
0x1030   :  { %8810 = vst [vmem:[#allocation18 + $0x8] sm:$0xff] %v8809_v7   ;;  %7729 = vmatmul.mubr.bf16.vlgmr.msra.gmra.mxu0 %v7695_v43  ;;  %9860 = vmatmul.mubr.bf16.vlgmr.msra.gmra.mxu1 %v7695_v43  ;;  %v7803_v11 = vunpack.c.l.bf16 %v7799_v3  ;;  %v7823_v7 = vunpack.c.h.bf16 %v7603_v27 }
0x10d0   :  { %v7645_v52 = vpop.f32.mrf.mxu0  ;;  %v7688_v56 = vpop.f32.mrf.mxu1 }
0x10d1   :  { %v7782_v49 = vadd.f32 %v7780_v1, %v7645_v52  ;;  %v7818_v37 = vadd.f32 %v10876_v16, %v7688_v56 }
0x10d2   :  { %v7647_v28 = vpop.f32.mrf.mxu0  ;;  %v9841_v54 = vpop.f32.mrf.mxu1 }
0x10d3   :  { %v8457_v61 = vmul.f32 -1.442695, %v7782_v49  ;;  %v7804_v45 = vadd.f32 %v7802_v5, %v7647_v28 }
0x10d4   :  { %v7649_v48 = vpop.f32.mrf.mxu0  ;;  %v7691_v53 = vpop.f32.mrf.mxu1 }
0x10d5   :  { %10585 = vpow2.f32 %v8457_v61  ;;  %v7783_v15 = vadd.f32 %v7781_v55, %v7649_v48  ;;  %v8459_v18 = vmul.f32 -1.442695, %v7804_v45  ;;  %v7819_v41 = vadd.f32 %v10876_v16, %v7691_v53 }
0x10d6   :  { %v7651_v44 = vpop.f32.mrf.mxu0  ;;  %v9842_v10 = vpop.f32.mrf.mxu1 }
0x10d7   :  { %v8458_v6 = vmul.f32 -1.442695, %v7783_v15  ;;  %v7805_v38 = vadd.f32 %v7803_v11, %v7651_v44 }
0x10d9   :  { %10587 = vpow2.f32 %v8458_v6  ;;  %v8460_v36 = vmul.f32 -1.442695, %v7805_v38 }
0x10da   :  { %10589 = vpow2.f32 %v8459_v18 }
0x10db   :  { %10591 = vpow2.f32 %v8460_v36  ;;  %v7844_v36 = vpop.permute.xlu0 %7843 }
0x10dc   :  { %vm7848_vm4 = vcmp.eq.s32.totalorder %v7844_v36, 1 }
0x10e2   :  { %v10586_v39 = vpop.eup %10585 }
0x10e3   :  { %v7790_v60 = vadd.f32 1.0, %v10586_v39  ;;  %v7847_v39 = vpop.permute.xlu1 %7846 }
0x10e4   :  { %vm7849_vm5 = vcmp.eq.s32.totalorder %v7847_v39, 1 }
0x10e5   :  { %10593 = vrcp.f32 %v7790_v60 }
0x10e6   :  { %v10588_v50 = vpop.eup %10587 }
0x10e7   :  { %v7791_v42 = vadd.f32 1.0, %v10588_v50  ;;  %v10590_v23 = vpop.eup %10589 }
0x10e8   :  { %v10592_v40 = vpop.eup %10591  ;;  %v7812_v20 = vadd.f32 1.0, %v10590_v23 }
0x10e9   :  { %10595 = vrcp.f32 %v7791_v42  ;;  %v7813_v19 = vadd.f32 1.0, %v10592_v40 }
0x10ea   :  { %10597 = vrcp.f32 %v7812_v20  ;;  %v7607_v20 = vld [vmem:[#allocation5 + $0x8] ss:$12 sps:$4 sm:$0xff]  }
0x10eb   :  { %10599 = vrcp.f32 %v7813_v19 }
0x10f0   :  { %v7730_v24 = vpop.f32.mrf.mxu0  ;;  %v13833_v32 = vpop.f32.mrf.mxu1 }
0x10f1   :  { %v7867_v26 = vadd.f32 %v7865_v57, %v7730_v24 }
0x10f2   :  { %v10594_v12 = vpop.eup %10593  ;;  %v7732_v46 = vpop.f32.mrf.mxu0 }
0x10f3   :  { %v7820_v31 = vmul.f32 %v10594_v12, %v7818_v37  ;;  %v9861_v47 = vpop.f32.mrf.mxu1  ;;  %v8463_v14 = vmul.f32 -1.442695, %v7867_v26  ;;  %v7889_v0 = vadd.f32 %v7887_v62, %v7732_v46 }
0x10f4   :  { %v7734_v63 = vpop.f32.mrf.mxu0 }
0x10f5   :  { %v7824_v9 = vadd.f32 %v7822_v58, %v7820_v31  ;;  %v13835_v13 = vpop.f32.mrf.mxu1  ;;  %10601 = vpow2.f32 %v8463_v14  ;;  %v7868_v34 = vadd.f32 %v7866_v22, %v7734_v63  ;;  %v8465_v17 = vmul.f32 -1.442695, %v7889_v0 }
0x10f6   :  { %v10596_v51 = vpop.eup %10595  ;;  %v7736_v52 = vpop.f32.mrf.mxu0 }
0x10f7   :  { %10603 = vtanh.f32 %v7824_v9  ;;  %v7821_v8 = vmul.f32 %v10596_v51, %v7819_v41  ;;  %v9862_v43 = vpop.f32.mrf.mxu1  ;;  %v8464_v1 = vmul.f32 -1.442695, %v7868_v34  ;;  %v7890_v49 = vadd.f32 %v7888_v30, %v7736_v52  ;;  %v10598_v54 = vpop.eup %10597 }
0x10f8   :  { %v10600_v61 = vpop.eup %10599  ;;  %v7828_v3 = vsub.f32 1.0, %v10598_v54  ;;  %v7832_v44 = vmul.f32 %v10598_v54, %v13776_v59 }
0x10f9   :  { %v7825_v56 = vadd.f32 %v7823_v7, %v7821_v8  ;;  %10605 = vpow2.f32 %v8464_v1  ;;  %v8466_v28 = vmul.f32 -1.442695, %v7890_v49  ;;  %v7829_v10 = vsub.f32 1.0, %v10600_v61 }
0x10fa   :  { %v7833_v18 = vmul.f32 %v10600_v61, %v13779_v29 }
0x10fb   :  { %10607 = vtanh.f32 %v7825_v56 }
0x10fc   :  { %10609 = vpow2.f32 %v8465_v17 }
0x10fd   :  { %10611 = vpow2.f32 %v8466_v28 }
0x1102   :  { %v10602_v55 = vpop.eup %10601 }
0x1103   :  { %v7875_v53 = vadd.f32 1.0, %v10602_v55 }
0x1104   :  { %v10604_v48 = vpop.eup %10603 }
0x1105   :  { %v7830_v5 = vmul.f32 %v10604_v48, %v7828_v3  ;;  %10613 = vrcp.f32 %v7875_v53 }
0x1106   :  { %v10606_v15 = vpop.eup %10605 }
0x1107   :  { %v7876_v6 = vadd.f32 1.0, %v10606_v15  ;;  %v7834_v11 = vadd.f32 %v7832_v44, %v7830_v5 }
0x1108   :  { %v10608_v45 = vpop.eup %10607 }
0x1109   :  { %v7831_v38 = vmul.f32 %v10608_v45, %v7829_v10  ;;  %10615 = vrcp.f32 %v7876_v6  ;;  %v10610_v50 = vpop.eup %10609  ;;  %v7852_v42 = vsel %vm7848_vm4, %v7834_v11, 0.0 }
0x110a   :  { %v10612_v59 = vpop.eup %10611  ;;  %v7897_v40 = vadd.f32 1.0, %v10610_v50 }
0x110b   :  { %v7835_v60 = vadd.f32 %v7833_v18, %v7831_v38 }
0x110d   :  { %v7853_v23 = vsel %vm7849_vm5, %v7835_v60, 0.0 }
0x110e   :  { %v8814_v35 = vpack.c.bf16 %v7853_v23, %v7852_v42 }
0x1110   :  { %8815 = vst [vmem:[#allocation17 + $0x78] sm:$0xff] %v8814_v35  }
0x1111   :  { %11009 = shalt.err (!%p11006_p6)
}
0x1112   :  { %7963 = dma.vmem_to_hbm [thread:$0]  %s7958_s22, 2048, %s13869_s11, [#allocation8], %s11052_s26, %s11052_s26, %s11053_s27   ;;  %v10614_v57 = vpop.eup %10613  ;;  %v7898_v16 = vadd.f32 1.0, %v10612_v59  ;;  %v7907_v19 = vunpack.c.l.bf16 %v7607_v20  ;;  %10617 = vrcp.f32 %v7897_v40  ;;  %v7908_v4 = vunpack.c.h.bf16 %v7607_v20  ;;  %v7928_v63 = vpop.permute.xlu0 %7927 }
0x1113   :  { %v10877_v29 = vld [vmem:[%s13868_s10] ss:$0 sm:$0xff]  ;;  %v7931_v33 = vpop.permute.xlu1 %7930  ;;  %s11065_s10 = smov [#allocation18]   ;;  %vm7932_vm6 = vcmp.eq.s32.totalorder %v7928_v63, 1 }
0x1114   :  { %v7903_v27 = vadd.f32 %v10877_v29, %v13833_v32  ;;  %v7904_v25 = vadd.f32 %v10877_v29, %v13835_v13  ;;  %10619 = vrcp.f32 %v7898_v16  ;;  %s7974_s11 = sshll.u32 %s11065_s10, 4  ;;  %vm7933_vm7 = vcmp.eq.s32.totalorder %v7931_v33, 1  ;;  %s7975_s11 = int_to_ptr.vmem [resolvable:$true] %s7974_s11 }
0x1115   :  { %s11018_s28 = scalar_lea.vmem %s7975_s11, 2048  ;;  %p11023_p8 = scmp.lt.s32.totalorder %s7975_s11, %s7975_s11 }
0x1116   :  { %v7905_v37 = vmul.f32 %v10614_v57, %v7903_v27  ;;  %v10616_v12 = vpop.eup %10615  ;;  %p11019_p7 = scmp.ne.s32.totalorder %s7975_s11, %s11018_s28  ;;  %p11024_p9 = scmp.lt.s32.totalorder %s11018_s28, %s11018_s28 }
0x1117   :  { %v7906_v26 = vmul.f32 %v10616_v12, %v7904_v25 }
0x1118   :  { %v7909_v24 = vadd.f32 %v7907_v19, %v7905_v37  ;;  %p11025_p10 = por %p11024_p9, %p11023_p8 }
0x1119   :  { %v7910_v31 = vadd.f32 %v7908_v4, %v7906_v26 }
0x111a   :  { %10621 = vtanh.f32 %v7909_v24  ;;  %p11026_p11 = pnand %p11025_p10, %p11019_p7 }
0x111b   :  { %10623 = vtanh.f32 %v7910_v31 }
0x111f   :  { %v10618_v58 = vpop.eup %10617 }
0x1120   :  { %v7913_v47 = vsub.f32 1.0, %v10618_v58  ;;  %v7917_v22 = vmul.f32 %v10618_v58, %v13823_v21 }
0x1121   :  { %v10620_v46 = vpop.eup %10619 }
0x1122   :  { %v7914_v9 = vsub.f32 1.0, %v10620_v46  ;;  %v7918_v62 = vmul.f32 %v10620_v46, %v13826_v2 }
0x1127   :  { %v10622_v14 = vpop.eup %10621 }
0x1128   :  { %v7915_v32 = vmul.f32 %v10622_v14, %v7913_v47  ;;  %v10624_v41 = vpop.eup %10623 }
0x1129   :  { %v7916_v13 = vmul.f32 %v10624_v41, %v7914_v9 }
0x112a   :  { %v7919_v51 = vadd.f32 %v7917_v22, %v7915_v32 }
0x112b   :  { %v7920_v34 = vadd.f32 %v7918_v62, %v7916_v13 }
0x112c   :  { %v7936_v8 = vsel %vm7932_vm6, %v7919_v51, 0.0 }
0x112d   :  { %v7937_v7 = vsel %vm7933_vm7, %v7920_v34, 0.0 }
0x112e   :  { %v8819_v43 = vpack.c.bf16 %v7937_v7, %v7936_v8 }
0x1130   :  { %8820 = vst [vmem:[#allocation18] sm:$0xff] %v8819_v43  }
0x1131   :  { %11029 = shalt.err (!%p11026_p11)
}
0x1132   :  { %7980 = dma.vmem_to_hbm [thread:$0]  %s7975_s11, 2048, %s13870_s12, [#allocation19], %s11052_s26, %s11052_s26, %s11053_s27  }
0x1133   :  { %11046 = dma.done.wait [#allocation8], 2048  }
0x1134   :  { %11047 = vsyncadd [#allocation8], 4294965248 }
0x1135   :  { %11048 = dma.done.wait [#allocation19], 2048  }
0x1136   :  { %11049 = vsyncadd [#allocation19], 4294965248 }
0x1137   :  { %7987 = vsyncpa [#allocation7], 1 }
0x1138   :  { %7988 = vsyncpa [#allocation10], 1 }
0x1139   :  { %7989 = vsyncpa [#allocation13], 1 }
0x113a   :  { %7990 = vsyncpa [#allocation16], 1 }
0x113b   :  { %7991 = vsyncpa [#allocation8], 1 }
0x113c   :  { %7992 = vsyncpa [#allocation19], 1 }

</bundles_post_ra>
